<compile_context>
chip_gen: v5e
topology: v5e:2x2
jax: 0.10.0
libtpu: 0.0.40
codegen_flags: <defaults>
</compile_context>

<pallas_src>
import functools

import jax
import jax.numpy as jnp
from jax import lax
from jax.experimental import pallas as pl
from jax.experimental.pallas import tpu as pltpu


# Subpixel / polyphase decomposition of ConvTranspose2d(k=4, s=2, p=1):
# output pixel (2i+r_h, 2j+r_w) = sum over taps of pad_in[i + a - 1, j + b - 1]
# with offset (a, b) = (r_h + dh, r_w + dw).  The 4 parities share only 9
# distinct patch offsets; each offset contributes to 1, 2 or 4 parities.
_OFFSET_GROUPS = tuple(
    ((a, b), tuple((rh, rw) for rh in (0, 1) for rw in (0, 1)
                   if 0 <= a - rh <= 1 and 0 <= b - rw <= 1))
    for a in range(3) for b in range(3))


# ----------------------------- in-kernel helpers ----------------------------

def _zero_border(ref):
    """Zero only the 1-pixel border ring of a (1, Hp, Wp, C) padded scratch."""
    _, hp, wp, c = ref.shape
    zrow = jnp.zeros((1, 1, wp, c), jnp.float32)
    zcol = jnp.zeros((1, hp, 1, c), jnp.float32)
    ref[:, 0:1, :, :] = zrow
    ref[:, hp - 1:hp, :, :] = zrow
    ref[:, :, 0:1, :] = zcol
    ref[:, :, wp - 1:wp, :] = zcol


def _deconv_subpixel(pad_in, w_ref, b_ref, pad_out, *, H, W, Cin, Cout):
    """ConvTranspose2d(k=4,s=2,p=1) + bias + ReLU, subpixel form, into pad_out.

    pad_in : VMEM ref (1, H+2, W+2, Cin), zero border, ReLU'd input.
    w_ref  : VMEM ref (Cin, 16*Cout); per offset (a,b) in _OFFSET_GROUPS order,
             the contributing parities' PyTorch taps W_pt[:,:,3+rh-2a,3+rw-2b]
             concatenated along Cout (packed once in prepare_params).
    b_ref  : VMEM ref (1, Cout).
    pad_out: VMEM ref (1, 2H+2, 2W+2, Cout), zero border; interior receives
             relu(deconv(x) + bias), ready for the next layer.
    """
    M = H * W
    bias = b_ref[...]                                         # (1, Cout) f32
    # Bias folded into the accumulator init (one broadcast per parity).
    acc = {p: jnp.broadcast_to(bias, (M, Cout))
           for p in ((0, 0), (0, 1), (1, 0), (1, 1))}

    col = 0
    for (a, b), pars in _OFFSET_GROUPS:
        patch = pad_in[:, a:a + H, b:b + W, :].reshape(M, Cin)
        patch = patch.astype(w_ref.dtype)                     # bf16 opt-in path
        width = len(pars) * Cout
        y = jnp.dot(patch, w_ref[:, col:col + width],
                    preferred_element_type=jnp.float32)       # (M, width)
        for idx, p in enumerate(pars):
            acc[p] = acc[p] + y[:, idx * Cout:(idx + 1) * Cout]
        col += width

    # Parity interleave by pure data movement (lane dim Cout never reshaped):
    # columns: stack at axis=-2 and merge; rows: stack at axis=2 and merge.
    rows = []
    for rh in (0, 1):
        y0 = jnp.maximum(acc[(rh, 0)], 0.0).reshape(1, H, W, Cout)
        y1 = jnp.maximum(acc[(rh, 1)], 0.0).reshape(1, H, W, Cout)
        rows.append(jnp.stack([y0, y1], axis=3).reshape(1, H, 2 * W, Cout))
    full = jnp.stack(rows, axis=2).reshape(1, 2 * H, 2 * W, Cout)
    # TODO(synk): for large H/W, stride-2 row stores into pad_out would avoid
    # materializing `full`; at VAE sizes the single interior store is cheapest.
    pad_out[:, 1:2 * H + 1, 1:2 * W + 1, :] = full


def _decoder_kernel(z_ref, fcw_ref, fcb_ref,
                    w1_ref, b1_ref, w2_ref, b2_ref, w3_ref, b3_ref,
                    wc_ref, bc_ref,
                    out_ref,
                    pad1, pad2, pad3, pad4, *, h8, w8):
    bidx = pl.program_id(0)

    # Zero only the padding rings; interiors are fully overwritten below.
    for ref in (pad1, pad2, pad3, pad4):
        _zero_border(ref)

    # ---- fc + ReLU; one interior store into pad1 as NHWC (weights pre-permuted)
    z_row = z_ref[pl.ds(bidx, 1), :]                          # (1, latent)
    h0 = jnp.dot(z_row.astype(fcw_ref.dtype), fcw_ref[...],
                 preferred_element_type=jnp.float32)
    h0 = jnp.maximum(h0 + fcb_ref[...], 0.0)                  # (1, h8*w8*256)
    cols = [h0[:, p * 256:(p + 1) * 256] for p in range(h8 * w8)]
    pad1[:, 1:h8 + 1, 1:w8 + 1, :] = (
        jnp.stack(cols, axis=1).reshape(1, h8, w8, 256))

    # ---- three ConvTranspose2d(k4,s2,p1) layers, subpixel form ----
    _deconv_subpixel(pad1, w1_ref, b1_ref, pad2,
                     H=h8, W=w8, Cin=256, Cout=128)
    _deconv_subpixel(pad2, w2_ref, b2_ref, pad3,
                     H=2 * h8, W=2 * w8, Cin=128, Cout=64)
    _deconv_subpixel(pad3, w3_ref, b3_ref, pad4,
                     H=4 * h8, W=4 * w8, Cin=64, Cout=32)

    # ---- final 3x3 'same' conv, 32 -> 3 (pad4 interior is already ReLU'd) ----
    H, W = 8 * h8, 8 * w8
    M = H * W
    acc = jnp.broadcast_to(bc_ref[...], (M, 3))               # bias as init
    for kh in range(3):
        for kw in range(3):
            patch = pad4[:, kh:kh + H, kw:kw + W, :].reshape(M, 32)
            acc = acc + jnp.dot(patch.astype(wc_ref.dtype), wc_ref[kh * 3 + kw],
                                preferred_element_type=jnp.float32)
    # TODO(synk): last dim 3 < 128 means a masked store; emit a lane-dense slab
    # (e.g. (1, H, W*3)) only if H*W grows enough for it to matter.
    out_ref[...] = acc.reshape(1, H, W, 3)


# ------------------------------ host-side glue -------------------------------

def prepare_params(params, output_shape, weights_dtype=jnp.float32):
    """One-time preprocessing of the PyTorch-shaped parameters (load time).

    weights_dtype=jnp.bfloat16 is recommended on v6e/v7x (bf16-native MXU,
    halves weight VMEM) if the accuracy budget allows; f32 matches the
    reference exactly and is the default here.
    """
    _, H, W = output_shape
    h8, w8 = H // 8, W // 8
    latent = params["fc_w"].shape[1]

    def pack_deconv(w_pt):
        # (Cin,Cout,4,4) -> (Cin, 16*Cout): per offset (a,b), the contributing
        # parities' taps W_pt[:,:,3+rh-2a,3+rw-2b] concatenated along Cout.
        slabs = []
        for (a, b), pars in _OFFSET_GROUPS:
            for rh, rw in pars:
                slabs.append(w_pt[:, :, 3 + rh - 2 * a, 3 + rw - 2 * b])
        return jnp.concatenate(slabs, axis=1).astype(weights_dtype)

    # fc: permute output columns from NCHW (c,y,x) ordering to NHWC (y,x,c).
    fcw = params["fc_w"].reshape(256, h8, w8, latent)
    fcw = fcw.transpose(1, 2, 0, 3).reshape(h8 * w8 * 256, latent).T
    fcb = params["fc_b"].reshape(256, h8, w8).transpose(1, 2, 0).reshape(1, -1)

    f32 = jnp.float32
    return {
        "fcw": fcw.astype(weights_dtype),
        "fcb": fcb.astype(f32),
        "w1": pack_deconv(params["ct1_w"]),
        "b1": params["ct1_b"].reshape(1, -1).astype(f32),
        "w2": pack_deconv(params["ct2_w"]),
        "b2": params["ct2_b"].reshape(1, -1).astype(f32),
        "w3": pack_deconv(params["ct3_w"]),
        "b3": params["ct3_b"].reshape(1, -1).astype(f32),
        "wc": params["conv_w"].transpose(2, 3, 1, 0).reshape(9, 32, 3)
                              .astype(weights_dtype),
        "bc": params["conv_b"].reshape(1, -1).astype(f32),
    }


def decoder_forward(z, prepped, output_shape):
    """z: (B, latent_dim) f32 -> image (B, 3, H, W) f32 (PyTorch NCHW output)."""
    _, H, W = output_shape
    h8, w8 = H // 8, W // 8
    B = z.shape[0]
    order = ("fcw", "fcb", "w1", "b1", "w2", "b2", "w3", "b3", "wc", "bc")
    weights = tuple(prepped[k] for k in order)

    def full_spec(a):
        nd = a.ndim
        return pl.BlockSpec(a.shape, lambda b, _nd=nd: (0,) * _nd)

    kern = functools.partial(_decoder_kernel, h8=h8, w8=w8)
    # Grid over batch, marked "parallel": v7x's two TensorCores each take a
    # batch slice; on single-TC v5e/v6e it is a cheap sequential loop.
    # TODO(synk): for much larger H/W add output-row-strip tiling with a halo;
    # weight specs could also use pipeline_mode=pl.Buffered(1) to drop the
    # pointless 2x input buffering of the constant weight blocks.
    out_nhwc = pl.pallas_call(
        kern,
        out_shape=jax.ShapeDtypeStruct((B, H, W, 3), jnp.float32),
        grid=(B,),
        in_specs=[pl.BlockSpec(z.shape, lambda b: (0, 0))]
                 + [full_spec(a) for a in weights],
        out_specs=pl.BlockSpec((1, H, W, 3), lambda b: (b, 0, 0, 0)),
        scratch_shapes=[
            pltpu.VMEM((1, h8 + 2, w8 + 2, 256), jnp.float32),
            pltpu.VMEM((1, 2 * h8 + 2, 2 * w8 + 2, 128), jnp.float32),
            pltpu.VMEM((1, 4 * h8 + 2, 4 * w8 + 2, 64), jnp.float32),
            pltpu.VMEM((1, 8 * h8 + 2, 8 * w8 + 2, 32), jnp.float32),
        ],
        compiler_params=pltpu.CompilerParams(
            dimension_semantics=("parallel",),
            vmem_limit_bytes=32 * 1024 * 1024),
    )(z, *weights)
    # Tiny NHWC->NCHW output transpose left to XLA (3 lanes; not worth a kernel).
    return out_nhwc.transpose(0, 3, 1, 2)


# --------------------------- pure-JAX reference -----------------------------

def decoder_reference(z, params, output_shape):
    _, H, W = output_shape
    h8, w8 = H // 8, W // 8
    dn = ("NHWC", "HWIO", "NHWC")
    out = z @ params["fc_w"].T + params["fc_b"]
    out = out.reshape(z.shape[0], 256, h8, w8).transpose(0, 2, 3, 1)

    def deconv(x, w_pt, b):
        x = jax.nn.relu(x)
        w = jnp.flip(w_pt, axis=(2, 3)).transpose(2, 3, 0, 1)
        y = lax.conv_general_dilated(x, w, window_strides=(1, 1),
                                     padding=[(2, 2), (2, 2)],
                                     lhs_dilation=(2, 2),
                                     dimension_numbers=dn)
        return y + b

    out = deconv(out, params["ct1_w"], params["ct1_b"])
    out = deconv(out, params["ct2_w"], params["ct2_b"])
    out = deconv(out, params["ct3_w"], params["ct3_b"])
    out = jax.nn.relu(out)
    w = params["conv_w"].transpose(2, 3, 1, 0)
    out = lax.conv_general_dilated(out, w, (1, 1), [(1, 1), (1, 1)],
                                   dimension_numbers=dn) + params["conv_b"]
    return out.transpose(0, 3, 1, 2)


# --------------------------------- main -------------------------------------

if __name__ == "__main__":
    latent_dim = 8
    output_shape = (3, 16, 16)               # (C, H, W), H and W divisible by 8
    batch = 2
    linear_dim = 256 * (output_shape[1] // 8) * (output_shape[2] // 8)

    key = jax.random.PRNGKey(0)
    ks = jax.random.split(key, 11)
    s = 0.05
    params = {
        # PyTorch-shaped parameters, deterministically initialized.
        "fc_w":   s * jax.random.normal(ks[0], (linear_dim, latent_dim), jnp.float32),
        "fc_b":   s * jax.random.normal(ks[1], (linear_dim,), jnp.float32),
        "ct1_w":  s * jax.random.normal(ks[2], (256, 128, 4, 4), jnp.float32),
        "ct1_b":  s * jax.random.normal(ks[3], (128,), jnp.float32),
        "ct2_w":  s * jax.random.normal(ks[4], (128, 64, 4, 4), jnp.float32),
        "ct2_b":  s * jax.random.normal(ks[5], (64,), jnp.float32),
        "ct3_w":  s * jax.random.normal(ks[6], (64, 32, 4, 4), jnp.float32),
        "ct3_b":  s * jax.random.normal(ks[7], (32,), jnp.float32),
        "conv_w": s * jax.random.normal(ks[8], (3, 32, 3, 3), jnp.float32),
        "conv_b": s * jax.random.normal(ks[9], (3,), jnp.float32),
    }
    z = jax.random.normal(ks[10], (batch, latent_dim), jnp.float32)

    prepped = prepare_params(params, output_shape)          # one-time, load time
    fwd = jax.jit(functools.partial(decoder_forward, output_shape=output_shape))

    out = jax.block_until_ready(fwd(z, prepped))
    ref = jax.block_until_ready(decoder_reference(z, params, output_shape))

    assert out.shape == (batch, *output_shape), out.shape
    assert bool(jnp.all(jnp.isfinite(out)))
    assert jnp.allclose(out, ref, atol=1e-4, rtol=1e-3), \
        float(jnp.max(jnp.abs(out - ref)))

    print("KERNEL_OK")
</pallas_src>

<mosaic_0001>
module attributes {stable_mosaic.version = 11 : i64} {
  func.func @_decoder_kernel(%arg0: i32, %arg1: memref<2x8xf32, #tpu.memory_space<vmem>>, %arg2: memref<8x1024xf32, #tpu.memory_space<vmem>>, %arg3: memref<1x1024xf32, #tpu.memory_space<vmem>>, %arg4: memref<256x2048xf32, #tpu.memory_space<vmem>>, %arg5: memref<1x128xf32, #tpu.memory_space<vmem>>, %arg6: memref<128x1024xf32, #tpu.memory_space<vmem>>, %arg7: memref<1x64xf32, #tpu.memory_space<vmem>>, %arg8: memref<64x512xf32, #tpu.memory_space<vmem>>, %arg9: memref<1x32xf32, #tpu.memory_space<vmem>>, %arg10: memref<9x32x3xf32, #tpu.memory_space<vmem>>, %arg11: memref<1x3xf32, #tpu.memory_space<vmem>>, %arg12: memref<1x16x16x3xf32, #tpu.memory_space<vmem>>, %arg13: memref<1x4x4x256xf32, #tpu.memory_space<vmem>>, %arg14: memref<1x6x6x128xf32, #tpu.memory_space<vmem>>, %arg15: memref<1x10x10x64xf32, #tpu.memory_space<vmem>>, %arg16: memref<1x18x18x32xf32, #tpu.memory_space<vmem>>) attributes {dimension_semantics = [#tpu.dimension_semantics<parallel>], iteration_bounds = array<i64: 2>, scalar_prefetch = 0 : i64, scratch_operands = 4 : i64, tpu.core_type = #tpu.core_type<tc>, window_params = [{pipeline_mode = #tpu.pipeline_mode<synchronous>, transform_indices = @transform_0, window_bounds = array<i64: 2, 8>}, {pipeline_mode = #tpu.pipeline_mode<synchronous>, transform_indices = @transform_1, window_bounds = array<i64: 8, 1024>}, {pipeline_mode = #tpu.pipeline_mode<synchronous>, transform_indices = @transform_2, window_bounds = array<i64: 1, 1024>}, {pipeline_mode = #tpu.pipeline_mode<synchronous>, transform_indices = @transform_3, window_bounds = array<i64: 256, 2048>}, {pipeline_mode = #tpu.pipeline_mode<synchronous>, transform_indices = @transform_4, window_bounds = array<i64: 1, 128>}, {pipeline_mode = #tpu.pipeline_mode<synchronous>, transform_indices = @transform_5, window_bounds = array<i64: 128, 1024>}, {pipeline_mode = #tpu.pipeline_mode<synchronous>, transform_indices = @transform_6, window_bounds = array<i64: 1, 64>}, {pipeline_mode = #tpu.pipeline_mode<synchronous>, transform_indices = @transform_7, window_bounds = array<i64: 64, 512>}, {pipeline_mode = #tpu.pipeline_mode<synchronous>, transform_indices = @transform_8, window_bounds = array<i64: 1, 32>}, {pipeline_mode = #tpu.pipeline_mode<synchronous>, transform_indices = @transform_9, window_bounds = array<i64: 9, 32, 3>}, {pipeline_mode = #tpu.pipeline_mode<synchronous>, transform_indices = @transform_10, window_bounds = array<i64: 1, 3>}, {transform_indices = @transform_11, window_bounds = array<i64: 1, 16, 16, 3>}]} {
    %cst = arith.constant 0.000000e+00 : f32
    %0 = vector.broadcast %cst : f32 to vector<1x1x4x256xf32>
    %cst_0 = arith.constant 0.000000e+00 : f32
    %1 = vector.broadcast %cst_0 : f32 to vector<1x4x1x256xf32>
    %c0 = arith.constant 0 : index
    %c0_1 = arith.constant 0 : index
    %c0_2 = arith.constant 0 : index
    %c0_3 = arith.constant 0 : index
    %2 = vector.load %arg13[%c0, %c0_1, %c0_2, %c0_3] : memref<1x4x4x256xf32, #tpu.memory_space<vmem>>, vector<1x1x4x256xf32>
    tpu.vector_store %arg13[%c0, %c0_1, %c0_2, %c0_3], %0 {strides = array<i32>} : memref<1x4x4x256xf32, #tpu.memory_space<vmem>>, vector<1x1x4x256xf32>,
    %c0_4 = arith.constant 0 : index
    %c3 = arith.constant 3 : index
    %c0_5 = arith.constant 0 : index
    %c0_6 = arith.constant 0 : index
    %3 = vector.load %arg13[%c0_4, %c3, %c0_5, %c0_6] : memref<1x4x4x256xf32, #tpu.memory_space<vmem>>, vector<1x1x4x256xf32>
    tpu.vector_store %arg13[%c0_4, %c3, %c0_5, %c0_6], %0 {strides = array<i32>} : memref<1x4x4x256xf32, #tpu.memory_space<vmem>>, vector<1x1x4x256xf32>,
    %c0_7 = arith.constant 0 : index
    %c0_8 = arith.constant 0 : index
    %c0_9 = arith.constant 0 : index
    %c0_10 = arith.constant 0 : index
    %4 = vector.load %arg13[%c0_7, %c0_8, %c0_9, %c0_10] : memref<1x4x4x256xf32, #tpu.memory_space<vmem>>, vector<1x4x1x256xf32>
    tpu.vector_store %arg13[%c0_7, %c0_8, %c0_9, %c0_10], %1 {strides = array<i32>} : memref<1x4x4x256xf32, #tpu.memory_space<vmem>>, vector<1x4x1x256xf32>,
    %c0_11 = arith.constant 0 : index
    %c0_12 = arith.constant 0 : index
    %c3_13 = arith.constant 3 : index
    %c0_14 = arith.constant 0 : index
    %5 = vector.load %arg13[%c0_11, %c0_12, %c3_13, %c0_14] : memref<1x4x4x256xf32, #tpu.memory_space<vmem>>, vector<1x4x1x256xf32>
    tpu.vector_store %arg13[%c0_11, %c0_12, %c3_13, %c0_14], %1 {strides = array<i32>} : memref<1x4x4x256xf32, #tpu.memory_space<vmem>>, vector<1x4x1x256xf32>,
    %cst_15 = arith.constant 0.000000e+00 : f32
    %6 = vector.broadcast %cst_15 : f32 to vector<1x1x6x128xf32>
    %cst_16 = arith.constant 0.000000e+00 : f32
    %7 = vector.broadcast %cst_16 : f32 to vector<1x6x1x128xf32>
    %c0_17 = arith.constant 0 : index
    %c0_18 = arith.constant 0 : index
    %c0_19 = arith.constant 0 : index
    %c0_20 = arith.constant 0 : index
    %8 = vector.load %arg14[%c0_17, %c0_18, %c0_19, %c0_20] : memref<1x6x6x128xf32, #tpu.memory_space<vmem>>, vector<1x1x6x128xf32>
    tpu.vector_store %arg14[%c0_17, %c0_18, %c0_19, %c0_20], %6 {strides = array<i32>} : memref<1x6x6x128xf32, #tpu.memory_space<vmem>>, vector<1x1x6x128xf32>,
    %c0_21 = arith.constant 0 : index
    %c5 = arith.constant 5 : index
    %c0_22 = arith.constant 0 : index
    %c0_23 = arith.constant 0 : index
    %9 = vector.load %arg14[%c0_21, %c5, %c0_22, %c0_23] : memref<1x6x6x128xf32, #tpu.memory_space<vmem>>, vector<1x1x6x128xf32>
    tpu.vector_store %arg14[%c0_21, %c5, %c0_22, %c0_23], %6 {strides = array<i32>} : memref<1x6x6x128xf32, #tpu.memory_space<vmem>>, vector<1x1x6x128xf32>,
    %c0_24 = arith.constant 0 : index
    %c0_25 = arith.constant 0 : index
    %c0_26 = arith.constant 0 : index
    %c0_27 = arith.constant 0 : index
    %10 = vector.load %arg14[%c0_24, %c0_25, %c0_26, %c0_27] : memref<1x6x6x128xf32, #tpu.memory_space<vmem>>, vector<1x6x1x128xf32>
    tpu.vector_store %arg14[%c0_24, %c0_25, %c0_26, %c0_27], %7 {strides = array<i32>} : memref<1x6x6x128xf32, #tpu.memory_space<vmem>>, vector<1x6x1x128xf32>,
    %c0_28 = arith.constant 0 : index
    %c0_29 = arith.constant 0 : index
    %c5_30 = arith.constant 5 : index
    %c0_31 = arith.constant 0 : index
    %11 = vector.load %arg14[%c0_28, %c0_29, %c5_30, %c0_31] : memref<1x6x6x128xf32, #tpu.memory_space<vmem>>, vector<1x6x1x128xf32>
    tpu.vector_store %arg14[%c0_28, %c0_29, %c5_30, %c0_31], %7 {strides = array<i32>} : memref<1x6x6x128xf32, #tpu.memory_space<vmem>>, vector<1x6x1x128xf32>,
    %cst_32 = arith.constant 0.000000e+00 : f32
    %12 = vector.broadcast %cst_32 : f32 to vector<1x1x10x64xf32>
    %cst_33 = arith.constant 0.000000e+00 : f32
    %13 = vector.broadcast %cst_33 : f32 to vector<1x10x1x64xf32>
    %c0_34 = arith.constant 0 : index
    %c0_35 = arith.constant 0 : index
    %c0_36 = arith.constant 0 : index
    %c0_37 = arith.constant 0 : index
    %14 = vector.load %arg15[%c0_34, %c0_35, %c0_36, %c0_37] : memref<1x10x10x64xf32, #tpu.memory_space<vmem>>, vector<1x1x10x64xf32>
    tpu.vector_store %arg15[%c0_34, %c0_35, %c0_36, %c0_37], %12 {strides = array<i32>} : memref<1x10x10x64xf32, #tpu.memory_space<vmem>>, vector<1x1x10x64xf32>,
    %c0_38 = arith.constant 0 : index
    %c9 = arith.constant 9 : index
    %c0_39 = arith.constant 0 : index
    %c0_40 = arith.constant 0 : index
    %15 = vector.load %arg15[%c0_38, %c9, %c0_39, %c0_40] : memref<1x10x10x64xf32, #tpu.memory_space<vmem>>, vector<1x1x10x64xf32>
    tpu.vector_store %arg15[%c0_38, %c9, %c0_39, %c0_40], %12 {strides = array<i32>} : memref<1x10x10x64xf32, #tpu.memory_space<vmem>>, vector<1x1x10x64xf32>,
    %c0_41 = arith.constant 0 : index
    %c0_42 = arith.constant 0 : index
    %c0_43 = arith.constant 0 : index
    %c0_44 = arith.constant 0 : index
    %16 = vector.load %arg15[%c0_41, %c0_42, %c0_43, %c0_44] : memref<1x10x10x64xf32, #tpu.memory_space<vmem>>, vector<1x10x1x64xf32>
    tpu.vector_store %arg15[%c0_41, %c0_42, %c0_43, %c0_44], %13 {strides = array<i32>} : memref<1x10x10x64xf32, #tpu.memory_space<vmem>>, vector<1x10x1x64xf32>,
    %c0_45 = arith.constant 0 : index
    %c0_46 = arith.constant 0 : index
    %c9_47 = arith.constant 9 : index
    %c0_48 = arith.constant 0 : index
    %17 = vector.load %arg15[%c0_45, %c0_46, %c9_47, %c0_48] : memref<1x10x10x64xf32, #tpu.memory_space<vmem>>, vector<1x10x1x64xf32>
    tpu.vector_store %arg15[%c0_45, %c0_46, %c9_47, %c0_48], %13 {strides = array<i32>} : memref<1x10x10x64xf32, #tpu.memory_space<vmem>>, vector<1x10x1x64xf32>,
    %cst_49 = arith.constant 0.000000e+00 : f32
    %18 = vector.broadcast %cst_49 : f32 to vector<1x1x18x32xf32>
    %cst_50 = arith.constant 0.000000e+00 : f32
    %19 = vector.broadcast %cst_50 : f32 to vector<1x18x1x32xf32>
    %c0_51 = arith.constant 0 : index
    %c0_52 = arith.constant 0 : index
    %c0_53 = arith.constant 0 : index
    %c0_54 = arith.constant 0 : index
    %20 = vector.load %arg16[%c0_51, %c0_52, %c0_53, %c0_54] : memref<1x18x18x32xf32, #tpu.memory_space<vmem>>, vector<1x1x18x32xf32>
    tpu.vector_store %arg16[%c0_51, %c0_52, %c0_53, %c0_54], %18 {strides = array<i32>} : memref<1x18x18x32xf32, #tpu.memory_space<vmem>>, vector<1x1x18x32xf32>,
    %c0_55 = arith.constant 0 : index
    %c17 = arith.constant 17 : index
    %c0_56 = arith.constant 0 : index
    %c0_57 = arith.constant 0 : index
    %21 = vector.load %arg16[%c0_55, %c17, %c0_56, %c0_57] : memref<1x18x18x32xf32, #tpu.memory_space<vmem>>, vector<1x1x18x32xf32>
    tpu.vector_store %arg16[%c0_55, %c17, %c0_56, %c0_57], %18 {strides = array<i32>} : memref<1x18x18x32xf32, #tpu.memory_space<vmem>>, vector<1x1x18x32xf32>,
    %c0_58 = arith.constant 0 : index
    %c0_59 = arith.constant 0 : index
    %c0_60 = arith.constant 0 : index
    %c0_61 = arith.constant 0 : index
    %22 = vector.load %arg16[%c0_58, %c0_59, %c0_60, %c0_61] : memref<1x18x18x32xf32, #tpu.memory_space<vmem>>, vector<1x18x1x32xf32>
    tpu.vector_store %arg16[%c0_58, %c0_59, %c0_60, %c0_61], %19 {strides = array<i32>} : memref<1x18x18x32xf32, #tpu.memory_space<vmem>>, vector<1x18x1x32xf32>,
    %c0_62 = arith.constant 0 : index
    %c0_63 = arith.constant 0 : index
    %c17_64 = arith.constant 17 : index
    %c0_65 = arith.constant 0 : index
    %23 = vector.load %arg16[%c0_62, %c0_63, %c17_64, %c0_65] : memref<1x18x18x32xf32, #tpu.memory_space<vmem>>, vector<1x18x1x32xf32>
    tpu.vector_store %arg16[%c0_62, %c0_63, %c17_64, %c0_65], %19 {strides = array<i32>} : memref<1x18x18x32xf32, #tpu.memory_space<vmem>>, vector<1x18x1x32xf32>,
    %24 = arith.index_cast %arg0 : i32 to index
    %c0_66 = arith.constant 0 : index
    %25 = vector.load %arg1[%24, %c0_66] : memref<2x8xf32, #tpu.memory_space<vmem>>, vector<1x8xf32>
    %c0_67 = arith.constant 0 : index
    %c0_68 = arith.constant 0 : index
    %26 = vector.load %arg2[%c0_67, %c0_68] : memref<8x1024xf32, #tpu.memory_space<vmem>>, vector<8x1024xf32>
    %cst_69 = arith.constant dense<0.000000e+00> : vector<1x1024xf32>
    %27 = tpu.matmul %25, %26, %cst_69 {dimension_numbers = #tpu.dot_dimension_numbers<[1], [0], [0], [1], [0, 0, 1, 1], [], []>} : vector<1x8xf32>, vector<8x1024xf32>, vector<1x1024xf32> -> vector<1x1024xf32>
    %c0_70 = arith.constant 0 : index
    %c0_71 = arith.constant 0 : index
    %28 = vector.load %arg3[%c0_70, %c0_71] : memref<1x1024xf32, #tpu.memory_space<vmem>>, vector<1x1024xf32>
    %29 = arith.addf %27, %28 : vector<1x1024xf32>
    %cst_72 = arith.constant 0.000000e+00 : f32
    %30 = vector.broadcast %cst_72 : f32 to vector<1x1024xf32>
    %31 = arith.maximumf %29, %30 : vector<1x1024xf32>
    %32 = vector.extract_strided_slice %31 {offsets = [0, 0], sizes = [1, 256], strides = [1, 1]} : vector<1x1024xf32> to vector<1x256xf32>
    %33 = vector.extract_strided_slice %31 {offsets = [0, 256], sizes = [1, 256], strides = [1, 1]} : vector<1x1024xf32> to vector<1x256xf32>
    %34 = vector.extract_strided_slice %31 {offsets = [0, 512], sizes = [1, 256], strides = [1, 1]} : vector<1x1024xf32> to vector<1x256xf32>
    %35 = vector.extract_strided_slice %31 {offsets = [0, 768], sizes = [1, 256], strides = [1, 1]} : vector<1x1024xf32> to vector<1x256xf32>
    %36 = vector.shape_cast %32 : vector<1x256xf32> to vector<1x1x256xf32>
    %37 = vector.shape_cast %33 : vector<1x256xf32> to vector<1x1x256xf32>
    %38 = vector.shape_cast %34 : vector<1x256xf32> to vector<1x1x256xf32>
    %39 = vector.shape_cast %35 : vector<1x256xf32> to vector<1x1x256xf32>
    %40 = tpu.concatenate %36, %37, %38, %39 in 1 : vector<1x1x256xf32>, vector<1x1x256xf32>, vector<1x1x256xf32>, vector<1x1x256xf32> -> vector<1x4x256xf32>
    %41 = vector.shape_cast %40 : vector<1x4x256xf32> to vector<1x2x2x256xf32>
    %c0_73 = arith.constant 0 : index
    %c1 = arith.constant 1 : index
    %c1_74 = arith.constant 1 : index
    %c0_75 = arith.constant 0 : index
    %42 = vector.load %arg13[%c0_73, %c1, %c1_74, %c0_75] : memref<1x4x4x256xf32, #tpu.memory_space<vmem>>, vector<1x2x2x256xf32>
    tpu.vector_store %arg13[%c0_73, %c1, %c1_74, %c0_75], %41 {strides = array<i32>} : memref<1x4x4x256xf32, #tpu.memory_space<vmem>>, vector<1x2x2x256xf32>,
    %c0_76 = arith.constant 0 : index
    %c0_77 = arith.constant 0 : index
    %43 = vector.load %arg5[%c0_76, %c0_77] : memref<1x128xf32, #tpu.memory_space<vmem>>, vector<1x128xf32>
    %44 = vector.shape_cast %43 : vector<1x128xf32> to vector<1x128xf32>
    %45 = vector.broadcast %44 : vector<1x128xf32> to vector<4x128xf32>
    %46 = vector.shape_cast %43 : vector<1x128xf32> to vector<1x128xf32>
    %47 = vector.broadcast %46 : vector<1x128xf32> to vector<4x128xf32>
    %48 = vector.shape_cast %43 : vector<1x128xf32> to vector<1x128xf32>
    %49 = vector.broadcast %48 : vector<1x128xf32> to vector<4x128xf32>
    %50 = vector.shape_cast %43 : vector<1x128xf32> to vector<1x128xf32>
    %51 = vector.broadcast %50 : vector<1x128xf32> to vector<4x128xf32>
    %c0_78 = arith.constant 0 : index
    %c0_79 = arith.constant 0 : index
    %c0_80 = arith.constant 0 : index
    %c0_81 = arith.constant 0 : index
    %52 = vector.load %arg13[%c0_78, %c0_79, %c0_80, %c0_81] : memref<1x4x4x256xf32, #tpu.memory_space<vmem>>, vector<1x2x2x256xf32>
    %53 = vector.shape_cast %52 : vector<1x2x2x256xf32> to vector<4x256xf32>
    %c0_82 = arith.constant 0 : index
    %c0_83 = arith.constant 0 : index
    %54 = vector.load %arg4[%c0_82, %c0_83] : memref<256x2048xf32, #tpu.memory_space<vmem>>, vector<256x128xf32>
    %cst_84 = arith.constant dense<0.000000e+00> : vector<4x128xf32>
    %55 = tpu.matmul %53, %54, %cst_84 {dimension_numbers = #tpu.dot_dimension_numbers<[1], [0], [0], [1], [0, 0, 1, 1], [], []>} : vector<4x256xf32>, vector<256x128xf32>, vector<4x128xf32> -> vector<4x128xf32>
    %56 = arith.addf %45, %55 : vector<4x128xf32>
    %c0_85 = arith.constant 0 : index
    %c0_86 = arith.constant 0 : index
    %c1_87 = arith.constant 1 : index
    %c0_88 = arith.constant 0 : index
    %57 = vector.load %arg13[%c0_85, %c0_86, %c1_87, %c0_88] : memref<1x4x4x256xf32, #tpu.memory_space<vmem>>, vector<1x2x2x256xf32>
    %58 = vector.shape_cast %57 : vector<1x2x2x256xf32> to vector<4x256xf32>
    %c0_89 = arith.constant 0 : index
    %c128 = arith.constant 128 : index
    %59 = vector.load %arg4[%c0_89, %c128] : memref<256x2048xf32, #tpu.memory_space<vmem>>, vector<256x256xf32>
    %cst_90 = arith.constant dense<0.000000e+00> : vector<4x256xf32>
    %60 = tpu.matmul %58, %59, %cst_90 {dimension_numbers = #tpu.dot_dimension_numbers<[1], [0], [0], [1], [0, 0, 1, 1], [], []>} : vector<4x256xf32>, vector<256x256xf32>, vector<4x256xf32> -> vector<4x256xf32>
    %61 = vector.extract_strided_slice %60 {offsets = [0, 0], sizes = [4, 128], strides = [1, 1]} : vector<4x256xf32> to vector<4x128xf32>
    %62 = arith.addf %56, %61 : vector<4x128xf32>
    %63 = vector.extract_strided_slice %60 {offsets = [0, 128], sizes = [4, 128], strides = [1, 1]} : vector<4x256xf32> to vector<4x128xf32>
    %64 = arith.addf %47, %63 : vector<4x128xf32>
    %c0_91 = arith.constant 0 : index
    %c0_92 = arith.constant 0 : index
    %c2 = arith.constant 2 : index
    %c0_93 = arith.constant 0 : index
    %65 = vector.load %arg13[%c0_91, %c0_92, %c2, %c0_93] : memref<1x4x4x256xf32, #tpu.memory_space<vmem>>, vector<1x2x2x256xf32>
    %66 = vector.shape_cast %65 : vector<1x2x2x256xf32> to vector<4x256xf32>
    %c0_94 = arith.constant 0 : index
    %c384 = arith.constant 384 : index
    %67 = vector.load %arg4[%c0_94, %c384] : memref<256x2048xf32, #tpu.memory_space<vmem>>, vector<256x128xf32>
    %cst_95 = arith.constant dense<0.000000e+00> : vector<4x128xf32>
    %68 = tpu.matmul %66, %67, %cst_95 {dimension_numbers = #tpu.dot_dimension_numbers<[1], [0], [0], [1], [0, 0, 1, 1], [], []>} : vector<4x256xf32>, vector<256x128xf32>, vector<4x128xf32> -> vector<4x128xf32>
    %69 = arith.addf %64, %68 : vector<4x128xf32>
    %c0_96 = arith.constant 0 : index
    %c1_97 = arith.constant 1 : index
    %c0_98 = arith.constant 0 : index
    %c0_99 = arith.constant 0 : index
    %70 = vector.load %arg13[%c0_96, %c1_97, %c0_98, %c0_99] : memref<1x4x4x256xf32, #tpu.memory_space<vmem>>, vector<1x2x2x256xf32>
    %71 = vector.shape_cast %70 : vector<1x2x2x256xf32> to vector<4x256xf32>
    %c0_100 = arith.constant 0 : index
    %c512 = arith.constant 512 : index
    %72 = vector.load %arg4[%c0_100, %c512] : memref<256x2048xf32, #tpu.memory_space<vmem>>, vector<256x256xf32>
    %cst_101 = arith.constant dense<0.000000e+00> : vector<4x256xf32>
    %73 = tpu.matmul %71, %72, %cst_101 {dimension_numbers = #tpu.dot_dimension_numbers<[1], [0], [0], [1], [0, 0, 1, 1], [], []>} : vector<4x256xf32>, vector<256x256xf32>, vector<4x256xf32> -> vector<4x256xf32>
    %74 = vector.extract_strided_slice %73 {offsets = [0, 0], sizes = [4, 128], strides = [1, 1]} : vector<4x256xf32> to vector<4x128xf32>
    %75 = arith.addf %62, %74 : vector<4x128xf32>
    %76 = vector.extract_strided_slice %73 {offsets = [0, 128], sizes = [4, 128], strides = [1, 1]} : vector<4x256xf32> to vector<4x128xf32>
    %77 = arith.addf %49, %76 : vector<4x128xf32>
    %c0_102 = arith.constant 0 : index
    %c1_103 = arith.constant 1 : index
    %c1_104 = arith.constant 1 : index
    %c0_105 = arith.constant 0 : index
    %78 = vector.load %arg13[%c0_102, %c1_103, %c1_104, %c0_105] : memref<1x4x4x256xf32, #tpu.memory_space<vmem>>, vector<1x2x2x256xf32>
    %79 = vector.shape_cast %78 : vector<1x2x2x256xf32> to vector<4x256xf32>
    %c0_106 = arith.constant 0 : index
    %c768 = arith.constant 768 : index
    %80 = vector.load %arg4[%c0_106, %c768] : memref<256x2048xf32, #tpu.memory_space<vmem>>, vector<256x512xf32>
    %cst_107 = arith.constant dense<0.000000e+00> : vector<4x512xf32>
    %81 = tpu.matmul %79, %80, %cst_107 {dimension_numbers = #tpu.dot_dimension_numbers<[1], [0], [0], [1], [0, 0, 1, 1], [], []>} : vector<4x256xf32>, vector<256x512xf32>, vector<4x512xf32> -> vector<4x512xf32>
    %82 = vector.extract_strided_slice %81 {offsets = [0, 0], sizes = [4, 128], strides = [1, 1]} : vector<4x512xf32> to vector<4x128xf32>
    %83 = arith.addf %75, %82 : vector<4x128xf32>
    %84 = vector.extract_strided_slice %81 {offsets = [0, 128], sizes = [4, 128], strides = [1, 1]} : vector<4x512xf32> to vector<4x128xf32>
    %85 = arith.addf %69, %84 : vector<4x128xf32>
    %86 = vector.extract_strided_slice %81 {offsets = [0, 256], sizes = [4, 128], strides = [1, 1]} : vector<4x512xf32> to vector<4x128xf32>
    %87 = arith.addf %77, %86 : vector<4x128xf32>
    %88 = vector.extract_strided_slice %81 {offsets = [0, 384], sizes = [4, 128], strides = [1, 1]} : vector<4x512xf32> to vector<4x128xf32>
    %89 = arith.addf %51, %88 : vector<4x128xf32>
    %c0_108 = arith.constant 0 : index
    %c1_109 = arith.constant 1 : index
    %c2_110 = arith.constant 2 : index
    %c0_111 = arith.constant 0 : index
    %90 = vector.load %arg13[%c0_108, %c1_109, %c2_110, %c0_111] : memref<1x4x4x256xf32, #tpu.memory_space<vmem>>, vector<1x2x2x256xf32>
    %91 = vector.shape_cast %90 : vector<1x2x2x256xf32> to vector<4x256xf32>
    %c0_112 = arith.constant 0 : index
    %c1280 = arith.constant 1280 : index
    %92 = vector.load %arg4[%c0_112, %c1280] : memref<256x2048xf32, #tpu.memory_space<vmem>>, vector<256x256xf32>
    %cst_113 = arith.constant dense<0.000000e+00> : vector<4x256xf32>
    %93 = tpu.matmul %91, %92, %cst_113 {dimension_numbers = #tpu.dot_dimension_numbers<[1], [0], [0], [1], [0, 0, 1, 1], [], []>} : vector<4x256xf32>, vector<256x256xf32>, vector<4x256xf32> -> vector<4x256xf32>
    %94 = vector.extract_strided_slice %93 {offsets = [0, 0], sizes = [4, 128], strides = [1, 1]} : vector<4x256xf32> to vector<4x128xf32>
    %95 = arith.addf %85, %94 : vector<4x128xf32>
    %96 = vector.extract_strided_slice %93 {offsets = [0, 128], sizes = [4, 128], strides = [1, 1]} : vector<4x256xf32> to vector<4x128xf32>
    %97 = arith.addf %89, %96 : vector<4x128xf32>
    %c0_114 = arith.constant 0 : index
    %c2_115 = arith.constant 2 : index
    %c0_116 = arith.constant 0 : index
    %c0_117 = arith.constant 0 : index
    %98 = vector.load %arg13[%c0_114, %c2_115, %c0_116, %c0_117] : memref<1x4x4x256xf32, #tpu.memory_space<vmem>>, vector<1x2x2x256xf32>
    %99 = vector.shape_cast %98 : vector<1x2x2x256xf32> to vector<4x256xf32>
    %c0_118 = arith.constant 0 : index
    %c1536 = arith.constant 1536 : index
    %100 = vector.load %arg4[%c0_118, %c1536] : memref<256x2048xf32, #tpu.memory_space<vmem>>, vector<256x128xf32>
    %cst_119 = arith.constant dense<0.000000e+00> : vector<4x128xf32>
    %101 = tpu.matmul %99, %100, %cst_119 {dimension_numbers = #tpu.dot_dimension_numbers<[1], [0], [0], [1], [0, 0, 1, 1], [], []>} : vector<4x256xf32>, vector<256x128xf32>, vector<4x128xf32> -> vector<4x128xf32>
    %102 = arith.addf %87, %101 : vector<4x128xf32>
    %c0_120 = arith.constant 0 : index
    %c2_121 = arith.constant 2 : index
    %c1_122 = arith.constant 1 : index
    %c0_123 = arith.constant 0 : index
    %103 = vector.load %arg13[%c0_120, %c2_121, %c1_122, %c0_123] : memref<1x4x4x256xf32, #tpu.memory_space<vmem>>, vector<1x2x2x256xf32>
    %104 = vector.shape_cast %103 : vector<1x2x2x256xf32> to vector<4x256xf32>
    %c0_124 = arith.constant 0 : index
    %c1664 = arith.constant 1664 : index
    %105 = vector.load %arg4[%c0_124, %c1664] : memref<256x2048xf32, #tpu.memory_space<vmem>>, vector<256x256xf32>
    %cst_125 = arith.constant dense<0.000000e+00> : vector<4x256xf32>
    %106 = tpu.matmul %104, %105, %cst_125 {dimension_numbers = #tpu.dot_dimension_numbers<[1], [0], [0], [1], [0, 0, 1, 1], [], []>} : vector<4x256xf32>, vector<256x256xf32>, vector<4x256xf32> -> vector<4x256xf32>
    %107 = vector.extract_strided_slice %106 {offsets = [0, 0], sizes = [4, 128], strides = [1, 1]} : vector<4x256xf32> to vector<4x128xf32>
    %108 = arith.addf %102, %107 : vector<4x128xf32>
    %109 = vector.extract_strided_slice %106 {offsets = [0, 128], sizes = [4, 128], strides = [1, 1]} : vector<4x256xf32> to vector<4x128xf32>
    %110 = arith.addf %97, %109 : vector<4x128xf32>
    %c0_126 = arith.constant 0 : index
    %c2_127 = arith.constant 2 : index
    %c2_128 = arith.constant 2 : index
    %c0_129 = arith.constant 0 : index
    %111 = vector.load %arg13[%c0_126, %c2_127, %c2_128, %c0_129] : memref<1x4x4x256xf32, #tpu.memory_space<vmem>>, vector<1x2x2x256xf32>
    %112 = vector.shape_cast %111 : vector<1x2x2x256xf32> to vector<4x256xf32>
    %c0_130 = arith.constant 0 : index
    %c1920 = arith.constant 1920 : index
    %113 = vector.load %arg4[%c0_130, %c1920] : memref<256x2048xf32, #tpu.memory_space<vmem>>, vector<256x128xf32>
    %cst_131 = arith.constant dense<0.000000e+00> : vector<4x128xf32>
    %114 = tpu.matmul %112, %113, %cst_131 {dimension_numbers = #tpu.dot_dimension_numbers<[1], [0], [0], [1], [0, 0, 1, 1], [], []>} : vector<4x256xf32>, vector<256x128xf32>, vector<4x128xf32> -> vector<4x128xf32>
    %115 = arith.addf %110, %114 : vector<4x128xf32>
    %cst_132 = arith.constant 0.000000e+00 : f32
    %116 = vector.broadcast %cst_132 : f32 to vector<4x128xf32>
    %117 = arith.maximumf %83, %116 : vector<4x128xf32>
    %118 = vector.shape_cast %117 : vector<4x128xf32> to vector<1x2x2x128xf32>
    %cst_133 = arith.constant 0.000000e+00 : f32
    %119 = vector.broadcast %cst_133 : f32 to vector<4x128xf32>
    %120 = arith.maximumf %95, %119 : vector<4x128xf32>
    %121 = vector.shape_cast %120 : vector<4x128xf32> to vector<1x2x2x128xf32>
    %122 = vector.shape_cast %118 : vector<1x2x2x128xf32> to vector<1x2x2x1x128xf32>
    %123 = vector.shape_cast %121 : vector<1x2x2x128xf32> to vector<1x2x2x1x128xf32>
    %124 = tpu.concatenate %122, %123 in 3 : vector<1x2x2x1x128xf32>, vector<1x2x2x1x128xf32> -> vector<1x2x2x2x128xf32>
    %125 = vector.shape_cast %124 : vector<1x2x2x2x128xf32> to vector<1x2x4x128xf32>
    %cst_134 = arith.constant 0.000000e+00 : f32
    %126 = vector.broadcast %cst_134 : f32 to vector<4x128xf32>
    %127 = arith.maximumf %108, %126 : vector<4x128xf32>
    %128 = vector.shape_cast %127 : vector<4x128xf32> to vector<1x2x2x128xf32>
    %cst_135 = arith.constant 0.000000e+00 : f32
    %129 = vector.broadcast %cst_135 : f32 to vector<4x128xf32>
    %130 = arith.maximumf %115, %129 : vector<4x128xf32>
    %131 = vector.shape_cast %130 : vector<4x128xf32> to vector<1x2x2x128xf32>
    %132 = vector.shape_cast %128 : vector<1x2x2x128xf32> to vector<1x2x2x1x128xf32>
    %133 = vector.shape_cast %131 : vector<1x2x2x128xf32> to vector<1x2x2x1x128xf32>
    %134 = tpu.concatenate %132, %133 in 3 : vector<1x2x2x1x128xf32>, vector<1x2x2x1x128xf32> -> vector<1x2x2x2x128xf32>
    %135 = vector.shape_cast %134 : vector<1x2x2x2x128xf32> to vector<1x2x4x128xf32>
    %136 = vector.shape_cast %125 : vector<1x2x4x128xf32> to vector<1x2x1x4x128xf32>
    %137 = vector.shape_cast %135 : vector<1x2x4x128xf32> to vector<1x2x1x4x128xf32>
    %138 = tpu.concatenate %136, %137 in 2 : vector<1x2x1x4x128xf32>, vector<1x2x1x4x128xf32> -> vector<1x2x2x4x128xf32>
    %139 = vector.shape_cast %138 : vector<1x2x2x4x128xf32> to vector<1x4x4x128xf32>
    %c0_136 = arith.constant 0 : index
    %c1_137 = arith.constant 1 : index
    %c1_138 = arith.constant 1 : index
    %c0_139 = arith.constant 0 : index
    %140 = vector.load %arg14[%c0_136, %c1_137, %c1_138, %c0_139] : memref<1x6x6x128xf32, #tpu.memory_space<vmem>>, vector<1x4x4x128xf32>
    tpu.vector_store %arg14[%c0_136, %c1_137, %c1_138, %c0_139], %139 {strides = array<i32>} : memref<1x6x6x128xf32, #tpu.memory_space<vmem>>, vector<1x4x4x128xf32>,
    %c0_140 = arith.constant 0 : index
    %c0_141 = arith.constant 0 : index
    %141 = vector.load %arg7[%c0_140, %c0_141] : memref<1x64xf32, #tpu.memory_space<vmem>>, vector<1x64xf32>
    %142 = vector.shape_cast %141 : vector<1x64xf32> to vector<1x64xf32>
    %143 = vector.broadcast %142 : vector<1x64xf32> to vector<16x64xf32>
    %144 = vector.shape_cast %141 : vector<1x64xf32> to vector<1x64xf32>
    %145 = vector.broadcast %144 : vector<1x64xf32> to vector<16x64xf32>
    %146 = vector.shape_cast %141 : vector<1x64xf32> to vector<1x64xf32>
    %147 = vector.broadcast %146 : vector<1x64xf32> to vector<16x64xf32>
    %148 = vector.shape_cast %141 : vector<1x64xf32> to vector<1x64xf32>
    %149 = vector.broadcast %148 : vector<1x64xf32> to vector<16x64xf32>
    %c0_142 = arith.constant 0 : index
    %c0_143 = arith.constant 0 : index
    %c0_144 = arith.constant 0 : index
    %c0_145 = arith.constant 0 : index
    %150 = vector.load %arg14[%c0_142, %c0_143, %c0_144, %c0_145] : memref<1x6x6x128xf32, #tpu.memory_space<vmem>>, vector<1x4x4x128xf32>
    %151 = vector.shape_cast %150 : vector<1x4x4x128xf32> to vector<16x128xf32>
    %c0_146 = arith.constant 0 : index
    %c0_147 = arith.constant 0 : index
    %152 = vector.load %arg6[%c0_146, %c0_147] : memref<128x1024xf32, #tpu.memory_space<vmem>>, vector<128x64xf32>
    %cst_148 = arith.constant dense<0.000000e+00> : vector<16x64xf32>
    %153 = tpu.matmul %151, %152, %cst_148 {dimension_numbers = #tpu.dot_dimension_numbers<[1], [0], [0], [1], [0, 0, 1, 1], [], []>} : vector<16x128xf32>, vector<128x64xf32>, vector<16x64xf32> -> vector<16x64xf32>
    %154 = arith.addf %143, %153 : vector<16x64xf32>
    %c0_149 = arith.constant 0 : index
    %c0_150 = arith.constant 0 : index
    %c1_151 = arith.constant 1 : index
    %c0_152 = arith.constant 0 : index
    %155 = vector.load %arg14[%c0_149, %c0_150, %c1_151, %c0_152] : memref<1x6x6x128xf32, #tpu.memory_space<vmem>>, vector<1x4x4x128xf32>
    %156 = vector.shape_cast %155 : vector<1x4x4x128xf32> to vector<16x128xf32>
    %c0_153 = arith.constant 0 : index
    %c64 = arith.constant 64 : index
    %157 = vector.load %arg6[%c0_153, %c64] : memref<128x1024xf32, #tpu.memory_space<vmem>>, vector<128x128xf32>
    %cst_154 = arith.constant dense<0.000000e+00> : vector<16x128xf32>
    %158 = tpu.matmul %156, %157, %cst_154 {dimension_numbers = #tpu.dot_dimension_numbers<[1], [0], [0], [1], [0, 0, 1, 1], [], []>} : vector<16x128xf32>, vector<128x128xf32>, vector<16x128xf32> -> vector<16x128xf32>
    %159 = vector.extract_strided_slice %158 {offsets = [0, 0], sizes = [16, 64], strides = [1, 1]} : vector<16x128xf32> to vector<16x64xf32>
    %160 = arith.addf %154, %159 : vector<16x64xf32>
    %161 = vector.extract_strided_slice %158 {offsets = [0, 64], sizes = [16, 64], strides = [1, 1]} : vector<16x128xf32> to vector<16x64xf32>
    %162 = arith.addf %145, %161 : vector<16x64xf32>
    %c0_155 = arith.constant 0 : index
    %c0_156 = arith.constant 0 : index
    %c2_157 = arith.constant 2 : index
    %c0_158 = arith.constant 0 : index
    %163 = vector.load %arg14[%c0_155, %c0_156, %c2_157, %c0_158] : memref<1x6x6x128xf32, #tpu.memory_space<vmem>>, vector<1x4x4x128xf32>
    %164 = vector.shape_cast %163 : vector<1x4x4x128xf32> to vector<16x128xf32>
    %c0_159 = arith.constant 0 : index
    %c192 = arith.constant 192 : index
    %165 = vector.load %arg6[%c0_159, %c192] : memref<128x1024xf32, #tpu.memory_space<vmem>>, vector<128x64xf32>
    %cst_160 = arith.constant dense<0.000000e+00> : vector<16x64xf32>
    %166 = tpu.matmul %164, %165, %cst_160 {dimension_numbers = #tpu.dot_dimension_numbers<[1], [0], [0], [1], [0, 0, 1, 1], [], []>} : vector<16x128xf32>, vector<128x64xf32>, vector<16x64xf32> -> vector<16x64xf32>
    %167 = arith.addf %162, %166 : vector<16x64xf32>
    %c0_161 = arith.constant 0 : index
    %c1_162 = arith.constant 1 : index
    %c0_163 = arith.constant 0 : index
    %c0_164 = arith.constant 0 : index
    %168 = vector.load %arg14[%c0_161, %c1_162, %c0_163, %c0_164] : memref<1x6x6x128xf32, #tpu.memory_space<vmem>>, vector<1x4x4x128xf32>
    %169 = vector.shape_cast %168 : vector<1x4x4x128xf32> to vector<16x128xf32>
    %c0_165 = arith.constant 0 : index
    %c256 = arith.constant 256 : index
    %170 = vector.load %arg6[%c0_165, %c256] : memref<128x1024xf32, #tpu.memory_space<vmem>>, vector<128x128xf32>
    %cst_166 = arith.constant dense<0.000000e+00> : vector<16x128xf32>
    %171 = tpu.matmul %169, %170, %cst_166 {dimension_numbers = #tpu.dot_dimension_numbers<[1], [0], [0], [1], [0, 0, 1, 1], [], []>} : vector<16x128xf32>, vector<128x128xf32>, vector<16x128xf32> -> vector<16x128xf32>
    %172 = vector.extract_strided_slice %171 {offsets = [0, 0], sizes = [16, 64], strides = [1, 1]} : vector<16x128xf32> to vector<16x64xf32>
    %173 = arith.addf %160, %172 : vector<16x64xf32>
    %174 = vector.extract_strided_slice %171 {offsets = [0, 64], sizes = [16, 64], strides = [1, 1]} : vector<16x128xf32> to vector<16x64xf32>
    %175 = arith.addf %147, %174 : vector<16x64xf32>
    %c0_167 = arith.constant 0 : index
    %c1_168 = arith.constant 1 : index
    %c1_169 = arith.constant 1 : index
    %c0_170 = arith.constant 0 : index
    %176 = vector.load %arg14[%c0_167, %c1_168, %c1_169, %c0_170] : memref<1x6x6x128xf32, #tpu.memory_space<vmem>>, vector<1x4x4x128xf32>
    %177 = vector.shape_cast %176 : vector<1x4x4x128xf32> to vector<16x128xf32>
    %c0_171 = arith.constant 0 : index
    %c384_172 = arith.constant 384 : index
    %178 = vector.load %arg6[%c0_171, %c384_172] : memref<128x1024xf32, #tpu.memory_space<vmem>>, vector<128x256xf32>
    %cst_173 = arith.constant dense<0.000000e+00> : vector<16x256xf32>
    %179 = tpu.matmul %177, %178, %cst_173 {dimension_numbers = #tpu.dot_dimension_numbers<[1], [0], [0], [1], [0, 0, 1, 1], [], []>} : vector<16x128xf32>, vector<128x256xf32>, vector<16x256xf32> -> vector<16x256xf32>
    %180 = vector.extract_strided_slice %179 {offsets = [0, 0], sizes = [16, 64], strides = [1, 1]} : vector<16x256xf32> to vector<16x64xf32>
    %181 = arith.addf %173, %180 : vector<16x64xf32>
    %182 = vector.extract_strided_slice %179 {offsets = [0, 64], sizes = [16, 64], strides = [1, 1]} : vector<16x256xf32> to vector<16x64xf32>
    %183 = arith.addf %167, %182 : vector<16x64xf32>
    %184 = vector.extract_strided_slice %179 {offsets = [0, 128], sizes = [16, 64], strides = [1, 1]} : vector<16x256xf32> to vector<16x64xf32>
    %185 = arith.addf %175, %184 : vector<16x64xf32>
    %186 = vector.extract_strided_slice %179 {offsets = [0, 192], sizes = [16, 64], strides = [1, 1]} : vector<16x256xf32> to vector<16x64xf32>
    %187 = arith.addf %149, %186 : vector<16x64xf32>
    %c0_174 = arith.constant 0 : index
    %c1_175 = arith.constant 1 : index
    %c2_176 = arith.constant 2 : index
    %c0_177 = arith.constant 0 : index
    %188 = vector.load %arg14[%c0_174, %c1_175, %c2_176, %c0_177] : memref<1x6x6x128xf32, #tpu.memory_space<vmem>>, vector<1x4x4x128xf32>
    %189 = vector.shape_cast %188 : vector<1x4x4x128xf32> to vector<16x128xf32>
    %c0_178 = arith.constant 0 : index
    %c640 = arith.constant 640 : index
    %190 = vector.load %arg6[%c0_178, %c640] : memref<128x1024xf32, #tpu.memory_space<vmem>>, vector<128x128xf32>
    %cst_179 = arith.constant dense<0.000000e+00> : vector<16x128xf32>
    %191 = tpu.matmul %189, %190, %cst_179 {dimension_numbers = #tpu.dot_dimension_numbers<[1], [0], [0], [1], [0, 0, 1, 1], [], []>} : vector<16x128xf32>, vector<128x128xf32>, vector<16x128xf32> -> vector<16x128xf32>
    %192 = vector.extract_strided_slice %191 {offsets = [0, 0], sizes = [16, 64], strides = [1, 1]} : vector<16x128xf32> to vector<16x64xf32>
    %193 = arith.addf %183, %192 : vector<16x64xf32>
    %194 = vector.extract_strided_slice %191 {offsets = [0, 64], sizes = [16, 64], strides = [1, 1]} : vector<16x128xf32> to vector<16x64xf32>
    %195 = arith.addf %187, %194 : vector<16x64xf32>
    %c0_180 = arith.constant 0 : index
    %c2_181 = arith.constant 2 : index
    %c0_182 = arith.constant 0 : index
    %c0_183 = arith.constant 0 : index
    %196 = vector.load %arg14[%c0_180, %c2_181, %c0_182, %c0_183] : memref<1x6x6x128xf32, #tpu.memory_space<vmem>>, vector<1x4x4x128xf32>
    %197 = vector.shape_cast %196 : vector<1x4x4x128xf32> to vector<16x128xf32>
    %c0_184 = arith.constant 0 : index
    %c768_185 = arith.constant 768 : index
    %198 = vector.load %arg6[%c0_184, %c768_185] : memref<128x1024xf32, #tpu.memory_space<vmem>>, vector<128x64xf32>
    %cst_186 = arith.constant dense<0.000000e+00> : vector<16x64xf32>
    %199 = tpu.matmul %197, %198, %cst_186 {dimension_numbers = #tpu.dot_dimension_numbers<[1], [0], [0], [1], [0, 0, 1, 1], [], []>} : vector<16x128xf32>, vector<128x64xf32>, vector<16x64xf32> -> vector<16x64xf32>
    %200 = arith.addf %185, %199 : vector<16x64xf32>
    %c0_187 = arith.constant 0 : index
    %c2_188 = arith.constant 2 : index
    %c1_189 = arith.constant 1 : index
    %c0_190 = arith.constant 0 : index
    %201 = vector.load %arg14[%c0_187, %c2_188, %c1_189, %c0_190] : memref<1x6x6x128xf32, #tpu.memory_space<vmem>>, vector<1x4x4x128xf32>
    %202 = vector.shape_cast %201 : vector<1x4x4x128xf32> to vector<16x128xf32>
    %c0_191 = arith.constant 0 : index
    %c832 = arith.constant 832 : index
    %203 = vector.load %arg6[%c0_191, %c832] : memref<128x1024xf32, #tpu.memory_space<vmem>>, vector<128x128xf32>
    %cst_192 = arith.constant dense<0.000000e+00> : vector<16x128xf32>
    %204 = tpu.matmul %202, %203, %cst_192 {dimension_numbers = #tpu.dot_dimension_numbers<[1], [0], [0], [1], [0, 0, 1, 1], [], []>} : vector<16x128xf32>, vector<128x128xf32>, vector<16x128xf32> -> vector<16x128xf32>
    %205 = vector.extract_strided_slice %204 {offsets = [0, 0], sizes = [16, 64], strides = [1, 1]} : vector<16x128xf32> to vector<16x64xf32>
    %206 = arith.addf %200, %205 : vector<16x64xf32>
    %207 = vector.extract_strided_slice %204 {offsets = [0, 64], sizes = [16, 64], strides = [1, 1]} : vector<16x128xf32> to vector<16x64xf32>
    %208 = arith.addf %195, %207 : vector<16x64xf32>
    %c0_193 = arith.constant 0 : index
    %c2_194 = arith.constant 2 : index
    %c2_195 = arith.constant 2 : index
    %c0_196 = arith.constant 0 : index
    %209 = vector.load %arg14[%c0_193, %c2_194, %c2_195, %c0_196] : memref<1x6x6x128xf32, #tpu.memory_space<vmem>>, vector<1x4x4x128xf32>
    %210 = vector.shape_cast %209 : vector<1x4x4x128xf32> to vector<16x128xf32>
    %c0_197 = arith.constant 0 : index
    %c960 = arith.constant 960 : index
    %211 = vector.load %arg6[%c0_197, %c960] : memref<128x1024xf32, #tpu.memory_space<vmem>>, vector<128x64xf32>
    %cst_198 = arith.constant dense<0.000000e+00> : vector<16x64xf32>
    %212 = tpu.matmul %210, %211, %cst_198 {dimension_numbers = #tpu.dot_dimension_numbers<[1], [0], [0], [1], [0, 0, 1, 1], [], []>} : vector<16x128xf32>, vector<128x64xf32>, vector<16x64xf32> -> vector<16x64xf32>
    %213 = arith.addf %208, %212 : vector<16x64xf32>
    %cst_199 = arith.constant 0.000000e+00 : f32
    %214 = vector.broadcast %cst_199 : f32 to vector<16x64xf32>
    %215 = arith.maximumf %181, %214 : vector<16x64xf32>
    %216 = vector.shape_cast %215 : vector<16x64xf32> to vector<1x4x4x64xf32>
    %cst_200 = arith.constant 0.000000e+00 : f32
    %217 = vector.broadcast %cst_200 : f32 to vector<16x64xf32>
    %218 = arith.maximumf %193, %217 : vector<16x64xf32>
    %219 = vector.shape_cast %218 : vector<16x64xf32> to vector<1x4x4x64xf32>
    %220 = vector.shape_cast %216 : vector<1x4x4x64xf32> to vector<1x4x4x1x64xf32>
    %221 = vector.shape_cast %219 : vector<1x4x4x64xf32> to vector<1x4x4x1x64xf32>
    %222 = tpu.concatenate %220, %221 in 3 : vector<1x4x4x1x64xf32>, vector<1x4x4x1x64xf32> -> vector<1x4x4x2x64xf32>
    %223 = vector.shape_cast %222 : vector<1x4x4x2x64xf32> to vector<1x4x8x64xf32>
    %cst_201 = arith.constant 0.000000e+00 : f32
    %224 = vector.broadcast %cst_201 : f32 to vector<16x64xf32>
    %225 = arith.maximumf %206, %224 : vector<16x64xf32>
    %226 = vector.shape_cast %225 : vector<16x64xf32> to vector<1x4x4x64xf32>
    %cst_202 = arith.constant 0.000000e+00 : f32
    %227 = vector.broadcast %cst_202 : f32 to vector<16x64xf32>
    %228 = arith.maximumf %213, %227 : vector<16x64xf32>
    %229 = vector.shape_cast %228 : vector<16x64xf32> to vector<1x4x4x64xf32>
    %230 = vector.shape_cast %226 : vector<1x4x4x64xf32> to vector<1x4x4x1x64xf32>
    %231 = vector.shape_cast %229 : vector<1x4x4x64xf32> to vector<1x4x4x1x64xf32>
    %232 = tpu.concatenate %230, %231 in 3 : vector<1x4x4x1x64xf32>, vector<1x4x4x1x64xf32> -> vector<1x4x4x2x64xf32>
    %233 = vector.shape_cast %232 : vector<1x4x4x2x64xf32> to vector<1x4x8x64xf32>
    %234 = vector.shape_cast %223 : vector<1x4x8x64xf32> to vector<1x4x1x8x64xf32>
    %235 = vector.shape_cast %233 : vector<1x4x8x64xf32> to vector<1x4x1x8x64xf32>
    %236 = tpu.concatenate %234, %235 in 2 : vector<1x4x1x8x64xf32>, vector<1x4x1x8x64xf32> -> vector<1x4x2x8x64xf32>
    %237 = vector.shape_cast %236 : vector<1x4x2x8x64xf32> to vector<1x8x8x64xf32>
    %c0_203 = arith.constant 0 : index
    %c1_204 = arith.constant 1 : index
    %c1_205 = arith.constant 1 : index
    %c0_206 = arith.constant 0 : index
    %238 = vector.load %arg15[%c0_203, %c1_204, %c1_205, %c0_206] : memref<1x10x10x64xf32, #tpu.memory_space<vmem>>, vector<1x8x8x64xf32>
    tpu.vector_store %arg15[%c0_203, %c1_204, %c1_205, %c0_206], %237 {strides = array<i32>} : memref<1x10x10x64xf32, #tpu.memory_space<vmem>>, vector<1x8x8x64xf32>,
    %c0_207 = arith.constant 0 : index
    %c0_208 = arith.constant 0 : index
    %239 = vector.load %arg9[%c0_207, %c0_208] : memref<1x32xf32, #tpu.memory_space<vmem>>, vector<1x32xf32>
    %240 = vector.shape_cast %239 : vector<1x32xf32> to vector<1x32xf32>
    %241 = vector.broadcast %240 : vector<1x32xf32> to vector<64x32xf32>
    %242 = vector.shape_cast %239 : vector<1x32xf32> to vector<1x32xf32>
    %243 = vector.broadcast %242 : vector<1x32xf32> to vector<64x32xf32>
    %244 = vector.shape_cast %239 : vector<1x32xf32> to vector<1x32xf32>
    %245 = vector.broadcast %244 : vector<1x32xf32> to vector<64x32xf32>
    %246 = vector.shape_cast %239 : vector<1x32xf32> to vector<1x32xf32>
    %247 = vector.broadcast %246 : vector<1x32xf32> to vector<64x32xf32>
    %c0_209 = arith.constant 0 : index
    %c0_210 = arith.constant 0 : index
    %c0_211 = arith.constant 0 : index
    %c0_212 = arith.constant 0 : index
    %248 = vector.load %arg15[%c0_209, %c0_210, %c0_211, %c0_212] : memref<1x10x10x64xf32, #tpu.memory_space<vmem>>, vector<1x8x8x64xf32>
    %249 = vector.shape_cast %248 : vector<1x8x8x64xf32> to vector<64x64xf32>
    %c0_213 = arith.constant 0 : index
    %c0_214 = arith.constant 0 : index
    %250 = vector.load %arg8[%c0_213, %c0_214] : memref<64x512xf32, #tpu.memory_space<vmem>>, vector<64x32xf32>
    %cst_215 = arith.constant dense<0.000000e+00> : vector<64x32xf32>
    %251 = tpu.matmul %249, %250, %cst_215 {dimension_numbers = #tpu.dot_dimension_numbers<[1], [0], [0], [1], [0, 0, 1, 1], [], []>} : vector<64x64xf32>, vector<64x32xf32>, vector<64x32xf32> -> vector<64x32xf32>
    %252 = arith.addf %241, %251 : vector<64x32xf32>
    %c0_216 = arith.constant 0 : index
    %c0_217 = arith.constant 0 : index
    %c1_218 = arith.constant 1 : index
    %c0_219 = arith.constant 0 : index
    %253 = vector.load %arg15[%c0_216, %c0_217, %c1_218, %c0_219] : memref<1x10x10x64xf32, #tpu.memory_space<vmem>>, vector<1x8x8x64xf32>
    %254 = vector.shape_cast %253 : vector<1x8x8x64xf32> to vector<64x64xf32>
    %c0_220 = arith.constant 0 : index
    %c32 = arith.constant 32 : index
    %255 = vector.load %arg8[%c0_220, %c32] : memref<64x512xf32, #tpu.memory_space<vmem>>, vector<64x64xf32>
    %cst_221 = arith.constant dense<0.000000e+00> : vector<64x64xf32>
    %256 = tpu.matmul %254, %255, %cst_221 {dimension_numbers = #tpu.dot_dimension_numbers<[1], [0], [0], [1], [0, 0, 1, 1], [], []>} : vector<64x64xf32>, vector<64x64xf32>, vector<64x64xf32> -> vector<64x64xf32>
    %257 = vector.extract_strided_slice %256 {offsets = [0, 0], sizes = [64, 32], strides = [1, 1]} : vector<64x64xf32> to vector<64x32xf32>
    %258 = arith.addf %252, %257 : vector<64x32xf32>
    %259 = vector.extract_strided_slice %256 {offsets = [0, 32], sizes = [64, 32], strides = [1, 1]} : vector<64x64xf32> to vector<64x32xf32>
    %260 = arith.addf %243, %259 : vector<64x32xf32>
    %c0_222 = arith.constant 0 : index
    %c0_223 = arith.constant 0 : index
    %c2_224 = arith.constant 2 : index
    %c0_225 = arith.constant 0 : index
    %261 = vector.load %arg15[%c0_222, %c0_223, %c2_224, %c0_225] : memref<1x10x10x64xf32, #tpu.memory_space<vmem>>, vector<1x8x8x64xf32>
    %262 = vector.shape_cast %261 : vector<1x8x8x64xf32> to vector<64x64xf32>
    %c0_226 = arith.constant 0 : index
    %c96 = arith.constant 96 : index
    %263 = vector.load %arg8[%c0_226, %c96] : memref<64x512xf32, #tpu.memory_space<vmem>>, vector<64x32xf32>
    %cst_227 = arith.constant dense<0.000000e+00> : vector<64x32xf32>
    %264 = tpu.matmul %262, %263, %cst_227 {dimension_numbers = #tpu.dot_dimension_numbers<[1], [0], [0], [1], [0, 0, 1, 1], [], []>} : vector<64x64xf32>, vector<64x32xf32>, vector<64x32xf32> -> vector<64x32xf32>
    %265 = arith.addf %260, %264 : vector<64x32xf32>
    %c0_228 = arith.constant 0 : index
    %c1_229 = arith.constant 1 : index
    %c0_230 = arith.constant 0 : index
    %c0_231 = arith.constant 0 : index
    %266 = vector.load %arg15[%c0_228, %c1_229, %c0_230, %c0_231] : memref<1x10x10x64xf32, #tpu.memory_space<vmem>>, vector<1x8x8x64xf32>
    %267 = vector.shape_cast %266 : vector<1x8x8x64xf32> to vector<64x64xf32>
    %c0_232 = arith.constant 0 : index
    %c128_233 = arith.constant 128 : index
    %268 = vector.load %arg8[%c0_232, %c128_233] : memref<64x512xf32, #tpu.memory_space<vmem>>, vector<64x64xf32>
    %cst_234 = arith.constant dense<0.000000e+00> : vector<64x64xf32>
    %269 = tpu.matmul %267, %268, %cst_234 {dimension_numbers = #tpu.dot_dimension_numbers<[1], [0], [0], [1], [0, 0, 1, 1], [], []>} : vector<64x64xf32>, vector<64x64xf32>, vector<64x64xf32> -> vector<64x64xf32>
    %270 = vector.extract_strided_slice %269 {offsets = [0, 0], sizes = [64, 32], strides = [1, 1]} : vector<64x64xf32> to vector<64x32xf32>
    %271 = arith.addf %258, %270 : vector<64x32xf32>
    %272 = vector.extract_strided_slice %269 {offsets = [0, 32], sizes = [64, 32], strides = [1, 1]} : vector<64x64xf32> to vector<64x32xf32>
    %273 = arith.addf %245, %272 : vector<64x32xf32>
    %c0_235 = arith.constant 0 : index
    %c1_236 = arith.constant 1 : index
    %c1_237 = arith.constant 1 : index
    %c0_238 = arith.constant 0 : index
    %274 = vector.load %arg15[%c0_235, %c1_236, %c1_237, %c0_238] : memref<1x10x10x64xf32, #tpu.memory_space<vmem>>, vector<1x8x8x64xf32>
    %275 = vector.shape_cast %274 : vector<1x8x8x64xf32> to vector<64x64xf32>
    %c0_239 = arith.constant 0 : index
    %c192_240 = arith.constant 192 : index
    %276 = vector.load %arg8[%c0_239, %c192_240] : memref<64x512xf32, #tpu.memory_space<vmem>>, vector<64x128xf32>
    %cst_241 = arith.constant dense<0.000000e+00> : vector<64x128xf32>
    %277 = tpu.matmul %275, %276, %cst_241 {dimension_numbers = #tpu.dot_dimension_numbers<[1], [0], [0], [1], [0, 0, 1, 1], [], []>} : vector<64x64xf32>, vector<64x128xf32>, vector<64x128xf32> -> vector<64x128xf32>
    %278 = vector.extract_strided_slice %277 {offsets = [0, 0], sizes = [64, 32], strides = [1, 1]} : vector<64x128xf32> to vector<64x32xf32>
    %279 = arith.addf %271, %278 : vector<64x32xf32>
    %280 = vector.extract_strided_slice %277 {offsets = [0, 32], sizes = [64, 32], strides = [1, 1]} : vector<64x128xf32> to vector<64x32xf32>
    %281 = arith.addf %265, %280 : vector<64x32xf32>
    %282 = vector.extract_strided_slice %277 {offsets = [0, 64], sizes = [64, 32], strides = [1, 1]} : vector<64x128xf32> to vector<64x32xf32>
    %283 = arith.addf %273, %282 : vector<64x32xf32>
    %284 = vector.extract_strided_slice %277 {offsets = [0, 96], sizes = [64, 32], strides = [1, 1]} : vector<64x128xf32> to vector<64x32xf32>
    %285 = arith.addf %247, %284 : vector<64x32xf32>
    %c0_242 = arith.constant 0 : index
    %c1_243 = arith.constant 1 : index
    %c2_244 = arith.constant 2 : index
    %c0_245 = arith.constant 0 : index
    %286 = vector.load %arg15[%c0_242, %c1_243, %c2_244, %c0_245] : memref<1x10x10x64xf32, #tpu.memory_space<vmem>>, vector<1x8x8x64xf32>
    %287 = vector.shape_cast %286 : vector<1x8x8x64xf32> to vector<64x64xf32>
    %c0_246 = arith.constant 0 : index
    %c320 = arith.constant 320 : index
    %288 = vector.load %arg8[%c0_246, %c320] : memref<64x512xf32, #tpu.memory_space<vmem>>, vector<64x64xf32>
    %cst_247 = arith.constant dense<0.000000e+00> : vector<64x64xf32>
    %289 = tpu.matmul %287, %288, %cst_247 {dimension_numbers = #tpu.dot_dimension_numbers<[1], [0], [0], [1], [0, 0, 1, 1], [], []>} : vector<64x64xf32>, vector<64x64xf32>, vector<64x64xf32> -> vector<64x64xf32>
    %290 = vector.extract_strided_slice %289 {offsets = [0, 0], sizes = [64, 32], strides = [1, 1]} : vector<64x64xf32> to vector<64x32xf32>
    %291 = arith.addf %281, %290 : vector<64x32xf32>
    %292 = vector.extract_strided_slice %289 {offsets = [0, 32], sizes = [64, 32], strides = [1, 1]} : vector<64x64xf32> to vector<64x32xf32>
    %293 = arith.addf %285, %292 : vector<64x32xf32>
    %c0_248 = arith.constant 0 : index
    %c2_249 = arith.constant 2 : index
    %c0_250 = arith.constant 0 : index
    %c0_251 = arith.constant 0 : index
    %294 = vector.load %arg15[%c0_248, %c2_249, %c0_250, %c0_251] : memref<1x10x10x64xf32, #tpu.memory_space<vmem>>, vector<1x8x8x64xf32>
    %295 = vector.shape_cast %294 : vector<1x8x8x64xf32> to vector<64x64xf32>
    %c0_252 = arith.constant 0 : index
    %c384_253 = arith.constant 384 : index
    %296 = vector.load %arg8[%c0_252, %c384_253] : memref<64x512xf32, #tpu.memory_space<vmem>>, vector<64x32xf32>
    %cst_254 = arith.constant dense<0.000000e+00> : vector<64x32xf32>
    %297 = tpu.matmul %295, %296, %cst_254 {dimension_numbers = #tpu.dot_dimension_numbers<[1], [0], [0], [1], [0, 0, 1, 1], [], []>} : vector<64x64xf32>, vector<64x32xf32>, vector<64x32xf32> -> vector<64x32xf32>
    %298 = arith.addf %283, %297 : vector<64x32xf32>
    %c0_255 = arith.constant 0 : index
    %c2_256 = arith.constant 2 : index
    %c1_257 = arith.constant 1 : index
    %c0_258 = arith.constant 0 : index
    %299 = vector.load %arg15[%c0_255, %c2_256, %c1_257, %c0_258] : memref<1x10x10x64xf32, #tpu.memory_space<vmem>>, vector<1x8x8x64xf32>
    %300 = vector.shape_cast %299 : vector<1x8x8x64xf32> to vector<64x64xf32>
    %c0_259 = arith.constant 0 : index
    %c416 = arith.constant 416 : index
    %301 = vector.load %arg8[%c0_259, %c416] : memref<64x512xf32, #tpu.memory_space<vmem>>, vector<64x64xf32>
    %cst_260 = arith.constant dense<0.000000e+00> : vector<64x64xf32>
    %302 = tpu.matmul %300, %301, %cst_260 {dimension_numbers = #tpu.dot_dimension_numbers<[1], [0], [0], [1], [0, 0, 1, 1], [], []>} : vector<64x64xf32>, vector<64x64xf32>, vector<64x64xf32> -> vector<64x64xf32>
    %303 = vector.extract_strided_slice %302 {offsets = [0, 0], sizes = [64, 32], strides = [1, 1]} : vector<64x64xf32> to vector<64x32xf32>
    %304 = arith.addf %298, %303 : vector<64x32xf32>
    %305 = vector.extract_strided_slice %302 {offsets = [0, 32], sizes = [64, 32], strides = [1, 1]} : vector<64x64xf32> to vector<64x32xf32>
    %306 = arith.addf %293, %305 : vector<64x32xf32>
    %c0_261 = arith.constant 0 : index
    %c2_262 = arith.constant 2 : index
    %c2_263 = arith.constant 2 : index
    %c0_264 = arith.constant 0 : index
    %307 = vector.load %arg15[%c0_261, %c2_262, %c2_263, %c0_264] : memref<1x10x10x64xf32, #tpu.memory_space<vmem>>, vector<1x8x8x64xf32>
    %308 = vector.shape_cast %307 : vector<1x8x8x64xf32> to vector<64x64xf32>
    %c0_265 = arith.constant 0 : index
    %c480 = arith.constant 480 : index
    %309 = vector.load %arg8[%c0_265, %c480] : memref<64x512xf32, #tpu.memory_space<vmem>>, vector<64x32xf32>
    %cst_266 = arith.constant dense<0.000000e+00> : vector<64x32xf32>
    %310 = tpu.matmul %308, %309, %cst_266 {dimension_numbers = #tpu.dot_dimension_numbers<[1], [0], [0], [1], [0, 0, 1, 1], [], []>} : vector<64x64xf32>, vector<64x32xf32>, vector<64x32xf32> -> vector<64x32xf32>
    %311 = arith.addf %306, %310 : vector<64x32xf32>
    %cst_267 = arith.constant 0.000000e+00 : f32
    %312 = vector.broadcast %cst_267 : f32 to vector<64x32xf32>
    %313 = arith.maximumf %279, %312 : vector<64x32xf32>
    %314 = vector.shape_cast %313 : vector<64x32xf32> to vector<1x8x8x32xf32>
    %cst_268 = arith.constant 0.000000e+00 : f32
    %315 = vector.broadcast %cst_268 : f32 to vector<64x32xf32>
    %316 = arith.maximumf %291, %315 : vector<64x32xf32>
    %317 = vector.shape_cast %316 : vector<64x32xf32> to vector<1x8x8x32xf32>
    %318 = vector.shape_cast %314 : vector<1x8x8x32xf32> to vector<1x8x8x1x32xf32>
    %319 = vector.shape_cast %317 : vector<1x8x8x32xf32> to vector<1x8x8x1x32xf32>
    %320 = tpu.concatenate %318, %319 in 3 : vector<1x8x8x1x32xf32>, vector<1x8x8x1x32xf32> -> vector<1x8x8x2x32xf32>
    %321 = vector.shape_cast %320 : vector<1x8x8x2x32xf32> to vector<1x8x16x32xf32>
    %cst_269 = arith.constant 0.000000e+00 : f32
    %322 = vector.broadcast %cst_269 : f32 to vector<64x32xf32>
    %323 = arith.maximumf %304, %322 : vector<64x32xf32>
    %324 = vector.shape_cast %323 : vector<64x32xf32> to vector<1x8x8x32xf32>
    %cst_270 = arith.constant 0.000000e+00 : f32
    %325 = vector.broadcast %cst_270 : f32 to vector<64x32xf32>
    %326 = arith.maximumf %311, %325 : vector<64x32xf32>
    %327 = vector.shape_cast %326 : vector<64x32xf32> to vector<1x8x8x32xf32>
    %328 = vector.shape_cast %324 : vector<1x8x8x32xf32> to vector<1x8x8x1x32xf32>
    %329 = vector.shape_cast %327 : vector<1x8x8x32xf32> to vector<1x8x8x1x32xf32>
    %330 = tpu.concatenate %328, %329 in 3 : vector<1x8x8x1x32xf32>, vector<1x8x8x1x32xf32> -> vector<1x8x8x2x32xf32>
    %331 = vector.shape_cast %330 : vector<1x8x8x2x32xf32> to vector<1x8x16x32xf32>
    %332 = vector.shape_cast %321 : vector<1x8x16x32xf32> to vector<1x8x1x16x32xf32>
    %333 = vector.shape_cast %331 : vector<1x8x16x32xf32> to vector<1x8x1x16x32xf32>
    %334 = tpu.concatenate %332, %333 in 2 : vector<1x8x1x16x32xf32>, vector<1x8x1x16x32xf32> -> vector<1x8x2x16x32xf32>
    %335 = vector.shape_cast %334 : vector<1x8x2x16x32xf32> to vector<1x16x16x32xf32>
    %c0_271 = arith.constant 0 : index
    %c1_272 = arith.constant 1 : index
    %c1_273 = arith.constant 1 : index
    %c0_274 = arith.constant 0 : index
    %336 = vector.load %arg16[%c0_271, %c1_272, %c1_273, %c0_274] : memref<1x18x18x32xf32, #tpu.memory_space<vmem>>, vector<1x16x16x32xf32>
    tpu.vector_store %arg16[%c0_271, %c1_272, %c1_273, %c0_274], %335 {strides = array<i32>} : memref<1x18x18x32xf32, #tpu.memory_space<vmem>>, vector<1x16x16x32xf32>,
    %c0_275 = arith.constant 0 : index
    %c0_276 = arith.constant 0 : index
    %337 = vector.load %arg11[%c0_275, %c0_276] : memref<1x3xf32, #tpu.memory_space<vmem>>, vector<1x3xf32>
    %338 = vector.shape_cast %337 : vector<1x3xf32> to vector<1x3xf32>
    %339 = vector.broadcast %338 : vector<1x3xf32> to vector<256x3xf32>
    %c0_277 = arith.constant 0 : index
    %c0_278 = arith.constant 0 : index
    %c0_279 = arith.constant 0 : index
    %c0_280 = arith.constant 0 : index
    %340 = vector.load %arg16[%c0_277, %c0_278, %c0_279, %c0_280] : memref<1x18x18x32xf32, #tpu.memory_space<vmem>>, vector<1x16x16x32xf32>
    %341 = vector.shape_cast %340 : vector<1x16x16x32xf32> to vector<256x32xf32>
    %c0_281 = arith.constant 0 : index
    %c0_282 = arith.constant 0 : index
    %c0_283 = arith.constant 0 : index
    %342 = vector.load %arg10[%c0_281, %c0_282, %c0_283] : memref<9x32x3xf32, #tpu.memory_space<vmem>>, vector<1x32x3xf32>
    %343 = vector.shape_cast %342 : vector<1x32x3xf32> to vector<32x3xf32>
    %cst_284 = arith.constant dense<0.000000e+00> : vector<256x3xf32>
    %344 = tpu.matmul %341, %343, %cst_284 {dimension_numbers = #tpu.dot_dimension_numbers<[1], [0], [0], [1], [0, 0, 1, 1], [], []>} : vector<256x32xf32>, vector<32x3xf32>, vector<256x3xf32> -> vector<256x3xf32>
    %345 = arith.addf %339, %344 : vector<256x3xf32>
    %c0_285 = arith.constant 0 : index
    %c0_286 = arith.constant 0 : index
    %c1_287 = arith.constant 1 : index
    %c0_288 = arith.constant 0 : index
    %346 = vector.load %arg16[%c0_285, %c0_286, %c1_287, %c0_288] : memref<1x18x18x32xf32, #tpu.memory_space<vmem>>, vector<1x16x16x32xf32>
    %347 = vector.shape_cast %346 : vector<1x16x16x32xf32> to vector<256x32xf32>
    %c1_289 = arith.constant 1 : index
    %c0_290 = arith.constant 0 : index
    %c0_291 = arith.constant 0 : index
    %348 = vector.load %arg10[%c1_289, %c0_290, %c0_291] : memref<9x32x3xf32, #tpu.memory_space<vmem>>, vector<1x32x3xf32>
    %349 = vector.shape_cast %348 : vector<1x32x3xf32> to vector<32x3xf32>
    %cst_292 = arith.constant dense<0.000000e+00> : vector<256x3xf32>
    %350 = tpu.matmul %347, %349, %cst_292 {dimension_numbers = #tpu.dot_dimension_numbers<[1], [0], [0], [1], [0, 0, 1, 1], [], []>} : vector<256x32xf32>, vector<32x3xf32>, vector<256x3xf32> -> vector<256x3xf32>
    %351 = arith.addf %345, %350 : vector<256x3xf32>
    %c0_293 = arith.constant 0 : index
    %c0_294 = arith.constant 0 : index
    %c2_295 = arith.constant 2 : index
    %c0_296 = arith.constant 0 : index
    %352 = vector.load %arg16[%c0_293, %c0_294, %c2_295, %c0_296] : memref<1x18x18x32xf32, #tpu.memory_space<vmem>>, vector<1x16x16x32xf32>
    %353 = vector.shape_cast %352 : vector<1x16x16x32xf32> to vector<256x32xf32>
    %c2_297 = arith.constant 2 : index
    %c0_298 = arith.constant 0 : index
    %c0_299 = arith.constant 0 : index
    %354 = vector.load %arg10[%c2_297, %c0_298, %c0_299] : memref<9x32x3xf32, #tpu.memory_space<vmem>>, vector<1x32x3xf32>
    %355 = vector.shape_cast %354 : vector<1x32x3xf32> to vector<32x3xf32>
    %cst_300 = arith.constant dense<0.000000e+00> : vector<256x3xf32>
    %356 = tpu.matmul %353, %355, %cst_300 {dimension_numbers = #tpu.dot_dimension_numbers<[1], [0], [0], [1], [0, 0, 1, 1], [], []>} : vector<256x32xf32>, vector<32x3xf32>, vector<256x3xf32> -> vector<256x3xf32>
    %357 = arith.addf %351, %356 : vector<256x3xf32>
    %c0_301 = arith.constant 0 : index
    %c1_302 = arith.constant 1 : index
    %c0_303 = arith.constant 0 : index
    %c0_304 = arith.constant 0 : index
    %358 = vector.load %arg16[%c0_301, %c1_302, %c0_303, %c0_304] : memref<1x18x18x32xf32, #tpu.memory_space<vmem>>, vector<1x16x16x32xf32>
    %359 = vector.shape_cast %358 : vector<1x16x16x32xf32> to vector<256x32xf32>
    %c3_305 = arith.constant 3 : index
    %c0_306 = arith.constant 0 : index
    %c0_307 = arith.constant 0 : index
    %360 = vector.load %arg10[%c3_305, %c0_306, %c0_307] : memref<9x32x3xf32, #tpu.memory_space<vmem>>, vector<1x32x3xf32>
    %361 = vector.shape_cast %360 : vector<1x32x3xf32> to vector<32x3xf32>
    %cst_308 = arith.constant dense<0.000000e+00> : vector<256x3xf32>
    %362 = tpu.matmul %359, %361, %cst_308 {dimension_numbers = #tpu.dot_dimension_numbers<[1], [0], [0], [1], [0, 0, 1, 1], [], []>} : vector<256x32xf32>, vector<32x3xf32>, vector<256x3xf32> -> vector<256x3xf32>
    %363 = arith.addf %357, %362 : vector<256x3xf32>
    %c0_309 = arith.constant 0 : index
    %c1_310 = arith.constant 1 : index
    %c1_311 = arith.constant 1 : index
    %c0_312 = arith.constant 0 : index
    %364 = vector.load %arg16[%c0_309, %c1_310, %c1_311, %c0_312] : memref<1x18x18x32xf32, #tpu.memory_space<vmem>>, vector<1x16x16x32xf32>
    %365 = vector.shape_cast %364 : vector<1x16x16x32xf32> to vector<256x32xf32>
    %c4 = arith.constant 4 : index
    %c0_313 = arith.constant 0 : index
    %c0_314 = arith.constant 0 : index
    %366 = vector.load %arg10[%c4, %c0_313, %c0_314] : memref<9x32x3xf32, #tpu.memory_space<vmem>>, vector<1x32x3xf32>
    %367 = vector.shape_cast %366 : vector<1x32x3xf32> to vector<32x3xf32>
    %cst_315 = arith.constant dense<0.000000e+00> : vector<256x3xf32>
    %368 = tpu.matmul %365, %367, %cst_315 {dimension_numbers = #tpu.dot_dimension_numbers<[1], [0], [0], [1], [0, 0, 1, 1], [], []>} : vector<256x32xf32>, vector<32x3xf32>, vector<256x3xf32> -> vector<256x3xf32>
    %369 = arith.addf %363, %368 : vector<256x3xf32>
    %c0_316 = arith.constant 0 : index
    %c1_317 = arith.constant 1 : index
    %c2_318 = arith.constant 2 : index
    %c0_319 = arith.constant 0 : index
    %370 = vector.load %arg16[%c0_316, %c1_317, %c2_318, %c0_319] : memref<1x18x18x32xf32, #tpu.memory_space<vmem>>, vector<1x16x16x32xf32>
    %371 = vector.shape_cast %370 : vector<1x16x16x32xf32> to vector<256x32xf32>
    %c5_320 = arith.constant 5 : index
    %c0_321 = arith.constant 0 : index
    %c0_322 = arith.constant 0 : index
    %372 = vector.load %arg10[%c5_320, %c0_321, %c0_322] : memref<9x32x3xf32, #tpu.memory_space<vmem>>, vector<1x32x3xf32>
    %373 = vector.shape_cast %372 : vector<1x32x3xf32> to vector<32x3xf32>
    %cst_323 = arith.constant dense<0.000000e+00> : vector<256x3xf32>
    %374 = tpu.matmul %371, %373, %cst_323 {dimension_numbers = #tpu.dot_dimension_numbers<[1], [0], [0], [1], [0, 0, 1, 1], [], []>} : vector<256x32xf32>, vector<32x3xf32>, vector<256x3xf32> -> vector<256x3xf32>
    %375 = arith.addf %369, %374 : vector<256x3xf32>
    %c0_324 = arith.constant 0 : index
    %c2_325 = arith.constant 2 : index
    %c0_326 = arith.constant 0 : index
    %c0_327 = arith.constant 0 : index
    %376 = vector.load %arg16[%c0_324, %c2_325, %c0_326, %c0_327] : memref<1x18x18x32xf32, #tpu.memory_space<vmem>>, vector<1x16x16x32xf32>
    %377 = vector.shape_cast %376 : vector<1x16x16x32xf32> to vector<256x32xf32>
    %c6 = arith.constant 6 : index
    %c0_328 = arith.constant 0 : index
    %c0_329 = arith.constant 0 : index
    %378 = vector.load %arg10[%c6, %c0_328, %c0_329] : memref<9x32x3xf32, #tpu.memory_space<vmem>>, vector<1x32x3xf32>
    %379 = vector.shape_cast %378 : vector<1x32x3xf32> to vector<32x3xf32>
    %cst_330 = arith.constant dense<0.000000e+00> : vector<256x3xf32>
    %380 = tpu.matmul %377, %379, %cst_330 {dimension_numbers = #tpu.dot_dimension_numbers<[1], [0], [0], [1], [0, 0, 1, 1], [], []>} : vector<256x32xf32>, vector<32x3xf32>, vector<256x3xf32> -> vector<256x3xf32>
    %381 = arith.addf %375, %380 : vector<256x3xf32>
    %c0_331 = arith.constant 0 : index
    %c2_332 = arith.constant 2 : index
    %c1_333 = arith.constant 1 : index
    %c0_334 = arith.constant 0 : index
    %382 = vector.load %arg16[%c0_331, %c2_332, %c1_333, %c0_334] : memref<1x18x18x32xf32, #tpu.memory_space<vmem>>, vector<1x16x16x32xf32>
    %383 = vector.shape_cast %382 : vector<1x16x16x32xf32> to vector<256x32xf32>
    %c7 = arith.constant 7 : index
    %c0_335 = arith.constant 0 : index
    %c0_336 = arith.constant 0 : index
    %384 = vector.load %arg10[%c7, %c0_335, %c0_336] : memref<9x32x3xf32, #tpu.memory_space<vmem>>, vector<1x32x3xf32>
    %385 = vector.shape_cast %384 : vector<1x32x3xf32> to vector<32x3xf32>
    %cst_337 = arith.constant dense<0.000000e+00> : vector<256x3xf32>
    %386 = tpu.matmul %383, %385, %cst_337 {dimension_numbers = #tpu.dot_dimension_numbers<[1], [0], [0], [1], [0, 0, 1, 1], [], []>} : vector<256x32xf32>, vector<32x3xf32>, vector<256x3xf32> -> vector<256x3xf32>
    %387 = arith.addf %381, %386 : vector<256x3xf32>
    %c0_338 = arith.constant 0 : index
    %c2_339 = arith.constant 2 : index
    %c2_340 = arith.constant 2 : index
    %c0_341 = arith.constant 0 : index
    %388 = vector.load %arg16[%c0_338, %c2_339, %c2_340, %c0_341] : memref<1x18x18x32xf32, #tpu.memory_space<vmem>>, vector<1x16x16x32xf32>
    %389 = vector.shape_cast %388 : vector<1x16x16x32xf32> to vector<256x32xf32>
    %c8 = arith.constant 8 : index
    %c0_342 = arith.constant 0 : index
    %c0_343 = arith.constant 0 : index
    %390 = vector.load %arg10[%c8, %c0_342, %c0_343] : memref<9x32x3xf32, #tpu.memory_space<vmem>>, vector<1x32x3xf32>
    %391 = vector.shape_cast %390 : vector<1x32x3xf32> to vector<32x3xf32>
    %cst_344 = arith.constant dense<0.000000e+00> : vector<256x3xf32>
    %392 = tpu.matmul %389, %391, %cst_344 {dimension_numbers = #tpu.dot_dimension_numbers<[1], [0], [0], [1], [0, 0, 1, 1], [], []>} : vector<256x32xf32>, vector<32x3xf32>, vector<256x3xf32> -> vector<256x3xf32>
    %393 = arith.addf %387, %392 : vector<256x3xf32>
    %394 = vector.shape_cast %393 : vector<256x3xf32> to vector<1x16x16x3xf32>
    %c0_345 = arith.constant 0 : index
    %c0_346 = arith.constant 0 : index
    %c0_347 = arith.constant 0 : index
    %c0_348 = arith.constant 0 : index
    %395 = vector.load %arg12[%c0_345, %c0_346, %c0_347, %c0_348] : memref<1x16x16x3xf32, #tpu.memory_space<vmem>>, vector<1x16x16x3xf32>
    tpu.vector_store %arg12[%c0_345, %c0_346, %c0_347, %c0_348], %394 {strides = array<i32>} : memref<1x16x16x3xf32, #tpu.memory_space<vmem>>, vector<1x16x16x3xf32>,
    return
  }
  func.func @transform_0(%arg0: i32) -> (i32, i32) {
    %c0_i32 = arith.constant 0 : i32
    %c0_i32_0 = arith.constant 0 : i32
    %c0_i32_1 = arith.constant 0 : i32
    return %c0_i32, %c0_i32_0 : i32, i32
  }
  func.func @transform_1(%arg0: i32) -> (i32, i32) {
    %c0_i32 = arith.constant 0 : i32
    %c0_i32_0 = arith.constant 0 : i32
    %c0_i32_1 = arith.constant 0 : i32
    return %c0_i32, %c0_i32_0 : i32, i32
  }
  func.func @transform_2(%arg0: i32) -> (i32, i32) {
    %c0_i32 = arith.constant 0 : i32
    %c0_i32_0 = arith.constant 0 : i32
    %c0_i32_1 = arith.constant 0 : i32
    return %c0_i32, %c0_i32_0 : i32, i32
  }
  func.func @transform_3(%arg0: i32) -> (i32, i32) {
    %c0_i32 = arith.constant 0 : i32
    %c0_i32_0 = arith.constant 0 : i32
    %c0_i32_1 = arith.constant 0 : i32
    return %c0_i32, %c0_i32_0 : i32, i32
  }
  func.func @transform_4(%arg0: i32) -> (i32, i32) {
    %c0_i32 = arith.constant 0 : i32
    %c0_i32_0 = arith.constant 0 : i32
    %c0_i32_1 = arith.constant 0 : i32
    return %c0_i32, %c0_i32_0 : i32, i32
  }
  func.func @transform_5(%arg0: i32) -> (i32, i32) {
    %c0_i32 = arith.constant 0 : i32
    %c0_i32_0 = arith.constant 0 : i32
    %c0_i32_1 = arith.constant 0 : i32
    return %c0_i32, %c0_i32_0 : i32, i32
  }
  func.func @transform_6(%arg0: i32) -> (i32, i32) {
    %c0_i32 = arith.constant 0 : i32
    %c0_i32_0 = arith.constant 0 : i32
    %c0_i32_1 = arith.constant 0 : i32
    return %c0_i32, %c0_i32_0 : i32, i32
  }
  func.func @transform_7(%arg0: i32) -> (i32, i32) {
    %c0_i32 = arith.constant 0 : i32
    %c0_i32_0 = arith.constant 0 : i32
    %c0_i32_1 = arith.constant 0 : i32
    return %c0_i32, %c0_i32_0 : i32, i32
  }
  func.func @transform_8(%arg0: i32) -> (i32, i32) {
    %c0_i32 = arith.constant 0 : i32
    %c0_i32_0 = arith.constant 0 : i32
    %c0_i32_1 = arith.constant 0 : i32
    return %c0_i32, %c0_i32_0 : i32, i32
  }
  func.func @transform_9(%arg0: i32) -> (i32, i32, i32) {
    %c0_i32 = arith.constant 0 : i32
    %c0_i32_0 = arith.constant 0 : i32
    %c0_i32_1 = arith.constant 0 : i32
    %c0_i32_2 = arith.constant 0 : i32
    return %c0_i32, %c0_i32_0, %c0_i32_1 : i32, i32, i32
  }
  func.func @transform_10(%arg0: i32) -> (i32, i32) {
    %c0_i32 = arith.constant 0 : i32
    %c0_i32_0 = arith.constant 0 : i32
    %c0_i32_1 = arith.constant 0 : i32
    return %c0_i32, %c0_i32_0 : i32, i32
  }
  func.func @transform_11(%arg0: i32) -> (i32, i32, i32, i32) {
    %c0_i32 = arith.constant 0 : i32
    %c0_i32_0 = arith.constant 0 : i32
    %c0_i32_1 = arith.constant 0 : i32
    %c0_i32_2 = arith.constant 0 : i32
    return %arg0, %c0_i32, %c0_i32_0, %c0_i32_1 : i32, i32, i32, i32
  }
}

</mosaic_0001>

<bundles_post_ra>
// kernel: decoder_forward.1
= control target key start
LH: loop header
LB: loop body
LE: loop exit
PB: predicated region body
PF: predicated region fallthrough
CT: control target
= control target key end

     0   :  { %16 = vsyncpa [#allocation7], 0  ;;  %s12979_s0 = inlined_call_operand.hbm [shape: f32[2,8], index: 0, kind: input, shape index: {}]   ;;  %s12980_s1 = inlined_call_operand.hbm [shape: f32[8,1024], index: 1, kind: input, shape index: {}]   ;;  %s12981_s2 = inlined_call_operand.hbm [shape: f32[1,1024], index: 2, kind: input, shape index: {}]   ;;  %s12982_s3 = inlined_call_operand.hbm [shape: f32[256,2048], index: 3, kind: input, shape index: {}]   ;;  %s12983_s4 = inlined_call_operand.hbm [shape: f32[1,128], index: 4, kind: input, shape index: {}]   ;;  %s12984_s5 = inlined_call_operand.hbm [shape: f32[128,1024], index: 5, kind: input, shape index: {}]   ;;  %s12985_s6 = inlined_call_operand.hbm [shape: f32[1,64], index: 6, kind: input, shape index: {}]   ;;  %s12986_s7 = inlined_call_operand.hbm [shape: f32[64,512], index: 7, kind: input, shape index: {}]   ;;  %s12987_s8 = inlined_call_operand.hbm [shape: f32[1,32], index: 8, kind: input, shape index: {}]   ;;  %s12988_s9 = inlined_call_operand.vmem [shape: f32[9,32,3], index: 9, kind: input, shape index: {}]   ;;  %s12989_s10 = inlined_call_operand.hbm [shape: f32[1,3], index: 10, kind: input, shape index: {}]   ;;  %s12990_s11 = inlined_call_operand.vmem [shape: f32[2,16,16,3], index: 11, kind: output, shape index: {}]  }
   0x1   :  { %17 = vsyncpa [#allocation9], 0 }
   0x2   :  { %18 = vsyncpa [#allocation12], 0 }
   0x3   :  { %19 = vsyncpa [#allocation15], 0 }
   0x4   :  { %20 = vsyncpa [#allocation18], 0 }
   0x5   :  { %21 = vsyncpa [#allocation21], 0  ;;  %s10058_s17 = smov 0  }
   0x6 LB: > { %s313_s20 = sshll.u32 %s12980_s1, 4  ;;  %s10067_s21 = sadd.s32 4294967295, %s9976_s17   ;;  %s9976_s17 = sphi %s10058_s17, %s27_s17   ;;  %s314_s20 = int_to_ptr.hbm [resolvable:$true] %s313_s20 }
   0x7   : > { %p8717_p0 = scmp.ge.s32.totalorder %s9976_s17, 1  ;;  %p289_p1 = scmp.lt.s32.totalorder %s9976_s17, 3 }
   0x8   : > { %p9231_p2 = scmp.eq.s32.totalorder %s10067_s21, 0  ;;  %s9978_s23 = smov [#allocation8]  }
   0x9   : > { %p10072_p3 = pnand %p8717_p0, %p289_p1  ;;  %s315_s24 = sshll.u32 %s9978_s23, 4  ;;  %s316_s24 = int_to_ptr.vmem [resolvable:$true] %s315_s24 }
   0xa   : > { %s336_s27 = sshll.u32 %s12982_s3, 4  ;;  %s9979_s29 = smov [#allocation11]   ;;  %s337_s27 = int_to_ptr.hbm [resolvable:$true] %s336_s27 }
   0xb   : > { %p9200_p4 = pneg %p10072_p3  ;;  %s338_s30 = sshll.u32 %s9979_s29, 4  ;;  %s339_s30 = int_to_ptr.vmem [resolvable:$true] %s338_s30 }
   0xc   : > { %s362_s14 = sshll.u32 %s12984_s5, 4  ;;  %s9980_s15 = smov 2048   ;;  %s363_s14 = int_to_ptr.hbm [resolvable:$true] %s362_s14 }
   0xd   : > { %p10083_p5 = pnand %p9231_p2, %p9200_p4  ;;  %s9981_s16 = smov 128  }
   0xe   : > { %s9982_s18 = smov [#allocation14]   ;;  %s9983_s23 = smov 1024  }
   0xf   : > { %9206 = dma.hbm_to_vmem [thread:$0]  (!%p10083_p5), %s314_s20, 1024, %s316_s24, [#allocation9]  }
  0x10   : > { %9212 = dma.hbm_to_vmem [thread:$0]  (!%p10083_p5), %s337_s27, 65536, %s339_s30, [#allocation12], %s9980_s15, %s9980_s15, %s9981_s16  }
  0x11   : > { %s364_s19 = sshll.u32 %s9982_s18, 4  ;;  %s9984_s25 = smov 64   ;;  %s365_s19 = int_to_ptr.vmem [resolvable:$true] %s364_s19 }
  0x12   : > { %9218 = dma.hbm_to_vmem [thread:$0]  (!%p10083_p5), %s363_s14, 16384, %s365_s19, [#allocation15], %s9983_s23, %s9983_s23, %s9984_s25  }
  0x13   : > { %s388_s12 = sshll.u32 %s12986_s7, 4  ;;  %s9985_s20 = smov [#allocation17]   ;;  %s389_s12 = int_to_ptr.hbm [resolvable:$true] %s388_s12 }
  0x14   : > { %s390_s24 = sshll.u32 %s9985_s20, 4  ;;  %s301_s30 = sshll.u32 %s12979_s0, 4  ;;  %s391_s24 = int_to_ptr.vmem [resolvable:$true] %s390_s24  ;;  %s302_s30 = int_to_ptr.hbm [resolvable:$true] %s301_s30 }
  0x15   : > { %s9986_s15 = smov 512   ;;  %s9987_s16 = smov 32  }
  0x16   : > { %9224 = dma.hbm_to_vmem [thread:$0]  (!%p10083_p5), %s389_s12, 4096, %s391_s24, [#allocation18], %s9986_s15, %s9986_s15, %s9987_s16  }
  0x17   : > { %s9988_s14 = smov [#allocation6]   ;;  %s325_s25 = sshll.u32 %s12981_s2, 4  ;;  %s326_s25 = int_to_ptr.hbm [resolvable:$true] %s325_s25 }
  0x18   : > { %s303_s18 = sshll.u32 %s9988_s14, 4  ;;  %s351_s20 = sshll.u32 %s12983_s4, 4  ;;  %s304_s18 = int_to_ptr.vmem [resolvable:$true] %s303_s18  ;;  %s352_s20 = int_to_ptr.hbm [resolvable:$true] %s351_s20 }
  0x19   : > { %9203 = dma.hbm_to_vmem [thread:$0]  (!%p10083_p5), %s302_s30, 32, %s304_s18, [#allocation7]  }
  0x1a   : > { %s9989_s13 = smov [#allocation10]   ;;  %s9990_s12 = smov [#allocation13]  }
  0x1b   : > { %s327_s27 = sshll.u32 %s9989_s13, 4  ;;  %s353_s24 = sshll.u32 %s9990_s12, 4  ;;  %s328_s27 = int_to_ptr.vmem [resolvable:$true] %s327_s27  ;;  %s354_s24 = int_to_ptr.vmem [resolvable:$true] %s353_s24 }
  0x1c   : > { %9209 = dma.hbm_to_vmem [thread:$0]  (!%p10083_p5), %s326_s25, 128, %s328_s27, [#allocation9]  }
  0x1d   : > { %s377_s14 = sshll.u32 %s12985_s6, 4  ;;  %s403_s19 = sshll.u32 %s12987_s8, 4  ;;  %s378_s14 = int_to_ptr.hbm [resolvable:$true] %s377_s14  ;;  %s404_s19 = int_to_ptr.hbm [resolvable:$true] %s403_s19 }
  0x1e   : > { %9215 = dma.hbm_to_vmem [thread:$0]  (!%p10083_p5), %s352_s20, 16, %s354_s24, [#allocation12]  }
  0x1f   : > { %s9991_s23 = smov [#allocation16]   ;;  %s9992_s25 = smov [#allocation19]  }
  0x20   : > { %s379_s26 = sshll.u32 %s9991_s23, 4  ;;  %s405_s29 = sshll.u32 %s9992_s25, 4  ;;  %s380_s26 = int_to_ptr.vmem [resolvable:$true] %s379_s26  ;;  %s406_s29 = int_to_ptr.vmem [resolvable:$true] %s405_s29 }
  0x21   : > { %9221 = dma.hbm_to_vmem [thread:$0]  (!%p10083_p5), %s378_s14, 16, %s380_s26, [#allocation15]  }
  0x22   : > { %s418_s12 = sshll.u32 %s12989_s10, 4  ;;  %s9993_s20 = smov [#allocation20]   ;;  %s419_s12 = int_to_ptr.hbm [resolvable:$true] %s418_s12 }
  0x23   : > { %9227 = dma.hbm_to_vmem [thread:$0]  (!%p10083_p5), %s404_s19, 16, %s406_s29, [#allocation18]  }
  0x24   : > { %s420_s24 = sshll.u32 %s9993_s20, 4  ;;  %433 = sbr.rel (%p10072_p3) target bundleno = 2231 (0x8b7), region = 64  ;;  %s421_s24 = int_to_ptr.vmem [resolvable:$true] %s420_s24 }
  0x25   : > { %9230 = dma.hbm_to_vmem [thread:$0]  (!%p10083_p5), %s419_s12, 16, %s421_s24, [#allocation21]  }
  0x29   : > { %9951 = dma.done.wait (%p9231_p2), [#allocation7], 32  }
  0x2a   : > { %9953 = vsyncadd (%p9231_p2), [#allocation7], 4294967264 }
  0x2b   : > { %9955 = dma.done.wait (%p9231_p2), [#allocation9], 1152  }
  0x2c   : > { %9957 = vsyncadd (%p9231_p2), [#allocation9], 4294966144 }
  0x2d   : > { %9959 = dma.done.wait (%p9231_p2), [#allocation12], 65552  }
  0x2e   : > { %9961 = vsyncadd (%p9231_p2), [#allocation12], 4294901744 }
  0x2f   : > { %9963 = dma.done.wait (%p9231_p2), [#allocation15], 16400  }
  0x30   : > { %9965 = vsyncadd (%p9231_p2), [#allocation15], 4294950896 }
  0x31   : > { %9967 = dma.done.wait (%p9231_p2), [#allocation18], 4112  }
  0x32   : > { %9969 = vsyncadd (%p9231_p2), [#allocation18], 4294963184 }
  0x33   : > { %9971 = dma.done.wait (%p9231_p2), [#allocation21], 16  }
  0x34   : > { %9973 = vsyncadd (%p9231_p2), [#allocation21], 4294967280  ;;  %v632_v0 = vld [vmem:[#allocation8] sm:$0xff]  ;;  %v633_v1 = vld [vmem:[#allocation8 + $0x8] sm:$0xff]  ;;  %vm658_vm0 = vcmask 64512   ;;  %s9157_s22 = scalar_lea.vmem [#allocation6], %s9976_s17  ;;  %v522_v53 = vlaneseq }
  0x35   : > { %v634_v2 = vld [vmem:[#allocation8 + $0x10] sm:$0xff]  ;;  %677 = vmatpush.msra.mxu0 %v632_v0  ;;  %697 = vmatpush.msra.mxu1 %v633_v1  ;;  %v635_v3 = vld [vmem:[#allocation8 + $0x18] sm:$0xff]  ;;  %v636_v5 = vld [vmem:[#allocation8 + $0x20] sm:$0xff]  ;;  %v12991_v57 = vmov 0.0   ;;  %vm848_vm2 = vcmask 1040384   ;;  %vm851_vm3 = vcmask 1041408  }
  0x36   : > { %v9159_v4 = vld [vmem:[%s9157_s22 - $0x1] sm:$0x1]  ;;  %717 = vmatpush.msra.mxu2 %v634_v2  ;;  %737 = vmatpush.msra.mxu3 %v635_v3  ;;  %v637_v6 = vld [vmem:[#allocation8 + $0x28] sm:$0xff]  ;;  %v639_v8 = vld [vmem:[#allocation8 + $0x38] sm:$0xff]  ;;  %519 = vst [vmem:[#allocation2] sm:$0xff] %v12991_v57  ;;  %vm10168_vm1 = vcmp.lt.s32.totalorder %v522_v53, 256 }
  0x37   : > { %8742 = vmatmul.msk.f32.vlgmr.msra.gmra.mxu0 %vm658_vm0, %v9159_v4  ;;  %8743 = vmatmul.msk.f32.vlgmr.msra.gmra.mxu1 %vm658_vm0, %v9159_v4  ;;  %v638_v7 = vld [vmem:[#allocation8 + $0x30] sm:$0xff]  ;;  %v903_v9 = vld [vmem:[#allocation11 + $0x780] sm:$0xff]  ;;  %v1188_v44 = vld [vmem:[#allocation11 + $0xf98] sm:$0xff]  ;;  %521 = vst [vmem:[#allocation2 + $0x18] sm:$0xff] %v12991_v57  ;;  %vm854_vm4 = vcmask 1042432   ;;  %vm861_vm5 = vcmask 1043458  }
  0x38   : > { %8744 = vmatmul.msk.f32.vlgmr.msra.gmra.mxu2 %vm658_vm0, %v9159_v4  ;;  %8745 = vmatmul.msk.f32.vlgmr.msra.gmra.mxu3 %vm658_vm0, %v9159_v4  ;;  %v919_v10 = vld [vmem:[#allocation11 + $0xf80] sm:$0xff]  ;;  %v1024_v19 = vld [vmem:[#allocation11 + $0x788] sm:$0xff]  ;;  %v1187_v48 = vld [vmem:[#allocation11 + $0xf18] sm:$0xff]  ;;  %526 = vst.msk [vmem:[#allocation2] ss:$4 sm:$0x3] %vm10168_vm1, %v12991_v57 }
  0x39   : > { %757 = vmatpush.msrb.mxu0 %v636_v5  ;;  %777 = vmatpush.msrb.mxu1 %v637_v6  ;;  %v902_v11 = vld [vmem:[#allocation11 + $0x700] sm:$0xff]  ;;  %v1022_v22 = vld [vmem:[#allocation11 + $0x708] sm:$0xff]  ;;  %v1186_v52 = vld [vmem:[#allocation11 + $0xe98] sm:$0xff]  ;;  %532 = vst.msk [vmem:[#allocation2 + $0x18] ss:$4 sm:$0x3] %vm10168_vm1, %v12991_v57 }
  0x3a   : > { %797 = vmatpush.msrb.mxu2 %v638_v7  ;;  %817 = vmatpush.msrb.mxu3 %v639_v8  ;;  %v918_v12 = vld [vmem:[#allocation11 + $0xf00] sm:$0xff]  ;;  %v1020_v25 = vld [vmem:[#allocation11 + $0x688] sm:$0xff]  ;;  %v1185_v58 = vld [vmem:[#allocation11 + $0xe18] sm:$0xff]  ;;  %538 = vst.msk [vmem:[#allocation2 + $0x13] ss:$4 sm:$0x3] %vm10168_vm1, %v12991_v57 }
  0x3b   : > { %927 = vmatpush.msra.mxu0 %v903_v9  ;;  %947 = vmatpush.msra.mxu1 %v919_v10  ;;  %v901_v13 = vld [vmem:[#allocation11 + $0x680] sm:$0xff]  ;;  %v1018_v28 = vld [vmem:[#allocation11 + $0x608] sm:$0xff]  ;;  %v1025_v59 = vld [vmem:[#allocation11 + $0x790] sm:$0xff]  ;;  %540 = vst.msk [vmem:[#allocation2 + $0x1b] ss:$4 sm:$0x3] %vm10168_vm1, %v12991_v57 }
  0x3c   : > { %v917_v14 = vld [vmem:[#allocation11 + $0xe80] sm:$0xff]  ;;  %1065 = vmatpush.msra.mxu2 %v1024_v19  ;;  %v1016_v31 = vld [vmem:[#allocation11 + $0x588] sm:$0xff]  ;;  %1216 = vmatpush.msra.mxu3 %v1188_v44  ;;  %v1057_v60 = vld [vmem:[#allocation11 + $0xf90] sm:$0xff]  ;;  %528 = vst.msk [vmem:[#allocation2 + $0x8] ss:$4 sm:$0x3] %vm10168_vm1, %v12991_v57 }
  0x3d   : > { %928 = vmatpush.msra.mxu0 %v902_v11  ;;  %948 = vmatpush.msra.mxu1 %v918_v12  ;;  %v900_v15 = vld [vmem:[#allocation11 + $0x600] sm:$0xff]  ;;  %v1014_v34 = vld [vmem:[#allocation11 + $0x508] sm:$0xff]  ;;  %v1184_v63 = vld [vmem:[#allocation11 + $0xd98] sm:$0xff]  ;;  %530 = vst.msk [vmem:[#allocation2 + $0x10] ss:$4 sm:$0x3] %vm10168_vm1, %v12991_v57 }
  0x3e   : > { %v916_v16 = vld [vmem:[#allocation11 + $0xe00] sm:$0xff]  ;;  %1066 = vmatpush.msra.mxu2 %v1022_v22  ;;  %v1012_v37 = vld [vmem:[#allocation11 + $0x488] sm:$0xff]  ;;  %1217 = vmatpush.msra.mxu3 %v1187_v48  ;;  %v1023_v0 = vld [vmem:[#allocation11 + $0x710] sm:$0xff]  ;;  %534 = vst.msk [vmem:[#allocation2 + $0x3] ss:$4 sm:$0x3] %vm10168_vm1, %v12991_v57 }
  0x3f   : > { %8746 = vmatmul.msk.f32.vlgmr.msrb.gmra.mxu0 %vm658_vm0, %v9159_v4  ;;  %8747 = vmatmul.msk.f32.vlgmr.msrb.gmra.mxu1 %vm658_vm0, %v9159_v4  ;;  %v899_v17 = vld [vmem:[#allocation11 + $0x580] sm:$0xff]  ;;  %v1010_v40 = vld [vmem:[#allocation11 + $0x408] sm:$0xff]  ;;  %v1055_v1 = vld [vmem:[#allocation11 + $0xf10] sm:$0xff]  ;;  %536 = vst.msk [vmem:[#allocation2 + $0xb] ss:$4 sm:$0x3] %vm10168_vm1, %v12991_v57 }
  0x40   : > { %8748 = vmatmul.msk.f32.vlgmr.msrb.gmra.mxu2 %vm658_vm0, %v9159_v4  ;;  %8749 = vmatmul.msk.f32.vlgmr.msrb.gmra.mxu3 %vm658_vm0, %v9159_v4  ;;  %v915_v18 = vld [vmem:[#allocation11 + $0xd80] sm:$0xff]  ;;  %v1008_v43 = vld [vmem:[#allocation11 + $0x388] sm:$0xff]  ;;  %v1183_v3 = vld [vmem:[#allocation11 + $0xd18] sm:$0xff]  ;;  %541 = vst [vmem:[#allocation3] sm:$0x3f] %v12991_v57  ;;  %vm980_vm6 = vcmask 1042434  }
  0x41   : > { %929 = vmatpush.msra.mxu0 %v901_v13  ;;  %949 = vmatpush.msra.mxu1 %v917_v14  ;;  %v898_v20 = vld [vmem:[#allocation11 + $0x500] sm:$0xff]  ;;  %v1006_v47 = vld [vmem:[#allocation11 + $0x308] sm:$0xff]  ;;  %v1021_v4 = vld [vmem:[#allocation11 + $0x690] sm:$0xff]  ;;  %543 = vst [vmem:[#allocation3 + $0x28] sm:$0x3f] %v12991_v57  ;;  %vm982_vm8 = vcmask 1044484  }
  0x42   : > { %v914_v21 = vld [vmem:[#allocation11 + $0xd00] sm:$0xff]  ;;  %1067 = vmatpush.msra.mxu2 %v1020_v25  ;;  %v1004_v51 = vld [vmem:[#allocation11 + $0x288] sm:$0xff]  ;;  %1218 = vmatpush.msra.mxu3 %v1186_v52  ;;  %v1053_v5 = vld [vmem:[#allocation11 + $0xe90] sm:$0xff]  ;;  %545 = vst [vmem:[#allocation3 + $0x8] sm:$0x1] %v12991_v57  ;;  %vm984_vm10 = vcmask 1046534  }
  0x43   : > { %930 = vmatpush.msra.mxu0 %v900_v15  ;;  %950 = vmatpush.msra.mxu1 %v916_v16  ;;  %v897_v23 = vld [vmem:[#allocation11 + $0x480] sm:$0xff]  ;;  %v1002_v56 = vld [vmem:[#allocation11 + $0x208] sm:$0xff]  ;;  %v1182_v7 = vld [vmem:[#allocation11 + $0xc98] sm:$0xff]  ;;  %546 = vst [vmem:[#allocation3 + $0x10] sm:$0x1] %v12991_v57  ;;  %s9995_s28 = smov 64  }
  0x44   : > { %v913_v24 = vld [vmem:[#allocation11 + $0xc80] sm:$0xff]  ;;  %1068 = vmatpush.msra.mxu2 %v1018_v28  ;;  %1219 = vmatpush.msra.mxu3 %v1185_v58  ;;  %v1000_v62 = vld [vmem:[#allocation11 + $0x188] sm:$0xff]  ;;  %v1019_v8 = vld [vmem:[#allocation11 + $0x610] sm:$0xff]  ;;  %547 = vst [vmem:[#allocation3 + $0x18] sm:$0x1] %v12991_v57  ;;  %vm556_vm12 = vcmask 523264  }
  0x45   : > { %931 = vmatpush.msra.mxu0 %v899_v17  ;;  %951 = vmatpush.msra.mxu1 %v915_v18  ;;  %v896_v26 = vld [vmem:[#allocation11 + $0x400] sm:$0xff]  ;;  %v998_v2 = vld [vmem:[#allocation11 + $0x108] sm:$0xff]  ;;  %v1051_v9 = vld [vmem:[#allocation11 + $0xe10] sm:$0xff]  ;;  %548 = vst [vmem:[#allocation3 + $0x20] sm:$0x1] %v12991_v57  ;;  %s9996_s15 = smov 96  }
  0x46   : > { %v912_v27 = vld [vmem:[#allocation11 + $0xc00] sm:$0xff]  ;;  %1069 = vmatpush.msra.mxu2 %v1016_v31  ;;  %1220 = vmatpush.msra.mxu3 %v1184_v63  ;;  %v996_v6 = vld [vmem:[#allocation11 + $0x88] sm:$0xff]  ;;  %v1181_v11 = vld [vmem:[#allocation11 + $0xc18] sm:$0xff]  ;;  %551 = vst [vmem:[#allocation3 + $0xd] sm:$0x1] %v12991_v57  ;;  %s9997_s16 = smov 32  }
  0x47   : > { %932 = vmatpush.msra.mxu0 %v898_v20  ;;  %952 = vmatpush.msra.mxu1 %v914_v21  ;;  %v895_v29 = vld [vmem:[#allocation11 + $0x380] sm:$0xff]  ;;  %v994_v10 = vld [vmem:[#allocation11 + $0x8] sm:$0xff]  ;;  %v1017_v13 = vld [vmem:[#allocation11 + $0x590] sm:$0xff]  ;;  %552 = vst [vmem:[#allocation3 + $0x15] sm:$0x1] %v12991_v57  ;;  %vm563_vm13 = vcmask 516096  }
  0x48   : > { %v911_v30 = vld [vmem:[#allocation11 + $0xb80] sm:$0xff]  ;;  %1070 = vmatpush.msra.mxu2 %v1014_v34  ;;  %1221 = vmatpush.msra.mxu3 %v1183_v3  ;;  %v1056_v12 = vld [vmem:[#allocation11 + $0xf88] sm:$0xff]  ;;  %v1049_v14 = vld [vmem:[#allocation11 + $0xd90] sm:$0xff]  ;;  %553 = vst [vmem:[#allocation3 + $0x1d] sm:$0x1] %v12991_v57  ;;  %vm558_vm14 = vcmask 517120  }
  0x49   : > { %933 = vmatpush.msra.mxu0 %v897_v23  ;;  %953 = vmatpush.msra.mxu1 %v913_v24  ;;  %v894_v32 = vld [vmem:[#allocation11 + $0x300] sm:$0xff]  ;;  %v10193_v15 = vld [vmem:[#allocation10] sm:$0xff]  ;;  %v1054_v19 = vld [vmem:[#allocation11 + $0xf08] sm:$0xff]  ;;  %554 = vst [vmem:[#allocation3 + $0x25] sm:$0x1] %v12991_v57  ;;  %vm584_vm15 = vcmask 261120  }
  0x4a   : > { %v910_v33 = vld [vmem:[#allocation11 + $0xb00] sm:$0xff]  ;;  %1071 = vmatpush.msra.mxu2 %v1012_v37  ;;  %1222 = vmatpush.msra.mxu3 %v1182_v7  ;;  %v1180_v18 = vld [vmem:[#allocation11 + $0xb98] sm:$0xff]  ;;  %v1015_v20 = vld [vmem:[#allocation11 + $0x510] sm:$0xff]  ;;  %v644_v25 = vperm.slane %v10193_v15, 2  ;;  %v646_v37 = vperm.slane %v10193_v15, 4  ;;  %v649_v61 = vperm.slane %v10193_v15, 7 }
  0x4b   : > { %934 = vmatpush.msra.mxu0 %v896_v26  ;;  %954 = vmatpush.msra.mxu1 %v912_v27  ;;  %v893_v35 = vld [vmem:[#allocation11 + $0x280] sm:$0xff]  ;;  %v1047_v21 = vld [vmem:[#allocation11 + $0xd10] sm:$0xff]  ;;  %v1179_v22 = vld [vmem:[#allocation11 + $0xb18] sm:$0xff]  ;;  %v645_v26 = vperm.slane %v10193_v15, 3  ;;  %544 = vst [vmem:[#allocation3] sm:$0x1] %v12991_v57 }
  0x4c   : > { %v909_v36 = vld [vmem:[#allocation11 + $0xa80] sm:$0xff]  ;;  %1072 = vmatpush.msra.mxu2 %v1010_v40  ;;  %1223 = vmatpush.msra.mxu3 %v1181_v11  ;;  %v1052_v23 = vld [vmem:[#allocation11 + $0xe88] sm:$0xff]  ;;  %v1013_v24 = vld [vmem:[#allocation11 + $0x490] sm:$0xff]  ;;  %549 = vst [vmem:[#allocation3 + $0x28] sm:$0x1] %v12991_v57  ;;  %vm593_vm0 = vcmask 253952  }
  0x4d   : > { %935 = vmatpush.msra.mxu0 %v895_v29  ;;  %955 = vmatpush.msra.mxu1 %v911_v30  ;;  %v892_v38 = vld [vmem:[#allocation11 + $0x200] sm:$0xff]  ;;  %v1045_v27 = vld [vmem:[#allocation11 + $0xc90] sm:$0xff]  ;;  %v1178_v28 = vld [vmem:[#allocation11 + $0xa98] sm:$0xff]  ;;  %v647_v29 = vperm.slane %v10193_v15, 5  ;;  %550 = vst [vmem:[#allocation3 + $0x5] sm:$0x1] %v12991_v57 }
  0x4e   : > { %v908_v39 = vld [vmem:[#allocation11 + $0xa00] sm:$0xff]  ;;  %1073 = vmatpush.msra.mxu2 %v1008_v43  ;;  %1224 = vmatpush.msra.mxu3 %v1180_v18  ;;  %v1050_v30 = vld [vmem:[#allocation11 + $0xe08] sm:$0xff]  ;;  %v1011_v31 = vld [vmem:[#allocation11 + $0x410] sm:$0xff]  ;;  %555 = vst [vmem:[#allocation3 + $0x2d] sm:$0x1] %v12991_v57  ;;  %vm587_vm1 = vcmask 254976  }
  0x4f   : > { %936 = vmatpush.msra.mxu0 %v894_v32  ;;  %956 = vmatpush.msra.mxu1 %v910_v33  ;;  %v891_v41 = vld [vmem:[#allocation11 + $0x180] sm:$0xff]  ;;  %v1043_v32 = vld [vmem:[#allocation11 + $0xc10] sm:$0xff]  ;;  %v642_v33 = vperm.slane %v10193_v15, 0  ;;  %v1177_v34 = vld [vmem:[#allocation11 + $0xa18] sm:$0xff]  ;;  %557 = vst.msk [vmem:[#allocation4] sm:$0xff] %vm556_vm12, %v12991_v57  ;;  %p514_p6 = scmp.lt.s32.totalorder %s10067_s21, 1 }
  0x50   : > { %v907_v42 = vld [vmem:[#allocation11 + $0x980] sm:$0xff]  ;;  %1074 = vmatpush.msra.mxu2 %v1006_v47  ;;  %1225 = vmatpush.msra.mxu3 %v1179_v22  ;;  %v1041_v40 = vld [vmem:[#allocation11 + $0xb90] sm:$0xff]  ;;  %v1046_v48 = vld [vmem:[#allocation11 + $0xd08] sm:$0xff]  ;;  %561 = vst.msk [vmem:[#allocation4 + $0x90] sm:$0xff] %vm556_vm12, %v12991_v57 }
  0x51   : > { %937 = vmatpush.msra.mxu0 %v893_v35  ;;  %957 = vmatpush.msra.mxu1 %v909_v36  ;;  %v890_v45 = vld [vmem:[#allocation11 + $0x100] sm:$0xff]  ;;  %v1175_v52 = vld [vmem:[#allocation11 + $0x918] sm:$0xff]  ;;  %v1005_v58 = vld [vmem:[#allocation11 + $0x290] sm:$0xff]  ;;  %564 = vst.msk [vmem:[#allocation4] sm:$0x1] %vm563_vm13, %v12991_v57  ;;  %s13074_s21 = smov (!%p514_p6, %s10067_s21), 1 }
  0x52   : > { %v906_v46 = vld [vmem:[#allocation11 + $0x900] sm:$0xff]  ;;  %1075 = vmatpush.msra.mxu2 %v1004_v51  ;;  %1226 = vmatpush.msra.mxu3 %v1178_v28  ;;  %v1174_v63 = vld [vmem:[#allocation11 + $0x898] sm:$0xff]  ;;  %v1001_v11 = vld [vmem:[#allocation11 + $0x190] sm:$0xff]  ;;  %565 = vst.msk [vmem:[#allocation4 + $0x10] sm:$0x1] %vm563_vm13, %v12991_v57  ;;  %s9156_s29 = sshll.u32 %s13074_s21, 8 }
  0x53   : > { %938 = vmatpush.msra.mxu0 %v892_v38  ;;  %958 = vmatpush.msra.mxu1 %v908_v39  ;;  %v889_v49 = vld [vmem:[#allocation11 + $0x80] sm:$0xff]  ;;  %v1048_v38 = vld [vmem:[#allocation11 + $0xd88] sm:$0xff]  ;;  %v1009_v39 = vld [vmem:[#allocation11 + $0x390] sm:$0xff]  ;;  %566 = vst.msk [vmem:[#allocation4 + $0x20] sm:$0x1] %vm563_vm13, %v12991_v57  ;;  %s12850_s12 = scalar_lea.vmem %s12990_s11, %s9156_s29 }
  0x54   : > { %v905_v50 = vld [vmem:[#allocation11 + $0x880] sm:$0xff]  ;;  %1076 = vmatpush.msra.mxu2 %v1002_v56  ;;  %1227 = vmatpush.msra.mxu3 %v1177_v34  ;;  %v1044_v56 = vld [vmem:[#allocation11 + $0xc88] sm:$0xff]  ;;  %vm981_vm7 = vmor %vm848_vm2, %vm980_vm6  ;;  %567 = vst.msk [vmem:[#allocation4 + $0x30] sm:$0x1] %vm563_vm13, %v12991_v57 }
  0x55   : > { %939 = vmatpush.msra.mxu0 %v891_v41  ;;  %959 = vmatpush.msra.mxu1 %v907_v42  ;;  %v888_v54 = vld [vmem:[#allocation11] sm:$0xff]  ;;  %v643_v41 = vperm.slane %v10193_v15, 1  ;;  %v1036_v28 = vld [vmem:[#allocation11 + $0xa88] sm:$0xff]  ;;  %vm983_vm9 = vmor %vm981_vm7, %vm982_vm8  ;;  %568 = vst.msk [vmem:[#allocation4 + $0x40] sm:$0x1] %vm563_vm13, %v12991_v57 }
  0x56   : > { %v904_v55 = vld [vmem:[#allocation11 + $0x800] sm:$0xff]  ;;  %1077 = vmatpush.msra.mxu2 %v1000_v62  ;;  %v1037_v62 = vld [vmem:[#allocation11 + $0xa90] sm:$0xff]  ;;  %v1304_v34 = vld [vmem:[#allocation11 + $0xea8] sm:$0xff]  ;;  %569 = vst.msk [vmem:[#allocation4 + $0x50] sm:$0x1] %vm563_vm13, %v12991_v57 }
  0x57   : > { %940 = vmatpush.msra.mxu0 %v890_v45  ;;  %960 = vmatpush.msra.mxu1 %v906_v46  ;;  %v1176_v46 = vld [vmem:[#allocation11 + $0x998] sm:$0xff]  ;;  %vm10240_vm11 = vmor %vm983_vm9, %vm984_vm10  ;;  %570 = vst.msk [vmem:[#allocation4 + $0x60] sm:$0x1] %vm563_vm13, %v12991_v57 }
  0x58   : > { %1078 = vmatpush.msra.mxu2 %v998_v2  ;;  %1228 = vmatpush.msra.mxu3 %v1176_v46  ;;  %v1003_v2 = vld [vmem:[#allocation11 + $0x210] sm:$0xff]  ;;  %571 = vst.msk [vmem:[#allocation4 + $0x70] sm:$0x1] %vm563_vm13, %v12991_v57 }
  0x59   : > { %941 = vmatpush.msra.mxu0 %v889_v49  ;;  %961 = vmatpush.msra.mxu1 %v905_v50  ;;  %v1007_v49 = vld [vmem:[#allocation11 + $0x310] sm:$0xff]  ;;  %572 = vst.msk [vmem:[#allocation4 + $0x80] sm:$0x1] %vm563_vm13, %v12991_v57 }
  0x5a   : > { %1079 = vmatpush.msra.mxu2 %v996_v6  ;;  %v1039_v50 = vld [vmem:[#allocation11 + $0xb10] sm:$0xff]  ;;  %1229 = vmatpush.msra.mxu3 %v1175_v52  ;;  %v1300_v52 = vld [vmem:[#allocation11 + $0xda8] sm:$0xff]  ;;  %573 = vst.msk [vmem:[#allocation4 + $0x90] sm:$0x1] %vm563_vm13, %v12991_v57 }
  0x5b   : > { %942 = vmatpush.msra.mxu0 %v888_v54  ;;  %962 = vmatpush.msra.mxu1 %v904_v55  ;;  %v648_v55 = vperm.slane %v10193_v15, 6  ;;  %575 = vst.msk [vmem:[#allocation4 + $0x19] sm:$0x1] %vm563_vm13, %v12991_v57 }
  0x5c   : > { %1080 = vmatpush.msra.mxu2 %v994_v10  ;;  %1230 = vmatpush.msra.mxu3 %v1174_v63  ;;  %v1040_v10 = vld [vmem:[#allocation11 + $0xb88] sm:$0xff]  ;;  %576 = vst.msk [vmem:[#allocation4 + $0x29] sm:$0x1] %vm563_vm13, %v12991_v57 }
  0x5d   : > { %1105 = vmatpush.msrb.mxu0 %v1025_v59  ;;  %1125 = vmatpush.msrb.mxu1 %v1057_v60  ;;  %577 = vst.msk [vmem:[#allocation4 + $0x39] sm:$0x1] %vm563_vm13, %v12991_v57 }
  0x5e   : > { %1085 = vmatpush.msrb.mxu2 %v1056_v12  ;;  %v1033_v12 = vld [vmem:[#allocation11 + $0x990] sm:$0xff]  ;;  %578 = vst.msk [vmem:[#allocation4 + $0x49] sm:$0x1] %vm563_vm13, %v12991_v57 }
  0x5f   : > { %1106 = vmatpush.msrb.mxu0 %v1023_v0  ;;  %1126 = vmatpush.msrb.mxu1 %v1055_v1  ;;  %v1042_v1 = vld [vmem:[#allocation11 + $0xc08] sm:$0xff]  ;;  %579 = vst.msk [vmem:[#allocation4 + $0x59] sm:$0x1] %vm563_vm13, %v12991_v57 }
  0x60   : > { %1086 = vmatpush.msrb.mxu2 %v1054_v19  ;;  %v1038_v19 = vld [vmem:[#allocation11 + $0xb08] sm:$0xff]  ;;  %580 = vst.msk [vmem:[#allocation4 + $0x69] sm:$0x1] %vm563_vm13, %v12991_v57 }
  0x61   : > { %1107 = vmatpush.msrb.mxu0 %v1021_v4  ;;  %1127 = vmatpush.msrb.mxu1 %v1053_v5  ;;  %v1035_v4 = vld [vmem:[#allocation11 + $0xa10] sm:$0xff]  ;;  %v1173_v5 = vld [vmem:[#allocation11 + $0x818] sm:$0xff]  ;;  %581 = vst.msk [vmem:[#allocation4 + $0x79] sm:$0x1] %vm563_vm13, %v12991_v57 }
  0x62   : > { %1087 = vmatpush.msrb.mxu2 %v1052_v23  ;;  %1231 = vmatpush.msra.mxu3 %v1173_v5  ;;  %v1970_v23 = vld [vmem:[#allocation2 + $0x18] sm:$0x66]  ;;  %582 = vst.msk [vmem:[#allocation4 + $0x89] sm:$0x1] %vm563_vm13, %v12991_v57 }
  0x63   : > { %1108 = vmatpush.msrb.mxu0 %v1019_v8  ;;  %1128 = vmatpush.msrb.mxu1 %v1051_v9  ;;  %v1292_v5 = vld [vmem:[#allocation11 + $0xba8] sm:$0xff]  ;;  %559 = vst.msk [vmem:[#allocation4 + $0x8] sm:$0x3] %vm558_vm14, %v12991_v57 }
  0x64   : > { %1088 = vmatpush.msrb.mxu2 %v1050_v30  ;;  %562 = vst.msk [vmem:[#allocation4 + $0x98] sm:$0x3] %vm558_vm14, %v12991_v57 }
  0x65   : > { %1109 = vmatpush.msrb.mxu0 %v1017_v13  ;;  %1129 = vmatpush.msrb.mxu1 %v1049_v14  ;;  %574 = vst.msk [vmem:[#allocation4 + $0x9] sm:$0x1] %vm563_vm13, %v12991_v57 }
  0x66   : > { %1089 = vmatpush.msrb.mxu2 %v1048_v38  ;;  %v1027_v38 = vld [vmem:[#allocation11 + $0x810] sm:$0xff]  ;;  %583 = vst.msk [vmem:[#allocation4 + $0x99] sm:$0x1] %vm563_vm13, %v12991_v57 }
  0x67   : > { %1110 = vmatpush.msrb.mxu0 %v1015_v20  ;;  %1130 = vmatpush.msrb.mxu1 %v1047_v21  ;;  %585 = vst.msk [vmem:[#allocation5] sm:$0xff] %vm584_vm15, %v12991_v57 }
  0x68   : > { %1090 = vmatpush.msrb.mxu2 %v1046_v48  ;;  %594 = vst.msk [vmem:[#allocation5] sm:$0x1] %vm593_vm0, %v12991_v57 }
  0x69   : > { %1111 = vmatpush.msrb.mxu0 %v1013_v24  ;;  %1131 = vmatpush.msrb.mxu1 %v1045_v27  ;;  %v999_v24 = vld [vmem:[#allocation11 + $0x110] sm:$0xff]  ;;  %v1306_v27 = vld [vmem:[#allocation11 + $0xf28] sm:$0xff]  ;;  %586 = vst.msk [vmem:[#allocation5 + $0x8] sm:$0xff] %vm584_vm15, %v12991_v57 }
  0x6a   : > { %1091 = vmatpush.msrb.mxu2 %v1044_v56  ;;  %v1298_v56 = vld [vmem:[#allocation11 + $0xd28] sm:$0xff]  ;;  %590 = vst.msk [vmem:[#allocation5 + $0x198] sm:$0xff] %vm584_vm15, %v12991_v57 }
  0x6b   : > { %1112 = vmatpush.msrb.mxu0 %v1011_v31  ;;  %1132 = vmatpush.msrb.mxu1 %v1043_v32  ;;  %591 = vst.msk [vmem:[#allocation5 + $0x1a0] sm:$0xff] %vm584_vm15, %v12991_v57 }
  0x6c   : > { %1092 = vmatpush.msrb.mxu2 %v1042_v1  ;;  %v1294_v1 = vld [vmem:[#allocation11 + $0xc28] sm:$0xff]  ;;  %595 = vst.msk [vmem:[#allocation5 + $0x18] sm:$0x1] %vm593_vm0, %v12991_v57 }
  0x6d   : > { %1113 = vmatpush.msrb.mxu0 %v1009_v39  ;;  %1133 = vmatpush.msrb.mxu1 %v1041_v40  ;;  %v1302_v39 = vld [vmem:[#allocation11 + $0xe28] sm:$0xff]  ;;  %596 = vst.msk [vmem:[#allocation5 + $0x30] sm:$0x1] %vm593_vm0, %v12991_v57 }
  0x6e   : > { %1093 = vmatpush.msrb.mxu2 %v1040_v10  ;;  %597 = vst.msk [vmem:[#allocation5 + $0x48] sm:$0x1] %vm593_vm0, %v12991_v57 }
  0x6f   : > { %1114 = vmatpush.msrb.mxu0 %v1007_v49  ;;  %1134 = vmatpush.msrb.mxu1 %v1039_v50  ;;  %v880_v50 = vld [vmem:[#allocation2] sm:$0x33]  ;;  %598 = vst.msk [vmem:[#allocation5 + $0x60] sm:$0x1] %vm593_vm0, %v12991_v57 }
  0x70   : > { %1094 = vmatpush.msrb.mxu2 %v1038_v19  ;;  %599 = vst.msk [vmem:[#allocation5 + $0x78] sm:$0x1] %vm593_vm0, %v12991_v57 }
  0x71   : > { %1115 = vmatpush.msrb.mxu0 %v1005_v58  ;;  %1135 = vmatpush.msrb.mxu1 %v1037_v62  ;;  %v884_v58 = vrot.slane %v880_v50, 2  ;;  %600 = vst.msk [vmem:[#allocation5 + $0x90] sm:$0x1] %vm593_vm0, %v12991_v57 }
  0x72   : > { %1095 = vmatpush.msrb.mxu2 %v1036_v28  ;;  %601 = vst.msk [vmem:[#allocation5 + $0xa8] sm:$0x1] %vm593_vm0, %v12991_v57 }
  0x73   : > { %1116 = vmatpush.msrb.mxu0 %v1003_v2  ;;  %1136 = vmatpush.msrb.mxu1 %v1035_v4  ;;  %602 = vst.msk [vmem:[#allocation5 + $0xc0] sm:$0x1] %vm593_vm0, %v12991_v57 }
  0x74   : > { %603 = vst.msk [vmem:[#allocation5 + $0xd8] sm:$0x1] %vm593_vm0, %v12991_v57 }
  0x75   : > { %1117 = vmatpush.msrb.mxu0 %v1001_v11  ;;  %1137 = vmatpush.msrb.mxu1 %v1033_v12  ;;  %v1286_v11 = vld [vmem:[#allocation11 + $0xa28] sm:$0xff]  ;;  %604 = vst.msk [vmem:[#allocation5 + $0xf0] sm:$0x1] %vm593_vm0, %v12991_v57 }
  0x76   : > { %605 = vst.msk [vmem:[#allocation5 + $0x108] sm:$0x1] %vm593_vm0, %v12991_v57 }
  0x77   : > { %1118 = vmatpush.msrb.mxu0 %v999_v24  ;;  %606 = vst.msk [vmem:[#allocation5 + $0x120] sm:$0x1] %vm593_vm0, %v12991_v57 }
  0x78   : > { %607 = vst.msk [vmem:[#allocation5 + $0x138] sm:$0x1] %vm593_vm0, %v12991_v57 }
  0x79   : > { %608 = vst.msk [vmem:[#allocation5 + $0x150] sm:$0x1] %vm593_vm0, %v12991_v57 }
  0x7a   : > { %609 = vst.msk [vmem:[#allocation5 + $0x168] sm:$0x1] %vm593_vm0, %v12991_v57 }
  0x7b   : > { %610 = vst.msk [vmem:[#allocation5 + $0x180] sm:$0x1] %vm593_vm0, %v12991_v57 }
  0x7c   : > { %613 = vst.msk [vmem:[#allocation5 + $0x29] sm:$0x1] %vm593_vm0, %v12991_v57 }
  0x7d   : > { %614 = vst.msk [vmem:[#allocation5 + $0x41] sm:$0x1] %vm593_vm0, %v12991_v57 }
  0x7e   : > { %615 = vst.msk [vmem:[#allocation5 + $0x59] sm:$0x1] %vm593_vm0, %v12991_v57 }
  0x7f   : > { %616 = vst.msk [vmem:[#allocation5 + $0x71] sm:$0x1] %vm593_vm0, %v12991_v57 }
  0x80   : > { %617 = vst.msk [vmem:[#allocation5 + $0x89] sm:$0x1] %vm593_vm0, %v12991_v57 }
  0x81   : > { %618 = vst.msk [vmem:[#allocation5 + $0xa1] sm:$0x1] %vm593_vm0, %v12991_v57 }
  0x82   : > { %619 = vst.msk [vmem:[#allocation5 + $0xb9] sm:$0x1] %vm593_vm0, %v12991_v57 }
  0x83   : > { %620 = vst.msk [vmem:[#allocation5 + $0xd1] sm:$0x1] %vm593_vm0, %v12991_v57 }
  0x84   : > { %621 = vst.msk [vmem:[#allocation5 + $0xe9] sm:$0x1] %vm593_vm0, %v12991_v57 }
  0xb4   : > { %v10195_v16 = vpop.f32.mrf.mxu0  ;;  %v10197_v17 = vpop.f32.mrf.mxu1 }
  0xb5   : > { %v10219_v53 = vadd.f32 %v10195_v16, %v642_v33  ;;  %v700_v59 = vadd.f32 %v10197_v17, %v643_v41  ;;  %v1308_v17 = vld [vmem:[#allocation11 + $0xfa8] sm:$0xff]  ;;  %v1029_v33 = vld [vmem:[#allocation11 + $0x890] sm:$0xff]  ;;  %v1974_v41 = vrot.slane %v1970_v23, 2 }
  0xb6   : > { %1376 = vmatpush.msrb.mxu3 %v1308_v17 }
  0xb7   : > { %v822_v6 = vmax.f32 %v10219_v53, 0.0  ;;  %v823_v13 = vmax.f32 %v700_v59, 0.0  ;;  %v1978_v48 = vsel %vm851_vm3, %v1970_v23, %v1974_v41  ;;  %v1979_v49 = vsel %vm861_vm5, %v1970_v23, %v1974_v41  ;;  %v1028_v59 = vld [vmem:[#allocation11 + $0x888] sm:$0xff] }
  0xb8   : > { %1377 = vmatpush.msrb.mxu3 %v1306_v27  ;;  %v8760_v53 = vrot.slane %v1978_v48, 9  ;;  %v1301_v48 = vld [vmem:[#allocation11 + $0xe20] sm:$0xff] }
  0xba   : > { %1378 = vmatpush.msrb.mxu3 %v1304_v34 }
  0xbb   : > { %v719_v35 = vpop.f32.mrf.mxu2  ;;  %v739_v36 = vpop.f32.mrf.mxu3 }
  0xbc   : > { %v720_v42 = vadd.f32 %v719_v35, %v644_v25  ;;  %v740_v43 = vadd.f32 %v739_v36, %v645_v26  ;;  %v759_v44 = vpop.f32.mrf.mxu0  ;;  %v779_v45 = vpop.f32.mrf.mxu1  ;;  %v1031_v25 = vld [vmem:[#allocation11 + $0x910] sm:$0xff]  ;;  %v1034_v35 = vld [vmem:[#allocation11 + $0xa08] sm:$0xff]  ;;  %1379 = vmatpush.msrb.mxu3 %v1302_v39 }
  0xbd   : > { %v780_v47 = vadd.f32 %v779_v45, %v647_v29  ;;  %v760_v54 = vadd.f32 %v759_v44, %v646_v37  ;;  %v997_v29 = vld [vmem:[#allocation11 + $0x90] sm:$0xff]  ;;  %1138 = vmatpush.msrb.mxu1 %v1031_v25  ;;  %1096 = vmatpush.msrb.mxu2 %v1034_v35 }
  0xbe   : > { %v825_v51 = vmax.f32 %v740_v43, 0.0  ;;  %v824_v60 = vmax.f32 %v720_v42, 0.0  ;;  %1119 = vmatpush.msrb.mxu0 %v997_v29  ;;  %v995_v37 = vld [vmem:[#allocation11 + $0x10] sm:$0xff]  ;;  %1380 = vmatpush.msrb.mxu3 %v1300_v52  ;;  %v1299_v52 = vld [vmem:[#allocation11 + $0xda0] sm:$0xff] }
  0xbf   : > { %v827_v0 = vmax.f32 %v780_v47, 0.0  ;;  %v826_v7 = vmax.f32 %v760_v54, 0.0  ;;  %1139 = vmatpush.msrb.mxu1 %v1029_v33  ;;  %v8761_v54 = vrot.slane %v1979_v49, 9  ;;  %v1147_v49 = vld [vmem:[#allocation2] sm:$0xcc] }
  0xc0   : > { %v833_v3 = vrot.slane %v825_v51, 7  ;;  %v832_v14 = vrot.slane %v824_v60, 7  ;;  %1120 = vmatpush.msrb.mxu0 %v995_v37  ;;  %v1032_v51 = vld [vmem:[#allocation11 + $0x988] sm:$0xff]  ;;  %1381 = vmatpush.msrb.mxu3 %v1298_v56  ;;  %v1275_v37 = vld [vmem:[#allocation11 + $0x7a0] sm:$0xff] }
  0xc1   : > { %v839_v18 = vrot.slane %v827_v0, 6  ;;  %v838_v26 = vrot.slane %v826_v7, 6  ;;  %1140 = vmatpush.msrb.mxu1 %v1027_v38  ;;  %1097 = vmatpush.msrb.mxu2 %v1032_v51  ;;  %v1296_v60 = vld [vmem:[#allocation11 + $0xca8] sm:$0xff]  ;;  %v10246_v63 = vsel %vm10240_vm11, %v8760_v53, %v8761_v54  ;;  %v1307_v38 = vld [vmem:[#allocation11 + $0xfa0] sm:$0xff] }
  0xc2   : > { %v850_v20 = vsel %vm848_vm2, %v823_v13, %v833_v3  ;;  %v849_v30 = vsel %vm848_vm2, %v822_v6, %v832_v14  ;;  %1382 = vmatpush.msrb.mxu3 %v1296_v60  ;;  %v1026_v0 = vld [vmem:[#allocation11 + $0x808] sm:$0xff]  ;;  %v886_v3 = vsel %vm851_vm3, %v880_v50, %v884_v58  ;;  %v1172_v50 = vld [vmem:[#allocation11 + $0x798] sm:$0xff]  ;;  %v1267_v51 = vld [vmem:[#allocation11 + $0x5a0] sm:$0xff] }
  0xc3   : > { %v799_v8 = vpop.f32.mrf.mxu2  ;;  %v819_v9 = vpop.f32.mrf.mxu3  ;;  %v853_v36 = vsel %vm851_vm3, %v850_v20, %v839_v18  ;;  %v852_v42 = vsel %vm851_vm3, %v849_v30, %v838_v26  ;;  %v1290_v7 = vld [vmem:[#allocation11 + $0xb28] sm:$0xff]  ;;  %v1265_v56 = vld [vmem:[#allocation11 + $0x520] sm:$0xff] }
  0xc4   : > { %v800_v15 = vadd.f32 %v799_v8, %v648_v55  ;;  %v820_v16 = vadd.f32 %v819_v9, %v649_v61  ;;  %v1030_v55 = vld [vmem:[#allocation11 + $0x908] sm:$0xff]  ;;  %1383 = vmatpush.msrb.mxu3 %v1294_v1  ;;  %v968_v8 = vld [vmem:[#allocation2] sm:$0x66]  ;;  %v1297_v58 = vld [vmem:[#allocation11 + $0xd20] sm:$0xff] }
  0xc5   : > { %1098 = vmatpush.msrb.mxu2 %v1030_v55  ;;  %v1288_v9 = vld [vmem:[#allocation11 + $0xaa8] sm:$0xff]  ;;  %v972_v10 = vrot.slane %v968_v8, 2  ;;  %v1171_v55 = vld [vmem:[#allocation11 + $0x718] sm:$0xff]  ;;  %v1263_v60 = vld [vmem:[#allocation11 + $0x4a0] sm:$0xff] }
  0xc6   : > { %v828_v21 = vmax.f32 %v800_v15, 0.0  ;;  %v829_v22 = vmax.f32 %v820_v16, 0.0  ;;  %1384 = vmatpush.msrb.mxu3 %v1292_v5  ;;  %v1284_v15 = vld [vmem:[#allocation11 + $0x9a8] sm:$0xff]  ;;  %v1261_v1 = vld [vmem:[#allocation11 + $0x420] sm:$0xff]  ;;  %v1534_v61 = vld [vmem:[#allocation11 + $0xeb0] sm:$0xff] }
  0xc7   : > { %1099 = vmatpush.msrb.mxu2 %v1028_v59  ;;  %v974_v18 = vsel %vm851_vm3, %v968_v8, %v972_v10  ;;  %v975_v20 = vsel %vm861_vm5, %v968_v8, %v972_v10  ;;  %v1280_v26 = vld [vmem:[#allocation11 + $0x8a8] sm:$0xff]  ;;  %v1170_v59 = vld [vmem:[#allocation11 + $0x698] sm:$0xff]  ;;  %v1259_v5 = vld [vmem:[#allocation11 + $0x3a0] sm:$0xff] }
  0xc8   : > { %v844_v31 = vrot.slane %v828_v21, 5  ;;  %v845_v32 = vrot.slane %v829_v22, 5  ;;  %1385 = vmatpush.msrb.mxu3 %v1290_v7  ;;  %v1282_v22 = vld [vmem:[#allocation11 + $0x928] sm:$0xff]  ;;  %v8750_v25 = vrot.slane %v974_v18, 9  ;;  %v8751_v30 = vrot.slane %v975_v20, 9  ;;  %v1291_v7 = vld [vmem:[#allocation11 + $0xba0] sm:$0xff] }
  0xc9   : > { %1100 = vmatpush.msrb.mxu2 %v1026_v0  ;;  %v1169_v0 = vld [vmem:[#allocation11 + $0x618] sm:$0xff]  ;;  %v1253_v20 = vld [vmem:[#allocation11 + $0x220] sm:$0xff] }
  0xca   : > { %v856_v40 = vsel %vm854_vm4, %v853_v36, %v845_v32  ;;  %v855_v44 = vsel %vm854_vm4, %v852_v42, %v844_v31  ;;  %1386 = vmatpush.msrb.mxu3 %v1288_v9  ;;  %v1278_v32 = vld [vmem:[#allocation11 + $0x828] sm:$0xff]  ;;  %v989_v36 = vsel %vm10240_vm11, %v8750_v25, %v8751_v30  ;;  %v1273_v42 = vld [vmem:[#allocation11 + $0x720] sm:$0xff]  ;;  %v1167_v8 = vld [vmem:[#allocation11 + $0x518] sm:$0xff] }
  0xcb   : > { %v859_v43 = vrot.slane %v856_v40, 6  ;;  %v1257_v9 = vld [vmem:[#allocation11 + $0x320] sm:$0xff] }
  0xcc   : > { %1387 = vmatpush.msrb.mxu3 %v1286_v11  ;;  %v1289_v11 = vld [vmem:[#allocation11 + $0xb20] sm:$0xff] }
  0xcd   : > { %v860_v45 = vsel %vm851_vm3, %v855_v44, %v859_v43  ;;  %v862_v46 = vsel %vm861_vm5, %v855_v44, %v859_v43  ;;  %v1305_v43 = vld [vmem:[#allocation11 + $0xf20] sm:$0xff] }
  0xce   : > { %v863_v47 = vrot.slane %v862_v46, 2  ;;  %864 = vst [vmem:[#allocation1] ss:$2 sm:$0xff] %v860_v45  ;;  %1388 = vmatpush.msrb.mxu3 %v1284_v15  ;;  %v1271_v45 = vld [vmem:[#allocation11 + $0x6a0] sm:$0xff] }
  0xcf   : > { %v1303_v46 = vld [vmem:[#allocation11 + $0xea0] sm:$0xff] }
  0xd0   : > { %867 = vst [vmem:[#allocation1 + $0x10] ss:$2 sm:$0xff] %v863_v47  ;;  %1389 = vmatpush.msrb.mxu3 %v1282_v22  ;;  %v1269_v47 = vld [vmem:[#allocation11 + $0x620] sm:$0xff] }
  0xd1   : > { %v1255_v15 = vld [vmem:[#allocation11 + $0x2a0] sm:$0xff] }
  0xd2   : > { %1390 = vmatpush.msrb.mxu3 %v1280_v26  ;;  %v1251_v26 = vld [vmem:[#allocation11 + $0x1a0] sm:$0xff] }
  0xd4   : > { %1391 = vmatpush.msrb.mxu3 %v1278_v32  ;;  %v1163_v32 = vld [vmem:[#allocation11 + $0x318] sm:$0xff] }
  0xd5   : > { %v865_v62 = vld.sshfl [vmem:[#allocation1] sm:$0xff pattern:$0x75643120] }
  0xd6   : > { %v869_v2 = vrot.slane %v865_v62, 7  ;;  %v1295_v62 = vld [vmem:[#allocation11 + $0xca0] sm:$0xff] }
  0xd7   : > { %v868_v4 = vld.sshfl [vmem:[#allocation1 + $0x10] sm:$0xff pattern:$0x75643120] }
  0xd8   : > { %v870_v6 = vrot.slane %v868_v4, 7  ;;  %874 = vst [vmem:[#allocation2 + $0x8] sm:$0x66] %v869_v2  ;;  %v1293_v2 = vld [vmem:[#allocation11 + $0xc20] sm:$0xff]  ;;  %v1168_v4 = vld [vmem:[#allocation11 + $0x598] sm:$0xff] }
  0xd9   : > { %920 = vst [vmem:[#allocation1] ss:$4 sm:$0xff] %v886_v3 }
  0xda   : > { %875 = vst [vmem:[#allocation2 + $0x10] sm:$0x66] %v870_v6 }
  0xdf   : > { %v881_v12 = vld [vmem:[#allocation2 + $0x8] sm:$0x33]  ;;  %v1148_v44 = vld [vmem:[#allocation2 + $0x8] sm:$0xcc] }
  0xe0   : > { %v969_v13 = vld [vmem:[#allocation2 + $0x8] sm:$0x66]  ;;  %v885_v14 = vrot.slane %v881_v12, 2 }
  0xe1   : > { %v1969_v16 = vld [vmem:[#allocation2 + $0x10] sm:$0x66]  ;;  %v973_v17 = vrot.slane %v969_v13, 2  ;;  %v1237_v10 = vld [vmem:[#allocation2 + $0x8] sm:$0x33] }
  0xe2   : > { %v1973_v19 = vrot.slane %v1969_v16, 2  ;;  %v887_v21 = vsel %vm851_vm3, %v881_v12, %v885_v14  ;;  %v1238_v12 = vld [vmem:[#allocation2 + $0x10] sm:$0x33]  ;;  %v1166_v14 = vld [vmem:[#allocation11 + $0x498] sm:$0xff]  ;;  %v1241_v18 = vrot.slane %v1237_v10, 2 }
  0xe3   : > { %922 = vst [vmem:[#allocation1 + $0x1] ss:$4 sm:$0xff] %v887_v21  ;;  %v977_v29 = vsel %vm851_vm3, %v969_v13, %v973_v17  ;;  %v978_v31 = vsel %vm861_vm5, %v969_v13, %v973_v17  ;;  %v1398_v13 = vld [vmem:[#allocation2 + $0x8] sm:$0x66]  ;;  %v1242_v21 = vrot.slane %v1238_v12, 2 }
  0xe4   : > { %v1975_v23 = vsel %vm851_vm3, %v1969_v16, %v1973_v19  ;;  %v1976_v24 = vsel %vm861_vm5, %v1969_v16, %v1973_v19  ;;  %v8752_v34 = vrot.slane %v977_v29, 9  ;;  %v8753_v35 = vrot.slane %v978_v31, 9  ;;  %v1399_v16 = vld [vmem:[#allocation2 + $0x10] sm:$0x66]  ;;  %v1165_v19 = vld [vmem:[#allocation11 + $0x418] sm:$0xff] }
  0xe5   : > { %v8758_v27 = vrot.slane %v1975_v23, 9  ;;  %v8759_v28 = vrot.slane %v1976_v24, 9  ;;  %v1287_v17 = vld [vmem:[#allocation11 + $0xaa0] sm:$0xff]  ;;  %v1402_v22 = vrot.slane %v1398_v13, 2  ;;  %v1164_v24 = vld [vmem:[#allocation11 + $0x398] sm:$0xff]  ;;  %v1403_v25 = vrot.slane %v1399_v16, 2 }
  0xe6   : > { %v993_v41 = vsel %vm10240_vm11, %v8752_v34, %v8753_v35  ;;  %v1285_v23 = vld [vmem:[#allocation11 + $0xa20] sm:$0xff]  ;;  %v1243_v31 = vsel %vm851_vm3, %v1237_v10, %v1241_v18  ;;  %v1244_v35 = vsel %vm851_vm3, %v1238_v12, %v1242_v21  ;;  %v1530_v10 = vld [vmem:[#allocation11 + $0xe30] sm:$0xff]  ;;  %v1515_v12 = vld [vmem:[#allocation11 + $0xc38] sm:$0xff] }
  0xe7   : > { %v10258_v33 = vsel %vm10240_vm11, %v8758_v27, %v8759_v28  ;;  %v1283_v27 = vld [vmem:[#allocation11 + $0x9a0] sm:$0xff]  ;;  %v1543_v28 = vld [vmem:[#allocation11 + $0xfb8] sm:$0xff]  ;;  %v1522_v21 = vld [vmem:[#allocation11 + $0xd30] sm:$0xff] }
  0xe8   : > { %v1249_v34 = vld [vmem:[#allocation11 + $0x120] sm:$0xff] }
  0xea   : > { %v923_v39 = vld.sshfl [vmem:[#allocation1] sm:$0xff pattern:$0x73625140]  ;;  %v924_v40 = vld.sshfl [vmem:[#allocation1 + $0x8] sm:$0xff pattern:$0x73625140] }
  0xeb   : > { %943 = vmatmul.f32.vlgmr.msra.gmra.mxu0 %v923_v39  ;;  %1058 = vst [vmem:[#allocation1] ss:$4 sm:$0xff] %v989_v36  ;;  %963 = vmatmul.f32.vlgmr.msra.gmra.mxu1 %v924_v40  ;;  %v1404_v36 = vsel %vm851_vm3, %v1398_v13, %v1402_v22  ;;  %v1539_v39 = vld [vmem:[#allocation11 + $0xf38] sm:$0xff]  ;;  %v1407_v40 = vsel %vm851_vm3, %v1399_v16, %v1403_v25 }
  0xec   : > { %1060 = vst [vmem:[#allocation1 + $0x1] ss:$4 sm:$0xff] %v993_v41  ;;  %1316 = vmatpush.msra.mxu0 %v1275_v37  ;;  %1336 = vmatpush.msra.mxu1 %v1307_v38  ;;  %v1405_v37 = vsel %vm861_vm5, %v1398_v13, %v1402_v22  ;;  %v1281_v38 = vld [vmem:[#allocation11 + $0x920] sm:$0xff]  ;;  %v1408_v41 = vsel %vm861_vm5, %v1399_v16, %v1403_v25  ;;  %v1276_v13 = vld [vmem:[#allocation11 + $0x7a8] sm:$0xff]  ;;  %v1526_v16 = vld [vmem:[#allocation11 + $0xdb0] sm:$0xff] }
  0xed   : > { %1154 = vst.sshfl [vmem:[#allocation1 + $0x10] sm:$0xff pattern:$0x75643120] %v1148_v44  ;;  %v1279_v44 = vld [vmem:[#allocation11 + $0x8a0] sm:$0xff]  ;;  %v1507_v22 = vld [vmem:[#allocation11 + $0xb38] sm:$0xff]  ;;  %v1518_v25 = vld [vmem:[#allocation11 + $0xcb0] sm:$0xff] }
  0xee   : > { %1317 = vmatpush.msra.mxu0 %v1273_v42  ;;  %1337 = vmatpush.msra.mxu1 %v1305_v43  ;;  %v1162_v42 = vld [vmem:[#allocation11 + $0x298] sm:$0xff]  ;;  %v1247_v43 = vld [vmem:[#allocation11 + $0xa0] sm:$0xff] }
  0xf0   : > { %1318 = vmatpush.msra.mxu0 %v1271_v45  ;;  %1338 = vmatpush.msra.mxu1 %v1303_v46  ;;  %v1535_v45 = vld [vmem:[#allocation11 + $0xeb8] sm:$0xff]  ;;  %v8754_v46 = vrot.slane %v1404_v36, 9 }
  0xf1   : > { %v1495_v36 = vld [vmem:[#allocation11 + $0x9b8] sm:$0xff] }
  0xf2   : > { %1319 = vmatpush.msra.mxu0 %v1269_v47  ;;  %1339 = vmatpush.msra.mxu1 %v1301_v48  ;;  %v8755_v47 = vrot.slane %v1405_v37, 9  ;;  %v1161_v48 = vld [vmem:[#allocation11 + $0x218] sm:$0xff] }
  0xf3   : > { %v1062_v53 = vld.sshfl [vmem:[#allocation1 + $0x8] sm:$0xff pattern:$0x73625140]  ;;  %v1061_v54 = vld.sshfl [vmem:[#allocation1] sm:$0xff pattern:$0x73625140] }
  0xf4   : > { %1081 = vmatmul.f32.vlgmr.msra.gmra.mxu2 %v1061_v54  ;;  %1151 = vst.sshfl [vmem:[#allocation1] sm:$0xff pattern:$0x75643120] %v1147_v49  ;;  %1121 = vmatmul.f32.vlgmr.msrb.gmra.mxu0 %v1061_v54  ;;  %v1156_v6 = vld [vmem:[#allocation1 + $0x11] ss:$2 sm:$0xff]  ;;  %v1478_v54 = vld [vmem:[#allocation11 + $0x7b0] sm:$0xff] }
  0xf5   : > { %1141 = vmatmul.f32.vlgmr.msrb.gmra.mxu1 %v1062_v53  ;;  %1196 = vmatpush.msra.mxu2 %v1172_v50  ;;  %v1245_v49 = vld [vmem:[#allocation11 + $0x20] sm:$0xff]  ;;  %v8756_v50 = vrot.slane %v1407_v40, 9  ;;  %v1442_v40 = vld [vmem:[#allocation11 + $0x330] sm:$0xff] }
  0xf6   : > { %1320 = vmatpush.msra.mxu0 %v1267_v51  ;;  %1340 = vmatpush.msra.mxu1 %v1299_v52  ;;  %v8757_v51 = vrot.slane %v1408_v41, 9  ;;  %v1277_v52 = vld [vmem:[#allocation11 + $0x820] sm:$0xff]  ;;  %v1882_v41 = vld [vmem:[#allocation2 + $0x18] sm:$0x33] }
  0xf7   : > { %1197 = vmatpush.msra.mxu2 %v1171_v55  ;;  %v1542_v55 = vld [vmem:[#allocation11 + $0xfb0] sm:$0xff] }
  0xf8   : > { %1321 = vmatpush.msra.mxu0 %v1265_v56  ;;  %1341 = vmatpush.msra.mxu1 %v1297_v58  ;;  %v1160_v56 = vld [vmem:[#allocation11 + $0x198] sm:$0xff]  ;;  %v1413_v58 = vsel %vm10240_vm11, %v8754_v46, %v8755_v47  ;;  %v1881_v46 = vld [vmem:[#allocation2 + $0x10] sm:$0x33]  ;;  %v1502_v47 = vld [vmem:[#allocation11 + $0xab0] sm:$0xff] }
  0xf9   : > { %1198 = vmatpush.msra.mxu2 %v1170_v59 }
  0xfa   : > { %1322 = vmatpush.msra.mxu0 %v1263_v60  ;;  %1342 = vmatpush.msra.mxu1 %v1295_v62  ;;  %v1417_v62 = vsel %vm10240_vm11, %v8756_v50, %v8757_v51  ;;  %v1262_v50 = vld [vmem:[#allocation11 + $0x428] sm:$0xff]  ;;  %v1434_v51 = vld [vmem:[#allocation11 + $0x230] sm:$0xff] }
  0xfb   : > { %v1153_v3 = vld [vmem:[#allocation1 + $0x1] ss:$2 sm:$0xff]  ;;  %1199 = vmatpush.msra.mxu2 %v1169_v0 }
  0xfc   : > { %1189 = vst [vmem:[#allocation1] ss:$4 sm:$0xff] %v1153_v3  ;;  %1323 = vmatpush.msra.mxu0 %v1261_v1  ;;  %1343 = vmatpush.msra.mxu1 %v1293_v2  ;;  %v1527_v0 = vld [vmem:[#allocation11 + $0xdb8] sm:$0xff]  ;;  %v1474_v1 = vld [vmem:[#allocation11 + $0x730] sm:$0xff]  ;;  %v1718_v2 = vld [vmem:[#allocation2 + $0x10] sm:$0xcc] }
  0xfd   : > { %1191 = vst [vmem:[#allocation1 + $0x1] ss:$4 sm:$0xff] %v1156_v6  ;;  %1101 = vmatmul.f32.vlgmr.msrb.gmra.mxu2 %v1062_v53  ;;  %v1531_v53 = vld [vmem:[#allocation11 + $0xe38] sm:$0xff]  ;;  %v1538_v3 = vld [vmem:[#allocation11 + $0xf30] sm:$0xff] }
  0xfe   : > { %1200 = vmatpush.msra.mxu2 %v1168_v4  ;;  %1324 = vmatpush.msra.mxu0 %v1259_v5  ;;  %v1159_v4 = vld [vmem:[#allocation11 + $0x118] sm:$0xff]  ;;  %v1470_v6 = vld [vmem:[#allocation11 + $0x6b0] sm:$0xff] }
  0xff   : > { %1344 = vmatpush.msra.mxu1 %v1291_v7  ;;  %v1523_v5 = vld [vmem:[#allocation11 + $0xd38] sm:$0xff] }
 0x100   : > { %1201 = vmatpush.msra.mxu2 %v1167_v8  ;;  %1325 = vmatpush.msra.mxu0 %v1257_v9  ;;  %v1158_v7 = vld [vmem:[#allocation11 + $0x98] sm:$0xff]  ;;  %v1466_v9 = vld [vmem:[#allocation11 + $0x630] sm:$0xff] }
 0x101   : > { %1345 = vmatpush.msra.mxu1 %v1289_v11  ;;  %v1519_v8 = vld [vmem:[#allocation11 + $0xcb8] sm:$0xff] }
 0x102   : > { %1202 = vmatpush.msra.mxu2 %v1166_v14  ;;  %1326 = vmatpush.msra.mxu0 %v1255_v15  ;;  %v1157_v11 = vld [vmem:[#allocation11 + $0x18] sm:$0xff]  ;;  %v1462_v14 = vld [vmem:[#allocation11 + $0x5b0] sm:$0xff]  ;;  %v1717_v15 = vld [vmem:[#allocation2 + $0x8] sm:$0xcc] }
 0x103   : > { %1346 = vmatpush.msra.mxu1 %v1287_v17  ;;  %v1511_v17 = vld [vmem:[#allocation11 + $0xbb8] sm:$0xff] }
 0x104   : > { %v1193_v29 = vld.sshfl [vmem:[#allocation1 + $0x8] sm:$0xff pattern:$0x73625140]  ;;  %1203 = vmatpush.msra.mxu2 %v1165_v19  ;;  %1327 = vmatpush.msra.mxu0 %v1253_v20  ;;  %v10264_v30 = vld.sshfl [vmem:[#allocation1] sm:$0xff pattern:$0x73625140] }
 0x105   : > { %1347 = vmatpush.msra.mxu1 %v1285_v23  ;;  %1232 = vmatmul.f32.vlgmr.msra.gmra.mxu3 %v1193_v29  ;;  %1309 = vst [vmem:[#allocation1] ss:$4 sm:$0xff] %v1243_v31  ;;  %v1274_v19 = vld [vmem:[#allocation11 + $0x728] sm:$0xff]  ;;  %v1458_v20 = vld [vmem:[#allocation11 + $0x530] sm:$0xff] }
 0x106   : > { %1204 = vmatpush.msra.mxu2 %v1164_v24  ;;  %1328 = vmatpush.msra.mxu0 %v1251_v26  ;;  %1311 = vst [vmem:[#allocation1 + $0x1] ss:$4 sm:$0xff] %v1244_v35  ;;  %v1272_v23 = vld [vmem:[#allocation11 + $0x6a8] sm:$0xff]  ;;  %v1454_v24 = vld [vmem:[#allocation11 + $0x4b0] sm:$0xff]  ;;  %v1503_v26 = vld [vmem:[#allocation11 + $0xab8] sm:$0xff] }
 0x107   : > { %1348 = vmatpush.msra.mxu1 %v1283_v27  ;;  %1613 = vmatpush.msra.mxu3 %v1543_v28  ;;  %v1270_v27 = vld [vmem:[#allocation11 + $0x628] sm:$0xff]  ;;  %v1450_v28 = vld [vmem:[#allocation11 + $0x430] sm:$0xff] }
 0x108   : > { %1205 = vmatpush.msra.mxu2 %v1163_v32  ;;  %1329 = vmatpush.msra.mxu0 %v1249_v34  ;;  %v1514_v29 = vld [vmem:[#allocation11 + $0xc30] sm:$0xff]  ;;  %v1268_v31 = vld [vmem:[#allocation11 + $0x5a8] sm:$0xff] }
 0x109   : > { %1349 = vmatpush.msra.mxu1 %v1281_v38  ;;  %1614 = vmatpush.msra.mxu3 %v1539_v39  ;;  %v1446_v32 = vld [vmem:[#allocation11 + $0x3b0] sm:$0xff]  ;;  %v1266_v39 = vld [vmem:[#allocation11 + $0x528] sm:$0xff] }
 0x10a   : > { %1206 = vmatpush.msra.mxu2 %v1162_v42  ;;  %1330 = vmatpush.msra.mxu0 %v1247_v43  ;;  %v1510_v34 = vld [vmem:[#allocation11 + $0xbb0] sm:$0xff]  ;;  %v1491_v43 = vld [vmem:[#allocation11 + $0x938] sm:$0xff] }
 0x10b   : > { %1350 = vmatpush.msra.mxu1 %v1279_v44  ;;  %1615 = vmatpush.msra.mxu3 %v1535_v45  ;;  %v1506_v42 = vld [vmem:[#allocation11 + $0xb30] sm:$0xff]  ;;  %v1264_v44 = vld [vmem:[#allocation11 + $0x4a8] sm:$0xff] }
 0x10c   : > { %1207 = vmatpush.msra.mxu2 %v1161_v48  ;;  %1331 = vmatpush.msra.mxu0 %v1245_v49  ;;  %v1438_v45 = vld [vmem:[#allocation11 + $0x2b0] sm:$0xff]  ;;  %v1487_v48 = vld [vmem:[#allocation11 + $0x8b8] sm:$0xff]  ;;  %v1886_v49 = vrot.slane %v1882_v41, 2 }
 0x10d   : > { %1351 = vmatpush.msra.mxu1 %v1277_v52  ;;  %1616 = vmatpush.msra.mxu3 %v1531_v53  ;;  %v10274_v59 = vld.sshfl [vmem:[#allocation1] sm:$0xff pattern:$0x73625140]  ;;  %v1313_v60 = vld.sshfl [vmem:[#allocation1 + $0x8] sm:$0xff pattern:$0x73625140] }
 0x10e   : > { %1553 = vmatpush.msrb.mxu0 %v1478_v54  ;;  %1546 = vst [vmem:[#allocation1] ss:$4 sm:$0xff] %v1413_v58  ;;  %1208 = vmatpush.msra.mxu2 %v1160_v56  ;;  %v1498_v52 = vld [vmem:[#allocation11 + $0xa30] sm:$0xff]  ;;  %v1483_v53 = vld [vmem:[#allocation11 + $0x838] sm:$0xff]  ;;  %v1885_v54 = vrot.slane %v1881_v46, 2 }
 0x10f   : > { %1573 = vmatpush.msrb.mxu1 %v1542_v55  ;;  %1332 = vmatmul.f32.vlgmr.msra.gmra.mxu0 %v10274_v59  ;;  %1548 = vst [vmem:[#allocation1 + $0x1] ss:$4 sm:$0xff] %v1417_v62  ;;  %v1260_v55 = vld [vmem:[#allocation11 + $0x3a8] sm:$0xff]  ;;  %v1430_v56 = vld [vmem:[#allocation11 + $0x1b0] sm:$0xff] }
 0x110   : > { %1724 = vst.sshfl [vmem:[#allocation1 + $0x10] sm:$0xff pattern:$0x75643120] %v1718_v2  ;;  %1352 = vmatmul.f32.vlgmr.msra.gmra.mxu1 %v1313_v60  ;;  %1392 = vmatmul.f32.vlgmr.msrb.gmra.mxu3 %v1313_v60  ;;  %v1494_v58 = vld [vmem:[#allocation11 + $0x9b0] sm:$0xff]  ;;  %v1888_v60 = vsel %vm851_vm3, %v1882_v41, %v1886_v49  ;;  %v1545_v62 = vld [vmem:[#allocation11 + $0xfc8] sm:$0xff]  ;;  %v1516_v49 = vld [vmem:[#allocation11 + $0xc40] sm:$0xff] }
 0x111   : > { %1617 = vmatpush.msra.mxu3 %v1527_v0  ;;  %1554 = vmatpush.msrb.mxu0 %v1474_v1  ;;  %v1258_v0 = vld [vmem:[#allocation11 + $0x328] sm:$0xff]  ;;  %v1426_v2 = vld [vmem:[#allocation11 + $0x130] sm:$0xff] }
 0x112   : > { %1574 = vmatpush.msrb.mxu1 %v1538_v3  ;;  %1209 = vmatpush.msra.mxu2 %v1159_v4  ;;  %v1490_v3 = vld [vmem:[#allocation11 + $0x930] sm:$0xff]  ;;  %v1509_v41 = vld [vmem:[#allocation11 + $0xb48] sm:$0xff] }
 0x113   : > { %1618 = vmatpush.msra.mxu3 %v1523_v5  ;;  %1555 = vmatpush.msrb.mxu0 %v1470_v6  ;;  %v1887_v5 = vsel %vm851_vm3, %v1881_v46, %v1885_v54  ;;  %v1541_v6 = vld [vmem:[#allocation11 + $0xf48] sm:$0xff] }
 0x114   : > { %1575 = vmatpush.msrb.mxu1 %v1534_v61  ;;  %1210 = vmatpush.msra.mxu2 %v1158_v7  ;;  %v1256_v61 = vld [vmem:[#allocation11 + $0x2a8] sm:$0xff]  ;;  %v1422_v7 = vld [vmem:[#allocation11 + $0xb0] sm:$0xff] }
 0x115   : > { %1619 = vmatpush.msra.mxu3 %v1519_v8  ;;  %1556 = vmatpush.msrb.mxu0 %v1466_v9  ;;  %v1486_v8 = vld [vmem:[#allocation11 + $0x8b0] sm:$0xff]  ;;  %v1537_v9 = vld [vmem:[#allocation11 + $0xec8] sm:$0xff] }
 0x116   : > { %1576 = vmatpush.msrb.mxu1 %v1530_v10  ;;  %1211 = vmatpush.msra.mxu2 %v1157_v11  ;;  %v10279_v18 = vld.sshfl [vmem:[#allocation1] sm:$0xff pattern:$0x73625140]  ;;  %v10282_v35 = vld.sshfl [vmem:[#allocation1 + $0x8] sm:$0xff pattern:$0x73625140] }
 0x117   : > { %1620 = vmatpush.msra.mxu3 %v1515_v12  ;;  %1212 = vmatmul.f32.vlgmr.msra.gmra.mxu2 %v10264_v30  ;;  %1721 = vst.sshfl [vmem:[#allocation1] sm:$0xff pattern:$0x75643120] %v1717_v15  ;;  %v1499_v30 = vld [vmem:[#allocation11 + $0xa38] sm:$0xff]  ;;  %v1254_v10 = vld [vmem:[#allocation11 + $0x228] sm:$0xff]  ;;  %v1418_v11 = vld [vmem:[#allocation11 + $0x30] sm:$0xff] }
 0x118   : > { %1356 = vmatpush.msrb.mxu2 %v1276_v13  ;;  %1557 = vmatpush.msrb.mxu0 %v1462_v14  ;;  %v1726_v38 = vld [vmem:[#allocation1 + $0x11] ss:$2 sm:$0xff]  ;;  %v1482_v12 = vld [vmem:[#allocation11 + $0x830] sm:$0xff] }
 0x119   : > { %1577 = vmatpush.msrb.mxu1 %v1526_v16  ;;  %1621 = vmatpush.msra.mxu3 %v1511_v17  ;;  %v1533_v13 = vld [vmem:[#allocation11 + $0xe48] sm:$0xff]  ;;  %v1480_v14 = vld [vmem:[#allocation11 + $0x7c0] sm:$0xff] }
 0x11a   : > { %1357 = vmatpush.msrb.mxu2 %v1274_v19  ;;  %1558 = vmatpush.msrb.mxu0 %v1458_v20  ;;  %v1544_v15 = vld [vmem:[#allocation11 + $0xfc0] sm:$0xff]  ;;  %v1252_v16 = vld [vmem:[#allocation11 + $0x1a8] sm:$0xff] }
 0x11b   : > { %1578 = vmatpush.msrb.mxu1 %v1522_v21  ;;  %1622 = vmatpush.msra.mxu3 %v1507_v22  ;;  %v1529_v17 = vld [vmem:[#allocation11 + $0xdc8] sm:$0xff]  ;;  %v1476_v19 = vld [vmem:[#allocation11 + $0x740] sm:$0xff] }
 0x11c   : > { %1358 = vmatpush.msrb.mxu2 %v1272_v23  ;;  %1559 = vmatpush.msrb.mxu0 %v1454_v24  ;;  %v1540_v20 = vld [vmem:[#allocation11 + $0xf40] sm:$0xff]  ;;  %v1250_v21 = vld [vmem:[#allocation11 + $0x128] sm:$0xff] }
 0x11d   : > { %1579 = vmatpush.msrb.mxu1 %v1518_v25  ;;  %1623 = vmatpush.msra.mxu3 %v1503_v26  ;;  %v1525_v22 = vld [vmem:[#allocation11 + $0xd48] sm:$0xff]  ;;  %v1472_v24 = vld [vmem:[#allocation11 + $0x6c0] sm:$0xff]  ;;  %v2143_v26 = vld [vmem:[#allocation2 + $0x18] sm:$0xcc] }
 0x11e   : > { %1359 = vmatpush.msrb.mxu2 %v1270_v27  ;;  %1560 = vmatpush.msrb.mxu0 %v1450_v28  ;;  %v1723_v37 = vld [vmem:[#allocation1 + $0x1] ss:$2 sm:$0xff]  ;;  %v1536_v27 = vld [vmem:[#allocation11 + $0xec0] sm:$0xff] }
 0x11f   : > { %1580 = vmatpush.msrb.mxu1 %v1514_v29  ;;  %1624 = vmatpush.msra.mxu3 %v1499_v30  ;;  %1791 = vst [vmem:[#allocation1] ss:$4 sm:$0xff] %v1723_v37  ;;  %v1248_v28 = vld [vmem:[#allocation11 + $0xa8] sm:$0xff]  ;;  %v1468_v30 = vld [vmem:[#allocation11 + $0x640] sm:$0xff] }
 0x120   : > { %1360 = vmatpush.msrb.mxu2 %v1268_v31  ;;  %1561 = vmatpush.msrb.mxu0 %v1446_v32  ;;  %1793 = vst [vmem:[#allocation1 + $0x1] ss:$4 sm:$0xff] %v1726_v38  ;;  %v1521_v29 = vld [vmem:[#allocation11 + $0xcc8] sm:$0xff]  ;;  %v1532_v31 = vld [vmem:[#allocation11 + $0xe40] sm:$0xff] }
 0x121   : > { %1581 = vmatpush.msrb.mxu1 %v1510_v34  ;;  %1625 = vmatpush.msra.mxu3 %v1495_v36  ;;  %v1246_v32 = vld [vmem:[#allocation11 + $0x28] sm:$0xff]  ;;  %v1479_v36 = vld [vmem:[#allocation11 + $0x7b8] sm:$0xff]  ;;  %v1464_v37 = vld [vmem:[#allocation11 + $0x5c0] sm:$0xff] }
 0x122   : > { %1361 = vmatpush.msrb.mxu2 %v1266_v39  ;;  %1562 = vmatpush.msrb.mxu0 %v1442_v40  ;;  %v1517_v34 = vld [vmem:[#allocation11 + $0xc48] sm:$0xff]  ;;  %v1460_v39 = vld [vmem:[#allocation11 + $0x540] sm:$0xff] }
 0x123   : > { %1582 = vmatpush.msrb.mxu1 %v1506_v42  ;;  %1626 = vmatpush.msra.mxu3 %v1491_v43  ;;  %v1513_v38 = vld [vmem:[#allocation11 + $0xbc8] sm:$0xff]  ;;  %v1524_v40 = vld [vmem:[#allocation11 + $0xd40] sm:$0xff]  ;;  %v1471_v42 = vld [vmem:[#allocation11 + $0x6b8] sm:$0xff] }
 0x124   : > { %1362 = vmatpush.msrb.mxu2 %v1264_v44  ;;  %1563 = vmatpush.msrb.mxu0 %v1438_v45  ;;  %v1456_v43 = vld [vmem:[#allocation11 + $0x4c0] sm:$0xff]  ;;  %v1505_v45 = vld [vmem:[#allocation11 + $0xac8] sm:$0xff] }
 0x125   : > { %1583 = vmatpush.msrb.mxu1 %v1502_v47  ;;  %1627 = vmatpush.msra.mxu3 %v1487_v48  ;;  %v1520_v44 = vld [vmem:[#allocation11 + $0xcc0] sm:$0xff]  ;;  %v2142_v47 = vld [vmem:[#allocation2 + $0x10] sm:$0xcc] }
 0x126   : > { %1363 = vmatpush.msrb.mxu2 %v1262_v50  ;;  %1564 = vmatpush.msrb.mxu0 %v1434_v51  ;;  %v1452_v48 = vld [vmem:[#allocation11 + $0x440] sm:$0xff]  ;;  %v1501_v50 = vld [vmem:[#allocation11 + $0xa48] sm:$0xff]  ;;  %v1463_v51 = vld [vmem:[#allocation11 + $0x5b8] sm:$0xff] }
 0x127   : > { %1584 = vmatpush.msrb.mxu1 %v1498_v52  ;;  %1628 = vmatpush.msra.mxu3 %v1483_v53  ;;  %v10285_v1 = vld.sshfl [vmem:[#allocation1 + $0x8] sm:$0xff pattern:$0x73625140]  ;;  %v10287_v4 = vld.sshfl [vmem:[#allocation1] sm:$0xff pattern:$0x73625140] }
 0x128   : > { %1364 = vmatpush.msrb.mxu2 %v1260_v55  ;;  %1565 = vmatpush.msrb.mxu0 %v1430_v56  ;;  %1921 = vst [vmem:[#allocation1] ss:$4 sm:$0xff] %v1887_v5  ;;  %v1448_v52 = vld [vmem:[#allocation11 + $0x3c0] sm:$0xff]  ;;  %v1497_v54 = vld [vmem:[#allocation11 + $0x9c8] sm:$0xff]  ;;  %v1459_v55 = vld [vmem:[#allocation11 + $0x538] sm:$0xff] }
 0x129   : > { %1585 = vmatpush.msrb.mxu1 %v1494_v58  ;;  %1629 = vmatmul.f32.vlgmr.msra.gmra.mxu3 %v10282_v35  ;;  %1923 = vst [vmem:[#allocation1 + $0x1] ss:$4 sm:$0xff] %v1888_v60  ;;  %v1512_v53 = vld [vmem:[#allocation11 + $0xbc0] sm:$0xff]  ;;  %v1493_v60 = vld [vmem:[#allocation11 + $0x948] sm:$0xff]  ;;  %v1451_v5 = vld [vmem:[#allocation11 + $0x438] sm:$0xff] }
 0x12a   : > { %1693 = vmatpush.msrb.mxu3 %v1545_v62  ;;  %1365 = vmatpush.msrb.mxu2 %v1258_v0  ;;  %v1444_v56 = vld [vmem:[#allocation11 + $0x340] sm:$0xff]  ;;  %v1455_v62 = vld [vmem:[#allocation11 + $0x4b8] sm:$0xff] }
 0x12b   : > { %1566 = vmatpush.msrb.mxu0 %v1426_v2  ;;  %1586 = vmatpush.msrb.mxu1 %v1490_v3  ;;  %v1508_v58 = vld [vmem:[#allocation11 + $0xb40] sm:$0xff]  ;;  %v1489_v3 = vld [vmem:[#allocation11 + $0x8c8] sm:$0xff] }
 0x12c   : > { %1694 = vmatpush.msrb.mxu3 %v1541_v6  ;;  %1366 = vmatpush.msrb.mxu2 %v1256_v61  ;;  %v1440_v0 = vld [vmem:[#allocation11 + $0x2c0] sm:$0xff] }
 0x12d   : > { %1567 = vmatpush.msrb.mxu0 %v1422_v7  ;;  %1587 = vmatpush.msrb.mxu1 %v1486_v8  ;;  %v1504_v2 = vld [vmem:[#allocation11 + $0xac0] sm:$0xff] }
 0x12e   : > { %1695 = vmatpush.msrb.mxu3 %v1537_v9  ;;  %1367 = vmatpush.msrb.mxu2 %v1254_v10  ;;  %v1436_v61 = vld [vmem:[#allocation11 + $0x240] sm:$0xff]  ;;  %v1485_v10 = vld [vmem:[#allocation11 + $0x848] sm:$0xff] }
 0x12f   : > { %1568 = vmatpush.msrb.mxu0 %v1418_v11  ;;  %1588 = vmatpush.msrb.mxu1 %v1482_v12  ;;  %v1500_v9 = vld [vmem:[#allocation11 + $0xa40] sm:$0xff]  ;;  %v1447_v11 = vld [vmem:[#allocation11 + $0x3b8] sm:$0xff] }
 0x130   : > { %1696 = vmatpush.msrb.mxu3 %v1533_v13  ;;  %1569 = vmatmul.f32.vlgmr.msrb.gmra.mxu0 %v10279_v18  ;;  %v10293_v23 = vld.sshfl [vmem:[#allocation1] sm:$0xff pattern:$0x73625140]  ;;  %v10295_v25 = vld.sshfl [vmem:[#allocation1 + $0x8] sm:$0xff pattern:$0x73625140] }
 0x131   : > { %1589 = vmatmul.f32.vlgmr.msrb.gmra.mxu1 %v10282_v35  ;;  %1633 = vmatpush.msra.mxu0 %v1480_v14  ;;  %2053 = vst [vmem:[#allocation1] ss:$4 sm:$0xff] %v10258_v33  ;;  %v1528_v33 = vld [vmem:[#allocation11 + $0xdc0] sm:$0xff]  ;;  %v1790_v14 = vld [vmem:[#allocation11 + $0xfd8] sm:$0xff] }
 0x132   : > { %1653 = vmatpush.msra.mxu1 %v1544_v15  ;;  %1368 = vmatpush.msrb.mxu2 %v1252_v16  ;;  %2055 = vst [vmem:[#allocation1 + $0x1] ss:$4 sm:$0xff] %v10246_v63  ;;  %v1475_v63 = vld [vmem:[#allocation11 + $0x738] sm:$0xff]  ;;  %v1432_v12 = vld [vmem:[#allocation11 + $0x1c0] sm:$0xff] }
 0x133   : > { %1697 = vmatpush.msrb.mxu3 %v1529_v17  ;;  %1634 = vmatpush.msra.mxu0 %v1476_v19  ;;  %2149 = vst.sshfl [vmem:[#allocation1 + $0x10] sm:$0xff pattern:$0x75643120] %v2143_v26  ;;  %v1496_v13 = vld [vmem:[#allocation11 + $0x9c0] sm:$0xff]  ;;  %v1443_v15 = vld [vmem:[#allocation11 + $0x338] sm:$0xff] }
 0x134   : > { %1654 = vmatpush.msra.mxu1 %v1540_v20  ;;  %1369 = vmatpush.msrb.mxu2 %v1250_v21  ;;  %v1428_v16 = vld [vmem:[#allocation11 + $0x140] sm:$0xff]  ;;  %v1788_v19 = vld [vmem:[#allocation11 + $0xf58] sm:$0xff] }
 0x135   : > { %1698 = vmatpush.msrb.mxu3 %v1525_v22  ;;  %1635 = vmatpush.msra.mxu0 %v1472_v24  ;;  %v1492_v17 = vld [vmem:[#allocation11 + $0x940] sm:$0xff]  ;;  %v1439_v20 = vld [vmem:[#allocation11 + $0x2b8] sm:$0xff] }
 0x136   : > { %1655 = vmatpush.msra.mxu1 %v1536_v27  ;;  %1370 = vmatpush.msrb.mxu2 %v1248_v28  ;;  %v1424_v21 = vld [vmem:[#allocation11 + $0xc0] sm:$0xff]  ;;  %v1786_v24 = vld [vmem:[#allocation11 + $0xed8] sm:$0xff] }
 0x137   : > { %1699 = vmatpush.msrb.mxu3 %v1521_v29  ;;  %1636 = vmatpush.msra.mxu0 %v1468_v30  ;;  %v1488_v22 = vld [vmem:[#allocation11 + $0x8c0] sm:$0xff]  ;;  %v1435_v26 = vld [vmem:[#allocation11 + $0x238] sm:$0xff]  ;;  %v1757_v30 = vld [vmem:[#allocation11 + $0x7d0] sm:$0xff] }
 0x138   : > { %1656 = vmatpush.msra.mxu1 %v1532_v31  ;;  %1371 = vmatpush.msrb.mxu2 %v1246_v32  ;;  %v1420_v27 = vld [vmem:[#allocation11 + $0x40] sm:$0xff]  ;;  %v1784_v29 = vld [vmem:[#allocation11 + $0xe58] sm:$0xff]  ;;  %v1789_v31 = vld [vmem:[#allocation11 + $0xfd0] sm:$0xff] }
 0x139   : > { %1700 = vmatpush.msrb.mxu3 %v1517_v34  ;;  %1372 = vmatmul.f32.vlgmr.msrb.gmra.mxu2 %v10274_v59  ;;  %v10300_v46 = vld.sshfl [vmem:[#allocation1] sm:$0xff pattern:$0x73625140]  ;;  %v1467_v59 = vld [vmem:[#allocation11 + $0x638] sm:$0xff]  ;;  %v1484_v28 = vld [vmem:[#allocation11 + $0x840] sm:$0xff] }
 0x13a   : > { %1593 = vmatpush.msra.mxu2 %v1479_v36  ;;  %1637 = vmatpush.msra.mxu0 %v1464_v37  ;;  %2146 = vst.sshfl [vmem:[#allocation1] sm:$0xff pattern:$0x75643120] %v2142_v47  ;;  %v2151_v6 = vld [vmem:[#allocation1 + $0x11] ss:$2 sm:$0xff]  ;;  %v1755_v36 = vld [vmem:[#allocation11 + $0x750] sm:$0xff] }
 0x13b   : > { %1657 = vmatpush.msra.mxu1 %v1528_v33  ;;  %1701 = vmatpush.msrb.mxu3 %v1513_v38  ;;  %v10302_v7 = vld.sshfl [vmem:[#allocation1 + $0x8] sm:$0xff pattern:$0x73625140] }
 0x13c   : > { %1594 = vmatpush.msra.mxu2 %v1475_v63  ;;  %1638 = vmatpush.msra.mxu0 %v1460_v39  ;;  %v1431_v32 = vld [vmem:[#allocation11 + $0x1b8] sm:$0xff]  ;;  %v1787_v37 = vld [vmem:[#allocation11 + $0xf50] sm:$0xff] }
 0x13d   : > { %1658 = vmatpush.msra.mxu1 %v1524_v40  ;;  %1702 = vmatpush.msrb.mxu3 %v1509_v41  ;;  %v1782_v34 = vld [vmem:[#allocation11 + $0xdd8] sm:$0xff]  ;;  %v1753_v63 = vld [vmem:[#allocation11 + $0x6d0] sm:$0xff] }
 0x13e   : > { %1595 = vmatpush.msra.mxu2 %v1471_v42  ;;  %1639 = vmatpush.msra.mxu0 %v1456_v43  ;;  %v1427_v33 = vld [vmem:[#allocation11 + $0x138] sm:$0xff]  ;;  %v1785_v39 = vld [vmem:[#allocation11 + $0xed0] sm:$0xff]  ;;  %v2410_v43 = vld [vmem:[#allocation14 + $0x380] sm:$0xff] }
 0x13f   : > { %1659 = vmatpush.msra.mxu1 %v1520_v44  ;;  %1703 = vmatpush.msrb.mxu3 %v1505_v45  ;;  %v1780_v38 = vld [vmem:[#allocation11 + $0xd58] sm:$0xff]  ;;  %v1751_v42 = vld [vmem:[#allocation11 + $0x650] sm:$0xff] }
 0x140   : > { %1596 = vmatpush.msra.mxu2 %v1467_v59  ;;  %1640 = vmatpush.msra.mxu0 %v1452_v48  ;;  %v1423_v40 = vld [vmem:[#allocation11 + $0xb8] sm:$0xff]  ;;  %v10307_v44 = vld [vmem:[#allocation14 + $0x348] sm:$0xff] }
 0x141   : > { %1660 = vmatpush.msra.mxu1 %v1516_v49  ;;  %1704 = vmatpush.msrb.mxu3 %v1501_v50  ;;  %v2148_v8 = vld [vmem:[#allocation1 + $0x1] ss:$2 sm:$0xff]  ;;  %v9289_v49 = vpack.i.bf16 %v2410_v43, %v10307_v44 }
 0x142   : > { %1597 = vmatpush.msra.mxu2 %v1463_v51  ;;  %1641 = vmatpush.msra.mxu0 %v1448_v52  ;;  %2184 = vst [vmem:[#allocation1] ss:$4 sm:$0xff] %v2148_v8  ;;  %v1778_v41 = vld [vmem:[#allocation11 + $0xcd8] sm:$0xff]  ;;  %v1481_v59 = vld [vmem:[#allocation11 + $0x7c8] sm:$0xff]  ;;  %v1749_v48 = vld [vmem:[#allocation11 + $0x5d0] sm:$0xff] }
 0x143   : > { %1661 = vmatpush.msra.mxu1 %v1512_v53  ;;  %1705 = vmatpush.msrb.mxu3 %v1497_v54  ;;  %2186 = vst [vmem:[#allocation1 + $0x1] ss:$4 sm:$0xff] %v2151_v6  ;;  %v1419_v45 = vld [vmem:[#allocation11 + $0x38] sm:$0xff]  ;;  %v1781_v50 = vld [vmem:[#allocation11 + $0xdd0] sm:$0xff]  ;;  %v1477_v52 = vld [vmem:[#allocation11 + $0x748] sm:$0xff] }
 0x144   : > { %1598 = vmatpush.msra.mxu2 %v1459_v55  ;;  %1642 = vmatpush.msra.mxu0 %v1444_v56  ;;  %v1776_v47 = vld [vmem:[#allocation11 + $0xc58] sm:$0xff]  ;;  %v2610_v53 = vld [vmem:[#allocation14 + $0x388] sm:$0xff] }
 0x145   : > { %1662 = vmatpush.msra.mxu1 %v1508_v58  ;;  %1706 = vmatpush.msrb.mxu3 %v1493_v60  ;;  %v1774_v51 = vld [vmem:[#allocation11 + $0xbd8] sm:$0xff]  ;;  %v10311_v54 = vld [vmem:[#allocation14 + $0x3c8] sm:$0xff] }
 0x146   : > { %1599 = vmatpush.msra.mxu2 %v1455_v62  ;;  %1643 = vmatpush.msra.mxu0 %v1440_v0  ;;  %v1747_v55 = vld [vmem:[#allocation11 + $0x550] sm:$0xff]  ;;  %v1772_v58 = vld [vmem:[#allocation11 + $0xb58] sm:$0xff]  ;;  %v1473_v60 = vld [vmem:[#allocation11 + $0x6c8] sm:$0xff] }
 0x147   : > { %1663 = vmatpush.msra.mxu1 %v1504_v2  ;;  %1707 = vmatpush.msrb.mxu3 %v1489_v3  ;;  %v1779_v56 = vld [vmem:[#allocation11 + $0xd50] sm:$0xff]  ;;  %v9279_v2 = vpack.i.bf16 %v2610_v53, %v10311_v54  ;;  %v1770_v3 = vld [vmem:[#allocation11 + $0xad8] sm:$0xff]  ;;  %v1469_v6 = vld [vmem:[#allocation11 + $0x648] sm:$0xff] }
 0x148   : > { %1600 = vmatpush.msra.mxu2 %v1451_v5  ;;  %1644 = vmatpush.msra.mxu0 %v1436_v61  ;;  %v1745_v62 = vld [vmem:[#allocation11 + $0x4d0] sm:$0xff]  ;;  %v2049_v43 = vld [vmem:[#allocation11 + $0xf68] sm:$0xff] }
 0x149   : > { %1664 = vmatpush.msra.mxu1 %v1500_v9  ;;  %1708 = vmatpush.msrb.mxu3 %v1485_v10  ;;  %v1777_v0 = vld [vmem:[#allocation11 + $0xcd0] sm:$0xff]  ;;  %v1768_v9 = vld [vmem:[#allocation11 + $0xa58] sm:$0xff]  ;;  %v1465_v10 = vld [vmem:[#allocation11 + $0x5c8] sm:$0xff] }
 0x14a   : > { %1601 = vmatpush.msra.mxu2 %v1447_v11  ;;  %1645 = vmatpush.msra.mxu0 %v1432_v12  ;;  %v10315_v5 = vld [vmem:[#allocation14 + $0x308] sm:$0xff] }
 0x14b   : > { %1665 = vmatpush.msra.mxu1 %v1496_v13  ;;  %1709 = vmatmul.f32.vlgmr.msrb.gmra.mxu3 %v10282_v35  ;;  %v1743_v61 = vld [vmem:[#allocation11 + $0x450] sm:$0xff]  ;;  %v9294_v12 = vpack.i.bf16 %v10315_v5, %v2610_v53 }
 0x14c   : > { %1858 = vmatpush.msra.mxu3 %v1790_v14  ;;  %1602 = vmatpush.msra.mxu2 %v1443_v15  ;;  %v1775_v8 = vld [vmem:[#allocation11 + $0xc50] sm:$0xff]  ;;  %v1766_v14 = vld [vmem:[#allocation11 + $0x9d8] sm:$0xff]  ;;  %v1461_v15 = vld [vmem:[#allocation11 + $0x548] sm:$0xff] }
 0x14d   : > { %1646 = vmatpush.msra.mxu0 %v1428_v16  ;;  %1666 = vmatpush.msra.mxu1 %v1492_v17  ;;  %v1741_v11 = vld [vmem:[#allocation11 + $0x3d0] sm:$0xff]  ;;  %v2412_v16 = vld [vmem:[#allocation14 + $0x3c0] sm:$0xff] }
 0x14e   : > { %1859 = vmatpush.msra.mxu3 %v1788_v19  ;;  %1603 = vmatpush.msra.mxu2 %v1439_v20  ;;  %v1773_v13 = vld [vmem:[#allocation11 + $0xbd0] sm:$0xff]  ;;  %v1764_v20 = vld [vmem:[#allocation11 + $0x958] sm:$0xff] }
 0x14f   : > { %1647 = vmatpush.msra.mxu0 %v1424_v21  ;;  %1667 = vmatpush.msra.mxu1 %v1488_v22  ;;  %v1739_v17 = vld [vmem:[#allocation11 + $0x350] sm:$0xff]  ;;  %v1457_v21 = vld [vmem:[#allocation11 + $0x4c8] sm:$0xff] }
 0x150   : > { %1860 = vmatpush.msra.mxu3 %v1786_v24  ;;  %1604 = vmatpush.msra.mxu2 %v1435_v26  ;;  %v1771_v19 = vld [vmem:[#allocation11 + $0xb50] sm:$0xff]  ;;  %v9284_v26 = vpack.i.bf16 %v10311_v54, %v2412_v16  ;;  %v2045_v54 = vld [vmem:[#allocation11 + $0xe68] sm:$0xff] }
 0x151   : > { %1648 = vmatpush.msra.mxu0 %v1420_v27  ;;  %1668 = vmatpush.msra.mxu1 %v1484_v28  ;;  %v1737_v22 = vld [vmem:[#allocation11 + $0x2d0] sm:$0xff]  ;;  %v1762_v27 = vld [vmem:[#allocation11 + $0x8d8] sm:$0xff]  ;;  %v1453_v28 = vld [vmem:[#allocation11 + $0x448] sm:$0xff] }
 0x152   : > { %1861 = vmatpush.msra.mxu3 %v1784_v29  ;;  %1649 = vmatmul.f32.vlgmr.msra.gmra.mxu0 %v10279_v18  ;;  %v1769_v24 = vld [vmem:[#allocation11 + $0xad0] sm:$0xff]  ;;  %v2396_v16 = vld [vmem:[#allocation14 + $0x1c0] sm:$0xff] }
 0x153   : > { %1669 = vmatmul.f32.vlgmr.msra.gmra.mxu1 %v10282_v35  ;;  %1798 = vmatpush.msrb.mxu0 %v1757_v30  ;;  %v1783_v35 = vld [vmem:[#allocation11 + $0xe50] sm:$0xff]  ;;  %v2404_v30 = vld [vmem:[#allocation14 + $0x2c0] sm:$0xff] }
 0x154   : > { %1818 = vmatpush.msrb.mxu1 %v1789_v31  ;;  %1605 = vmatpush.msra.mxu2 %v1431_v32  ;;  %v1735_v29 = vld [vmem:[#allocation11 + $0x250] sm:$0xff] }
 0x155   : > { %1862 = vmatpush.msra.mxu3 %v1782_v34  ;;  %1799 = vmatpush.msrb.mxu0 %v1755_v36  ;;  %v10321_v31 = vld [vmem:[#allocation14 + $0x2c8] sm:$0xff]  ;;  %v1760_v34 = vld [vmem:[#allocation11 + $0x858] sm:$0xff] }
 0x156   : > { %1819 = vmatpush.msrb.mxu1 %v1787_v37  ;;  %1606 = vmatpush.msra.mxu2 %v1427_v33  ;;  %v1767_v32 = vld [vmem:[#allocation11 + $0xa50] sm:$0xff]  ;;  %v1449_v36 = vld [vmem:[#allocation11 + $0x3c8] sm:$0xff] }
 0x157   : > { %1863 = vmatpush.msra.mxu3 %v1780_v38  ;;  %1800 = vmatpush.msrb.mxu0 %v1753_v63  ;;  %v1733_v37 = vld [vmem:[#allocation11 + $0x1d0] sm:$0xff]  ;;  %v9314_v38 = vpack.i.bf16 %v10321_v31, %v2404_v30  ;;  %v2051_v63 = vld [vmem:[#allocation11 + $0xfe8] sm:$0xff] }
 0x158   : > { %1820 = vmatpush.msrb.mxu1 %v1785_v39  ;;  %1607 = vmatpush.msra.mxu2 %v1423_v40  ;;  %v1765_v33 = vld [vmem:[#allocation11 + $0x9d0] sm:$0xff]  ;;  %v1445_v39 = vld [vmem:[#allocation11 + $0x348] sm:$0xff] }
 0x159   : > { %1864 = vmatpush.msra.mxu3 %v1778_v41  ;;  %1801 = vmatpush.msrb.mxu0 %v1751_v42  ;;  %v1731_v40 = vld [vmem:[#allocation11 + $0x150] sm:$0xff]  ;;  %v2033_v30 = vld [vmem:[#allocation11 + $0xb68] sm:$0xff] }
 0x15a   : > { %1821 = vmatpush.msrb.mxu1 %v1783_v35  ;;  %1608 = vmatpush.msra.mxu2 %v1419_v45  ;;  %v10325_v41 = vld [vmem:[#allocation14 + $0x288] sm:$0xff] }
 0x15b   : > { %1865 = vmatpush.msra.mxu3 %v1776_v47  ;;  %1609 = vmatmul.f32.vlgmr.msra.gmra.mxu2 %v10279_v18  ;;  %v1763_v42 = vld [vmem:[#allocation11 + $0x950] sm:$0xff]  ;;  %v1441_v35 = vld [vmem:[#allocation11 + $0x2c8] sm:$0xff] }
 0x15c   : > { %1673 = vmatpush.msrb.mxu2 %v1481_v59  ;;  %1802 = vmatpush.msrb.mxu0 %v1749_v48  ;;  %v1729_v45 = vld [vmem:[#allocation11 + $0xd0] sm:$0xff]  ;;  %v2047_v59 = vld [vmem:[#allocation11 + $0xee8] sm:$0xff]  ;;  %v9309_v48 = vpack.i.bf16 %v10325_v41, %v10315_v5 }
 0x15d   : > { %1822 = vmatpush.msrb.mxu1 %v1781_v50  ;;  %9290 = vrot.lane.b32.xlu1 %v9289_v49, %s9995_s28  ;;  %v1761_v47 = vld [vmem:[#allocation11 + $0x8d0] sm:$0xff]  ;;  %v1437_v49 = vld [vmem:[#allocation11 + $0x248] sm:$0xff] }
 0x15e   : > { %1866 = vmatpush.msra.mxu3 %v1774_v51  ;;  %1674 = vmatpush.msrb.mxu2 %v1477_v52  ;;  %v1727_v50 = vld [vmem:[#allocation11 + $0x50] sm:$0xff]  ;;  %v2400_v52 = vld [vmem:[#allocation14 + $0x240] sm:$0xff] }
 0x15f   : > { %1803 = vmatpush.msrb.mxu0 %v1747_v55  ;;  %1823 = vmatpush.msrb.mxu1 %v1779_v56  ;;  %v1759_v51 = vld [vmem:[#allocation11 + $0x850] sm:$0xff]  ;;  %v1904_v55 = vld [vmem:[#allocation11 + $0x7e0] sm:$0xff]  ;;  %v1429_v5 = vld [vmem:[#allocation11 + $0x148] sm:$0xff] }
 0x160   : > { %1867 = vmatpush.msra.mxu3 %v1772_v58  ;;  %1675 = vmatpush.msrb.mxu2 %v1473_v60  ;;  %v10331_v53 = vld [vmem:[#allocation14 + $0x248] sm:$0xff]  ;;  %v1920_v56 = vld [vmem:[#allocation11 + $0xfe0] sm:$0xff] }
 0x161   : > { %1804 = vmatpush.msrb.mxu0 %v1745_v62  ;;  %1824 = vmatpush.msrb.mxu1 %v1777_v0  ;;  %v1433_v58 = vld [vmem:[#allocation11 + $0x1c8] sm:$0xff]  ;;  %v9329_v60 = vpack.i.bf16 %v10331_v53, %v2400_v52  ;;  %v1903_v0 = vld [vmem:[#allocation11 + $0x760] sm:$0xff] }
 0x162   : > { %9280 = vrot.lane.b32.xlu0 %v9279_v2, %s9995_s28  ;;  %1868 = vmatpush.msra.mxu3 %v1770_v3  ;;  %v2043_v62 = vld [vmem:[#allocation11 + $0xde8] sm:$0xff]  ;;  %v1919_v2 = vld [vmem:[#allocation11 + $0xf60] sm:$0xff] }
 0x163   : > { %1676 = vmatpush.msrb.mxu2 %v1469_v6  ;;  %1805 = vmatpush.msrb.mxu0 %v1743_v61  ;;  %v10337_v3 = vld [vmem:[#allocation14 + $0x208] sm:$0xff]  ;;  %v1902_v61 = vld [vmem:[#allocation11 + $0x6e0] sm:$0xff] }
 0x164   : > { %1825 = vmatpush.msrb.mxu1 %v1775_v8  ;;  %1869 = vmatpush.msra.mxu3 %v1768_v9  ;;  %v2041_v6 = vld [vmem:[#allocation11 + $0xd68] sm:$0xff]  ;;  %v1918_v8 = vld [vmem:[#allocation11 + $0xee0] sm:$0xff] }
 0x165   : > { %1677 = vmatpush.msrb.mxu2 %v1465_v10  ;;  %1806 = vmatpush.msrb.mxu0 %v1741_v11  ;;  %v10340_v9 = vld [vmem:[#allocation14 + $0x340] sm:$0xff]  ;;  %v9324_v11 = vpack.i.bf16 %v10337_v3, %v10325_v41 }
 0x166   : > { %1826 = vmatpush.msrb.mxu1 %v1773_v13  ;;  %9295 = vrot.lane.b32.xlu1 %v9294_v12, %s9995_s28  ;;  %v1425_v10 = vld [vmem:[#allocation11 + $0xc8] sm:$0xff]  ;;  %v1901_v12 = vld [vmem:[#allocation11 + $0x660] sm:$0xff] }
 0x167   : > { %1870 = vmatpush.msra.mxu3 %v1766_v14  ;;  %1678 = vmatpush.msrb.mxu2 %v1461_v15  ;;  %v1917_v13 = vld [vmem:[#allocation11 + $0xe60] sm:$0xff]  ;;  %v1421_v14 = vld [vmem:[#allocation11 + $0x48] sm:$0xff]  ;;  %v9299_v15 = vpack.i.bf16 %v10307_v44, %v10340_v9 }
 0x168   : > { %1807 = vmatpush.msrb.mxu0 %v1739_v17  ;;  %1827 = vmatpush.msrb.mxu1 %v1771_v19  ;;  %v10346_v17 = vld [vmem:[#allocation14 + $0x1c8] sm:$0xff]  ;;  %v10361_v41 = vld [vmem:[#allocation14 + $0x140] sm:$0xff] }
 0x169   : > { %1871 = vmatpush.msra.mxu3 %v1764_v20  ;;  %1679 = vmatpush.msrb.mxu2 %v1457_v21  ;;  %v2037_v19 = vld [vmem:[#allocation11 + $0xc68] sm:$0xff]  ;;  %v1900_v20 = vld [vmem:[#allocation11 + $0x5e0] sm:$0xff]  ;;  %v1758_v21 = vld [vmem:[#allocation11 + $0x7d8] sm:$0xff] }
 0x16a   : > { %1808 = vmatpush.msrb.mxu0 %v1737_v22  ;;  %1828 = vmatpush.msrb.mxu1 %v1769_v24  ;;  %v1916_v22 = vld [vmem:[#allocation11 + $0xde0] sm:$0xff]  ;;  %v9344_v24 = vpack.i.bf16 %v10346_v17, %v2396_v16  ;;  %v2035_v44 = vld [vmem:[#allocation11 + $0xbe8] sm:$0xff] }
 0x16b   : > { %9285 = vrot.lane.b32.xlu0 %v9284_v26, %s9995_s28  ;;  %1872 = vmatpush.msra.mxu3 %v1762_v27  ;;  %v1756_v26 = vld [vmem:[#allocation11 + $0x758] sm:$0xff]  ;;  %v1899_v27 = vld [vmem:[#allocation11 + $0x560] sm:$0xff]  ;;  %v2025_v52 = vld [vmem:[#allocation11 + $0x968] sm:$0xff] }
 0x16c   : > { %1680 = vmatpush.msrb.mxu2 %v1453_v28  ;;  %1809 = vmatpush.msrb.mxu0 %v1735_v29  ;;  %v10352_v28 = vld [vmem:[#allocation14 + $0x188] sm:$0xff]  ;;  %v1915_v29 = vld [vmem:[#allocation11 + $0xd60] sm:$0xff] }
 0x16d   : > { %1829 = vmatpush.msrb.mxu1 %v1767_v32  ;;  %1873 = vmatpush.msra.mxu3 %v1760_v34  ;;  %v1754_v32 = vld [vmem:[#allocation11 + $0x6d8] sm:$0xff]  ;;  %v1898_v34 = vld [vmem:[#allocation11 + $0x4e0] sm:$0xff] }
 0x16e   : > { %1681 = vmatpush.msrb.mxu2 %v1449_v36  ;;  %1810 = vmatpush.msrb.mxu0 %v1733_v37  ;;  %v10355_v36 = vld [vmem:[#allocation14 + $0x300] sm:$0xff] }
 0x16f   : > { %1830 = vmatpush.msrb.mxu1 %v1765_v33  ;;  %1874 = vmatmul.f32.vlgmr.msra.gmra.mxu3 %v10285_v1  ;;  %v1914_v37 = vld [vmem:[#allocation11 + $0xce0] sm:$0xff]  ;;  %v9339_v33 = vpack.i.bf16 %v10352_v28, %v10337_v3  ;;  %v3070_v3 = vld [vmem:[#allocation14 + $0x3b0] sm:$0xff] }
 0x170   : > { %2080 = vmatpush.msrb.mxu3 %v2051_v63  ;;  %9315 = vrot.lane.b32.xlu1 %v9314_v38, %s9995_s28  ;;  %v1752_v38 = vld [vmem:[#allocation11 + $0x658] sm:$0xff]  ;;  %v1897_v63 = vld [vmem:[#allocation11 + $0x460] sm:$0xff] }
 0x171   : > { %1682 = vmatpush.msrb.mxu2 %v1445_v39  ;;  %1811 = vmatpush.msrb.mxu0 %v1731_v40  ;;  %v1913_v39 = vld [vmem:[#allocation11 + $0xc60] sm:$0xff]  ;;  %v9304_v40 = vpack.i.bf16 %v10355_v36, %v10321_v31  ;;  %v1748_v31 = vld [vmem:[#allocation11 + $0x558] sm:$0xff] }
 0x172   : > { %1831 = vmatpush.msrb.mxu1 %v1763_v42  ;;  %2081 = vmatpush.msrb.mxu3 %v2049_v43  ;;  %v10363_v42 = vld [vmem:[#allocation14 + $0x148] sm:$0xff]  ;;  %v1907_v16 = vld [vmem:[#allocation11 + $0x960] sm:$0xff] }
 0x173   : > { %1683 = vmatpush.msrb.mxu2 %v1441_v35  ;;  %1812 = vmatpush.msrb.mxu0 %v1729_v45  ;;  %v2029_v43 = vld [vmem:[#allocation11 + $0xa68] sm:$0xff]  ;;  %v1750_v35 = vld [vmem:[#allocation11 + $0x5d8] sm:$0xff]  ;;  %v1896_v45 = vld [vmem:[#allocation11 + $0x3e0] sm:$0xff] }
 0x174   : > { %1832 = vmatpush.msrb.mxu1 %v1761_v47  ;;  %2082 = vmatpush.msrb.mxu3 %v2047_v59  ;;  %v1912_v47 = vld [vmem:[#allocation11 + $0xbe0] sm:$0xff]  ;;  %v2027_v59 = vld [vmem:[#allocation11 + $0x9e8] sm:$0xff] }
 0x175   : > { %9310 = vrot.lane.b32.xlu0 %v9309_v48, %s9995_s28  ;;  %1684 = vmatpush.msrb.mxu2 %v1437_v49  ;;  %v9359_v48 = vpack.i.bf16 %v10363_v42, %v10361_v41  ;;  %v2600_v49 = vld [vmem:[#allocation14 + $0x108] sm:$0xff] }
 0x176   : > { %1813 = vmatpush.msrb.mxu0 %v1727_v50  ;;  %1833 = vmatpush.msrb.mxu1 %v1759_v51  ;;  %v1895_v50 = vld [vmem:[#allocation11 + $0x360] sm:$0xff] }
 0x177   : > { %2083 = vmatpush.msrb.mxu3 %v2045_v54  ;;  %1814 = vmatmul.f32.vlgmr.msrb.gmra.mxu0 %v10287_v4  ;;  %v1911_v51 = vld [vmem:[#allocation11 + $0xb60] sm:$0xff]  ;;  %v1746_v54 = vld [vmem:[#allocation11 + $0x4d8] sm:$0xff] }
 0x178   : > { %1834 = vmatmul.f32.vlgmr.msrb.gmra.mxu1 %v10285_v1  ;;  %1928 = vmatpush.msra.mxu0 %v1904_v55  ;;  %v2039_v1 = vld [vmem:[#allocation11 + $0xce8] sm:$0xff]  ;;  %v1894_v55 = vld [vmem:[#allocation11 + $0x2e0] sm:$0xff] }
 0x179   : > { %1948 = vmatpush.msra.mxu1 %v1920_v56  ;;  %1685 = vmatpush.msrb.mxu2 %v1433_v58  ;;  %v1910_v56 = vld [vmem:[#allocation11 + $0xae0] sm:$0xff]  ;;  %v9354_v58 = vpack.i.bf16 %v2600_v49, %v10352_v28 }
 0x17a   : > { %2084 = vmatpush.msrb.mxu3 %v2043_v62  ;;  %9330 = vrot.lane.b32.xlu1 %v9329_v60, %s9995_s28  ;;  %v10371_v60 = vld [vmem:[#allocation14 + $0x280] sm:$0xff] }
 0x17b   : > { %1929 = vmatpush.msra.mxu0 %v1903_v0  ;;  %1949 = vmatpush.msra.mxu1 %v1919_v2  ;;  %v2023_v62 = vld [vmem:[#allocation11 + $0x8e8] sm:$0xff]  ;;  %v1744_v0 = vld [vmem:[#allocation11 + $0x458] sm:$0xff]  ;;  %v1893_v2 = vld [vmem:[#allocation11 + $0x260] sm:$0xff] }
 0x17c   : > { %1686 = vmatpush.msrb.mxu2 %v1429_v5  ;;  %2085 = vmatpush.msrb.mxu3 %v2041_v6  ;;  %v1909_v5 = vld [vmem:[#allocation11 + $0xa60] sm:$0xff]  ;;  %v2021_v6 = vld [vmem:[#allocation11 + $0x868] sm:$0xff] }
 0x17d   : > { %1930 = vmatpush.msra.mxu0 %v1902_v61  ;;  %1950 = vmatpush.msra.mxu1 %v1918_v8  ;;  %v9319_v61 = vpack.i.bf16 %v10371_v60, %v10331_v53  ;;  %v1742_v8 = vld [vmem:[#allocation11 + $0x3d8] sm:$0xff]  ;;  %v1891_v53 = vld [vmem:[#allocation11 + $0x160] sm:$0xff] }
 0x17e   : > { %1687 = vmatpush.msrb.mxu2 %v1425_v10  ;;  %2086 = vmatpush.msrb.mxu3 %v2039_v1  ;;  %v1892_v10 = vld [vmem:[#allocation11 + $0x1e0] sm:$0xff] }
 0x17f   : > { %9325 = vrot.lane.b32.xlu0 %v9324_v11, %s9995_s28  ;;  %1931 = vmatpush.msra.mxu0 %v1901_v12  ;;  %v1908_v1 = vld [vmem:[#allocation11 + $0x9e0] sm:$0xff]  ;;  %v9374_v11 = vpack.i.bf16 %v3070_v3, %v2600_v49  ;;  %v2183_v12 = vld [vmem:[#allocation11 + $0xff8] sm:$0xff]  ;;  %v2017_v3 = vld [vmem:[#allocation11 + $0x768] sm:$0xff] }
 0x180   : > { %1951 = vmatpush.msra.mxu1 %v1917_v13  ;;  %1688 = vmatpush.msrb.mxu2 %v1421_v14  ;;  %v1740_v13 = vld [vmem:[#allocation11 + $0x358] sm:$0xff]  ;;  %v10377_v14 = vld [vmem:[#allocation14 + $0x100] sm:$0xff] }
 0x181   : > { %2087 = vmatpush.msrb.mxu3 %v2037_v19  ;;  %9300 = vrot.lane.b32.xlu2 %v9299_v15, %s9995_s28  ;;  %v10379_v15 = vld [vmem:[#allocation14 + $0xc8] sm:$0xff]  ;;  %v2182_v19 = vld [vmem:[#allocation11 + $0xf78] sm:$0xff]  ;;  %v10385_v28 = vld [vmem:[#allocation14 + $0x200] sm:$0xff] }
 0x182   : > { %1689 = vmatmul.f32.vlgmr.msrb.gmra.mxu2 %v10279_v18  ;;  %1932 = vmatpush.msra.mxu0 %v1900_v20  ;;  %v2031_v18 = vld [vmem:[#allocation11 + $0xae8] sm:$0xff]  ;;  %v1738_v20 = vld [vmem:[#allocation11 + $0x2d8] sm:$0xff] }
 0x183   : > { %1838 = vmatpush.msra.mxu2 %v1758_v21  ;;  %1952 = vmatpush.msra.mxu1 %v1916_v22  ;;  %v1890_v21 = vld [vmem:[#allocation11 + $0xe0] sm:$0xff] }
 0x184   : > { %2088 = vmatpush.msrb.mxu3 %v2035_v44  ;;  %9345 = vrot.lane.b32.xlu1 %v9344_v24, %s9995_s28  ;;  %v1906_v22 = vld [vmem:[#allocation11 + $0x8e0] sm:$0xff]  ;;  %v9369_v24 = vpack.i.bf16 %v10377_v14, %v10379_v15  ;;  %v2181_v44 = vld [vmem:[#allocation11 + $0xef8] sm:$0xff] }
 0x185   : > { %1839 = vmatpush.msra.mxu2 %v1756_v26  ;;  %1933 = vmatpush.msra.mxu0 %v1899_v27  ;;  %v1736_v26 = vld [vmem:[#allocation11 + $0x258] sm:$0xff]  ;;  %v1889_v27 = vld [vmem:[#allocation11 + $0x60] sm:$0xff] }
 0x186   : > { %1953 = vmatpush.msra.mxu1 %v1915_v29  ;;  %2089 = vmatpush.msrb.mxu3 %v2033_v30  ;;  %v1905_v29 = vld [vmem:[#allocation11 + $0x860] sm:$0xff]  ;;  %v2180_v30 = vld [vmem:[#allocation11 + $0xe78] sm:$0xff] }
 0x187   : > { %1840 = vmatpush.msra.mxu2 %v1754_v32  ;;  %1934 = vmatpush.msra.mxu0 %v1898_v34  ;;  %v3068_v32 = vld [vmem:[#allocation14 + $0x370] sm:$0xff]  ;;  %v3069_v34 = vld [vmem:[#allocation14 + $0x378] sm:$0xff] }
 0x188   : > { %1954 = vmatpush.msra.mxu1 %v1914_v37  ;;  %2090 = vmatpush.msrb.mxu3 %v2031_v18  ;;  %v2020_v37 = vld [vmem:[#allocation11 + $0x7f0] sm:$0xff] }
 0x189   : > { %9340 = vrot.lane.b32.xlu0 %v9339_v33, %s9995_s28  ;;  %1841 = vmatpush.msra.mxu2 %v1752_v38  ;;  %v2052_v18 = vld [vmem:[#allocation11 + $0xff0] sm:$0xff]  ;;  %v9334_v33 = vpack.i.bf16 %v10385_v28, %v10346_v17  ;;  %v1734_v38 = vld [vmem:[#allocation11 + $0x1d8] sm:$0xff] }
 0x18a   : > { %1935 = vmatpush.msra.mxu0 %v1897_v63  ;;  %1955 = vmatpush.msra.mxu1 %v1913_v39  ;;  %v2179_v63 = vld [vmem:[#allocation11 + $0xdf8] sm:$0xff]  ;;  %v2018_v39 = vld [vmem:[#allocation11 + $0x770] sm:$0xff] }
 0x18b   : > { %2091 = vmatpush.msrb.mxu3 %v2029_v43  ;;  %9305 = vrot.lane.b32.xlu2 %v9304_v40, %s9995_s28  ;;  %v9389_v40 = vpack.i.bf16 %v3069_v34, %v3068_v32  ;;  %v2050_v43 = vld [vmem:[#allocation11 + $0xf70] sm:$0xff] }
 0x18c   : > { %1842 = vmatpush.msra.mxu2 %v1750_v35  ;;  %1936 = vmatpush.msra.mxu0 %v1896_v45  ;;  %v1732_v35 = vld [vmem:[#allocation11 + $0x158] sm:$0xff]  ;;  %v2016_v17 = vld [vmem:[#allocation11 + $0x6f0] sm:$0xff] }
 0x18d   : > { %1956 = vmatpush.msra.mxu1 %v1912_v47  ;;  %2092 = vmatpush.msrb.mxu3 %v2027_v59  ;;  %v2178_v45 = vld [vmem:[#allocation11 + $0xd78] sm:$0xff]  ;;  %v10393_v47 = vld [vmem:[#allocation14 + $0xc0] sm:$0xff]  ;;  %v2048_v59 = vld [vmem:[#allocation11 + $0xef0] sm:$0xff] }
 0x18e   : > { %9360 = vrot.lane.b32.xlu1 %v9359_v48, %s9995_s28  ;;  %1843 = vmatpush.msra.mxu2 %v1748_v31  ;;  %v2014_v48 = vld [vmem:[#allocation11 + $0x670] sm:$0xff]  ;;  %v9384_v49 = vpack.i.bf16 %v10379_v15, %v10393_v47 }
 0x18f   : > { %1937 = vmatpush.msra.mxu0 %v1895_v50  ;;  %1957 = vmatpush.msra.mxu1 %v1911_v51  ;;  %v2046_v31 = vld [vmem:[#allocation11 + $0xe70] sm:$0xff]  ;;  %v10398_v50 = vld [vmem:[#allocation14 + $0x180] sm:$0xff]  ;;  %v1728_v51 = vld [vmem:[#allocation11 + $0x58] sm:$0xff] }
 0x190   : > { %2093 = vmatpush.msrb.mxu3 %v2025_v52  ;;  %1844 = vmatpush.msra.mxu2 %v1746_v54  ;;  %v2176_v52 = vld [vmem:[#allocation11 + $0xc78] sm:$0xff]  ;;  %v2019_v54 = vld [vmem:[#allocation11 + $0x7e8] sm:$0xff]  ;;  %v2006_v15 = vld [vmem:[#allocation11 + $0x470] sm:$0xff] }
 0x191   : > { %1938 = vmatpush.msra.mxu0 %v1894_v55  ;;  %1958 = vmatpush.msra.mxu1 %v1910_v56  ;;  %v2012_v55 = vld [vmem:[#allocation11 + $0x5f0] sm:$0xff]  ;;  %v9349_v56 = vpack.i.bf16 %v10398_v50, %v10363_v42 }
 0x192   : > { %2094 = vmatpush.msrb.mxu3 %v2023_v62  ;;  %9355 = vrot.lane.b32.xlu0 %v9354_v58, %s9995_s28  ;;  %v10402_v58 = vld [vmem:[#allocation14 + $0x8] sm:$0xff]  ;;  %v10404_v62 = vld [vmem:[#allocation14 + $0x338] sm:$0xff] }
 0x193   : > { %1845 = vmatpush.msra.mxu2 %v1744_v0  ;;  %1939 = vmatpush.msra.mxu0 %v1893_v2  ;;  %v2044_v0 = vld [vmem:[#allocation11 + $0xdf0] sm:$0xff]  ;;  %v2175_v2 = vld [vmem:[#allocation11 + $0xbf8] sm:$0xff]  ;;  %v9404_v42 = vpack.i.bf16 %v10402_v58, %v10404_v62 }
 0x194   : > { %1959 = vmatpush.msra.mxu1 %v1909_v5  ;;  %2095 = vmatpush.msrb.mxu3 %v2021_v6  ;;  %v2010_v5 = vld [vmem:[#allocation11 + $0x570] sm:$0xff] }
 0x195   : > { %9320 = vrot.lane.b32.xlu2 %v9319_v61, %s9995_s28  ;;  %1846 = vmatpush.msra.mxu2 %v1742_v8  ;;  %v2042_v6 = vld [vmem:[#allocation11 + $0xd70] sm:$0xff]  ;;  %v2174_v61 = vld [vmem:[#allocation11 + $0xb78] sm:$0xff] }
 0x196   : > { %1940 = vmatpush.msra.mxu0 %v1892_v10  ;;  %1960 = vmatpush.msra.mxu1 %v1908_v1  ;;  %v10411_v8 = vld [vmem:[#allocation14 + $0x88] sm:$0xff]  ;;  %v3066_v10 = vld [vmem:[#allocation14 + $0x330] sm:$0xff] }
 0x197   : > { %2096 = vmatmul.f32.vlgmr.msrb.gmra.mxu3 %v10302_v7  ;;  %9375 = vrot.lane.b32.xlu1 %v9374_v11, %s9995_s28  ;;  %v2015_v1 = vld [vmem:[#allocation11 + $0x6e8] sm:$0xff]  ;;  %v2040_v11 = vld [vmem:[#allocation11 + $0xcf0] sm:$0xff] }
 0x198   : > { %2211 = vmatpush.msra.mxu3 %v2183_v12  ;;  %1847 = vmatpush.msra.mxu2 %v1740_v13  ;;  %v2173_v12 = vld [vmem:[#allocation11 + $0xaf8] sm:$0xff]  ;;  %v2013_v13 = vld [vmem:[#allocation11 + $0x668] sm:$0xff]  ;;  %v2002_v32 = vld [vmem:[#allocation11 + $0x370] sm:$0xff] }
 0x199   : > { %1941 = vmatpush.msra.mxu0 %v1891_v53  ;;  %1961 = vmatpush.msra.mxu1 %v1907_v16  ;;  %v9399_v53 = vpack.i.bf16 %v3066_v10, %v10411_v8  ;;  %v3072_v16 = vld [vmem:[#allocation14 + $0x3f0] sm:$0xff]  ;;  %v10436_v10 = vld [vmem:[#allocation14 + $0x40] sm:$0xff] }
 0x19a   : > { %2212 = vmatpush.msra.mxu3 %v2182_v19  ;;  %1848 = vmatpush.msra.mxu2 %v1738_v20  ;;  %v10415_v19 = vld [vmem:[#allocation14 + $0x3f8] sm:$0xff]  ;;  %v2038_v20 = vld [vmem:[#allocation11 + $0xc70] sm:$0xff] }
 0x19b   : > { %1942 = vmatpush.msra.mxu0 %v1890_v21  ;;  %1962 = vmatpush.msra.mxu1 %v1906_v22  ;;  %v2172_v21 = vld [vmem:[#allocation11 + $0xa78] sm:$0xff]  ;;  %v2011_v22 = vld [vmem:[#allocation11 + $0x5e8] sm:$0xff] }
 0x19c   : > { %2213 = vmatpush.msra.mxu3 %v2181_v44  ;;  %9370 = vrot.lane.b32.xlu0 %v9369_v24, %s9995_s28  ;;  %v10417_v24 = vld [vmem:[#allocation14] sm:$0xff]  ;;  %v2004_v44 = vld [vmem:[#allocation11 + $0x3f0] sm:$0xff] }
 0x19d   : > { %1849 = vmatpush.msra.mxu2 %v1736_v26  ;;  %1943 = vmatpush.msra.mxu0 %v1889_v27  ;;  %v2036_v26 = vld [vmem:[#allocation11 + $0xbf0] sm:$0xff]  ;;  %v9364_v27 = vpack.i.bf16 %v10415_v19, %v3072_v16  ;;  %v9419_v34 = vpack.i.bf16 %v10402_v58, %v10417_v24  ;;  %v10430_v58 = vld [vmem:[#allocation14 + $0x80] sm:$0xff]  ;;  %v2164_v16 = vld [vmem:[#allocation11 + $0x678] sm:$0xff] }
 0x19e   : > { %1963 = vmatpush.msra.mxu1 %v1905_v29  ;;  %2214 = vmatpush.msra.mxu3 %v2180_v30  ;;  %v2171_v29 = vld [vmem:[#allocation11 + $0x9f8] sm:$0xff]  ;;  %v2009_v30 = vld [vmem:[#allocation11 + $0x568] sm:$0xff] }
 0x19f   : > { %1944 = vmatmul.f32.vlgmr.msra.gmra.mxu0 %v10293_v23  ;;  %1964 = vmatmul.f32.vlgmr.msra.gmra.mxu1 %v10295_v25  ;;  %v1730_v23 = vld [vmem:[#allocation11 + $0xd8] sm:$0xff] }
 0x1a0   : > { %2100 = vmatpush.msrb.mxu0 %v2020_v37  ;;  %2120 = vmatpush.msrb.mxu1 %v2052_v18  ;;  %v2177_v25 = vld [vmem:[#allocation11 + $0xcf8] sm:$0xff]  ;;  %v2034_v37 = vld [vmem:[#allocation11 + $0xb70] sm:$0xff] }
 0x1a1   : > { %9335 = vrot.lane.b32.xlu2 %v9334_v33, %s9995_s28  ;;  %1850 = vmatpush.msra.mxu2 %v1734_v38  ;;  %v2170_v18 = vld [vmem:[#allocation11 + $0x978] sm:$0xff]  ;;  %v2007_v33 = vld [vmem:[#allocation11 + $0x4e8] sm:$0xff]  ;;  %v2000_v38 = vld [vmem:[#allocation11 + $0x2f0] sm:$0xff] }
 0x1a2   : > { %2215 = vmatpush.msra.mxu3 %v2179_v63  ;;  %2101 = vmatpush.msrb.mxu0 %v2018_v39  ;;  %v2032_v63 = vld [vmem:[#allocation11 + $0xaf0] sm:$0xff]  ;;  %v2169_v39 = vld [vmem:[#allocation11 + $0x8f8] sm:$0xff] }
 0x1a3   : > { %2121 = vmatpush.msrb.mxu1 %v2050_v43  ;;  %9390 = vrot.lane.b32.xlu1 %v9389_v40, %s9995_s28  ;;  %v2005_v40 = vld [vmem:[#allocation11 + $0x468] sm:$0xff]  ;;  %v10425_v43 = vld [vmem:[#allocation14 + $0x3b8] sm:$0xff] }
 0x1a4   : > { %1851 = vmatpush.msra.mxu2 %v1732_v35  ;;  %2216 = vmatpush.msra.mxu3 %v2178_v45  ;;  %v1998_v35 = vld [vmem:[#allocation11 + $0x270] sm:$0xff] }
 0x1a5   : > { %2102 = vmatpush.msrb.mxu0 %v2016_v17  ;;  %2122 = vmatpush.msrb.mxu1 %v2048_v59  ;;  %v2030_v45 = vld [vmem:[#allocation11 + $0xa70] sm:$0xff]  ;;  %v2168_v17 = vld [vmem:[#allocation11 + $0x878] sm:$0xff]  ;;  %v2003_v59 = vld [vmem:[#allocation11 + $0x3e8] sm:$0xff] }
 0x1a6   : > { %1852 = vmatpush.msra.mxu2 %v1730_v23  ;;  %2217 = vmatpush.msra.mxu3 %v2177_v25  ;;  %v1996_v23 = vld [vmem:[#allocation11 + $0x1f0] sm:$0xff] }
 0x1a7   : > { %2103 = vmatpush.msrb.mxu0 %v2014_v48  ;;  %2123 = vmatpush.msrb.mxu1 %v2046_v31  ;;  %v2028_v25 = vld [vmem:[#allocation11 + $0x9f0] sm:$0xff]  ;;  %v9379_v48 = vpack.i.bf16 %v10411_v8, %v10425_v43  ;;  %v2001_v31 = vld [vmem:[#allocation11 + $0x368] sm:$0xff] }
 0x1a8   : > { %9385 = vrot.lane.b32.xlu0 %v9384_v49, %s9995_s28  ;;  %1853 = vmatpush.msra.mxu2 %v1728_v51  ;;  %v1994_v49 = vld [vmem:[#allocation11 + $0x170] sm:$0xff]  ;;  %v1991_v8 = vld [vmem:[#allocation11 + $0xe8] sm:$0xff] }
 0x1a9   : > { %2218 = vmatpush.msra.mxu3 %v2176_v52  ;;  %1854 = vmatmul.f32.vlgmr.msra.gmra.mxu2 %v10287_v4  ;;  %v2008_v4 = vld [vmem:[#allocation11 + $0x4f0] sm:$0xff] }
 0x1aa   : > { %2060 = vmatpush.msrb.mxu2 %v2019_v54  ;;  %2104 = vmatpush.msrb.mxu0 %v2012_v55  ;;  %v2188_v51 = vld.sshfl [vmem:[#allocation1 + $0x8] sm:$0xff pattern:$0x73625140]  ;;  %v1999_v54 = vld [vmem:[#allocation11 + $0x2e8] sm:$0xff] }
 0x1ab   : > { %2124 = vmatpush.msrb.mxu1 %v2044_v0  ;;  %9350 = vrot.lane.b32.xlu2 %v9349_v56, %s9995_s28  ;;  %v2026_v52 = vld [vmem:[#allocation11 + $0x970] sm:$0xff] }
 0x1ac   : > { %2219 = vmatpush.msra.mxu3 %v2175_v2  ;;  %2061 = vmatpush.msrb.mxu2 %v2017_v3  ;;  %v1992_v55 = vld [vmem:[#allocation11 + $0xf0] sm:$0xff]  ;;  %v1997_v2 = vld [vmem:[#allocation11 + $0x268] sm:$0xff] }
 0x1ad   : > { %2105 = vmatpush.msrb.mxu0 %v2010_v5  ;;  %2125 = vmatpush.msrb.mxu1 %v2042_v6  ;;  %v2024_v56 = vld [vmem:[#allocation11 + $0x8f0] sm:$0xff]  ;;  %v1995_v6 = vld [vmem:[#allocation11 + $0x1e8] sm:$0xff] }
 0x1ae   : > { %9405 = vrot.lane.b32.xlu1 %v9404_v42, %s9995_s28  ;;  %2220 = vmatpush.msra.mxu3 %v2174_v61  ;;  %v2597_v0 = vld [vmem:[#allocation14 + $0x48] sm:$0xff] }
 0x1af   : > { %2062 = vmatpush.msrb.mxu2 %v2015_v1  ;;  %2106 = vmatpush.msrb.mxu0 %v2008_v4  ;;  %v1990_v3 = vld [vmem:[#allocation11 + $0x70] sm:$0xff]  ;;  %v9394_v42 = vpack.i.bf16 %v10430_v58, %v2597_v0  ;;  %v1993_v61 = vld [vmem:[#allocation11 + $0x168] sm:$0xff]  ;;  %v944_v4 = vpop.f32.mrf.mxu0 }
 0x1b0   : > { %2126 = vmatpush.msrb.mxu1 %v2040_v11  ;;  %2221 = vmatpush.msra.mxu3 %v2173_v12  ;;  %v2022_v5 = vld [vmem:[#allocation11 + $0x870] sm:$0xff]  ;;  %v1989_v1 = vld [vmem:[#allocation11 + $0x68] sm:$0xff]  ;;  %v964_v11 = vpop.f32.mrf.mxu1  ;;  %v2167_v12 = vld [vmem:[#allocation11 + $0x7f8] sm:$0xff] }
 0x1b1   : > { %2063 = vmatpush.msrb.mxu2 %v2013_v13  ;;  %2107 = vmatpush.msrb.mxu0 %v2006_v15  ;;  %v9409_v13 = vpack.i.bf16 %v2597_v0, %v10436_v10  ;;  %v10439_v15 = vpop.f32.mrf.mxu2  ;;  %v10470_v0 = vld [vmem:[#allocation13] ss:$0 sm:$0xff] }
 0x1b2   : > { %2127 = vmatpush.msrb.mxu1 %v2038_v20  ;;  %9400 = vrot.lane.b32.xlu0 %v9399_v53, %s9995_s28  ;;  %v2165_v53 = vld [vmem:[#allocation11 + $0x6f8] sm:$0xff] }
 0x1b3   : > { %2222 = vmatpush.msra.mxu3 %v2172_v21  ;;  %2064 = vmatpush.msrb.mxu2 %v2011_v22  ;;  %v2163_v21 = vld [vmem:[#allocation11 + $0x5f8] sm:$0xff] }
 0x1b4   : > { %2108 = vmatpush.msrb.mxu0 %v2004_v44  ;;  %2128 = vmatpush.msrb.mxu1 %v2036_v26  ;;  %v2162_v26 = vld [vmem:[#allocation11 + $0x578] sm:$0xff] }
 0x1b5   : > { %9365 = vrot.lane.b32.xlu2 %v9364_v27, %s9995_s28  ;;  %2223 = vmatpush.msra.mxu3 %v2171_v29  ;;  %v2161_v29 = vld [vmem:[#allocation11 + $0x4f8] sm:$0xff] }
 0x1b6   : > { %2065 = vmatpush.msrb.mxu2 %v2009_v30  ;;  %2109 = vmatpush.msrb.mxu0 %v2002_v32  ;;  %v2160_v30 = vld [vmem:[#allocation11 + $0x478] sm:$0xff] }
 0x1b7   : > { %2129 = vmatpush.msrb.mxu1 %v2034_v37  ;;  %9420 = vrot.lane.b32.xlu1 %v9419_v34, %s9995_s28  ;;  %v10445_v22 = vpop.f32.mrf.mxu0  ;;  %v2159_v32 = vld [vmem:[#allocation11 + $0x3f8] sm:$0xff] }
 0x1b8   : > { %2224 = vmatpush.msra.mxu3 %v2170_v18  ;;  %2066 = vmatpush.msrb.mxu2 %v2007_v33  ;;  %v1142_v44 = vpop.f32.mrf.mxu1  ;;  %v2158_v33 = vld [vmem:[#allocation11 + $0x378] sm:$0xff] }
 0x1b9   : > { %2110 = vmatpush.msrb.mxu0 %v2000_v38  ;;  %2130 = vmatpush.msrb.mxu1 %v2032_v63 }
 0x1ba   : > { %2225 = vmatpush.msra.mxu3 %v2169_v39  ;;  %2067 = vmatpush.msrb.mxu2 %v2005_v40  ;;  %v1233_v39 = vpop.f32.mrf.mxu3 }
 0x1bb   : > { %2111 = vmatpush.msrb.mxu0 %v1998_v35  ;;  %2131 = vmatpush.msrb.mxu1 %v2030_v45  ;;  %v2157_v35 = vld [vmem:[#allocation11 + $0x2f8] sm:$0xff] }
 0x1bc   : > { %2226 = vmatpush.msra.mxu3 %v2168_v17  ;;  %2068 = vmatpush.msrb.mxu2 %v2003_v59  ;;  %v2156_v45 = vld [vmem:[#allocation11 + $0x278] sm:$0xff] }
 0x1bd   : > { %2112 = vmatpush.msrb.mxu0 %v1996_v23  ;;  %2132 = vmatpush.msrb.mxu1 %v2028_v25  ;;  %v2155_v17 = vld [vmem:[#allocation11 + $0x1f8] sm:$0xff] }
 0x1be   : > { %2227 = vmatmul.f32.vlgmr.msra.gmra.mxu3 %v2188_v51  ;;  %9380 = vrot.lane.b32.xlu2 %v9379_v48, %s9995_s28  ;;  %v2154_v23 = vld [vmem:[#allocation11 + $0x178] sm:$0xff] }
 0x1bf   : > { %2069 = vmatpush.msrb.mxu2 %v2001_v31  ;;  %2113 = vmatpush.msrb.mxu0 %v1994_v49  ;;  %v1333_v37 = vpop.f32.mrf.mxu0  ;;  %v10457_v48 = vld [vmem:[#allocation14 + $0x2f0] sm:$0xff]  ;;  %v10459_v31 = vld [vmem:[#allocation14 + $0x2f8] sm:$0xff] }
 0x1c0   : > { %2133 = vmatpush.msrb.mxu1 %v2026_v52  ;;  %v1353_v18 = vpop.f32.mrf.mxu1  ;;  %v9414_v51 = vpack.i.bf16 %v10459_v31, %v10457_v48 }
 0x1c1   : > { %2070 = vmatpush.msrb.mxu2 %v1999_v54  ;;  %2114 = vmatpush.msrb.mxu0 %v1992_v55  ;;  %v2153_v54 = vld [vmem:[#allocation11 + $0xf8] sm:$0xff] }
 0x1c2   : > { %2134 = vmatpush.msrb.mxu1 %v2024_v56  ;;  %9415 = vrot.lane.b32.xlu0 %v9414_v51, %s9995_s28 }
 0x1c3   : > { %2071 = vmatpush.msrb.mxu2 %v1997_v2  ;;  %2115 = vmatpush.msrb.mxu0 %v1990_v3  ;;  %v965_v2 = vadd.f32 %v964_v11, %v944_v4  ;;  %v10472_v3 = vpop.f32.mrf.mxu3 }
 0x1c4   : > { %2135 = vmatpush.msrb.mxu1 %v2022_v5  ;;  %2116 = vmatmul.f32.vlgmr.msrb.gmra.mxu0 %v10300_v46  ;;  %v2152_v5 = vld [vmem:[#allocation11 + $0x78] sm:$0xff] }
 0x1c5   : > { %2136 = vmatmul.f32.vlgmr.msrb.gmra.mxu1 %v10302_v7  ;;  %2072 = vmatpush.msrb.mxu2 %v1995_v6  ;;  %v2166_v7 = vld [vmem:[#allocation11 + $0x778] sm:$0xff]  ;;  %v2337_v6 = vld [vmem:[#allocation14 + $0x3c0] sm:$0xff] }
 0x1c6   : > { %9395 = vrot.lane.b32.xlu2 %v9394_v42, %s9995_s28  ;;  %2353 = vmatpush.msra.mxu0 %v2337_v6 }
 0x1c7   : > { %2073 = vmatpush.msrb.mxu2 %v1993_v61  ;;  %v1570_v59 = vpop.f32.mrf.mxu0  ;;  %v2336_v61 = vld [vmem:[#allocation14 + $0x380] sm:$0xff] }
 0x1c8   : > { %v1590_v49 = vpop.f32.mrf.mxu1  ;;  %2354 = vmatpush.msra.mxu0 %v2336_v61 }
 0x1c9   : > { %2074 = vmatpush.msrb.mxu2 %v1991_v8  ;;  %v2187_v8 = vld.sshfl [vmem:[#allocation1] sm:$0xff pattern:$0x73625140] }
 0x1ca   : > { %2355 = vmatpush.msra.mxu0 %v10340_v9 }
 0x1cb   : > { %2075 = vmatpush.msrb.mxu2 %v1989_v1 }
 0x1cc   : > { %2076 = vmatmul.f32.vlgmr.msrb.gmra.mxu2 %v10300_v46  ;;  %v1102_v46 = vpop.f32.mrf.mxu2  ;;  %2356 = vmatpush.msra.mxu0 %v10355_v36 }
 0x1cd   : > { %2191 = vmatpush.msra.mxu2 %v2167_v12  ;;  %v1103_v1 = vadd.f32 %v1102_v46, %v10439_v15  ;;  %v967_v12 = vadd.f32 %v10470_v0, %v965_v2  ;;  %v1143_v15 = vadd.f32 %v1142_v44, %v10445_v22 }
 0x1ce   : > { %9410 = vrot.lane.b32.xlu2 %v9409_v13, %s9995_s28 }
 0x1cf   : > { %2192 = vmatpush.msra.mxu2 %v2166_v7  ;;  %v10443_v20 = vpop.permute.xlu1 %9290  ;;  %v10477_v13 = vpop.f32.mrf.mxu0  ;;  %v1145_v44 = vadd.f32 %v1103_v1, %v967_v12  ;;  %v2331_v1 = vld [vmem:[#allocation14 + $0x240] sm:$0xff] }
 0x1d0   : > { %v10489_v46 = vpop.f32.mrf.mxu1 }
 0x1d1   : > { %2193 = vmatpush.msra.mxu2 %v2165_v53  ;;  %v10482_v53 = vld [vmem:[#allocation14 + $0x270] sm:$0xff] }
 0x1d3   : > { %2194 = vmatpush.msra.mxu2 %v2164_v16  ;;  %v10484_v16 = vld [vmem:[#allocation14 + $0x278] sm:$0xff] }
 0x1d4   : > { %v10447_v27 = vpop.permute.xlu0 %9280  ;;  %v1213_v40 = vpop.f32.mrf.mxu2 }
 0x1d5   : > { %2195 = vmatpush.msra.mxu2 %v2163_v21  ;;  %v9282_v42 = vunpack.i.l.bf16 %v10447_v27  ;;  %v9283_v4 = vunpack.i.h.bf16 %v10447_v27  ;;  %v10486_v21 = vld [vmem:[#allocation14 + $0x230] sm:$0xff]  ;;  %v9429_v27 = vpack.i.bf16 %v10484_v16, %v10482_v53  ;;  %v1234_v9 = vadd.f32 %v1233_v39, %v1213_v40 }
 0x1d6   : > { %v1146_v39 = vadd.f32 %v10470_v0, %v1143_v15 }
 0x1d7   : > { %2196 = vmatpush.msra.mxu2 %v2162_v26  ;;  %v1354_v26 = vadd.f32 %v1353_v18, %v1333_v37  ;;  %v1591_v37 = vadd.f32 %v1590_v49, %v1570_v59  ;;  %9430 = vrot.lane.b32.xlu0 %v9429_v27, %s9995_s28  ;;  %v1630_v18 = vpop.f32.mrf.mxu3  ;;  %v10534_v27 = vld [vmem:[#allocation14 + $0x178] sm:$0xff] }
 0x1d8   : > { %v10449_v34 = vpop.permute.xlu1 %9295 }
 0x1d9   : > { %2197 = vmatpush.msra.mxu2 %v2161_v29  ;;  %v10494_v29 = vld [vmem:[#allocation14 + $0x238] sm:$0xff]  ;;  %v1396_v36 = vadd.f32 %v1354_v26, %v1145_v44 }
 0x1da   : > { %v9434_v22 = vpack.i.bf16 %v10494_v29, %v10486_v21 }
 0x1db   : > { %2198 = vmatpush.msra.mxu2 %v2160_v30  ;;  %v10451_v38 = vpop.permute.xlu2 %9300  ;;  %v9293_v30 = vunpack.i.h.bf16 %v10443_v20  ;;  %v1713_v6 = vadd.f32 %v1591_v37, %v1396_v36 }
 0x1dc   : > { %v10463_v52 = vpop.f32.mrf.mxu2  ;;  %9435 = vrot.lane.b32.xlu1 %v9434_v22, %s9995_s28 }
 0x1dd   : > { %2199 = vmatpush.msra.mxu2 %v2159_v32  ;;  %v10453_v63 = vpop.permute.xlu0 %9285  ;;  %v9292_v32 = vunpack.i.l.bf16 %v10443_v20  ;;  %v9302_v20 = vunpack.i.l.bf16 %v10451_v38 }
 0x1de   : > { %v9288_v11 = vunpack.i.h.bf16 %v10453_v63  ;;  %v9287_v7 = vunpack.i.l.bf16 %v10453_v63 }
 0x1df   : > { %2200 = vmatpush.msra.mxu2 %v2158_v33  ;;  %v9297_v33 = vunpack.i.l.bf16 %v10449_v34 }
 0x1e0   : > { %v2540_v51 = vsel %vm556_vm12, %v9287_v7, %v9288_v11 }
 0x1e1   : > { %2201 = vmatpush.msra.mxu2 %v2157_v35  ;;  %2557 = vmatpush.msra.mxu1 %v2540_v51  ;;  %v2539_v2 = vsel %vm556_vm12, %v9293_v30, %v9297_v33 }
 0x1e2   : > { %v10455_v25 = vpop.permute.xlu1 %9315 }
 0x1e3   : > { %2202 = vmatpush.msra.mxu2 %v2156_v45  ;;  %v9303_v45 = vunpack.i.h.bf16 %v10451_v38  ;;  %2558 = vmatpush.msra.mxu1 %v2539_v2  ;;  %v9317_v61 = vunpack.i.l.bf16 %v10455_v25 }
 0x1e4   : > { %v1610_v63 = vpop.f32.mrf.mxu2 }
 0x1e5   : > { %2203 = vmatpush.msra.mxu2 %v2155_v17  ;;  %v10465_v55 = vpop.permute.xlu2 %9305  ;;  %v9298_v17 = vunpack.i.h.bf16 %v10449_v34  ;;  %v1631_v40 = vadd.f32 %v1630_v18, %v1610_v63  ;;  %v2538_v12 = vsel %vm556_vm12, %v9302_v20, %v9303_v45 }
 0x1e6   : > { %v9308_v34 = vunpack.i.h.bf16 %v10465_v55  ;;  %v9307_v38 = vunpack.i.l.bf16 %v10465_v55  ;;  %v10527_v55 = vld [vmem:[#allocation14 + $0x1b8] sm:$0xff]  ;;  %2559 = vmatpush.msra.mxu1 %v2538_v12 }
 0x1e7   : > { %2204 = vmatpush.msra.mxu2 %v2154_v23  ;;  %v10467_v56 = vpop.permute.xlu0 %9310  ;;  %v2333_v23 = vld [vmem:[#allocation14 + $0x2c0] sm:$0xff] }
 0x1e8   : > { %2357 = vmatpush.msra.mxu0 %v2333_v23  ;;  %v9313_v7 = vunpack.i.h.bf16 %v10467_v56 }
 0x1e9   : > { %2205 = vmatpush.msra.mxu2 %v2153_v54  ;;  %v9312_v54 = vunpack.i.l.bf16 %v10467_v56 }
 0x1ea   : > { %2358 = vmatpush.msra.mxu0 %v10371_v60 }
 0x1eb   : > { %2206 = vmatpush.msra.mxu2 %v2152_v5  ;;  %v1236_v5 = vadd.f32 %v1234_v9, %v1146_v39  ;;  %v2537_v63 = vsel %vm556_vm12, %v9308_v34, %v9312_v54  ;;  %v2329_v9 = vld [vmem:[#allocation14 + $0x1c0] sm:$0xff]  ;;  %v10557_v54 = vld [vmem:[#allocation14 + $0xb0] sm:$0xff] }
 0x1ec   : > { %2207 = vmatmul.f32.vlgmr.msra.gmra.mxu2 %v2187_v8  ;;  %v10499_v35 = vpop.permute.xlu1 %9330  ;;  %2359 = vmatpush.msra.mxu0 %v2331_v1 }
 0x1ed   : > { %2691 = vmatpush.msrb.mxu2 %v9282_v42  ;;  %v9318_v42 = vunpack.i.h.bf16 %v10455_v25  ;;  %v1714_v11 = vadd.f32 %v1631_v40, %v1236_v5  ;;  %v10532_v25 = vld [vmem:[#allocation14 + $0x170] sm:$0xff]  ;;  %2560 = vmatpush.msra.mxu1 %v2537_v63  ;;  %v9333_v18 = vunpack.i.h.bf16 %v10499_v35  ;;  %v9332_v45 = vunpack.i.l.bf16 %v10499_v35 }
 0x1ee   : > { %v9449_v33 = vpack.i.bf16 %v10534_v27, %v10532_v25  ;;  %2360 = vmatpush.msra.mxu0 %v10385_v28 }
 0x1ef   : > { %2692 = vmatpush.msrb.mxu2 %v9283_v4  ;;  %v9321_v59 = vpop.permute.xlu2 %9320  ;;  %v10525_v4 = vld [vmem:[#allocation14 + $0x1b0] sm:$0xff]  ;;  %v2536_v37 = vsel %vm556_vm12, %v9317_v61, %v9318_v42 }
 0x1f0   : > { %v9323_v15 = vunpack.i.h.bf16 %v9321_v59  ;;  %v9444_v26 = vpack.i.bf16 %v10527_v55, %v10525_v4  ;;  %v9322_v56 = vunpack.i.l.bf16 %v9321_v59  ;;  %9450 = vrot.lane.b32.xlu1 %v9449_v33, %s9995_s28  ;;  %2361 = vmatpush.msra.mxu0 %v2329_v9  ;;  %v10585_v9 = vld [vmem:[#allocation14 + $0x38] sm:$0xff] }
 0x1f1   : > { %v10513_v49 = vpop.permute.xlu0 %9325  ;;  %2693 = vmatpush.msrb.mxu2 %v9292_v32  ;;  %2561 = vmatpush.msra.mxu1 %v2536_v37 }
 0x1f2   : > { %v9327_v30 = vunpack.i.l.bf16 %v10513_v49  ;;  %9445 = vrot.lane.b32.xlu0 %v9444_v26, %s9995_s28  ;;  %v9328_v20 = vunpack.i.h.bf16 %v10513_v49  ;;  %2362 = vmatpush.msra.mxu0 %v10398_v50  ;;  %v10553_v49 = vld [vmem:[#allocation14 + $0xf0] sm:$0xff]  ;;  %v10562_v50 = vld [vmem:[#allocation14 + $0xb8] sm:$0xff] }
 0x1f3   : > { %2694 = vmatpush.msrb.mxu2 %v9298_v17  ;;  %v10547_v17 = vmax.f32 %v1713_v6, 0.0  ;;  %v2534_v6 = vsel %vm556_vm12, %v9332_v45, %v9333_v18  ;;  %v9464_v1 = vpack.i.bf16 %v10562_v50, %v10557_v54  ;;  %v3063_v26 = vld [vmem:[#allocation14 + $0x2b8] sm:$0xff] }
 0x1f4   : > { %v1815_v8 = vpop.f32.mrf.mxu0  ;;  %v2535_v28 = vsel %vm556_vm12, %v9323_v15, %v9327_v30  ;;  %2363 = vmatpush.msra.mxu0 %v10361_v41 }
 0x1f5   : > { %v1835_v60 = vpop.f32.mrf.mxu1  ;;  %2695 = vmatpush.msrb.mxu2 %v9307_v38  ;;  %2562 = vmatpush.msra.mxu1 %v2535_v28  ;;  %v10555_v38 = vld [vmem:[#allocation14 + $0xf8] sm:$0xff]  ;;  %v2235_v42 = vrot.slane %v10547_v17, 1 }
 0x1f6   : > { %v1836_v32 = vadd.f32 %v1835_v60, %v1815_v8  ;;  %v9346_v22 = vpop.permute.xlu1 %9345  ;;  %v9459_v8 = vpack.i.bf16 %v10555_v38, %v10553_v49  ;;  %2364 = vmatpush.msra.mxu0 %v10377_v14  ;;  %v10577_v60 = vld [vmem:[#allocation14 + $0x2b0] sm:$0xff] }
 0x1f7   : > { %2696 = vmatpush.msrb.mxu2 %v9313_v7  ;;  %v9348_v39 = vunpack.i.h.bf16 %v9346_v22  ;;  %v9347_v35 = vunpack.i.l.bf16 %v9346_v22  ;;  %2563 = vmatpush.msra.mxu1 %v2534_v6  ;;  %v9424_v14 = vpack.i.bf16 %v3063_v26, %v10577_v60 }
 0x1f8   : > { %v1878_v44 = vadd.f32 %v1836_v32, %v1714_v11  ;;  %9465 = vrot.lane.b32.xlu1 %v9464_v1, %s9995_s28  ;;  %2365 = vmatpush.msra.mxu0 %v10393_v47  ;;  %v10615_v1 = vld [vmem:[#allocation14 + $0x130] sm:$0xff] }
 0x1f9   : > { %2697 = vmatpush.msrb.mxu2 %v9322_v56  ;;  %v2532_v15 = vsel %vm556_vm12, %v9347_v35, %v9348_v39  ;;  %9425 = vrot.lane.b32.xlu2 %v9424_v14, %s9995_s28  ;;  %v10599_v35 = vld [vmem:[#allocation14 + $0x1f0] sm:$0xff]  ;;  %v9509_v14 = vpack.i.bf16 %v10562_v50, %v10555_v38 }
 0x1fa   : > { %v2233_v23 = vmax.f32 %v1878_v44, 0.0  ;;  %9460 = vrot.lane.b32.xlu0 %v9459_v8, %s9995_s28  ;;  %2366 = vmatpush.msra.mxu0 %v10430_v58  ;;  %v10583_v44 = vld [vmem:[#allocation14 + $0x30] sm:$0xff]  ;;  %v2237_v58 = vrot.slane %v10547_v17, 3 }
 0x1fb   : > { %v9336_v51 = vpop.permute.xlu2 %9335  ;;  %v10550_v36 = vpop.permute.xlu0 %9340  ;;  %2698 = vmatpush.msrb.mxu2 %v9328_v20  ;;  %v9474_v47 = vpack.i.bf16 %v10585_v9, %v10583_v44  ;;  %v9479_v20 = vpack.i.bf16 %v10425_v43, %v10415_v19  ;;  %v10601_v19 = vld [vmem:[#allocation14 + $0x1f8] sm:$0xff] }
 0x1fc   : > { %v9338_v40 = vunpack.i.h.bf16 %v9336_v51  ;;  %v9337_v59 = vunpack.i.l.bf16 %v9336_v51  ;;  %v2242_v34 = vrot.slane %v2233_v23, 1  ;;  %v2245_v2 = vperm.slane %v2233_v23, 0  ;;  %2367 = vmatpush.msra.mxu0 %v10436_v10 }
 0x1fd   : > { %v9342_v5 = vunpack.i.l.bf16 %v10550_v36  ;;  %v2243_v11 = vrot.slane %v2233_v23, 2  ;;  %v2244_v30 = vrot.slane %v2233_v23, 3  ;;  %v2236_v23 = vrot.slane %v10547_v17, 2 }
 0x1fe   : > { %v2246_v61 = vperm.slane %v2242_v34, 0  ;;  %v2253_v12 = vsel %vm848_vm2, %v10547_v17, %v2245_v2  ;;  %2699 = vmatpush.msrb.mxu2 %v9337_v59  ;;  %v9343_v10 = vunpack.i.h.bf16 %v10550_v36  ;;  %2368 = vmatpush.msra.mxu0 %v10417_v24  ;;  %v9439_v17 = vpack.i.bf16 %v10601_v19, %v10599_v35 }
 0x1ff   : > { %v2533_v41 = vsel %vm556_vm12, %v9338_v40, %v9342_v5  ;;  %2290 = vst [vmem:[#allocation1] ss:$4 sm:$0xff] %v2253_v12  ;;  %v2247_v33 = vperm.slane %v2243_v11, 0  ;;  %v2248_v37 = vperm.slane %v2244_v30, 0  ;;  %v9489_v36 = vpack.i.bf16 %v3063_v26, %v10459_v31  ;;  %v3051_v12 = vld [vmem:[#allocation14 + $0x138] sm:$0xff] }
 0x200   : > { %v2254_v7 = vsel %vm848_vm2, %v2235_v42, %v2246_v61  ;;  %2564 = vmatpush.msra.mxu1 %v2533_v41  ;;  %v9361_v32 = vpop.permute.xlu1 %9360  ;;  %9480 = vrot.lane.b32.xlu1 %v9479_v20, %s9995_s28  ;;  %v9494_v41 = vpack.i.bf16 %v10494_v29, %v10484_v16  ;;  %v2318_v11 = vld [vmem:[#allocation3] sm:$0xf]  ;;  %v9504_v16 = vpack.i.bf16 %v3051_v12, %v10534_v27  ;;  %v10627_v30 = vld [vmem:[#allocation14 + $0x78] sm:$0xff] }
 0x201   : > { %2292 = vst [vmem:[#allocation1 + $0x1] ss:$4 sm:$0xff] %v2254_v7  ;;  %v9363_v63 = vunpack.i.h.bf16 %v9361_v32  ;;  %v9362_v56 = vunpack.i.l.bf16 %v9361_v32  ;;  %v2255_v51 = vsel %vm848_vm2, %v2236_v23, %v2247_v33  ;;  %v2256_v43 = vsel %vm848_vm2, %v2237_v58, %v2248_v37  ;;  %9440 = vrot.lane.b32.xlu2 %v9439_v17, %s9995_s28  ;;  %2700 = vmatpush.msrb.mxu2 %v9343_v10  ;;  %v10625_v29 = vld [vmem:[#allocation14 + $0x70] sm:$0xff] }
 0x202   : > { %2565 = vmatpush.msra.mxu1 %v2532_v15  ;;  %9475 = vrot.lane.b32.xlu0 %v9474_v47, %s9995_s28  ;;  %v9454_v7 = vpack.i.bf16 %v3051_v12, %v10615_v1  ;;  %v9469_v33 = vpack.i.bf16 %v10627_v30, %v10625_v29 }
 0x203   : > { %v2530_v59 = vsel %vm556_vm12, %v9362_v56, %v9363_v63 }
 0x204   : > { %v9356_v22 = vpop.permute.xlu0 %9355 }
 0x205   : > { %v9351_v18 = vpop.permute.xlu2 %9350  ;;  %v9357_v45 = vunpack.i.l.bf16 %v9356_v22  ;;  %v9358_v5 = vunpack.i.h.bf16 %v9356_v22  ;;  %v2378_v22 = vld [vmem:[#allocation3 + $0x1] sm:$0xf] }
 0x206   : > { %v9353_v28 = vunpack.i.h.bf16 %v9351_v18  ;;  %v9352_v34 = vunpack.i.l.bf16 %v9351_v18 }
 0x208   : > { %v2293_v39 = vld.sshfl [vmem:[#allocation1] sm:$0xff pattern:$0x73625140]  ;;  %v2531_v40 = vsel %vm556_vm12, %v9353_v28, %v9357_v45  ;;  %2701 = vmatpush.msrb.mxu2 %v9352_v34  ;;  %9495 = vrot.lane.b32.xlu1 %v9494_v41, %s9995_s28  ;;  %v3269_v28 = vld [vmem:[#allocation14 + $0x378] sm:$0xff] }
 0x209   : > { %2299 = vst [vmem:[#allocation1] ss:$4 sm:$0xff] %v2255_v51  ;;  %2566 = vmatpush.msra.mxu1 %v2531_v40  ;;  %v10609_v2 = vpop.permute.xlu1 %9375  ;;  %9455 = vrot.lane.b32.xlu2 %v9454_v7, %s9995_s28  ;;  %v9484_v40 = vpack.i.bf16 %v10404_v62, %v3269_v28  ;;  %v9499_v62 = vpack.i.bf16 %v10527_v55, %v10601_v19  ;;  %v2820_v19 = vld [vmem:[#allocation14 + $0x3d8] sm:$0xff] }
 0x20a   : > { %2300 = vst [vmem:[#allocation1 + $0x1] ss:$4 sm:$0xff] %v2256_v43  ;;  %v9377_v6 = vunpack.i.l.bf16 %v10609_v2  ;;  %9490 = vrot.lane.b32.xlu0 %v9489_v36, %s9995_s28  ;;  %2702 = vmatpush.msrb.mxu2 %v9358_v5  ;;  %v9514_v55 = vpack.i.bf16 %v10585_v9, %v10627_v30  ;;  %v2802_v9 = vld [vmem:[#allocation14 + $0x198] sm:$0xff] }
 0x20b   : > { %2310 = vst [vmem:[#allocation3 + $0x9] sm:$0xf] %v2293_v39  ;;  %2567 = vmatpush.msra.mxu1 %v2530_v59  ;;  %v2592_v39 = vld [vmem:[#allocation3 + $0x2] sm:$0xf]  ;;  %2837 = vmatpush.msrb.mxu0 %v2820_v19 }
 0x20c   : > { %v2800_v30 = vld [vmem:[#allocation14 + $0x158] sm:$0xff]  ;;  %v2730_v19 = vld [vmem:[#allocation14 + $0x290] sm:$0xff] }
 0x20d   : > { %v2792_v28 = vld [vmem:[#allocation14 + $0x58] sm:$0xff] }
 0x20e   : > { %v9371_v42 = vpop.permute.xlu0 %9370 }
 0x20f   : > { %v10613_v24 = vpop.permute.xlu2 %9365  ;;  %v9373_v61 = vunpack.i.h.bf16 %v9371_v42  ;;  %v9372_v8 = vunpack.i.l.bf16 %v9371_v42 }
 0x210   : > { %9510 = vrot.lane.b32.xlu1 %v9509_v14, %s9995_s28  ;;  %v2812_v14 = vld [vmem:[#allocation14 + $0x2d8] sm:$0xff] }
 0x211   : > { %v2301_v15 = vld.sshfl [vmem:[#allocation1] sm:$0xff pattern:$0x73625140]  ;;  %v2529_v31 = vsel %vm556_vm12, %v9373_v61, %v9377_v6  ;;  %2703 = vmatpush.msrb.mxu2 %v9372_v8  ;;  %9470 = vrot.lane.b32.xlu2 %v9469_v33, %s9995_s28  ;;  %v2810_v33 = vld [vmem:[#allocation14 + $0x298] sm:$0xff] }
 0x212   : > { %2312 = vst [vmem:[#allocation3 + $0x19] sm:$0xf] %v2301_v15  ;;  %v2319_v26 = vld [vmem:[#allocation3 + $0x8] sm:$0xf]  ;;  %2568 = vmatpush.msra.mxu1 %v2529_v31  ;;  %9505 = vrot.lane.b32.xlu0 %v9504_v16, %s9995_s28 }
 0x213   : > { %2342 = vst [vmem:[#allocation1] ss:$2 sm:$0xff] %v2318_v11  ;;  %v2379_v50 = vld [vmem:[#allocation3 + $0x9] sm:$0xf] }
 0x214   : > { %2344 = vst [vmem:[#allocation1 + $0x1] ss:$2 sm:$0xff] %v2319_v26  ;;  %v2593_v17 = vld [vmem:[#allocation3 + $0xa] sm:$0xf] }
 0x215   : > { %v10631_v32 = vpop.permute.xlu1 %9390  ;;  %v2716_v15 = vld [vmem:[#allocation3 + $0x8] sm:$0xf] }
 0x216   : > { %v2818_v31 = vld [vmem:[#allocation14 + $0x398] sm:$0xff] }
 0x217   : > { %v2816_v26 = vld [vmem:[#allocation14 + $0x358] sm:$0xff]  ;;  %2838 = vmatpush.msrb.mxu0 %v2818_v31 }
 0x218   : > { %v10635_v63 = vpop.permute.xlu2 %9380  ;;  %v2814_v16 = vld [vmem:[#allocation14 + $0x318] sm:$0xff] }
 0x219   : > { %v2321_v56 = vld [vmem:[#allocation3 + $0x18] sm:$0xf]  ;;  %v9383_v27 = vunpack.i.h.bf16 %v10635_v63  ;;  %9485 = vrot.lane.b32.xlu2 %v9484_v40, %s9995_s28  ;;  %2839 = vmatpush.msrb.mxu0 %v2816_v26  ;;  %v9367_v40 = vunpack.i.l.bf16 %v10613_v24  ;;  %v2819_v26 = vld [vmem:[#allocation14 + $0x3a0] sm:$0xff] }
 0x21a   : > { %2348 = vst [vmem:[#allocation1 + $0x11] ss:$2 sm:$0xff] %v2321_v56  ;;  %v9386_v37 = vpop.permute.xlu0 %9385  ;;  %v2808_v56 = vld [vmem:[#allocation14 + $0x258] sm:$0xff] }
 0x21b   : > { %v2349_v18 = vld.sshfl [vmem:[#allocation1] sm:$0xff pattern:$0x75316420]  ;;  %v9388_v45 = vunpack.i.h.bf16 %v9386_v37  ;;  %v9387_v38 = vunpack.i.l.bf16 %v9386_v37  ;;  %2704 = vmatpush.msrb.mxu2 %v9383_v27  ;;  %2840 = vmatpush.msrb.mxu0 %v2814_v16  ;;  %v2804_v27 = vld [vmem:[#allocation14 + $0x1d8] sm:$0xff]  ;;  %v9393_v16 = vunpack.i.h.bf16 %v10631_v32 }
 0x21c   : > { %2418 = vst [vmem:[#allocation1] ss:$2 sm:$0xff] %v2378_v22  ;;  %2369 = vmatmul.f32.vlgmr.msra.gmra.mxu0 %v2349_v18  ;;  %v2806_v22 = vld [vmem:[#allocation14 + $0x218] sm:$0xff]  ;;  %v1710_v18 = vpop.f32.mrf.mxu3 }
 0x21d   : > { %2420 = vst [vmem:[#allocation1 + $0x1] ss:$2 sm:$0xff] %v2379_v50  ;;  %v2528_v47 = vsel %vm556_vm12, %v9387_v38, %v9388_v45  ;;  %2841 = vmatpush.msrb.mxu0 %v2812_v14  ;;  %v2798_v37 = vld [vmem:[#allocation14 + $0x118] sm:$0xff]  ;;  %v1690_v45 = vpop.f32.mrf.mxu2  ;;  %v2735_v50 = vld [vmem:[#allocation14 + $0x3d0] sm:$0xff]  ;;  %v9392_v14 = vunpack.i.l.bf16 %v10631_v32 }
 0x21e   : > { %2569 = vmatpush.msra.mxu1 %v2528_v47  ;;  %v2796_v38 = vld [vmem:[#allocation14 + $0xd8] sm:$0xff]  ;;  %2751 = vmatpush.msrb.mxu3 %v2735_v50 }
 0x21f   : > { %2842 = vmatpush.msrb.mxu0 %v2810_v33  ;;  %v2794_v47 = vld [vmem:[#allocation14 + $0x98] sm:$0xff] }
 0x220   : > { %v9396_v20 = vpop.permute.xlu2 %9395  ;;  %v10642_v23 = vpop.permute.xlu1 %9405 }
 0x221   : > { %v9397_v58 = vunpack.i.l.bf16 %v9396_v20  ;;  %v9408_v51 = vunpack.i.h.bf16 %v10642_v23  ;;  %v9398_v59 = vunpack.i.h.bf16 %v9396_v20  ;;  %9500 = vrot.lane.b32.xlu2 %v9499_v62, %s9995_s28  ;;  %2843 = vmatpush.msrb.mxu0 %v2808_v56  ;;  %v2734_v20 = vld [vmem:[#allocation14 + $0x390] sm:$0xff] }
 0x222   : > { %2752 = vmatpush.msrb.mxu3 %v2734_v20 }
 0x223   : > { %2705 = vmatpush.msrb.mxu2 %v9397_v58  ;;  %2844 = vmatpush.msrb.mxu0 %v2806_v22 }
 0x224   : > { %v2425_v43 = vld.sshfl [vmem:[#allocation1] sm:$0xff pattern:$0x75316420]  ;;  %v10646_v10 = vpop.permute.xlu0 %9400  ;;  %v1875_v58 = vpop.f32.mrf.mxu3 }
 0x225   : > { %2616 = vst [vmem:[#allocation1] ss:$2 sm:$0xff] %v2592_v39  ;;  %v9402_v34 = vunpack.i.l.bf16 %v10646_v10  ;;  %2706 = vmatpush.msrb.mxu2 %v9408_v51  ;;  %2845 = vmatpush.msrb.mxu0 %v2804_v27  ;;  %v9368_v39 = vunpack.i.h.bf16 %v10613_v24  ;;  %v1394_v24 = vadd.f32 %v10472_v3, %v10463_v52  ;;  %v2817_v27 = vld [vmem:[#allocation14 + $0x360] sm:$0xff] }
 0x226   : > { %2618 = vst [vmem:[#allocation1 + $0x1] ss:$2 sm:$0xff] %v2593_v17  ;;  %v1965_v17 = vpop.f32.mrf.mxu1 }
 0x227   : > { %v2527_v5 = vsel %vm556_vm12, %v9398_v59, %v9402_v34  ;;  %2846 = vmatpush.msrb.mxu0 %v2802_v9  ;;  %v1945_v59 = vpop.f32.mrf.mxu0  ;;  %v9378_v34 = vunpack.i.h.bf16 %v10609_v2  ;;  %v1671_v2 = vadd.f32 %v10489_v46, %v10477_v13  ;;  %v1397_v52 = vadd.f32 %v10470_v0, %v1394_v24  ;;  %v2729_v13 = vld [vmem:[#allocation14 + $0x250] sm:$0xff] }
 0x228   : > { %v9411_v6 = vpop.permute.xlu2 %9410  ;;  %2570 = vmatpush.msra.mxu1 %v2527_v5  ;;  %v9382_v5 = vunpack.i.l.bf16 %v10635_v63  ;;  %v1711_v63 = vadd.f32 %v1710_v18, %v1690_v45  ;;  %v1966_v3 = vadd.f32 %v1965_v17, %v1945_v59  ;;  %v9407_v17 = vunpack.i.l.bf16 %v10642_v23  ;;  %v2723_v23 = vld [vmem:[#allocation14 + $0xd0] sm:$0xff] }
 0x229   : > { %v9413_v36 = vunpack.i.h.bf16 %v9411_v6  ;;  %v9412_v42 = vunpack.i.l.bf16 %v9411_v6  ;;  %v9421_v61 = vpop.permute.xlu1 %9420  ;;  %9515 = vrot.lane.b32.xlu2 %v9514_v55, %s9995_s28  ;;  %2847 = vmatpush.msrb.mxu0 %v2800_v30  ;;  %v2790_v6 = vld [vmem:[#allocation14 + $0x18] sm:$0xff]  ;;  %v1715_v46 = vadd.f32 %v1671_v2, %v1397_v52  ;;  %v2807_v2 = vld [vmem:[#allocation14 + $0x220] sm:$0xff] }
 0x22a   : > { %v9423_v8 = vunpack.i.h.bf16 %v9421_v61  ;;  %v9422_v12 = vunpack.i.l.bf16 %v9421_v61  ;;  %v2731_v61 = vld [vmem:[#allocation14 + $0x2d0] sm:$0xff]  ;;  %v1716_v33 = vadd.f32 %v10470_v0, %v1711_v63  ;;  %v3198_v0 = vsel %vm556_vm12, %v9392_v14, %v9393_v16  ;;  %v2803_v14 = vld [vmem:[#allocation14 + $0x1a0] sm:$0xff] }
 0x22b   : > { %v2526_v41 = vsel %vm556_vm12, %v9412_v42, %v9413_v36  ;;  %2848 = vmatpush.msrb.mxu0 %v2798_v37  ;;  %v2732_v36 = vld [vmem:[#allocation14 + $0x310] sm:$0xff]  ;;  %v3200_v42 = vsel %vm556_vm12, %v9367_v40, %v9368_v39  ;;  %v1968_v18 = vadd.f32 %v1966_v3, %v1715_v46 }
 0x22c   : > { %2571 = vmatpush.msra.mxu1 %v2526_v41  ;;  %v2525_v11 = vsel %vm556_vm12, %v9422_v12, %v9423_v8  ;;  %v1855_v51 = vpop.f32.mrf.mxu2  ;;  %v3199_v8 = vsel %vm556_vm12, %v9378_v34, %v9382_v5  ;;  %v2097_v12 = vpop.f32.mrf.mxu3  ;;  %v2728_v37 = vld [vmem:[#allocation14 + $0x210] sm:$0xff]  ;;  %v9403_v34 = vunpack.i.h.bf16 %v10646_v10  ;;  %v2926_v10 = vld [vmem:[#allocation14 + $0x3e8] sm:$0xff] }
 0x22d   : > { %v2623_v7 = vld.sshfl [vmem:[#allocation1] sm:$0xff pattern:$0x75316420]  ;;  %2849 = vmatpush.msrb.mxu0 %v2796_v38  ;;  %v1876_v31 = vadd.f32 %v1875_v58, %v1855_v51  ;;  %v2815_v38 = vld [vmem:[#allocation14 + $0x320] sm:$0xff]  ;;  %2942 = vmatpush.msra.mxu2 %v2926_v10 }
 0x22e   : > { %2740 = vst [vmem:[#allocation1] ss:$2 sm:$0xff] %v2716_v15  ;;  %2572 = vmatpush.msra.mxu1 %v2525_v11  ;;  %2707 = vmatmul.f32.vlgmr.msrb.gmra.mxu2 %v2623_v7  ;;  %v2821_v7 = vld [vmem:[#allocation14 + $0x3e0] sm:$0xff]  ;;  %v2726_v40 = vld [vmem:[#allocation14 + $0x190] sm:$0xff]  ;;  %v3197_v63 = vsel %vm556_vm12, %v9403_v34, %v9407_v17  ;;  %v2918_v10 = vld [vmem:[#allocation14 + $0x1e8] sm:$0xff] }
 0x22f   : > { %2573 = vmatmul.f32.vlgmr.msra.gmra.mxu1 %v2425_v43  ;;  %2850 = vmatpush.msrb.mxu0 %v2794_v47  ;;  %v2733_v43 = vld [vmem:[#allocation14 + $0x350] sm:$0xff]  ;;  %v1879_v45 = vadd.f32 %v1876_v31, %v1716_v33  ;;  %v2813_v51 = vld [vmem:[#allocation14 + $0x2e0] sm:$0xff]  ;;  %v2925_v31 = vld [vmem:[#allocation14 + $0x3a8] sm:$0xff] }
 0x230   : > { %2753 = vmatpush.msrb.mxu3 %v2733_v43  ;;  %2860 = vmatpush.msrb.mxu1 %v2821_v7  ;;  %v2727_v47 = vld [vmem:[#allocation14 + $0x1d0] sm:$0xff]  ;;  %v2811_v43 = vld [vmem:[#allocation14 + $0x2a0] sm:$0xff]  ;;  %v2924_v33 = vld [vmem:[#allocation14 + $0x368] sm:$0xff] }
 0x231   : > { %2851 = vmatpush.msrb.mxu0 %v2792_v28  ;;  %v2725_v5 = vld [vmem:[#allocation14 + $0x150] sm:$0xff]  ;;  %2943 = vmatpush.msra.mxu2 %v2925_v31  ;;  %v2795_v17 = vld [vmem:[#allocation14 + $0xa0] sm:$0xff] }
 0x232   : > { %2754 = vmatpush.msrb.mxu3 %v2732_v36  ;;  %2861 = vmatpush.msrb.mxu1 %v2819_v26  ;;  %v2722_v3 = vld [vmem:[#allocation14 + $0x90] sm:$0xff] }
 0x233   : > { %2852 = vmatpush.msrb.mxu0 %v2790_v6  ;;  %v2721_v46 = vld [vmem:[#allocation14 + $0x50] sm:$0xff]  ;;  %2944 = vmatpush.msra.mxu2 %v2924_v33 }
 0x234   : > { %v10663_v62 = vpop.permute.xlu0 %9415  ;;  %2755 = vmatpush.msrb.mxu3 %v2731_v61  ;;  %2862 = vmatpush.msrb.mxu1 %v2817_v27 }
 0x235   : > { %3217 = vmatpush.msra.mxu0 %v3200_v42  ;;  %v2809_v42 = vld [vmem:[#allocation14 + $0x260] sm:$0xff]  ;;  %v9417_v31 = vunpack.i.l.bf16 %v10663_v62 }
 0x236   : > { %2756 = vmatpush.msrb.mxu3 %v2730_v19  ;;  %2863 = vmatpush.msrb.mxu1 %v2815_v38  ;;  %v2805_v19 = vld [vmem:[#allocation14 + $0x1e0] sm:$0xff] }
 0x237   : > { %3218 = vmatpush.msra.mxu0 %v3199_v8  ;;  %v2724_v8 = vld [vmem:[#allocation14 + $0x110] sm:$0xff]  ;;  %v2799_v38 = vld [vmem:[#allocation14 + $0x120] sm:$0xff] }
 0x238   : > { %2757 = vmatpush.msrb.mxu3 %v2729_v13  ;;  %2864 = vmatpush.msrb.mxu1 %v2813_v51  ;;  %v2921_v51 = vld [vmem:[#allocation14 + $0x2a8] sm:$0xff] }
 0x239   : > { %3219 = vmatpush.msra.mxu0 %v3198_v0 }
 0x23a   : > { %2758 = vmatpush.msrb.mxu3 %v2728_v37  ;;  %2865 = vmatpush.msrb.mxu1 %v2811_v43  ;;  %v2720_v37 = vld [vmem:[#allocation14 + $0x10] sm:$0xff] }
 0x23b   : > { %3220 = vmatpush.msra.mxu0 %v3197_v63 }
 0x23c   : > { %2759 = vmatpush.msrb.mxu3 %v2727_v47  ;;  %2866 = vmatpush.msrb.mxu1 %v2809_v42  ;;  %v2997_v47 = vld [vmem:[#allocation14 + $0x3f0] sm:$0xff] }
 0x23e   : > { %2760 = vmatpush.msrb.mxu3 %v2726_v40  ;;  %2867 = vmatpush.msrb.mxu1 %v2807_v2  ;;  %v2996_v40 = vld [vmem:[#allocation14 + $0x3b0] sm:$0xff] }
 0x240   : > { %2761 = vmatpush.msrb.mxu3 %v2725_v5  ;;  %2868 = vmatpush.msrb.mxu1 %v2805_v19  ;;  %v2920_v5 = vld [vmem:[#allocation14 + $0x268] sm:$0xff] }
 0x241   : > { %v2117_v11 = vpop.f32.mrf.mxu0  ;;  %v2228_v32 = vpop.f32.mrf.mxu3 }
 0x242   : > { %v2137_v15 = vpop.f32.mrf.mxu1  ;;  %2762 = vmatpush.msrb.mxu3 %v2724_v8  ;;  %2869 = vmatpush.msrb.mxu1 %v2803_v14 }
 0x243   : > { %v2138_v56 = vadd.f32 %v2137_v15, %v2117_v11 }
 0x244   : > { %2763 = vmatpush.msrb.mxu3 %v2723_v23  ;;  %v2791_v23 = vld [vmem:[#allocation14 + $0x20] sm:$0xff] }
 0x245   : > { %v2141_v20 = vadd.f32 %v2138_v56, %v1879_v45  ;;  %v2801_v56 = vld [vmem:[#allocation14 + $0x160] sm:$0xff] }
 0x246   : > { %2764 = vmatpush.msrb.mxu3 %v2722_v3  ;;  %2870 = vmatpush.msrb.mxu1 %v2801_v56  ;;  %v9418_v3 = vunpack.i.h.bf16 %v10663_v62  ;;  %v2915_v62 = vld [vmem:[#allocation14 + $0x128] sm:$0xff] }
 0x247   : > { %v2914_v56 = vld [vmem:[#allocation14 + $0xe8] sm:$0xff] }
 0x248   : > { %2765 = vmatpush.msrb.mxu3 %v2721_v46  ;;  %2871 = vmatpush.msrb.mxu1 %v2799_v38  ;;  %v2913_v38 = vld [vmem:[#allocation14 + $0xa8] sm:$0xff] }
 0x249   : > { %v10677_v9 = vpop.permute.xlu0 %9430 }
 0x24a   : > { %2766 = vmatpush.msrb.mxu3 %v2720_v37  ;;  %v3196_v37 = vsel %vm556_vm12, %v9417_v31, %v9418_v3 }
 0x24b   : > { %3221 = vmatpush.msra.mxu0 %v3196_v37 }
 0x24c   : > { %3013 = vmatpush.msra.mxu3 %v2997_v47 }
 0x24e   : > { %v10679_v30 = vpop.permute.xlu1 %9435  ;;  %3014 = vmatpush.msra.mxu3 %v2996_v40  ;;  %v2911_v40 = vld [vmem:[#allocation14 + $0x28] sm:$0xff] }
 0x24f   : > { %v2077_v41 = vpop.f32.mrf.mxu2  ;;  %v9437_v47 = vunpack.i.l.bf16 %v10679_v30 }
 0x250   : > { %v2098_v22 = vadd.f32 %v2097_v12, %v2077_v41 }
 0x252   : > { %v2140_v28 = vadd.f32 %v2098_v22, %v1968_v18  ;;  %v2923_v18 = vld [vmem:[#allocation14 + $0x328] sm:$0xff] }
 0x253   : > { %v10671_v55 = vpop.permute.xlu2 %9425  ;;  %2945 = vmatpush.msra.mxu2 %v2923_v18 }
 0x254   : > { %v10686_v6 = vmax.f32 %v2140_v28, 0.0  ;;  %v9427_v33 = vunpack.i.l.bf16 %v10671_v55 }
 0x256   : > { %v2260_v11 = vrot.slane %v10686_v6, 1  ;;  %v2261_v0 = vrot.slane %v10686_v6, 2  ;;  %v2262_v28 = vrot.slane %v10686_v6, 3 }
 0x25b   : > { %v10682_v39 = vpop.permute.xlu2 %9440 }
 0x262   : > { %v10690_v61 = vpop.permute.xlu1 %9450 }
 0x263   : > { %v10696_v52 = vpop.permute.xlu2 %9455 }
 0x264   : > { %v10688_v24 = vpop.permute.xlu0 %9445 }
 0x26a   : > { %v10701_v27 = vpop.permute.xlu1 %9465 }
 0x26b   : > { %v9468_v3 = vunpack.i.h.bf16 %v10701_v27 }
 0x26c   : > { %v10699_v22 = vpop.permute.xlu0 %9460 }
 0x26f   : > { %v2208_v50 = vpop.f32.mrf.mxu2 }
 0x270   : > { %v2229_v58 = vadd.f32 %v2228_v32, %v2208_v50  ;;  %v2922_v50 = vld [vmem:[#allocation14 + $0x2e8] sm:$0xff] }
 0x271   : > { %2946 = vmatpush.msra.mxu2 %v2922_v50  ;;  %v9438_v50 = vunpack.i.h.bf16 %v10679_v30 }
 0x272   : > { %v2231_v59 = vadd.f32 %v2229_v58, %v2141_v20  ;;  %v2797_v20 = vld [vmem:[#allocation14 + $0xe0] sm:$0xff]  ;;  %v10705_v58 = vpop.permute.xlu2 %9470  ;;  %v9481_v8 = vpop.permute.xlu1 %9480 }
 0x273   : > { %2872 = vmatpush.msrb.mxu1 %v2797_v20  ;;  %2947 = vmatpush.msra.mxu2 %v2921_v51  ;;  %v9482_v2 = vunpack.i.l.bf16 %v9481_v8  ;;  %v9483_v63 = vunpack.i.h.bf16 %v9481_v8  ;;  %v9443_v20 = vunpack.i.h.bf16 %v10682_v39  ;;  %v2912_v51 = vld [vmem:[#allocation14 + $0x68] sm:$0xff] }
 0x274   : > { %v2258_v36 = vmax.f32 %v2231_v59, 0.0  ;;  %v10709_v42 = vpop.permute.xlu0 %9475 }
 0x275   : > { %2873 = vmatpush.msrb.mxu1 %v2795_v17  ;;  %2948 = vmatpush.msra.mxu2 %v2920_v5  ;;  %v3193_v17 = vsel %vm556_vm12, %v9437_v47, %v9438_v50  ;;  %v9447_v5 = vunpack.i.l.bf16 %v10688_v24 }
 0x276   : > { %v2267_v12 = vrot.slane %v2258_v36, 1  ;;  %v2270_v41 = vperm.slane %v2258_v36, 0  ;;  %v2268_v26 = vrot.slane %v2258_v36, 2  ;;  %v2269_v13 = vrot.slane %v2258_v36, 3  ;;  %v2995_v36 = vld [vmem:[#allocation14 + $0x370] sm:$0xff] }
 0x277   : > { %3015 = vmatpush.msra.mxu3 %v2995_v36 }
 0x278   : > { %v2271_v7 = vperm.slane %v2267_v12, 0  ;;  %v2278_v15 = vsel %vm848_vm2, %v10686_v6, %v2270_v41  ;;  %v2272_v45 = vperm.slane %v2268_v26, 0  ;;  %v2273_v32 = vperm.slane %v2269_v13, 0  ;;  %v2793_v6 = vld [vmem:[#allocation14 + $0x60] sm:$0xff]  ;;  %v2919_v12 = vld [vmem:[#allocation14 + $0x228] sm:$0xff]  ;;  %v2994_v41 = vld [vmem:[#allocation14 + $0x330] sm:$0xff] }
 0x279   : > { %2295 = vst [vmem:[#allocation1 + $0x20] ss:$4 sm:$0xff] %v2278_v15  ;;  %2874 = vmatpush.msrb.mxu1 %v2793_v6  ;;  %2949 = vmatpush.msra.mxu2 %v2919_v12  ;;  %v2916_v26 = vld [vmem:[#allocation14 + $0x168] sm:$0xff]  ;;  %v9452_v12 = vunpack.i.l.bf16 %v10690_v61 }
 0x27a   : > { %v2279_v16 = vsel %vm848_vm2, %v2260_v11, %v2271_v7  ;;  %v2280_v59 = vsel %vm848_vm2, %v2261_v0, %v2272_v45  ;;  %v2281_v34 = vsel %vm848_vm2, %v2262_v28, %v2273_v32  ;;  %3016 = vmatpush.msra.mxu3 %v2994_v41  ;;  %v9486_v11 = vpop.permute.xlu2 %9485  ;;  %v2917_v7 = vld [vmem:[#allocation14 + $0x1a8] sm:$0xff]  ;;  %v9432_v45 = vunpack.i.l.bf16 %v10677_v9 }
 0x27b   : > { %2297 = vst [vmem:[#allocation1 + $0x21] ss:$4 sm:$0xff] %v2279_v16  ;;  %2875 = vmatpush.msrb.mxu1 %v2791_v23  ;;  %2950 = vmatpush.msra.mxu2 %v2918_v10  ;;  %v9487_v15 = vunpack.i.l.bf16 %v9486_v11  ;;  %v9488_v14 = vunpack.i.h.bf16 %v9486_v11  ;;  %v9442_v28 = vunpack.i.l.bf16 %v10682_v39  ;;  %v2786_v39 = vld [vmem:[#allocation3 + $0x9] sm:$0xf]  ;;  %v9458_v23 = vunpack.i.h.bf16 %v10696_v52 }
 0x27c   : > { %3017 = vmatpush.msra.mxu3 %v10457_v48  ;;  %v9491_v13 = vpop.permute.xlu0 %9490  ;;  %v9457_v10 = vunpack.i.l.bf16 %v10696_v52 }
 0x27d   : > { %3351 = vmatpush.msra.mxu1 %v9482_v2  ;;  %2951 = vmatpush.msra.mxu2 %v2917_v7  ;;  %v9492_v46 = vunpack.i.l.bf16 %v9491_v13  ;;  %v9493_v18 = vunpack.i.h.bf16 %v9491_v13  ;;  %v3192_v6 = vsel %vm556_vm12, %v9442_v28, %v9443_v20  ;;  %v2909_v20 = vld [vmem:[#allocation3 + $0x1a] sm:$0xf] }
 0x27e   : > { %3018 = vmatpush.msra.mxu3 %v10577_v60  ;;  %v9428_v60 = vunpack.i.h.bf16 %v10671_v55 }
 0x27f   : > { %3352 = vmatpush.msra.mxu1 %v9483_v63  ;;  %2952 = vmatpush.msra.mxu2 %v2916_v26  ;;  %v2595_v26 = vld [vmem:[#allocation3 + $0x1a] sm:$0xf] }
 0x280   : > { %3019 = vmatpush.msra.mxu3 %v10482_v53  ;;  %v9433_v53 = vunpack.i.h.bf16 %v10677_v9  ;;  %v3195_v55 = vsel %vm556_vm12, %v9427_v33, %v9428_v60  ;;  %v2381_v9 = vld [vmem:[#allocation3 + $0x19] sm:$0xf]  ;;  %v9478_v60 = vunpack.i.h.bf16 %v10709_v42  ;;  %v9477_v33 = vunpack.i.l.bf16 %v10709_v42 }
 0x281   : > { %3353 = vmatpush.msra.mxu1 %v9487_v15  ;;  %2953 = vmatpush.msra.mxu2 %v2915_v62  ;;  %v3189_v15 = vsel %vm556_vm12, %v9457_v10, %v9458_v23 }
 0x282   : > { %v2298_v43 = vld.sshfl [vmem:[#allocation1 + $0x20] sm:$0xff pattern:$0x73625140]  ;;  %3020 = vmatpush.msra.mxu3 %v10486_v21  ;;  %v9496_v21 = vpop.permute.xlu1 %9495  ;;  %3222 = vmatpush.msra.mxu0 %v3195_v55  ;;  %v3185_v37 = vsel %vm556_vm12, %v9477_v33, %v9478_v60 }
 0x283   : > { %2302 = vst [vmem:[#allocation1 + $0x20] ss:$4 sm:$0xff] %v2280_v59  ;;  %3354 = vmatpush.msra.mxu1 %v9488_v14  ;;  %2954 = vmatpush.msra.mxu2 %v2914_v56  ;;  %v9497_v32 = vunpack.i.l.bf16 %v9496_v21  ;;  %v9498_v0 = vunpack.i.h.bf16 %v9496_v21  ;;  %v9473_v14 = vunpack.i.h.bf16 %v10705_v58  ;;  %v4166_v33 = vld [vmem:[#allocation17 + $0xa8] sm:$0xff] }
 0x284   : > { %2303 = vst [vmem:[#allocation1 + $0x21] ss:$4 sm:$0xff] %v2281_v34  ;;  %3021 = vmatpush.msra.mxu3 %v10599_v35  ;;  %v3194_v35 = vsel %vm556_vm12, %v9432_v45, %v9433_v53  ;;  %v9506_v41 = vpop.permute.xlu0 %9505 }
 0x285   : > { %2311 = vst [vmem:[#allocation3 + $0x11] sm:$0xf] %v2298_v43  ;;  %3355 = vmatpush.msra.mxu1 %v9492_v46  ;;  %2955 = vmatpush.msra.mxu2 %v2913_v38  ;;  %v9508_v11 = vunpack.i.h.bf16 %v9506_v41  ;;  %v2979_v38 = vld [vmem:[#allocation3 + $0x18] sm:$0xf] }
 0x286   : > { %3022 = vmatpush.msra.mxu3 %v10525_v4  ;;  %3223 = vmatpush.msra.mxu0 %v3194_v35  ;;  %v9501_v4 = vpop.permute.xlu2 %9500 }
 0x287   : > { %3356 = vmatpush.msra.mxu1 %v9493_v18  ;;  %2956 = vmatpush.msra.mxu2 %v2912_v51  ;;  %v9502_v43 = vunpack.i.l.bf16 %v9501_v4  ;;  %v9503_v36 = vunpack.i.h.bf16 %v9501_v4  ;;  %v2718_v18 = vld [vmem:[#allocation3 + $0x18] sm:$0xf] }
 0x288   : > { %3023 = vmatpush.msra.mxu3 %v10532_v25  ;;  %v9448_v25 = vunpack.i.h.bf16 %v10688_v24  ;;  %3224 = vmatpush.msra.mxu0 %v3193_v17  ;;  %v9507_v24 = vunpack.i.l.bf16 %v9506_v41 }
 0x289   : > { %3357 = vmatpush.msra.mxu1 %v9497_v32  ;;  %2957 = vmatpush.msra.mxu2 %v2911_v40  ;;  %v2788_v32 = vld [vmem:[#allocation3 + $0x19] sm:$0xf] }
 0x28a   : > { %3024 = vmatpush.msra.mxu3 %v10615_v1  ;;  %v9453_v1 = vunpack.i.h.bf16 %v10690_v61  ;;  %v3191_v2 = vsel %vm556_vm12, %v9447_v5, %v9448_v25  ;;  %3225 = vmatpush.msra.mxu0 %v3192_v6  ;;  %v9463_v61 = vunpack.i.h.bf16 %v10699_v22  ;;  %v9511_v7 = vpop.permute.xlu1 %9510  ;;  %v3041_v25 = vld [vmem:[#allocation3 + $0x29] sm:$0xf] }
 0x28b   : > { %v2304_v19 = vld.sshfl [vmem:[#allocation1 + $0x20] sm:$0xff pattern:$0x73625140]  ;;  %3358 = vmatpush.msra.mxu1 %v9498_v0  ;;  %v9512_v31 = vunpack.i.l.bf16 %v9511_v7  ;;  %v9513_v13 = vunpack.i.h.bf16 %v9511_v7  ;;  %v3685_v7 = vld [vmem:[#allocation17 + $0xa0] sm:$0xff] }
 0x28c   : > { %2313 = vst [vmem:[#allocation3 + $0x21] sm:$0xf] %v2304_v19  ;;  %v2320_v16 = vld [vmem:[#allocation3 + $0x10] sm:$0xf]  ;;  %3025 = vmatpush.msra.mxu3 %v10553_v49  ;;  %v3190_v63 = vsel %vm556_vm12, %v9452_v12, %v9453_v1  ;;  %v9462_v49 = vunpack.i.l.bf16 %v10699_v22  ;;  %3226 = vmatpush.msra.mxu0 %v3191_v2  ;;  %v2907_v22 = vld [vmem:[#allocation3 + $0xa] sm:$0xf] }
 0x28d   : > { %v2717_v48 = vld [vmem:[#allocation3 + $0x10] sm:$0xf]  ;;  %2346 = vst [vmem:[#allocation1 + $0x10] ss:$2 sm:$0xff] %v2320_v16  ;;  %3359 = vmatpush.msra.mxu1 %v9502_v43 }
 0x28e   : > { %2742 = vst [vmem:[#allocation1 + $0x1] ss:$2 sm:$0xff] %v2717_v48  ;;  %v2380_v59 = vld [vmem:[#allocation3 + $0x11] sm:$0xf]  ;;  %3026 = vmatpush.msra.mxu3 %v10557_v54  ;;  %v9467_v54 = vunpack.i.l.bf16 %v10701_v27  ;;  %3227 = vmatpush.msra.mxu0 %v3190_v63  ;;  %v9472_v48 = vunpack.i.l.bf16 %v10705_v58  ;;  %v9516_v27 = vpop.permute.xlu2 %9515 }
 0x28f   : > { %v2787_v8 = vld [vmem:[#allocation3 + $0x11] sm:$0xf]  ;;  %3360 = vmatpush.msra.mxu1 %v9503_v36  ;;  %v9517_v62 = vunpack.i.l.bf16 %v9516_v27  ;;  %v9518_v58 = vunpack.i.h.bf16 %v9516_v27  ;;  %v3255_v36 = vld [vmem:[#allocation3 + $0x2a] sm:$0xf]  ;;  %v4161_v27 = vld [vmem:[#allocation17 + $0x50] sm:$0xff] }
 0x290   : > { %3027 = vmatpush.msra.mxu3 %v10625_v29  ;;  %v2594_v19 = vld [vmem:[#allocation3 + $0x12] sm:$0xf]  ;;  %v3188_v29 = vsel %vm556_vm12, %v9462_v49, %v9463_v61  ;;  %3228 = vmatpush.msra.mxu0 %v3189_v15  ;;  %v3186_v56 = vsel %vm556_vm12, %v9472_v48, %v9473_v14  ;;  %v4170_v48 = vld [vmem:[#allocation17 + $0xe8] sm:$0xff] }
 0x291   : > { %3361 = vmatpush.msra.mxu1 %v9507_v24  ;;  %v2908_v46 = vld [vmem:[#allocation3 + $0x12] sm:$0xf] }
 0x292   : > { %3028 = vmatpush.msra.mxu3 %v10583_v44  ;;  %v3187_v44 = vsel %vm556_vm12, %v9467_v54, %v9468_v3  ;;  %3229 = vmatpush.msra.mxu0 %v3188_v29  ;;  %v2978_v21 = vld [vmem:[#allocation3 + $0x10] sm:$0xf] }
 0x293   : > { %3362 = vmatpush.msra.mxu1 %v9508_v11  ;;  %v2719_v45 = vld [vmem:[#allocation3 + $0x20] sm:$0xf]  ;;  %v3038_v35 = vld [vmem:[#allocation3 + $0x11] sm:$0xf] }
 0x294   : > { %v2350_v30 = vld.sshfl [vmem:[#allocation1 + $0x10] sm:$0xff pattern:$0x75316420]  ;;  %3230 = vmatpush.msra.mxu0 %v3187_v44  ;;  %v2789_v47 = vld [vmem:[#allocation3 + $0x21] sm:$0xf]  ;;  %v4168_v44 = vld [vmem:[#allocation17 + $0xc8] sm:$0xff] }
 0x295   : > { %v2747_v34 = vld.sshfl [vmem:[#allocation1] sm:$0xff pattern:$0x75316420]  ;;  %2422 = vst [vmem:[#allocation1 + $0x10] ss:$2 sm:$0xff] %v2380_v59  ;;  %2372 = vmatmul.f32.gmra.mxu0 %v2350_v30  ;;  %3363 = vmatpush.msra.mxu1 %v9512_v31  ;;  %v3687_v61 = vld [vmem:[#allocation17 + $0xe0] sm:$0xff] }
 0x296   : > { %2424 = vst [vmem:[#allocation1 + $0x11] ss:$2 sm:$0xff] %v2381_v9  ;;  %2767 = vmatmul.f32.vlgmr.msrb.gmra.mxu3 %v2747_v34  ;;  %3231 = vmatpush.msra.mxu0 %v3186_v56  ;;  %v3039_v9 = vld [vmem:[#allocation3 + $0x19] sm:$0xf]  ;;  %v2910_v51 = vld [vmem:[#allocation3 + $0x22] sm:$0xf] }
 0x297   : > { %2826 = vst [vmem:[#allocation1] ss:$2 sm:$0xff] %v2786_v39  ;;  %3364 = vmatpush.msra.mxu1 %v9513_v13  ;;  %v3252_v4 = vld [vmem:[#allocation3 + $0x12] sm:$0xf]  ;;  %v3253_v59 = vld [vmem:[#allocation3 + $0x1a] sm:$0xf]  ;;  %3720 = vmatpush.msrb.mxu2 %v3687_v61 }
 0x298   : > { %2828 = vst [vmem:[#allocation1 + $0x1] ss:$2 sm:$0xff] %v2787_v8  ;;  %3232 = vmatpush.msra.mxu0 %v3185_v37  ;;  %v2981_v30 = vld [vmem:[#allocation3 + $0x28] sm:$0xf]  ;;  %v2980_v43 = vld [vmem:[#allocation3 + $0x20] sm:$0xf] }
 0x299   : > { %3365 = vmatpush.msra.mxu1 %v9517_v62  ;;  %v3040_v5 = vld [vmem:[#allocation3 + $0x21] sm:$0xf]  ;;  %v10763_v12 = vpop.f32.mrf.mxu0  ;;  %v3686_v49 = vld [vmem:[#allocation17 + $0xc0] sm:$0xff]  ;;  %v4164_v56 = vld [vmem:[#allocation17 + $0x88] sm:$0xff] }
 0x29a   : > { %v3254_v6 = vld [vmem:[#allocation3 + $0x22] sm:$0xf]  ;;  %3721 = vmatpush.msrb.mxu2 %v3686_v49  ;;  %v3684_v15 = vld [vmem:[#allocation17 + $0x80] sm:$0xff]  ;;  %v9519_v54 = vpack.i.bf16 %v3686_v49, %v3687_v61  ;;  %v10880_v61 = vld [vmem:[#allocation17 + $0x78] sm:$0xff] }
 0x29b   : > { %3366 = vmatpush.msra.mxu1 %v9518_v58  ;;  %v3683_v31 = vld [vmem:[#allocation17 + $0x60] sm:$0xff]  ;;  %v9524_v58 = vpack.i.bf16 %v3684_v15, %v3685_v7  ;;  %v4169_v37 = vld [vmem:[#allocation17 + $0xd0] sm:$0xff] }
 0x29c   : > { %3722 = vmatpush.msrb.mxu2 %v3685_v7  ;;  %v3682_v29 = vld [vmem:[#allocation17 + $0x40] sm:$0xff] }
 0x29d   : > { %v2426_v52 = vld.sshfl [vmem:[#allocation1 + $0x10] sm:$0xff pattern:$0x75316420] }
 0x29e   : > { %2620 = vst [vmem:[#allocation1 + $0x10] ss:$2 sm:$0xff] %v2594_v19  ;;  %2576 = vmatmul.f32.gmra.mxu1 %v2426_v52  ;;  %3723 = vmatpush.msrb.mxu2 %v3684_v15 }
 0x29f   : > { %v2833_v16 = vld.sshfl [vmem:[#allocation1] sm:$0xff pattern:$0x75316420]  ;;  %2622 = vst [vmem:[#allocation1 + $0x11] ss:$2 sm:$0xff] %v2595_v26  ;;  %v3680_v26 = vld [vmem:[#allocation17] sm:$0xff] }
 0x2a0   : > { %2931 = vst [vmem:[#allocation1] ss:$2 sm:$0xff] %v2907_v22  ;;  %2853 = vmatmul.f32.vlgmr.msrb.gmra.mxu0 %v2833_v16  ;;  %3724 = vmatpush.msrb.mxu2 %v3683_v31  ;;  %v3681_v22 = vld [vmem:[#allocation17 + $0x20] sm:$0xff] }
 0x2a1   : > { %2933 = vst [vmem:[#allocation1 + $0x1] ss:$2 sm:$0xff] %v2908_v46  ;;  %v9534_v14 = vpack.i.bf16 %v3680_v26, %v3681_v22  ;;  %v4163_v46 = vld [vmem:[#allocation17 + $0x70] sm:$0xff] }
 0x2a2   : > { %3725 = vmatpush.msrb.mxu2 %v3682_v29  ;;  %v9549_v62 = vpack.i.bf16 %v4161_v27, %v4163_v46 }
 0x2a4   : > { %3726 = vmatpush.msrb.mxu2 %v3681_v22 }
 0x2a6   : > { %v2624_v53 = vld.sshfl [vmem:[#allocation1 + $0x10] sm:$0xff pattern:$0x75316420]  ;;  %2876 = vmatmul.f32.vlgmr.msrb.gmra.mxu1 %v2833_v16  ;;  %3727 = vmatpush.msrb.mxu2 %v3680_v26 }
 0x2a7   : > { %2744 = vst [vmem:[#allocation1 + $0x10] ss:$2 sm:$0xff] %v2718_v18  ;;  %2710 = vmatmul.f32.gmra.mxu2 %v2624_v53  ;;  %4067 = vmatpush.msrb.mxu1 %v4170_v48  ;;  %v4171_v18 = vld [vmem:[#allocation17 + $0xf0] sm:$0xff]  ;;  %v9564_v53 = vpack.i.bf16 %v4164_v56, %v4166_v33 }
 0x2a8   : > { %v2938_v42 = vld.sshfl [vmem:[#allocation1] sm:$0xff pattern:$0x75316420]  ;;  %2746 = vst [vmem:[#allocation1 + $0x11] ss:$2 sm:$0xff] %v2719_v45 }
 0x2a9   : > { %3002 = vst [vmem:[#allocation1] ss:$2 sm:$0xff] %v2978_v21  ;;  %4068 = vmatpush.msrb.mxu1 %v4168_v44  ;;  %v9539_v21 = vpack.i.bf16 %v4169_v37, %v4171_v18 }
 0x2aa   : > { %3004 = vst [vmem:[#allocation1 + $0x1] ss:$2 sm:$0xff] %v2979_v38  ;;  %v4157_v38 = vld [vmem:[#allocation17 + $0x10] sm:$0xff] }
 0x2ab   : > { %4069 = vmatpush.msrb.mxu1 %v4166_v33 }
 0x2ac   : > { %v10759_v55 = vpop.f32.mrf.mxu1 }
 0x2ad   : > { %2584 = vrot.lane.b32.xlu0 %v10759_v55, %s9995_s28  ;;  %4070 = vmatpush.msrb.mxu1 %v4164_v56 }
 0x2af   : > { %v2748_v50 = vld.sshfl [vmem:[#allocation1 + $0x10] sm:$0xff pattern:$0x75316420]  ;;  %2958 = vmatmul.f32.vlgmr.msra.gmra.mxu2 %v2938_v42  ;;  %v9529_v42 = vpack.i.bf16 %v3682_v29, %v3683_v31 }
 0x2b0   : > { %2830 = vst [vmem:[#allocation1 + $0x10] ss:$2 sm:$0xff] %v2788_v32  ;;  %2770 = vmatmul.f32.gmra.mxu3 %v2748_v50  ;;  %v4159_v32 = vld [vmem:[#allocation17 + $0x30] sm:$0xff] }
 0x2b1   : > { %2832 = vst [vmem:[#allocation1 + $0x11] ss:$2 sm:$0xff] %v2789_v47  ;;  %v3009_v0 = vld.sshfl [vmem:[#allocation1] sm:$0xff pattern:$0x75316420]  ;;  %v10777_v10 = vpop.f32.mrf.mxu2  ;;  %v9554_v50 = vpack.i.bf16 %v4157_v38, %v4159_v32 }
 0x2b2   : > { %3078 = vst [vmem:[#allocation1] ss:$2 sm:$0xff] %v3038_v35  ;;  %v4165_v47 = vld [vmem:[#allocation17 + $0x90] sm:$0xff] }
 0x2b3   : > { %3080 = vst [vmem:[#allocation1 + $0x1] ss:$2 sm:$0xff] %v3039_v9  ;;  %v4167_v35 = vld [vmem:[#allocation17 + $0xb0] sm:$0xff]  ;;  %v4162_v9 = vld [vmem:[#allocation17 + $0x68] sm:$0xff] }
 0x2b4   : > { %4071 = vmatpush.msrb.mxu1 %v4162_v9 }
 0x2b8   : > { %v2834_v28 = vld.sshfl [vmem:[#allocation1 + $0x10] sm:$0xff pattern:$0x75316420]  ;;  %3029 = vmatmul.f32.vlgmr.msra.gmra.mxu3 %v3009_v0  ;;  %v9544_v0 = vpack.i.bf16 %v4165_v47, %v4167_v35 }
 0x2b9   : > { %2935 = vst [vmem:[#allocation1 + $0x10] ss:$2 sm:$0xff] %v2909_v20  ;;  %2856 = vmatmul.f32.gmra.mxu0 %v2834_v28  ;;  %2879 = vmatmul.f32.gmra.mxu1 %v2834_v28  ;;  %v4160_v20 = vld [vmem:[#allocation17 + $0x48] sm:$0xff] }
 0x2ba   : > { %2937 = vst [vmem:[#allocation1 + $0x11] ss:$2 sm:$0xff] %v2910_v51  ;;  %v3085_v40 = vld.sshfl [vmem:[#allocation1] sm:$0xff pattern:$0x75316420]  ;;  %4072 = vmatpush.msrb.mxu1 %v4160_v20 }
 0x2bb   : > { %3276 = vst [vmem:[#allocation1] ss:$2 sm:$0xff] %v3252_v4  ;;  %v4158_v28 = vld [vmem:[#allocation17 + $0x28] sm:$0xff]  ;;  %v9559_v4 = vpack.i.bf16 %v4168_v44, %v4170_v48 }
 0x2bc   : > { %3278 = vst [vmem:[#allocation1 + $0x1] ss:$2 sm:$0xff] %v3253_v59  ;;  %4073 = vmatpush.msrb.mxu1 %v4158_v28  ;;  %v4156_v51 = vld [vmem:[#allocation17 + $0x8] sm:$0xff]  ;;  %v9574_v59 = vpack.i.bf16 %v4160_v20, %v4162_v9  ;;  %v10920_v20 = vld [vmem:[#allocation17 + $0x98] sm:$0xff] }
 0x2be   : > { %4074 = vmatpush.msrb.mxu1 %v4156_v51 }
 0x2c1   : > { %v2939_v17 = vld.sshfl [vmem:[#allocation1 + $0x10] sm:$0xff pattern:$0x75316420]  ;;  %3233 = vmatmul.f32.vlgmr.msra.gmra.mxu0 %v3085_v40  ;;  %v9584_v40 = vpack.i.bf16 %v4156_v51, %v4158_v28 }
 0x2c2   : > { %3006 = vst [vmem:[#allocation1 + $0x10] ss:$2 sm:$0xff] %v2980_v43  ;;  %2961 = vmatmul.f32.gmra.mxu2 %v2939_v17  ;;  %v10922_v28 = vld [vmem:[#allocation17 + $0xb8] sm:$0xff] }
 0x2c3   : > { %3008 = vst [vmem:[#allocation1 + $0x11] ss:$2 sm:$0xff] %v2981_v30  ;;  %v3283_v34 = vld.sshfl [vmem:[#allocation1] sm:$0xff pattern:$0x75316420] }
 0x2c4   : > { %3367 = vmatmul.f32.vlgmr.msra.gmra.mxu1 %v3283_v34  ;;  %v10834_v30 = vld [vmem:[#allocation16] ss:$0 sm:$0xff] }
 0x2c5   : > { %v2376_v17 = vadd.f32 %v10834_v30, %v10763_v12 }
 0x2ca   : > { %v3010_v39 = vld.sshfl [vmem:[#allocation1 + $0x10] sm:$0xff pattern:$0x75316420] }
 0x2cb   : > { %3082 = vst [vmem:[#allocation1 + $0x10] ss:$2 sm:$0xff] %v3040_v5  ;;  %3032 = vmatmul.f32.gmra.mxu3 %v3010_v39  ;;  %v2580_v5 = vadd.f32 %v10759_v55, %v2376_v17  ;;  %v10855_v39 = vld [vmem:[#allocation17 + $0xd8] sm:$0xff] }
 0x2cc   : > { %3084 = vst [vmem:[#allocation1 + $0x11] ss:$2 sm:$0xff] %v3041_v25  ;;  %v3672_v25 = vld [vmem:[#allocation4] sm:$0xff] }
 0x2cd   : > { %8762 = vmatmul.msk.f32.vlgmr.msrb.gmra.mxu2 %vm556_vm12, %v3672_v25 }
 0x2d3   : > { %v3086_v8 = vld.sshfl [vmem:[#allocation1 + $0x10] sm:$0xff pattern:$0x75316420] }
 0x2d4   : > { %3280 = vst [vmem:[#allocation1 + $0x10] ss:$2 sm:$0xff] %v3254_v6  ;;  %3236 = vmatmul.f32.gmra.mxu0 %v3086_v8 }
 0x2d5   : > { %3282 = vst [vmem:[#allocation1 + $0x11] ss:$2 sm:$0xff] %v3255_v36  ;;  %v10857_v36 = vld [vmem:[#allocation17 + $0xf8] sm:$0xff] }
 0x2d6   : > { %v10864_v8 = vpack.i.bf16 %v10855_v39, %v10857_v36 }
 0x2dc   : > { %v3284_v1 = vld.sshfl [vmem:[#allocation1 + $0x10] sm:$0xff pattern:$0x75316420] }
 0x2dd   : > { %3370 = vmatmul.f32.gmra.mxu1 %v3284_v1 }
 0x312   : > { %v10765_v41 = vpop.f32.mrf.mxu0 }
 0x319   : > { %v10767_v24 = vpop.f32.mrf.mxu3 }
 0x31a   : > { %2778 = vrot.lane.b32.xlu0 %v10767_v24, %s9995_s28  ;;  %v2774_v6 = vadd.f32 %v10767_v24, %v2580_v5  ;;  %v10878_v24 = vld [vmem:[#allocation17 + $0x58] sm:$0xff] }
 0x31b   : > { %v10771_v2 = vpop.f32.mrf.mxu1  ;;  %v10887_v49 = vpack.i.bf16 %v10878_v24, %v10880_v61 }
 0x31d   : > { %v10773_v23 = vpop.f32.mrf.mxu0 }
 0x31e   : > { %2887 = vrot.lane.b32.xlu1 %v10773_v23, %s9995_s28 }
 0x31f   : > { %v2585_v43 = vpop.permute.xlu0 %2584 }
 0x320   : > { %v2590_v34 = vadd.f32 %v10834_v30, %v2585_v43 }
 0x322   : > { %2586 = vrot.lane.b32.xlu0 %v10771_v2, %s9995_s28  ;;  %v2714_v55 = vadd.f32 %v10777_v10, %v2590_v34  ;;  %v2883_v10 = vadd.f32 %v10773_v23, %v2774_v6 }
 0x323   : > { %v10781_v63 = vpop.f32.mrf.mxu1 }
 0x324   : > { %2899 = vrot.lane.b32.xlu2 %v10781_v63, %s9995_s28 }
 0x32a   : > { %v10785_v11 = vpop.f32.mrf.mxu2 }
 0x332   : > { %v10787_v19 = vpop.f32.mrf.mxu2 }
 0x333   : > { %v10789_v52 = vpop.f32.mrf.mxu3  ;;  %2969 = vrot.lane.b32.xlu1 %v10787_v19, %s9995_s28 }
 0x334   : > { %2780 = vrot.lane.b32.xlu0 %v10789_v52, %s9995_s28 }
 0x336   : > { %v10795_v3 = vpop.f32.mrf.mxu0  ;;  %v10807_v60 = vpop.f32.mrf.mxu1 }
 0x33b   : > { %2889 = vrot.lane.b32.xlu1 %v10795_v3, %s9995_s28  ;;  %v3030_v17 = vpop.f32.mrf.mxu3 }
 0x33c   : > { %9520 = vrot.lane.b32.xlu0 %v9519_v54, %s9996_s15 }
 0x33e   : > { %v10800_v16 = vpop.f32.mrf.mxu0 }
 0x33f   : > { %3244 = vrot.lane.b32.xlu2 %v10800_v16, %s9995_s28 }
 0x344   : > { %9535 = vrot.lane.b32.xlu0 %v9534_v14, %s9996_s15 }
 0x345   : > { %v10805_v13 = vpop.f32.mrf.mxu2 }
 0x346   : > { %2971 = vrot.lane.b32.xlu1 %v10805_v13, %s9995_s28 }
 0x347   : > { %2901 = vrot.lane.b32.xlu2 %v10807_v60, %s9995_s28 }
 0x34c   : > { %9550 = vrot.lane.b32.xlu0 %v9549_v62, %s9995_s28 }
 0x34e   : > { %9525 = vrot.lane.b32.xlu1 %v9524_v58, %s9996_s15 }
 0x351   : > { %v10815_v45 = vpop.f32.mrf.mxu0 }
 0x352   : > { %3246 = vrot.lane.b32.xlu2 %v10815_v45, %s9995_s28 }
 0x354   : > { %9565 = vrot.lane.b32.xlu0 %v9564_v53, %s9995_s28 }
 0x356   : > { %9540 = vrot.lane.b32.xlu1 %v9539_v21, %s9995_s28  ;;  %v10909_v21 = vld [vmem:[#allocation17 + $0x18] sm:$0xff] }
 0x35a   : > { %9530 = vrot.lane.b32.xlu2 %v9529_v42, %s9996_s15 }
 0x35c   : > { %9580 = vrot.lane.b32.xlu0 %v9524_v58, %s9997_s16 }
 0x35e   : > { %9555 = vrot.lane.b32.xlu1 %v9554_v50, %s9995_s28 }
 0x362   : > { %9545 = vrot.lane.b32.xlu2 %v9544_v0, %s9995_s28 }
 0x364   : > { %9595 = vrot.lane.b32.xlu0 %v9534_v14, %s9997_s16 }
 0x366   : > { %9570 = vrot.lane.b32.xlu1 %v9519_v54, %s9997_s16  ;;  %v10898_v54 = vmax.f32 %v2883_v10, 0.0 }
 0x368   : > { %v3382_v29 = vrot.slane %v10898_v54, 1  ;;  %v3383_v27 = vrot.slane %v10898_v54, 2  ;;  %v3384_v46 = vrot.slane %v10898_v54, 3  ;;  %v3385_v43 = vrot.slane %v10898_v54, 4 }
 0x36a   : > { %9560 = vrot.lane.b32.xlu2 %v9559_v4, %s9995_s28  ;;  %v10926_v4 = vpack.i.bf16 %v10920_v20, %v10922_v28 }
 0x36c   : > { %9610 = vrot.lane.b32.xlu0 %v10887_v49, %s9996_s15 }
 0x36e   : > { %9585 = vrot.lane.b32.xlu1 %v9584_v40, %s9995_s28 }
 0x372   : > { %9575 = vrot.lane.b32.xlu2 %v9574_v59, %s9995_s28 }
 0x374   : > { %9625 = vrot.lane.b32.xlu0 %v10926_v4, %s9997_s16 }
 0x376   : > { %9600 = vrot.lane.b32.xlu1 %v10864_v8, %s9996_s15 }
 0x37a   : > { %9590 = vrot.lane.b32.xlu2 %v9529_v42, %s9997_s16  ;;  %v10911_v42 = vld [vmem:[#allocation17 + $0x38] sm:$0xff] }
 0x37b   : > { %v10915_v32 = vpack.i.bf16 %v10909_v21, %v10911_v42 }
 0x37e   : > { %v2900_v15 = vpop.permute.xlu2 %2899  ;;  %9615 = vrot.lane.b32.xlu1 %v10915_v32, %s9996_s15 }
 0x37f   : > { %v2905_v40 = vadd.f32 %v10834_v30, %v2900_v15  ;;  %v3388_v15 = vrot.slane %v10898_v54, 7 }
 0x382   : > { %9605 = vrot.lane.b32.xlu2 %v10926_v4, %s9996_s15 }
 0x386   : > { %9630 = vrot.lane.b32.xlu1 %v10887_v49, %s9997_s16 }
 0x38a   : > { %9620 = vrot.lane.b32.xlu2 %v10864_v8, %s9997_s16 }
 0x38c   : > { %v2779_v31 = vpop.permute.xlu0 %2778 }
 0x38d   : > { %v2784_v53 = vadd.f32 %v10834_v30, %v2779_v31 }
 0x38f   : > { %v2895_v0 = vadd.f32 %v10781_v63, %v2784_v53  ;;  %v3386_v63 = vrot.slane %v10898_v54, 5 }
 0x390   : > { %v2888_v1 = vpop.permute.xlu1 %2887 }
 0x391   : > { %v2893_v12 = vadd.f32 %v2888_v1, %v2714_v55  ;;  %v3036_v5 = vadd.f32 %v3030_v17, %v2895_v0  ;;  %v3387_v1 = vrot.slane %v10898_v54, 6 }
 0x392   : > { %9635 = vrot.lane.b32.xlu2 %v10915_v32, %s9997_s16 }
 0x393   : > { %v2965_v7 = vadd.f32 %v10787_v19, %v2893_v12 }
 0x394   : > { %v2587_v35 = vpop.permute.xlu0 %2586 }
 0x395   : > { %v3378_v23 = vmax.f32 %v2965_v7, 0.0 }
 0x397   : > { %v3412_v26 = vrot.slane %v3378_v23, 1  ;;  %v3413_v22 = vrot.slane %v3378_v23, 2  ;;  %v3414_v19 = vrot.slane %v3378_v23, 3  ;;  %v3426_v14 = vperm.slane %v3378_v23, 0 }
 0x398   : > { %v3415_v38 = vrot.slane %v3378_v23, 4  ;;  %v3416_v50 = vrot.slane %v3378_v23, 5  ;;  %v3417_v47 = vrot.slane %v3378_v23, 6  ;;  %v3418_v9 = vrot.slane %v3378_v23, 7 }
 0x399   : > { %v3427_v48 = vperm.slane %v3412_v26, 0  ;;  %v3428_v44 = vperm.slane %v3413_v22, 0  ;;  %v3429_v33 = vperm.slane %v3414_v19, 0  ;;  %v3458_v62 = vsel %vm848_vm2, %v10898_v54, %v3426_v14  ;;  %v3245_v18 = vpop.permute.xlu2 %3244  ;;  %v3368_v26 = vpop.f32.mrf.mxu1 }
 0x39a   : > { %3604 = vst [vmem:[#allocation1] ss:$4 sm:$0xff] %v3458_v62  ;;  %v3430_v51 = vperm.slane %v3415_v38, 0  ;;  %v3431_v59 = vperm.slane %v3416_v50, 0  ;;  %v3432_v34 = vperm.slane %v3417_v47, 0  ;;  %v3433_v6 = vperm.slane %v3418_v9, 0 }
 0x39b   : > { %v3459_v56 = vsel %vm848_vm2, %v3382_v29, %v3427_v48  ;;  %v3460_v58 = vsel %vm848_vm2, %v3383_v27, %v3428_v44  ;;  %v3461_v37 = vsel %vm848_vm2, %v3384_v46, %v3429_v33  ;;  %v3240_v29 = vadd.f32 %v10800_v16, %v3036_v5 }
 0x39c   : > { %3606 = vst [vmem:[#allocation1 + $0x1] ss:$4 sm:$0xff] %v3459_v56  ;;  %v3462_v12 = vsel %vm848_vm2, %v3385_v43, %v3430_v51  ;;  %v3463_v23 = vsel %vm848_vm2, %v3386_v63, %v3431_v59  ;;  %v3464_v22 = vsel %vm848_vm2, %v3387_v1, %v3432_v34  ;;  %v3465_v14 = vsel %vm848_vm2, %v3388_v15, %v3433_v6 }
 0x39d   : > { %3608 = vst [vmem:[#allocation1 + $0x2] ss:$4 sm:$0xff] %v3460_v58  ;;  %v2377_v27 = vadd.f32 %v10834_v30, %v10765_v41  ;;  %v10947_v46 = vmax.f32 %v3240_v29, 0.0  ;;  %v2591_v56 = vadd.f32 %v10834_v30, %v2587_v35 }
 0x39e   : > { %3610 = vst [vmem:[#allocation1 + $0x3] ss:$4 sm:$0xff] %v3461_v37 }
 0x39f   : > { %v2581_v62 = vadd.f32 %v10771_v2, %v2377_v27  ;;  %v3480_v0 = vrot.slane %v10947_v46, 1  ;;  %v3481_v9 = vrot.slane %v10947_v46, 2  ;;  %v3482_v51 = vrot.slane %v10947_v46, 3 }
 0x3a0   : > { %v2715_v59 = vadd.f32 %v10785_v11, %v2591_v56  ;;  %v3484_v29 = vrot.slane %v10947_v46, 5 }
 0x3a1   : > { %v2902_v7 = vpop.permute.xlu2 %2901  ;;  %v2775_v41 = vadd.f32 %v10789_v52, %v2581_v62 }
 0x3a2   : > { %v2906_v63 = vadd.f32 %v10834_v30, %v2902_v7 }
 0x3a5   : > { %v2970_v25 = vpop.permute.xlu1 %2969  ;;  %v3611_v10 = vld.sshfl [vmem:[#allocation1] sm:$0xff pattern:$0x73625140] }
 0x3a6   : > { %v2975_v55 = vadd.f32 %v2970_v25, %v2905_v40  ;;  %3621 = vst [vmem:[#allocation1] ss:$4 sm:$0xff] %v3462_v12  ;;  %v2781_v19 = vpop.permute.xlu0 %2780  ;;  %v2884_v25 = vadd.f32 %v10795_v3, %v2775_v41  ;;  %v3033_v12 = vpop.f32.mrf.mxu3  ;;  %v3486_v41 = vrot.slane %v10947_v46, 7 }
 0x3a7   : > { %3622 = vst [vmem:[#allocation1 + $0x1] ss:$4 sm:$0xff] %v3463_v23  ;;  %v2785_v38 = vadd.f32 %v10834_v30, %v2781_v19  ;;  %v3483_v19 = vrot.slane %v10947_v46, 4 }
 0x3a8   : > { %v3250_v31 = vadd.f32 %v3245_v18, %v2975_v55  ;;  %3623 = vst [vmem:[#allocation1 + $0x2] ss:$4 sm:$0xff] %v3464_v22 }
 0x3a9   : > { %3624 = vst [vmem:[#allocation1 + $0x3] ss:$4 sm:$0xff] %v3465_v14  ;;  %v2896_v34 = vadd.f32 %v10807_v60, %v2785_v38 }
 0x3aa   : > { %v3374_v48 = vadd.f32 %v3368_v26, %v3250_v31  ;;  %3660 = vst.msk [vmem:[#allocation4 + $0x11] sm:$0xff] %vm556_vm12, %v3611_v10 }
 0x3ab   : > { %v3037_v3 = vadd.f32 %v3033_v12, %v2896_v34 }
 0x3ac   : > { %v10943_v54 = vmax.f32 %v3374_v48, 0.0  ;;  %v3247_v50 = vpop.permute.xlu2 %3246 }
 0x3ad   : > { %v2890_v33 = vpop.permute.xlu1 %2889 }
 0x3ae   : > { %v3510_v44 = vrot.slane %v10943_v54, 1  ;;  %v3511_v49 = vrot.slane %v10943_v54, 2  ;;  %v3512_v16 = vrot.slane %v10943_v54, 3  ;;  %v3524_v58 = vperm.slane %v10943_v54, 0  ;;  %v9521_v47 = vpop.permute.xlu0 %9520 }
 0x3af   : > { %v3513_v11 = vrot.slane %v10943_v54, 4  ;;  %v2894_v5 = vadd.f32 %v2890_v33, %v2715_v59  ;;  %v3514_v6 = vrot.slane %v10943_v54, 5  ;;  %v9523_v55 = vunpack.i.h.bf16 %v9521_v47 }
 0x3b0   : > { %v3525_v37 = vperm.slane %v3510_v44, 0  ;;  %v3526_v18 = vperm.slane %v3511_v49, 0  ;;  %v3527_v53 = vperm.slane %v3512_v16, 0  ;;  %v3625_v2 = vld.sshfl [vmem:[#allocation1] sm:$0xff pattern:$0x73625140]  ;;  %v3556_v35 = vsel %vm848_vm2, %v10947_v46, %v3524_v58  ;;  %v3371_v49 = vpop.f32.mrf.mxu1 }
 0x3b1   : > { %3662 = vst.msk [vmem:[#allocation4 + $0x31] sm:$0xff] %vm556_vm12, %v3625_v2  ;;  %v3673_v40 = vld [vmem:[#allocation4 + $0x10] sm:$0xff]  ;;  %v9522_v1 = vunpack.i.l.bf16 %v9521_v47  ;;  %v3515_v10 = vrot.slane %v10943_v54, 6  ;;  %v2966_v60 = vadd.f32 %v10805_v13, %v2894_v5  ;;  %v3516_v30 = vrot.slane %v10943_v54, 7 }
 0x3b2   : > { %v3557_v52 = vsel %vm848_vm2, %v3480_v0, %v3525_v37  ;;  %v3558_v43 = vsel %vm848_vm2, %v3481_v9, %v3526_v18  ;;  %v3559_v17 = vsel %vm848_vm2, %v3482_v51, %v3527_v53  ;;  %3613 = vst [vmem:[#allocation1 + $0x20] ss:$4 sm:$0xff] %v3556_v35  ;;  %8763 = vmatmul.msk.f32.gmra.mxu2 %vm556_vm12, %v3673_v40  ;;  %v10987_v13 = vmax.f32 %v2884_v25, 0.0 }
 0x3b3   : > { %8786 = vmatmul.msk.f32.vlgmr.msrb.gmra.mxu1 %vm556_vm12, %v3673_v40  ;;  %3615 = vst [vmem:[#allocation1 + $0x21] ss:$4 sm:$0xff] %v3557_v52  ;;  %3833 = vmatpush.msrb.mxu0 %v9522_v1  ;;  %v3528_v26 = vperm.slane %v3513_v11, 0  ;;  %v10989_v22 = vmax.f32 %v2966_v60, 0.0  ;;  %v3529_v14 = vperm.slane %v3514_v6, 0  ;;  %v3530_v48 = vperm.slane %v3515_v10, 0 }
 0x3b4   : > { %3617 = vst [vmem:[#allocation1 + $0x22] ss:$4 sm:$0xff] %v3558_v43  ;;  %v10979_v23 = vpop.permute.xlu2 %9530  ;;  %v3485_v16 = vrot.slane %v10947_v46, 6  ;;  %v3241_v33 = vadd.f32 %v10815_v45, %v3037_v3  ;;  %v3531_v62 = vperm.slane %v3516_v30, 0  ;;  %v3389_v47 = vrot.slane %v10987_v13, 1 }
 0x3b5   : > { %3619 = vst [vmem:[#allocation1 + $0x23] ss:$4 sm:$0xff] %v3559_v17  ;;  %3834 = vmatpush.msrb.mxu0 %v9523_v55  ;;  %v3419_v54 = vrot.slane %v10989_v22, 1  ;;  %v3420_v27 = vrot.slane %v10989_v22, 2  ;;  %v3421_v44 = vrot.slane %v10989_v22, 3  ;;  %v3434_v56 = vperm.slane %v10989_v22, 0 }
 0x3b6   : > { %v10983_v31 = vpop.permute.xlu0 %9535  ;;  %v3560_v58 = vsel %vm848_vm2, %v3483_v19, %v3528_v26  ;;  %v3561_v38 = vsel %vm848_vm2, %v3484_v29, %v3529_v14  ;;  %v3390_v0 = vrot.slane %v10987_v13, 2  ;;  %v3562_v45 = vsel %vm848_vm2, %v3485_v16, %v3530_v48 }
 0x3b7   : > { %v3435_v18 = vperm.slane %v3419_v54, 0  ;;  %v3437_v9 = vperm.slane %v3421_v44, 0  ;;  %v3391_v2 = vrot.slane %v10987_v13, 3  ;;  %v11010_v35 = vmax.f32 %v3241_v33, 0.0 }
 0x3b8   : > { %v2972_v15 = vpop.permute.xlu1 %2971  ;;  %v3563_v40 = vsel %vm848_vm2, %v3486_v41, %v3531_v62  ;;  %v3466_v46 = vsel %vm848_vm2, %v10987_v13, %v3434_v56  ;;  %v9532_v5 = vunpack.i.l.bf16 %v10979_v23  ;;  %v3392_v8 = vrot.slane %v10987_v13, 4 }
 0x3b9   : > { %v2976_v7 = vadd.f32 %v2972_v15, %v2906_v63  ;;  %v3467_v43 = vsel %vm848_vm2, %v3389_v47, %v3435_v18  ;;  %v3422_v63 = vrot.slane %v10989_v22, 4  ;;  %v3469_v6 = vsel %vm848_vm2, %v3391_v2, %v3437_v9  ;;  %3631 = vst [vmem:[#allocation1] ss:$4 sm:$0xff] %v3466_v46  ;;  %v3761_v9 = vld [vmem:[#allocation4 + $0x1] sm:$0xff] }
 0x3ba   : > { %v3487_v10 = vrot.slane %v11010_v35, 1  ;;  %v3488_v60 = vrot.slane %v11010_v35, 2  ;;  %3632 = vst [vmem:[#allocation1 + $0x1] ss:$4 sm:$0xff] %v3467_v43  ;;  %v3489_v26 = vrot.slane %v11010_v35, 3  ;;  %v3423_v19 = vrot.slane %v10989_v22, 5 }
 0x3bb   : > { %v3251_v4 = vadd.f32 %v3247_v50, %v2976_v7  ;;  %v3436_v50 = vperm.slane %v3420_v27, 0  ;;  %v9533_v7 = vunpack.i.h.bf16 %v10979_v23  ;;  %3634 = vst [vmem:[#allocation1 + $0x3] ss:$4 sm:$0xff] %v3469_v6  ;;  %v9537_v14 = vunpack.i.l.bf16 %v10983_v31 }
 0x3bc   : > { %v3620_v37 = vld.sshfl [vmem:[#allocation1 + $0x20] sm:$0xff pattern:$0x73625140]  ;;  %v11015_v59 = vpop.permute.xlu2 %9545  ;;  %v3425_v48 = vrot.slane %v10989_v22, 7  ;;  %v3438_v54 = vperm.slane %v3422_v63, 0  ;;  %v9538_v27 = vunpack.i.h.bf16 %v10983_v31  ;;  %v3393_v41 = vrot.slane %v10987_v13, 5 }
 0x3bd   : > { %v3375_v53 = vadd.f32 %v3371_v49, %v3251_v4  ;;  %3626 = vst [vmem:[#allocation1 + $0x20] ss:$4 sm:$0xff] %v3560_v58  ;;  %v3468_v11 = vsel %vm848_vm2, %v3390_v0, %v3436_v50  ;;  %v3424_v4 = vrot.slane %v10989_v22, 6  ;;  %v9547_v33 = vunpack.i.l.bf16 %v11015_v59 }
 0x3be   : > { %3627 = vst [vmem:[#allocation1 + $0x21] ss:$4 sm:$0xff] %v3561_v38  ;;  %v11017_v52 = vpop.permute.xlu0 %9550  ;;  %v3439_v38 = vperm.slane %v3423_v19, 0  ;;  %v3394_v0 = vrot.slane %v10987_v13, 6  ;;  %v3441_v2 = vperm.slane %v3425_v48, 0  ;;  %v9548_v46 = vunpack.i.h.bf16 %v11015_v59 }
 0x3bf   : > { %3628 = vst [vmem:[#allocation1 + $0x22] ss:$4 sm:$0xff] %v3562_v45  ;;  %v11020_v17 = vmax.f32 %v3375_v53, 0.0  ;;  %v3440_v45 = vperm.slane %v3424_v4, 0  ;;  %v3490_v19 = vrot.slane %v11010_v35, 4  ;;  %v3492_v48 = vrot.slane %v11010_v35, 6 }
 0x3c0   : > { %v9526_v51 = vpop.permute.xlu1 %9525  ;;  %3629 = vst [vmem:[#allocation1 + $0x23] ss:$4 sm:$0xff] %v3563_v40  ;;  %v3471_v6 = vsel %vm848_vm2, %v3393_v41, %v3439_v38 }
 0x3c1   : > { %v9528_v34 = vunpack.i.h.bf16 %v9526_v51  ;;  %v9527_v25 = vunpack.i.l.bf16 %v9526_v51  ;;  %3661 = vst.msk [vmem:[#allocation4 + $0x21] sm:$0xff] %vm556_vm12, %v3620_v37  ;;  %v3517_v55 = vrot.slane %v11020_v17, 1  ;;  %v3518_v1 = vrot.slane %v11020_v17, 2 }
 0x3c2   : > { %v3519_v12 = vrot.slane %v11020_v17, 3  ;;  %v3532_v15 = vperm.slane %v11020_v17, 0  ;;  %3633 = vst [vmem:[#allocation1 + $0x2] ss:$4 sm:$0xff] %v3468_v11  ;;  %v3520_v40 = vrot.slane %v11020_v17, 4  ;;  %v3521_v63 = vrot.slane %v11020_v17, 5 }
 0x3c3   : > { %3835 = vmatpush.msrb.mxu0 %v9527_v25  ;;  %v3533_v3 = vperm.slane %v3517_v55, 0  ;;  %v3534_v30 = vperm.slane %v3518_v1, 0  ;;  %v3522_v55 = vrot.slane %v11020_v17, 6  ;;  %v3472_v59 = vsel %vm848_vm2, %v3394_v0, %v3440_v45 }
 0x3c4   : > { %v3535_v29 = vperm.slane %v3519_v12, 0  ;;  %v3564_v23 = vsel %vm848_vm2, %v11010_v35, %v3532_v15  ;;  %v9561_v56 = vpop.permute.xlu2 %9560  ;;  %v3523_v1 = vrot.slane %v11020_v17, 7  ;;  %v9552_v12 = vunpack.i.l.bf16 %v11017_v52 }
 0x3c5   : > { %3836 = vmatpush.msrb.mxu0 %v9528_v34  ;;  %v3565_v16 = vsel %vm848_vm2, %v3487_v10, %v3533_v3  ;;  %v3566_v22 = vsel %vm848_vm2, %v3488_v60, %v3534_v30  ;;  %v9563_v18 = vunpack.i.h.bf16 %v9561_v56  ;;  %v9562_v53 = vunpack.i.l.bf16 %v9561_v56 }
 0x3c6   : > { %v9566_v58 = vpop.permute.xlu0 %9565  ;;  %v3567_v50 = vsel %vm848_vm2, %v3489_v26, %v3535_v29  ;;  %v3470_v34 = vsel %vm848_vm2, %v3392_v8, %v3438_v54  ;;  %v3536_v10 = vperm.slane %v3520_v40, 0  ;;  %v9553_v60 = vunpack.i.h.bf16 %v11017_v52 }
 0x3c7   : > { %3837 = vmatpush.msrb.mxu0 %v9532_v5  ;;  %v3630_v49 = vld.sshfl [vmem:[#allocation1 + $0x20] sm:$0xff pattern:$0x73625140]  ;;  %v9567_v47 = vunpack.i.l.bf16 %v9566_v58  ;;  %v9568_v43 = vunpack.i.h.bf16 %v9566_v58  ;;  %v3395_v5 = vrot.slane %v10987_v13, 7  ;;  %v3537_v30 = vperm.slane %v3521_v63, 0 }
 0x3c8   : > { %v9541_v44 = vpop.permute.xlu1 %9540  ;;  %3663 = vst.msk [vmem:[#allocation4 + $0x41] sm:$0xff] %vm556_vm12, %v3630_v49  ;;  %v11049_v37 = vld [vmem:[#allocation4 + $0x20] sm:$0xff]  ;;  %v3538_v29 = vperm.slane %v3522_v55, 0  ;;  %v3491_v52 = vrot.slane %v11010_v35, 5  ;;  %v3568_v54 = vsel %vm848_vm2, %v3490_v19, %v3536_v10  ;;  %v3493_v49 = vrot.slane %v11010_v35, 7 }
 0x3c9   : > { %v9543_v62 = vunpack.i.h.bf16 %v9541_v44  ;;  %v9542_v31 = vunpack.i.l.bf16 %v9541_v44  ;;  %3838 = vmatpush.msrb.mxu0 %v9533_v7  ;;  %3636 = vst [vmem:[#allocation1 + $0x20] ss:$4 sm:$0xff] %v3564_v23  ;;  %8764 = vmatmul.msk.f32.gmra.mxu2 %vm556_vm12, %v11049_v37  ;;  %v3635_v25 = vld.sshfl [vmem:[#allocation1] sm:$0xff pattern:$0x73625140]  ;;  %v4225_v11 = vsel %vm556_vm12, %v9567_v47, %v9547_v33  ;;  %v3473_v13 = vsel %vm848_vm2, %v3395_v5, %v3441_v2  ;;  %v11079_v7 = vld [vmem:[#allocation4 + $0x30] sm:$0xff] }
 0x3ca   : > { %8787 = vmatmul.msk.f32.gmra.mxu1 %vm556_vm12, %v11049_v37  ;;  %3637 = vst [vmem:[#allocation1 + $0x21] ss:$4 sm:$0xff] %v3565_v16  ;;  %v4224_v15 = vsel %vm556_vm12, %v9568_v43, %v9548_v46  ;;  %v3569_v23 = vsel %vm848_vm2, %v3491_v52, %v3537_v30  ;;  %v11094_v16 = vld [vmem:[#allocation4 + $0x11] sm:$0xff]  ;;  %v11110_v41 = vld [vmem:[#allocation4 + $0x21] sm:$0xff] }
 0x3cb   : > { %3839 = vmatpush.msrb.mxu0 %v9537_v14  ;;  %4461 = vmatpush.msra.mxu1 %v9542_v31  ;;  %v4227_v32 = vsel %vm556_vm12, %v9562_v53, %v9542_v31  ;;  %v4226_v51 = vsel %vm556_vm12, %v9563_v18, %v9543_v62  ;;  %3638 = vst [vmem:[#allocation1 + $0x22] ss:$4 sm:$0xff] %v3566_v22  ;;  %v3539_v14 = vperm.slane %v3523_v1, 0 }
 0x3cc   : > { %4268 = vmatpush.msra.mxu2 %v4227_v32  ;;  %3639 = vst [vmem:[#allocation1 + $0x23] ss:$4 sm:$0xff] %v3567_v50  ;;  %v9576_v3 = vpop.permute.xlu2 %9575 }
 0x3cd   : > { %3840 = vmatpush.msrb.mxu0 %v9538_v27  ;;  %4462 = vmatpush.msra.mxu1 %v9543_v62  ;;  %3641 = vst [vmem:[#allocation1] ss:$4 sm:$0xff] %v3470_v34  ;;  %v9578_v17 = vunpack.i.h.bf16 %v9576_v3  ;;  %v9577_v26 = vunpack.i.l.bf16 %v9576_v3  ;;  %v3570_v62 = vsel %vm848_vm2, %v3492_v48, %v3538_v29  ;;  %v3571_v56 = vsel %vm848_vm2, %v3493_v49, %v3539_v14 }
 0x3ce   : > { %8770 = vmatmul.msk.f32.vlgmr.msrb.gmra.mxu0 %vm556_vm12, %v3761_v9  ;;  %4269 = vmatpush.msra.mxu2 %v4226_v51  ;;  %3642 = vst [vmem:[#allocation1 + $0x1] ss:$4 sm:$0xff] %v3471_v6  ;;  %v9581_v51 = vpop.permute.xlu0 %9580 }
 0x3cf   : > { %4463 = vmatpush.msra.mxu1 %v9547_v33  ;;  %3643 = vst [vmem:[#allocation1 + $0x2] ss:$4 sm:$0xff] %v3472_v59  ;;  %v4223_v4 = vsel %vm556_vm12, %v9577_v26, %v9552_v12  ;;  %v4222_v44 = vsel %vm556_vm12, %v9578_v17, %v9553_v60  ;;  %v11103_v18 = vld [vmem:[#allocation4 + $0x40] sm:$0xff]  ;;  %v9583_v2 = vunpack.i.h.bf16 %v9581_v51  ;;  %v9582_v40 = vunpack.i.l.bf16 %v9581_v51 }
 0x3d0   : > { %v11074_v8 = vpop.permute.xlu1 %9555  ;;  %4270 = vmatpush.msra.mxu2 %v4225_v11  ;;  %3644 = vst [vmem:[#allocation1 + $0x3] ss:$4 sm:$0xff] %v3473_v13  ;;  %v11133_v11 = vld [vmem:[#allocation4 + $0x41] sm:$0xff]  ;;  %v11179_v13 = vld [vmem:[#allocation4 + $0x32] sm:$0xff] }
 0x3d1   : > { %4464 = vmatpush.msra.mxu1 %v9548_v46  ;;  %3664 = vst.msk [vmem:[#allocation4 + $0x51] sm:$0xff] %vm556_vm12, %v3635_v25  ;;  %8765 = vmatmul.msk.f32.gmra.mxu2 %vm556_vm12, %v11079_v7  ;;  %v9557_v33 = vunpack.i.l.bf16 %v11074_v8  ;;  %v9558_v35 = vunpack.i.h.bf16 %v11074_v8  ;;  %v11123_v46 = vld [vmem:[#allocation4 + $0x31] sm:$0xff]  ;;  %v4416_v26 = vld [vmem:[#allocation4 + $0x42] sm:$0xff] }
 0x3d2   : > { %8788 = vmatmul.msk.f32.gmra.mxu1 %vm556_vm12, %v11079_v7  ;;  %4271 = vmatpush.msra.mxu2 %v4224_v15 }
 0x3d3   : > { %4465 = vmatpush.msra.mxu1 %v9552_v12  ;;  %v3640_v27 = vld.sshfl [vmem:[#allocation1 + $0x20] sm:$0xff pattern:$0x73625140] }
 0x3d4   : > { %3646 = vst [vmem:[#allocation1 + $0x20] ss:$4 sm:$0xff] %v3568_v54  ;;  %4272 = vmatpush.msra.mxu2 %v4223_v4  ;;  %v9591_v34 = vpop.permute.xlu2 %9590 }
 0x3d5   : > { %4466 = vmatpush.msra.mxu1 %v9553_v60  ;;  %3647 = vst [vmem:[#allocation1 + $0x21] ss:$4 sm:$0xff] %v3569_v23  ;;  %v9592_v25 = vunpack.i.l.bf16 %v9591_v34  ;;  %v9593_v63 = vunpack.i.h.bf16 %v9591_v34 }
 0x3d6   : > { %8771 = vmatmul.msk.f32.gmra.mxu0 %vm556_vm12, %v11094_v16  ;;  %3648 = vst [vmem:[#allocation1 + $0x22] ss:$4 sm:$0xff] %v3570_v62  ;;  %4273 = vmatpush.msra.mxu2 %v4222_v44  ;;  %v9596_v5 = vpop.permute.xlu0 %9595 }
 0x3d7   : > { %4467 = vmatpush.msra.mxu1 %v9557_v33  ;;  %v3645_v22 = vld.sshfl [vmem:[#allocation1] sm:$0xff pattern:$0x73625140]  ;;  %3649 = vst [vmem:[#allocation1 + $0x23] ss:$4 sm:$0xff] %v3571_v56  ;;  %v9597_v6 = vunpack.i.l.bf16 %v9596_v5  ;;  %v9598_v55 = vunpack.i.h.bf16 %v9596_v5 }
 0x3d8   : > { %v9571_v58 = vpop.permute.xlu1 %9570  ;;  %3666 = vst.msk [vmem:[#allocation4 + $0x71] sm:$0xff] %vm556_vm12, %v3645_v22  ;;  %v11115_v45 = vld [vmem:[#allocation4 + $0x50] sm:$0xff] }
 0x3d9   : > { %v9572_v31 = vunpack.i.l.bf16 %v9571_v58  ;;  %v9573_v53 = vunpack.i.h.bf16 %v9571_v58  ;;  %4468 = vmatpush.msra.mxu1 %v9558_v35  ;;  %3665 = vst.msk [vmem:[#allocation4 + $0x61] sm:$0xff] %vm556_vm12, %v3640_v27  ;;  %8766 = vmatmul.msk.f32.gmra.mxu2 %vm556_vm12, %v11103_v18  ;;  %v11144_v1 = vld [vmem:[#allocation4 + $0x51] sm:$0xff] }
 0x3da   : > { %8789 = vmatmul.msk.f32.gmra.mxu1 %vm556_vm12, %v11103_v18  ;;  %v4417_v44 = vld [vmem:[#allocation4 + $0x52] sm:$0xff] }
 0x3db   : > { %3978 = vmatpush.msra.mxu0 %v9572_v31 }
 0x3dd   : > { %3979 = vmatpush.msra.mxu0 %v9573_v53  ;;  %v11206_v53 = vpop.f32.mrf.mxu2 }
 0x3de   : > { %8772 = vmatmul.msk.f32.gmra.mxu0 %vm556_vm12, %v11110_v41  ;;  %v3650_v38 = vld.sshfl [vmem:[#allocation1 + $0x20] sm:$0xff pattern:$0x73625140]  ;;  %v9611_v10 = vpop.permute.xlu0 %9610 }
 0x3df   : > { %3667 = vst.msk [vmem:[#allocation4 + $0x81] sm:$0xff] %vm556_vm12, %v3650_v38  ;;  %3980 = vmatpush.msra.mxu0 %v9582_v40  ;;  %v11137_v59 = vld [vmem:[#allocation4 + $0x70] sm:$0xff]  ;;  %v9612_v3 = vunpack.i.l.bf16 %v9611_v10  ;;  %v9613_v17 = vunpack.i.h.bf16 %v9611_v10 }
 0x3e0   : > { %v9586_v50 = vpop.permute.xlu1 %9585  ;;  %v11127_v43 = vld [vmem:[#allocation4 + $0x60] sm:$0xff]  ;;  %v4419_v22 = vld [vmem:[#allocation4 + $0x72] sm:$0xff] }
 0x3e1   : > { %v9588_v47 = vunpack.i.h.bf16 %v9586_v50  ;;  %v9587_v0 = vunpack.i.l.bf16 %v9586_v50  ;;  %8767 = vmatmul.msk.f32.gmra.mxu2 %vm556_vm12, %v11115_v45  ;;  %3981 = vmatpush.msra.mxu0 %v9583_v2  ;;  %v4418_v56 = vld [vmem:[#allocation4 + $0x62] sm:$0xff] }
 0x3e2   : > { %8790 = vmatmul.msk.f32.gmra.mxu1 %vm556_vm12, %v11115_v45 }
 0x3e3   : > { %v4221_v32 = vsel %vm556_vm12, %v9587_v0, %v9557_v33  ;;  %v4220_v9 = vsel %vm556_vm12, %v9588_v47, %v9558_v35  ;;  %3982 = vmatpush.msra.mxu0 %v9592_v25 }
 0x3e4   : > { %4274 = vmatpush.msra.mxu2 %v4221_v32 }
 0x3e5   : > { %3983 = vmatpush.msra.mxu0 %v9593_v63 }
 0x3e6   : > { %4275 = vmatpush.msra.mxu2 %v4220_v9  ;;  %8773 = vmatmul.msk.f32.gmra.mxu0 %vm556_vm12, %v11123_v46  ;;  %v11149_v12 = vld [vmem:[#allocation4 + $0x80] sm:$0xff]  ;;  %v9626_v48 = vpop.permute.xlu0 %9625 }
 0x3e7   : > { %3984 = vmatpush.msra.mxu0 %v9597_v6  ;;  %v9627_v54 = vunpack.i.l.bf16 %v9626_v48  ;;  %v9628_v49 = vunpack.i.h.bf16 %v9626_v48  ;;  %v4155_v58 = vld [vmem:[#allocation4 + $0x81] sm:$0xff]  ;;  %v6071_v48 = vld [vmem:[%s12988_s9 + $0x8] sm:$0xff] }
 0x3e8   : > { %v9601_v8 = vpop.permute.xlu1 %9600  ;;  %v4420_v31 = vld [vmem:[#allocation4 + $0x82] sm:$0xff] }
 0x3e9   : > { %8768 = vmatmul.msk.f32.gmra.mxu2 %vm556_vm12, %v11127_v43  ;;  %3985 = vmatpush.msra.mxu0 %v9598_v55 }
 0x3ea   : > { %8791 = vmatmul.msk.f32.gmra.mxu1 %vm556_vm12, %v11127_v43 }
 0x3eb   : > { %4591 = vmatpush.msrb.mxu0 %v10857_v36  ;;  %v11157_v36 = vld [vmem:[#allocation4 + $0x61] sm:$0xff] }
 0x3ed   : > { %4592 = vmatpush.msrb.mxu0 %v10855_v39  ;;  %v4413_v39 = vld [vmem:[#allocation4 + $0x12] sm:$0xff] }
 0x3ee   : > { %8774 = vmatmul.msk.f32.gmra.mxu0 %vm556_vm12, %v11133_v11 }
 0x3ef   : > { %4593 = vmatpush.msrb.mxu0 %v10922_v28  ;;  %v9603_v28 = vunpack.i.h.bf16 %v9601_v8 }
 0x3f0   : > { %v9616_v30 = vpop.permute.xlu1 %9615 }
 0x3f1   : > { %8769 = vmatmul.msk.f32.gmra.mxu2 %vm556_vm12, %v11137_v59  ;;  %4594 = vmatpush.msrb.mxu0 %v10920_v20  ;;  %v9602_v20 = vunpack.i.l.bf16 %v9601_v8  ;;  %v9617_v19 = vunpack.i.l.bf16 %v9616_v30  ;;  %v9618_v29 = vunpack.i.h.bf16 %v9616_v30  ;;  %v4550_v30 = vld [vmem:[#allocation4 + $0x90] sm:$0xff] }
 0x3f2   : > { %8792 = vmatmul.msk.f32.gmra.mxu1 %vm556_vm12, %v11137_v59 }
 0x3f3   : > { %4595 = vmatpush.msrb.mxu0 %v10880_v61  ;;  %4704 = vmatpush.msrb.mxu1 %v9602_v20  ;;  %v11168_v61 = vld [vmem:[#allocation4 + $0x71] sm:$0xff] }
 0x3f5   : > { %4596 = vmatpush.msrb.mxu0 %v10878_v24  ;;  %4705 = vmatpush.msrb.mxu1 %v9603_v28  ;;  %v11172_v24 = vld [vmem:[#allocation4 + $0x22] sm:$0xff] }
 0x3f6   : > { %8775 = vmatmul.msk.f32.gmra.mxu0 %vm556_vm12, %v11144_v1 }
 0x3f7   : > { %4597 = vmatpush.msrb.mxu0 %v10911_v42  ;;  %v3914_v42 = vld [vmem:[#allocation4 + $0x2] sm:$0xff] }
 0x3f8   : > { %v9631_v27 = vpop.permute.xlu1 %9630 }
 0x3f9   : > { %8794 = vmatmul.msk.f32.vlgmr.msra.gmra.mxu2 %vm556_vm12, %v11094_v16  ;;  %4598 = vmatpush.msrb.mxu0 %v10909_v21  ;;  %v9606_v21 = vpop.permute.xlu2 %9605  ;;  %v9632_v23 = vunpack.i.l.bf16 %v9631_v27  ;;  %v9633_v33 = vunpack.i.h.bf16 %v9631_v27  ;;  %v8903_v27 = vld [vmem:[%s12988_s9 + $0x48] sm:$0xff] }
 0x3fa   : > { %8793 = vmatmul.msk.f32.gmra.mxu1 %vm556_vm12, %v11149_v12  ;;  %v9608_v60 = vunpack.i.h.bf16 %v9606_v21  ;;  %v9607_v15 = vunpack.i.l.bf16 %v9606_v21 }
 0x3fc   : > { %4706 = vmatpush.msrb.mxu1 %v9607_v15 }
 0x3fe   : > { %8776 = vmatmul.msk.f32.gmra.mxu0 %vm556_vm12, %v11157_v36  ;;  %4707 = vmatpush.msrb.mxu1 %v9608_v60 }
 0x400   : > { %4708 = vmatpush.msrb.mxu1 %v9612_v3 }
 0x401   : > { %8795 = vmatmul.msk.f32.gmra.mxu2 %vm556_vm12, %v11110_v41  ;;  %v9621_v52 = vpop.permute.xlu2 %9620 }
 0x402   : > { %8802 = vmatmul.msk.f32.vlgmr.msra.gmra.mxu1 %vm556_vm12, %v4413_v39  ;;  %v9623_v14 = vunpack.i.h.bf16 %v9621_v52  ;;  %v9622_v4 = vunpack.i.l.bf16 %v9621_v52  ;;  %v8868_v52 = vld [vmem:[%s12988_s9 + $0x30] sm:$0xff] }
 0x403   : > { %4709 = vmatpush.msrb.mxu1 %v9613_v17  ;;  %v6073_v17 = vld [vmem:[%s12988_s9 + $0x18] sm:$0xff] }
 0x404   : > { %4849 = vmatpush.msrb.mxu2 %v9622_v4  ;;  %6182 = vmatpush.msrb.mxu3 %v6073_v17  ;;  %v8904_v4 = vld [vmem:[%s12988_s9 + $0x50] sm:$0xff]  ;;  %v6039_v17 = vld [vmem:[#allocation5 + $0x8] sm:$0xff] }
 0x405   : > { %4710 = vmatpush.msrb.mxu1 %v9617_v19  ;;  %v8905_v19 = vld [vmem:[%s12988_s9 + $0x58] sm:$0xff] }
 0x406   : > { %8777 = vmatmul.msk.f32.gmra.mxu0 %vm556_vm12, %v11168_v61  ;;  %4850 = vmatpush.msrb.mxu2 %v9623_v14  ;;  %v11393_v14 = vld [vmem:[#allocation19] ss:$0 sm:$0xff] }
 0x407   : > { %4711 = vmatpush.msrb.mxu1 %v9618_v29  ;;  %v6072_v29 = vld [vmem:[%s12988_s9 + $0x10] sm:$0xff] }
 0x408   : > { %4851 = vmatpush.msrb.mxu2 %v9627_v54  ;;  %6183 = vmatpush.msrb.mxu3 %v6072_v29  ;;  %v8867_v54 = vld [vmem:[%s12988_s9 + $0x28] sm:$0xff] }
 0x409   : > { %8796 = vmatmul.msk.f32.gmra.mxu2 %vm556_vm12, %v11123_v46  ;;  %v9636_v16 = vpop.permute.xlu2 %9635  ;;  %6738 = vmatpush.msra.mxu1 %v8905_v19 }
 0x40a   : > { %8803 = vmatmul.msk.f32.gmra.mxu1 %vm556_vm12, %v11172_v24  ;;  %4852 = vmatpush.msrb.mxu2 %v9628_v49  ;;  %v9637_v62 = vunpack.i.l.bf16 %v9636_v16  ;;  %v9638_v35 = vunpack.i.h.bf16 %v9636_v16  ;;  %v8866_v16 = vld [vmem:[%s12988_s9 + $0x20] sm:$0xff] }
 0x40b   : > { %6739 = vmatpush.msra.mxu1 %v8904_v4  ;;  %6184 = vmatpush.msrb.mxu3 %v6071_v48 }
 0x40c   : > { %4853 = vmatpush.msrb.mxu2 %v9632_v23  ;;  %v6070_v23 = vld [vmem:[%s12988_s9] sm:$0xff] }
 0x40d   : > { %6740 = vmatpush.msra.mxu1 %v8903_v27  ;;  %6185 = vmatpush.msrb.mxu3 %v6070_v23 }
 0x40e   : > { %8778 = vmatmul.msk.f32.vlgmr.msra.gmra.mxu0 %vm556_vm12, %v3914_v42  ;;  %4854 = vmatpush.msrb.mxu2 %v9633_v33  ;;  %v8902_v33 = vld [vmem:[%s12988_s9 + $0x40] sm:$0xff] }
 0x40f   : > { %6741 = vmatpush.msra.mxu1 %v8902_v33 }
 0x410   : > { %4855 = vmatpush.msrb.mxu2 %v9637_v62  ;;  %v6038_v62 = vld [vmem:[#allocation5] sm:$0xff] }
 0x411   : > { %8797 = vmatmul.msk.f32.gmra.mxu2 %vm556_vm12, %v11133_v11  ;;  %8834 = vmatmul.msk.f32.vlgmr.msrb.gmra.mxu3 %vm584_vm15, %v6038_v62 }
 0x412   : > { %8804 = vmatmul.msk.f32.gmra.mxu1 %vm556_vm12, %v11179_v13  ;;  %4856 = vmatpush.msrb.mxu2 %v9638_v35 }
 0x416   : > { %8779 = vmatmul.msk.f32.gmra.mxu0 %vm556_vm12, %v4413_v39 }
 0x419   : > { %8798 = vmatmul.msk.f32.gmra.mxu2 %vm556_vm12, %v11144_v1  ;;  %8835 = vmatmul.msk.f32.gmra.mxu3 %vm584_vm15, %v6039_v17 }
 0x41a   : > { %8805 = vmatmul.msk.f32.gmra.mxu1 %vm556_vm12, %v4416_v26 }
 0x41e   : > { %8780 = vmatmul.msk.f32.gmra.mxu0 %vm556_vm12, %v11172_v24 }
 0x421   : > { %8799 = vmatmul.msk.f32.gmra.mxu2 %vm556_vm12, %v11157_v36 }
 0x422   : > { %8806 = vmatmul.msk.f32.gmra.mxu1 %vm556_vm12, %v4417_v44 }
 0x426   : > { %8781 = vmatmul.msk.f32.gmra.mxu0 %vm556_vm12, %v11179_v13 }
 0x429   : > { %8800 = vmatmul.msk.f32.gmra.mxu2 %vm556_vm12, %v11168_v61 }
 0x42a   : > { %8807 = vmatmul.msk.f32.gmra.mxu1 %vm556_vm12, %v4418_v56 }
 0x42e   : > { %8782 = vmatmul.msk.f32.gmra.mxu0 %vm556_vm12, %v4416_v26 }
 0x430   : > { %v11209_v38 = vpop.f32.mrf.mxu1 }
 0x431   : > { %8801 = vmatmul.msk.f32.gmra.mxu2 %vm556_vm12, %v4155_v58 }
 0x432   : > { %8808 = vmatmul.msk.f32.gmra.mxu1 %vm556_vm12, %v4419_v22 }
 0x435   : > { %v11215_v50 = vpop.f32.mrf.mxu2 }
 0x436   : > { %8783 = vmatmul.msk.f32.gmra.mxu0 %vm556_vm12, %v4417_v44 }
 0x439   : > { %8826 = vmatmul.msk.f32.vlgmr.msrb.gmra.mxu2 %vm556_vm12, %v11172_v24 }
 0x43a   : > { %8809 = vmatmul.msk.f32.gmra.mxu1 %vm556_vm12, %v4420_v31 }
 0x43e   : > { %8784 = vmatmul.msk.f32.gmra.mxu0 %vm556_vm12, %v4418_v56 }
 0x441   : > { %8827 = vmatmul.msk.f32.gmra.mxu2 %vm556_vm12, %v11179_v13 }
 0x442   : > { %8818 = vmatmul.msk.f32.vlgmr.msrb.gmra.mxu1 %vm556_vm12, %v11110_v41 }
 0x446   : > { %8785 = vmatmul.msk.f32.gmra.mxu0 %vm556_vm12, %v4419_v22 }
 0x447   : > { %v11218_v47 = vpop.f32.mrf.mxu1 }
 0x449   : > { %8828 = vmatmul.msk.f32.gmra.mxu2 %vm556_vm12, %v4416_v26  ;;  %v8869_v26 = vld [vmem:[%s12988_s9 + $0x38] sm:$0xff] }
 0x44a   : > { %8819 = vmatmul.msk.f32.gmra.mxu1 %vm556_vm12, %v11123_v46  ;;  %6460 = vmatpush.msra.mxu0 %v8869_v26 }
 0x44b   : > { %v11223_v0 = vpop.f32.mrf.mxu0 }
 0x44c   : > { %3882 = vrot.lane.b32.xlu0 %v11223_v0, %s9996_s15  ;;  %v11227_v41 = vpop.f32.mrf.mxu2  ;;  %6461 = vmatpush.msra.mxu0 %v8868_v52 }
 0x44e   : > { %8810 = vmatmul.msk.f32.vlgmr.msrb.gmra.mxu0 %vm556_vm12, %v11049_v37 }
 0x44f   : > { %v11231_v32 = vpop.f32.mrf.mxu1  ;;  %6462 = vmatpush.msra.mxu0 %v8867_v54 }
 0x451   : > { %8829 = vmatmul.msk.f32.gmra.mxu2 %vm556_vm12, %v4417_v44  ;;  %v3753_v44 = vadd.f32 %v11393_v14, %v11206_v53  ;;  %6463 = vmatpush.msra.mxu0 %v8866_v16 }
 0x452   : > { %8820 = vmatmul.msk.f32.gmra.mxu1 %vm556_vm12, %v11133_v11 }
 0x453   : > { %v11294_v11 = vpop.f32.mrf.mxu0 }
 0x454   : > { %4116 = vrot.lane.b32.xlu0 %v11209_v38, %s9996_s15  ;;  %v11238_v9 = vpop.f32.mrf.mxu2 }
 0x456   : > { %8811 = vmatmul.msk.f32.gmra.mxu0 %vm556_vm12, %v11079_v7 }
 0x457   : > { %v11242_v51 = vpop.f32.mrf.mxu1 }
 0x459   : > { %8830 = vmatmul.msk.f32.gmra.mxu2 %vm556_vm12, %v4418_v56  ;;  %v6315_v56 = vld [vmem:[#allocation5 + $0x1] sm:$0xff] }
 0x45a   : > { %8821 = vmatmul.msk.f32.gmra.mxu1 %vm556_vm12, %v11144_v1  ;;  %v4639_v1 = vld [vmem:[#allocation4 + $0x91] sm:$0xff] }
 0x45c   : > { %v11247_v37 = vpop.f32.mrf.mxu2 }
 0x45e   : > { %8812 = vmatmul.msk.f32.gmra.mxu0 %vm556_vm12, %v11103_v18 }
 0x45f   : > { %v11251_v2 = vpop.f32.mrf.mxu1 }
 0x461   : > { %8831 = vmatmul.msk.f32.gmra.mxu2 %vm556_vm12, %v4419_v22  ;;  %v3866_v22 = vadd.f32 %v11223_v0, %v3753_v44 }
 0x462   : > { %8822 = vmatmul.msk.f32.gmra.mxu1 %vm556_vm12, %v11157_v36 }
 0x463   : > { %v4100_v0 = vadd.f32 %v11209_v38, %v3866_v22 }
 0x464   : > { %v11256_v7 = vpop.f32.mrf.mxu2 }
 0x466   : > { %8813 = vmatmul.msk.f32.gmra.mxu0 %vm556_vm12, %v11115_v45 }
 0x467   : > { %v11260_v40 = vpop.f32.mrf.mxu1 }
 0x469   : > { %8832 = vmatmul.msk.f32.gmra.mxu2 %vm556_vm12, %v4420_v31 }
 0x46a   : > { %8823 = vmatmul.msk.f32.gmra.mxu1 %vm556_vm12, %v11168_v61 }
 0x46c   : > { %v11265_v18 = vpop.f32.mrf.mxu2 }
 0x46d   : > { %13016 = vst [vmem:[#allocation28_spill] sm:$0xff] %v11265_v18 }
 0x46e   : > { %8814 = vmatmul.msk.f32.gmra.mxu0 %vm556_vm12, %v11127_v43 }
 0x46f   : > { %v11269_v46 = vpop.f32.mrf.mxu1 }
 0x470   : > { %13017 = vst [vmem:[#allocation29_spill] sm:$0xff] %v11269_v46 }
 0x472   : > { %8824 = vmatmul.msk.f32.gmra.mxu1 %vm556_vm12, %v4155_v58  ;;  %v6593_v58 = vld [vmem:[#allocation5 + $0x2] sm:$0xff] }
 0x474   : > { %v11272_v34 = vpop.f32.mrf.mxu2 }
 0x475   : > { %13018 = vst [vmem:[#allocation30_spill] sm:$0xff] %v11272_v34 }
 0x476   : > { %8815 = vmatmul.msk.f32.gmra.mxu0 %vm556_vm12, %v11137_v59  ;;  %v11310_v59 = vpop.f32.mrf.mxu0 }
 0x477   : > { %v11276_v45 = vpop.f32.mrf.mxu1 }
 0x478   : > { %13019 = vst [vmem:[#allocation31_spill] sm:$0xff] %v11276_v45 }
 0x47a   : > { %8825 = vmatmul.msk.f32.gmra.mxu1 %vm556_vm12, %v4639_v1 }
 0x47c   : > { %v11278_v25 = vpop.f32.mrf.mxu2 }
 0x47d   : > { %4381 = vrot.lane.b32.xlu2 %v11278_v25, %s9997_s16  ;;  %4317 = vrot.lane.b32.xlu1 %v11278_v25, %s9996_s15  ;;  %v4301_v26 = vadd.f32 %v11278_v25, %v4100_v0 }
 0x47e   : > { %8816 = vmatmul.msk.f32.gmra.mxu0 %vm556_vm12, %v11149_v12  ;;  %v11321_v39 = vpop.f32.mrf.mxu0 }
 0x47f   : > { %v11284_v43 = vpop.f32.mrf.mxu1 }
 0x482   : > { %8906 = vmatmul.msk.f32.vlgmr.msra.gmra.mxu1 %vm584_vm15, %v6593_v58 }
 0x484   : > { %v11296_v5 = vpop.f32.mrf.mxu2 }
 0x485   : > { %4349 = vrot.lane.b32.xlu2 %v11278_v25, %s9995_s28  ;;  %4510 = vrot.lane.b32.xlu1 %v11284_v43, %s9996_s15 }
 0x486   : > { %v11325_v28 = vpop.f32.mrf.mxu0  ;;  %8817 = vmatmul.msk.f32.gmra.mxu0 %vm556_vm12, %v4550_v30  ;;  %v4792_v30 = vld [vmem:[#allocation4 + $0x92] sm:$0xff] }
 0x487   : > { %v11292_v63 = vpop.f32.mrf.mxu1  ;;  %8833 = vmatmul.msk.f32.gmra.mxu2 %vm556_vm12, %v4792_v30 }
 0x48c   : > { %v11343_v21 = vpop.f32.mrf.mxu2 }
 0x48d   : > { %3884 = vrot.lane.b32.xlu1 %v11294_v11, %s9996_s15  ;;  %4319 = vrot.lane.b32.xlu2 %v11296_v5, %s9996_s15 }
 0x48e   : > { %v11329_v61 = vpop.f32.mrf.mxu0  ;;  %8870 = vmatmul.msk.f32.vlgmr.msra.gmra.mxu0 %vm584_vm15, %v6315_v56 }
 0x48f   : > { %v11302_v6 = vpop.f32.mrf.mxu1 }
 0x494   : > { %v11355_v15 = vpop.f32.mrf.mxu2 }
 0x495   : > { %4118 = vrot.lane.b32.xlu1 %v11218_v47, %s9996_s15  ;;  %4512 = vrot.lane.b32.xlu2 %v11292_v63, %s9996_s15 }
 0x496   : > { %v11335_v42 = vpop.f32.mrf.mxu0 }
 0x497   : > { %v11308_v55 = vpop.f32.mrf.mxu1  ;;  %13022 = vst [vmem:[#allocation34_spill] sm:$0xff] %v11335_v42 }
 0x49c   : > { %v11434_v35 = vpop.f32.mrf.mxu2 }
 0x49d   : > { %3886 = vrot.lane.b32.xlu2 %v11310_v59, %s9996_s15 }
 0x49e   : > { %v11347_v60 = vpop.f32.mrf.mxu0 }
 0x49f   : > { %v11315_v12 = vpop.f32.mrf.mxu1  ;;  %13023 = vst [vmem:[#allocation35_spill] sm:$0xff] %v11347_v60 }
 0x4a5   : > { %4120 = vrot.lane.b32.xlu2 %v11231_v32, %s9996_s15 }
 0x4a6   : > { %v11363_v3 = vpop.f32.mrf.mxu0 }
 0x4a7   : > { %v11319_v36 = vpop.f32.mrf.mxu1 }
 0x4ae   : > { %v11417_v49 = vpop.f32.mrf.mxu0 }
 0x4af   : > { %v11323_v8 = vpop.f32.mrf.mxu1 }
 0x4b0   : > { %13020 = vst [vmem:[#allocation32_spill] sm:$0xff] %v11323_v8 }
 0x4b6   : > { %v11464_v19 = vpop.f32.mrf.mxu0 }
 0x4b7   : > { %v11327_v20 = vpop.f32.mrf.mxu1 }
 0x4b8   : > { %13021 = vst [vmem:[#allocation33_spill] sm:$0xff] %v11327_v20 }
 0x4be   : > { %v3883_v31 = vpop.permute.xlu0 %3882  ;;  %v11497_v62 = vpop.f32.mrf.mxu0 }
 0x4bf   : > { %v11331_v24 = vpop.f32.mrf.mxu1  ;;  %v3906_v53 = vadd.f32 %v11393_v14, %v3883_v31 }
 0x4c0   : > { %4753 = vrot.lane.b32.xlu0 %v11331_v24, %s9996_s15 }
 0x4c1   : > { %v4011_v1 = vadd.f32 %v11363_v3, %v3906_v53  ;;  %v4890_v3 = vmax.f32 %v4301_v26, 0.0 }
 0x4c3   : > { %v4914_v48 = vrot.slane %v4890_v3, 1  ;;  %v4915_v54 = vrot.slane %v4890_v3, 2  ;;  %v4916_v27 = vrot.slane %v4890_v3, 3  ;;  %v4917_v44 = vrot.slane %v4890_v3, 4 }
 0x4c4   : > { %v4918_v17 = vrot.slane %v4890_v3, 5 }
 0x4c7   : > { %v11337_v13 = vpop.f32.mrf.mxu1 }
 0x4c8   : > { %4755 = vrot.lane.b32.xlu1 %v11337_v13, %s9996_s15  ;;  %4383 = vrot.lane.b32.xlu0 %v11296_v5, %s9997_s16 }
 0x4cf   : > { %v11345_v10 = vpop.f32.mrf.mxu1 }
 0x4d0   : > { %4351 = vrot.lane.b32.xlu0 %v11296_v5, %s9995_s28  ;;  %4757 = vrot.lane.b32.xlu2 %v11345_v10, %s9996_s15 }
 0x4d1   : > { %4385 = vrot.lane.b32.xlu1 %v11343_v21, %s9997_s16 }
 0x4d7   : > { %v11484_v29 = vpop.f32.mrf.mxu1 }
 0x4d8   : > { %4321 = vrot.lane.b32.xlu0 %v11343_v21, %s9996_s15  ;;  %4387 = vrot.lane.b32.xlu2 %v11355_v15, %s9997_s16 }
 0x4d9   : > { %4353 = vrot.lane.b32.xlu1 %v11343_v21, %s9995_s28 }
 0x4df   : > { %v11522_v57 = vpop.f32.mrf.mxu1 }
 0x4e0   : > { %4514 = vrot.lane.b32.xlu0 %v11302_v6, %s9996_s15  ;;  %4355 = vrot.lane.b32.xlu2 %v11355_v15, %s9995_s28 }
 0x4e1   : > { %4323 = vrot.lane.b32.xlu1 %v11355_v15, %s9996_s15 }
 0x4e8   : > { %3888 = vrot.lane.b32.xlu0 %v11321_v39, %s9996_s15  ;;  %4325 = vrot.lane.b32.xlu2 %v11434_v35, %s9996_s15 }
 0x4e9   : > { %4516 = vrot.lane.b32.xlu1 %v11308_v55, %s9996_s15 }
 0x4ef   : > { %v4318_v38 = vpop.permute.xlu1 %4317 }
 0x4f0   : > { %4122 = vrot.lane.b32.xlu0 %v11242_v51, %s9996_s15  ;;  %4518 = vrot.lane.b32.xlu2 %v11315_v12, %s9996_s15  ;;  %v4341_v25 = vadd.f32 %v4318_v38, %v4011_v1 }
 0x4f1   : > { %3890 = vrot.lane.b32.xlu1 %v11325_v28, %s9996_s15 }
 0x4f2   : > { %v4494_v52 = vadd.f32 %v11284_v43, %v4341_v25 }
 0x4f4   : > { %v4898_v4 = vmax.f32 %v4494_v52, 0.0  ;;  %v8941_v52 = vld [vmem:[%s12988_s9 + $0x78] sm:$0xff] }
 0x4f5   : > { %7016 = vmatpush.msra.mxu2 %v8941_v52 }
 0x4f6   : > { %v5034_v23 = vrot.slane %v4898_v4, 1  ;;  %v5035_v16 = vrot.slane %v4898_v4, 2  ;;  %v5036_v43 = vrot.slane %v4898_v4, 3  ;;  %v5037_v33 = vrot.slane %v4898_v4, 4 }
 0x4f7   : > { %v5038_v56 = vrot.slane %v4898_v4, 5  ;;  %v5039_v58 = vrot.slane %v4898_v4, 6  ;;  %v5040_v22 = vrot.slane %v4898_v4, 7  ;;  %v5090_v31 = vperm.slane %v4898_v4, 0 }
 0x4f8   : > { %4759 = vrot.lane.b32.xlu0 %v11484_v29, %s9996_s15  ;;  %3892 = vrot.lane.b32.xlu2 %v11329_v61, %s9996_s15  ;;  %v5091_v53 = vperm.slane %v5034_v23, 0  ;;  %v5092_v0 = vperm.slane %v5035_v16, 0  ;;  %v5093_v1 = vperm.slane %v5036_v43, 0  ;;  %v5094_v30 = vperm.slane %v5037_v33, 0 }
 0x4f9   : > { %4124 = vrot.lane.b32.xlu1 %v11251_v2, %s9996_s15  ;;  %v5095_v26 = vperm.slane %v5038_v56, 0  ;;  %v5096_v38 = vperm.slane %v5039_v58, 0  ;;  %v5218_v25 = vsel %vm848_vm2, %v4890_v3, %v5090_v31  ;;  %v5097_v4 = vperm.slane %v5040_v22, 0  ;;  %v8940_v58 = vld [vmem:[%s12988_s9 + $0x70] sm:$0xff] }
 0x4fa   : > { %v5219_v23 = vsel %vm848_vm2, %v4914_v48, %v5091_v53  ;;  %v5220_v16 = vsel %vm848_vm2, %v4915_v54, %v5092_v0  ;;  %v5221_v43 = vsel %vm848_vm2, %v4916_v27, %v5093_v1  ;;  %5802 = vst [vmem:[#allocation1] ss:$4 sm:$0xff] %v5218_v25  ;;  %v4919_v33 = vrot.slane %v4890_v3, 6  ;;  %v8939_v54 = vld [vmem:[%s12988_s9 + $0x68] sm:$0xff]  ;;  %7017 = vmatpush.msra.mxu2 %v8940_v58  ;;  %v11545_v0 = vpop.f32.mrf.mxu2  ;;  %v11551_v1 = vpop.f32.mrf.mxu1 }
 0x4fb   : > { %v5222_v56 = vsel %vm848_vm2, %v4917_v44, %v5094_v30  ;;  %5804 = vst [vmem:[#allocation1 + $0x1] ss:$4 sm:$0xff] %v5219_v23  ;;  %v4920_v31 = vrot.slane %v4890_v3, 7  ;;  %v5223_v22 = vsel %vm848_vm2, %v4918_v17, %v5095_v26  ;;  %v8938_v3 = vld [vmem:[%s12988_s9 + $0x60] sm:$0xff]  ;;  %v11539_v44 = vpop.f32.mrf.mxu0  ;;  %v13024_v53 = vmov 0.0  }
 0x4fc   : > { %5806 = vst [vmem:[#allocation1 + $0x2] ss:$4 sm:$0xff] %v5220_v16  ;;  %v5224_v48 = vsel %vm848_vm2, %v4919_v33, %v5096_v38  ;;  %7018 = vmatpush.msra.mxu2 %v8939_v54 }
 0x4fd   : > { %5808 = vst [vmem:[#allocation1 + $0x3] ss:$4 sm:$0xff] %v5221_v43  ;;  %v5225_v27 = vsel %vm848_vm2, %v4920_v31, %v5097_v4  ;;  %v4382_v43 = vpop.permute.xlu2 %4381  ;;  %v4511_v31 = vpop.permute.xlu1 %4510 }
 0x4fe   : > { %5810 = vst [vmem:[#allocation1 + $0x20] ss:$4 sm:$0xff] %v5222_v56  ;;  %7019 = vmatpush.msra.mxu2 %v8938_v3 }
 0x4ff   : > { %5812 = vst [vmem:[#allocation1 + $0x21] ss:$4 sm:$0xff] %v5223_v22 }
 0x500   : > { %4389 = vrot.lane.b32.xlu0 %v11434_v35, %s9997_s16  ;;  %4126 = vrot.lane.b32.xlu2 %v11260_v40, %s9996_s15  ;;  %5814 = vst [vmem:[#allocation1 + $0x22] ss:$4 sm:$0xff] %v5224_v48  ;;  %v4117_v48 = vpop.permute.xlu0 %4116 }
 0x501   : > { %4761 = vrot.lane.b32.xlu1 %v11522_v57, %s9996_s15  ;;  %5816 = vst [vmem:[#allocation1 + $0x23] ss:$4 sm:$0xff] %v5225_v27  ;;  %v4140_v3 = vadd.f32 %v11393_v14, %v4117_v48 }
 0x502   : > { %622 = vst.msk [vmem:[#allocation5 + $0x101] sm:$0x1] %vm593_vm0, %v13024_v53  ;;  %v11573_v38 = vpop.f32.mrf.mxu2 }
 0x503   : > { %623 = vst.msk [vmem:[#allocation5 + $0x119] sm:$0x1] %vm593_vm0, %v13024_v53  ;;  %v11567_v26 = vpop.f32.mrf.mxu0 }
 0x504   : > { %624 = vst.msk [vmem:[#allocation5 + $0x131] sm:$0x1] %vm593_vm0, %v13024_v53  ;;  %v5817_v30 = vld.sshfl [vmem:[#allocation1] sm:$0xff pattern:$0x73625140] }
 0x505   : > { %625 = vst.msk [vmem:[#allocation5 + $0x149] sm:$0x1] %vm593_vm0, %v13024_v53  ;;  %v4350_v54 = vpop.permute.xlu2 %4349 }
 0x506   : > { %626 = vst.msk [vmem:[#allocation5 + $0x161] sm:$0x1] %vm593_vm0, %v13024_v53 }
 0x507   : > { %627 = vst.msk [vmem:[#allocation5 + $0x179] sm:$0x1] %vm593_vm0, %v13024_v53 }
 0x508   : > { %4357 = vrot.lane.b32.xlu0 %v11434_v35, %s9995_s28  ;;  %4763 = vrot.lane.b32.xlu2 %v11551_v1, %s9996_s15  ;;  %v5818_v17 = vld.sshfl [vmem:[#allocation1 + $0x20] sm:$0xff pattern:$0x73625140]  ;;  %628 = vst.msk [vmem:[#allocation5 + $0x191] sm:$0x1] %vm593_vm0, %v13024_v53 }
 0x509   : > { %4391 = vrot.lane.b32.xlu1 %v11545_v0, %s9997_s16  ;;  %6002 = vst.msk [vmem:[#allocation5 + $0x19] sm:$0xff] %vm584_vm15, %v5817_v30  ;;  %v4373_v30 = vadd.f32 %v4350_v54, %v4140_v3 }
 0x50a   : > { %6003 = vst.msk [vmem:[#allocation5 + $0x21] sm:$0xff] %vm584_vm15, %v5818_v17  ;;  %v11600_v58 = vpop.f32.mrf.mxu2  ;;  %v3885_v17 = vpop.permute.xlu1 %3884 }
 0x50b   : > { %611 = vst.msk [vmem:[#allocation5 + $0x198] sm:$0x1] %vm593_vm0, %v13024_v53  ;;  %v11588_v4 = vpop.f32.mrf.mxu0 }
 0x50c   : > { %588 = vst.msk [vmem:[#allocation5 + $0x10] sm:$0x3] %vm587_vm1, %v13024_v53 }
 0x50d   : > { %592 = vst.msk [vmem:[#allocation5 + $0x1a8] sm:$0x3] %vm587_vm1, %v13024_v53 }
 0x50e   : > { %13025 = vst [vmem:[#allocation36_spill] sm:$0xff] %v11573_v38 }
 0x50f   : > { %612 = vst.msk [vmem:[#allocation5 + $0x11] sm:$0x1] %vm593_vm0, %v13024_v53 }
 0x510   : > { %629 = vst.msk [vmem:[#allocation5 + $0x1a9] sm:$0x1] %vm593_vm0, %v13024_v53  ;;  %4327 = vrot.lane.b32.xlu0 %v11545_v0, %s9996_s15  ;;  %4393 = vrot.lane.b32.xlu2 %v11573_v38, %s9997_s16  ;;  %v6040_v25 = vld [vmem:[#allocation5 + $0x18] sm:$0xff] }
 0x511   : > { %4359 = vrot.lane.b32.xlu1 %v11545_v0, %s9995_s28  ;;  %8836 = vmatmul.msk.f32.gmra.mxu3 %vm584_vm15, %v6040_v25  ;;  %13026 = vst [vmem:[#allocation37_spill] sm:$0xff] %v11588_v4  ;;  %v6041_v16 = vld [vmem:[#allocation5 + $0x20] sm:$0xff] }
 0x512   : > { %8942 = vmatmul.msk.f32.vlgmr.msra.gmra.mxu2 %vm584_vm15, %v6040_v25  ;;  %v6317_v33 = vld [vmem:[#allocation5 + $0x19] sm:$0xff]  ;;  %v6318_v27 = vld [vmem:[#allocation5 + $0x21] sm:$0xff] }
 0x513   : > { %v6316_v52 = vld [vmem:[#allocation5 + $0x9] sm:$0xff]  ;;  %v6595_v56 = vld [vmem:[#allocation5 + $0x1a] sm:$0xff]  ;;  %v11603_v22 = vpop.f32.mrf.mxu0 }
 0x514   : > { %8871 = vmatmul.msk.f32.gmra.mxu0 %vm584_vm15, %v6316_v52  ;;  %13027 = vst [vmem:[#allocation38_spill] sm:$0xff] %v11603_v22  ;;  %v6596_v53 = vld [vmem:[#allocation5 + $0x22] sm:$0xff] }
 0x516   : > { %v6594_v23 = vld [vmem:[#allocation5 + $0xa] sm:$0xff] }
 0x517   : > { %8907 = vmatmul.msk.f32.gmra.mxu1 %vm584_vm15, %v6594_v23  ;;  %v3907_v23 = vadd.f32 %v11393_v14, %v3885_v17 }
 0x518   : > { %4520 = vrot.lane.b32.xlu0 %v11319_v36, %s9996_s15  ;;  %4361 = vrot.lane.b32.xlu2 %v11573_v38, %s9995_s28 }
 0x519   : > { %4329 = vrot.lane.b32.xlu1 %v11573_v38, %s9996_s15  ;;  %8837 = vmatmul.msk.f32.gmra.mxu3 %vm584_vm15, %v6041_v16  ;;  %v4012_v54 = vadd.f32 %v11417_v49, %v3907_v23 }
 0x51a   : > { %8943 = vmatmul.msk.f32.gmra.mxu2 %vm584_vm15, %v6041_v16  ;;  %v4320_v16 = vpop.permute.xlu2 %4319 }
 0x51b   : > { %v4600_v25 = vpop.f32.mrf.mxu0 }
 0x51c   : > { %8872 = vmatmul.msk.f32.gmra.mxu0 %vm584_vm15, %v6317_v33  ;;  %v4624_v52 = vadd.f32 %v4600_v25, %v4373_v30  ;;  %v11621_v33 = vpop.f32.mrf.mxu1 }
 0x51d   : > { %13028 = vst [vmem:[#allocation39_spill] sm:$0xff] %v11621_v33 }
 0x51e   : > { %v4737_v48 = vadd.f32 %v11331_v24, %v4624_v52 }
 0x51f   : > { %8908 = vmatmul.msk.f32.gmra.mxu1 %vm584_vm15, %v6595_v56  ;;  %v4405_v56 = vadd.f32 %v11393_v14, %v4382_v43  ;;  %v4858_v43 = vpop.f32.mrf.mxu2 }
 0x520   : > { %3894 = vrot.lane.b32.xlu0 %v11335_v42, %s9996_s15  ;;  %4331 = vrot.lane.b32.xlu2 %v11600_v58, %s9996_s15  ;;  %v5282_v17 = vmax.f32 %v4737_v48, 0.0 }
 0x521   : > { %4522 = vrot.lane.b32.xlu1 %v11323_v8, %s9996_s15  ;;  %v4534_v3 = vadd.f32 %v4511_v31, %v4405_v56 }
 0x522   : > { %v5306_v23 = vrot.slane %v5282_v17, 1  ;;  %v5308_v31 = vrot.slane %v5282_v17, 3  ;;  %v5309_v56 = vrot.slane %v5282_v17, 4 }
 0x524   : > { %8873 = vmatmul.msk.f32.gmra.mxu0 %vm584_vm15, %v6318_v27  ;;  %v3754_v27 = vadd.f32 %v11393_v14, %v11215_v50  ;;  %v11633_v52 = vpop.f32.mrf.mxu1  ;;  %v8977_v50 = vld [vmem:[%s12988_s9 + $0x98] sm:$0xff] }
 0x525   : > { %13029 = vst [vmem:[#allocation40_spill] sm:$0xff] %v11633_v52  ;;  %7294 = vmatpush.msra.mxu3 %v8977_v50 }
 0x526   : > { %v3867_v30 = vadd.f32 %v11294_v11, %v3754_v27  ;;  %v4513_v11 = vpop.permute.xlu2 %4512 }
 0x527   : > { %8909 = vmatmul.msk.f32.gmra.mxu1 %vm584_vm15, %v6596_v53 }
 0x528   : > { %4128 = vrot.lane.b32.xlu0 %v11269_v46, %s9996_s15  ;;  %4524 = vrot.lane.b32.xlu2 %v11327_v20, %s9996_s15  ;;  %v4342_v20 = vadd.f32 %v4320_v16, %v4012_v54  ;;  %v4101_v49 = vadd.f32 %v11218_v47, %v3867_v30  ;;  %v4119_v16 = vpop.permute.xlu1 %4118 }
 0x529   : > { %3896 = vrot.lane.b32.xlu1 %v11347_v60, %s9996_s15  ;;  %v5307_v60 = vrot.slane %v5282_v17, 2 }
 0x52a   : > { %v4495_v48 = vadd.f32 %v11292_v63, %v4342_v20 }
 0x52c   : > { %v11644_v38 = vmax.f32 %v4495_v48, 0.0 }
 0x530   : > { %4765 = vrot.lane.b32.xlu0 %v11621_v33, %s9996_s15 }
 0x531   : > { %4130 = vrot.lane.b32.xlu1 %v11276_v45, %s9996_s15  ;;  %v5310_v45 = vrot.slane %v5282_v17, 5 }
 0x532   : > { %v4754_v53 = vpop.permute.xlu0 %4753 }
 0x533   : > { %v4777_v25 = vadd.f32 %v4754_v53, %v4534_v3 }
 0x535   : > { %v4882_v24 = vadd.f32 %v4858_v43, %v4777_v25 }
 0x537   : > { %v5290_v34 = vmax.f32 %v4882_v24, 0.0 }
 0x538   : > { %4395 = vrot.lane.b32.xlu0 %v11600_v58, %s9997_s16 }
 0x539   : > { %v5426_v54 = vrot.slane %v5290_v34, 1  ;;  %v5427_v47 = vrot.slane %v5290_v34, 2  ;;  %v5428_v27 = vrot.slane %v5290_v34, 3  ;;  %v5429_v3 = vrot.slane %v5290_v34, 4  ;;  %4767 = vrot.lane.b32.xlu1 %v11633_v52, %s9996_s15 }
 0x53a   : > { %v5430_v53 = vrot.slane %v5290_v34, 5  ;;  %v5431_v30 = vrot.slane %v5290_v34, 6  ;;  %v5432_v25 = vrot.slane %v5290_v34, 7  ;;  %v5482_v43 = vperm.slane %v5290_v34, 0  ;;  %v4384_v24 = vpop.permute.xlu0 %4383 }
 0x53b   : > { %v5483_v33 = vperm.slane %v5426_v54, 0  ;;  %v5484_v22 = vperm.slane %v5427_v47, 0  ;;  %v5485_v63 = vperm.slane %v5428_v27, 0  ;;  %v5486_v20 = vperm.slane %v5429_v3, 0 }
 0x53c   : > { %v5487_v50 = vperm.slane %v5430_v53, 0  ;;  %v5488_v46 = vperm.slane %v5431_v30, 0  ;;  %v5610_v8 = vsel %vm848_vm2, %v5282_v17, %v5482_v43  ;;  %v5489_v42 = vperm.slane %v5432_v25, 0 }
 0x53d   : > { %v5611_v18 = vsel %vm848_vm2, %v5306_v23, %v5483_v33  ;;  %v5612_v52 = vsel %vm848_vm2, %v5307_v60, %v5484_v22  ;;  %v5613_v4 = vsel %vm848_vm2, %v5308_v31, %v5485_v63  ;;  %5819 = vst [vmem:[#allocation1] ss:$4 sm:$0xff] %v5610_v8  ;;  %v4302_v34 = vadd.f32 %v11296_v5, %v4101_v49  ;;  %v4756_v22 = vpop.permute.xlu1 %4755 }
 0x53e   : > { %v5311_v54 = vrot.slane %v5282_v17, 6  ;;  %v5614_v47 = vsel %vm848_vm2, %v5309_v56, %v5486_v20  ;;  %5820 = vst [vmem:[#allocation1 + $0x1] ss:$4 sm:$0xff] %v5611_v18  ;;  %v4406_v48 = vadd.f32 %v11393_v14, %v4384_v24  ;;  %v5312_v27 = vrot.slane %v5282_v17, 7 }
 0x53f   : > { %v5615_v3 = vsel %vm848_vm2, %v5310_v45, %v5487_v50  ;;  %5821 = vst [vmem:[#allocation1 + $0x2] ss:$4 sm:$0xff] %v5612_v52  ;;  %v5041_v53 = vrot.slane %v11644_v38, 1  ;;  %v5042_v5 = vrot.slane %v11644_v38, 2  ;;  %v4141_v8 = vadd.f32 %v11393_v14, %v4119_v16  ;;  %v3887_v45 = vpop.permute.xlu2 %3886 }
 0x540   : > { %v5616_v33 = vsel %vm848_vm2, %v5311_v54, %v5488_v46  ;;  %5822 = vst [vmem:[#allocation1 + $0x3] ss:$4 sm:$0xff] %v5613_v4  ;;  %v4535_v60 = vadd.f32 %v4513_v11, %v4406_v48  ;;  %4363 = vrot.lane.b32.xlu0 %v11600_v58, %s9995_s28  ;;  %v5617_v18 = vsel %vm848_vm2, %v5312_v27, %v5489_v42  ;;  %v4891_v17 = vmax.f32 %v4302_v34, 0.0  ;;  %v4861_v4 = vpop.f32.mrf.mxu2  ;;  %v4603_v11 = vpop.f32.mrf.mxu0 }
 0x541   : > { %5823 = vst [vmem:[#allocation1 + $0x20] ss:$4 sm:$0xff] %v5614_v47  ;;  %v5043_v52 = vrot.slane %v11644_v38, 3  ;;  %v5044_v23 = vrot.slane %v11644_v38, 4  ;;  %v5098_v31 = vperm.slane %v11644_v38, 0  ;;  %v5045_v16 = vrot.slane %v11644_v38, 5 }
 0x542   : > { %5824 = vst [vmem:[#allocation1 + $0x21] ss:$4 sm:$0xff] %v5615_v3  ;;  %v4778_v49 = vadd.f32 %v4756_v22, %v4535_v60  ;;  %v4352_v46 = vpop.permute.xlu0 %4351  ;;  %v5099_v42 = vperm.slane %v5041_v53, 0  ;;  %v3908_v25 = vadd.f32 %v11393_v14, %v3887_v45  ;;  %v5046_v43 = vrot.slane %v11644_v38, 6 }
 0x543   : > { %5825 = vst [vmem:[#allocation1 + $0x22] ss:$4 sm:$0xff] %v5616_v33  ;;  %v4374_v56 = vadd.f32 %v4352_v46, %v4141_v8  ;;  %v5100_v24 = vperm.slane %v5042_v5, 0  ;;  %v3755_v20 = vadd.f32 %v11393_v14, %v11227_v41  ;;  %v4921_v50 = vrot.slane %v4891_v17, 1 }
 0x544   : > { %5826 = vst [vmem:[#allocation1 + $0x23] ss:$4 sm:$0xff] %v5617_v18  ;;  %v4883_v30 = vadd.f32 %v4861_v4, %v4778_v49  ;;  %v5047_v34 = vrot.slane %v11644_v38, 7  ;;  %v5101_v54 = vperm.slane %v5043_v52, 0  ;;  %v4922_v47 = vrot.slane %v4891_v17, 2 }
 0x545   : > { %v4625_v63 = vadd.f32 %v4603_v11, %v4374_v56  ;;  %v4923_v48 = vrot.slane %v4891_v17, 3  ;;  %v5102_v27 = vperm.slane %v5044_v23, 0  ;;  %v5226_v3 = vsel %vm848_vm2, %v4891_v17, %v5098_v31 }
 0x546   : > { %v5103_v33 = vperm.slane %v5045_v16, 0  ;;  %v5227_v60 = vsel %vm848_vm2, %v4921_v50, %v5099_v42  ;;  %v11672_v8 = vmax.f32 %v4883_v30, 0.0  ;;  %v4924_v18 = vrot.slane %v4891_v17, 4 }
 0x547   : > { %v5827_v53 = vld.sshfl [vmem:[#allocation1] sm:$0xff pattern:$0x73625140]  ;;  %v4738_v5 = vadd.f32 %v11337_v13, %v4625_v63  ;;  %v5104_v41 = vperm.slane %v5046_v43, 0  ;;  %v5228_v22 = vsel %vm848_vm2, %v4922_v47, %v5100_v24  ;;  %v4013_v38 = vadd.f32 %v11464_v19, %v3908_v25 }
 0x548   : > { %5829 = vst [vmem:[#allocation1] ss:$4 sm:$0xff] %v5226_v3  ;;  %v4925_v45 = vrot.slane %v4891_v17, 5  ;;  %v5105_v52 = vperm.slane %v5047_v34, 0  ;;  %v5229_v49 = vsel %vm848_vm2, %v4923_v48, %v5101_v54  ;;  %v3868_v4 = vadd.f32 %v11310_v59, %v3755_v20  ;;  %v4386_v59 = vpop.permute.xlu1 %4385  ;;  %v4121_v20 = vpop.permute.xlu2 %4120 }
 0x549   : > { %5830 = vst [vmem:[#allocation1 + $0x1] ss:$4 sm:$0xff] %v5227_v60  ;;  %v4926_v23 = vrot.slane %v4891_v17, 6  ;;  %v5230_v31 = vsel %vm848_vm2, %v4924_v18, %v5102_v27  ;;  %v4927_v11 = vrot.slane %v4891_v17, 7  ;;  %v5433_v19 = vrot.slane %v11672_v8, 1 }
 0x54a   : > { %5831 = vst [vmem:[#allocation1 + $0x2] ss:$4 sm:$0xff] %v5228_v22  ;;  %v4322_v46 = vpop.permute.xlu0 %4321  ;;  %v5231_v16 = vsel %vm848_vm2, %v4925_v45, %v5103_v33  ;;  %v11682_v42 = vmax.f32 %v4738_v5, 0.0  ;;  %v5434_v25 = vrot.slane %v11672_v8, 2  ;;  %v5435_v24 = vrot.slane %v11672_v8, 3 }
 0x54b   : > { %v5828_v56 = vld.sshfl [vmem:[#allocation1 + $0x20] sm:$0xff pattern:$0x73625140]  ;;  %5832 = vst [vmem:[#allocation1 + $0x3] ss:$4 sm:$0xff] %v5229_v49  ;;  %v4343_v13 = vadd.f32 %v4322_v46, %v4013_v38  ;;  %v5232_v30 = vsel %vm848_vm2, %v4926_v23, %v5104_v41  ;;  %v5233_v43 = vsel %vm848_vm2, %v4927_v11, %v5105_v52  ;;  %v4102_v63 = vadd.f32 %v11231_v32, %v3868_v4 }
 0x54c   : > { %5833 = vst [vmem:[#allocation1 + $0x20] ss:$4 sm:$0xff] %v5230_v31  ;;  %v5313_v17 = vrot.slane %v11682_v42, 1  ;;  %v5314_v50 = vrot.slane %v11682_v42, 2  ;;  %v5436_v54 = vrot.slane %v11672_v8, 4  ;;  %v5437_v47 = vrot.slane %v11672_v8, 5 }
 0x54d   : > { %5834 = vst [vmem:[#allocation1 + $0x21] ss:$4 sm:$0xff] %v5231_v16  ;;  %v4496_v34 = vadd.f32 %v11302_v6, %v4343_v13  ;;  %v5491_v48 = vperm.slane %v5433_v19, 0  ;;  %v4407_v27 = vadd.f32 %v11393_v14, %v4386_v59  ;;  %v5438_v3 = vrot.slane %v11672_v8, 6 }
 0x54e   : > { %5835 = vst [vmem:[#allocation1 + $0x22] ss:$4 sm:$0xff] %v5232_v30  ;;  %v5490_v32 = vperm.slane %v11672_v8, 0  ;;  %v5492_v33 = vperm.slane %v5434_v25, 0  ;;  %v5315_v60 = vrot.slane %v11682_v42, 3  ;;  %v5439_v6 = vrot.slane %v11672_v8, 7 }
 0x54f   : > { %5836 = vst [vmem:[#allocation1 + $0x23] ss:$4 sm:$0xff] %v5233_v43  ;;  %v5316_v18 = vrot.slane %v11682_v42, 4  ;;  %v5619_v41 = vsel %vm848_vm2, %v5313_v17, %v5491_v48  ;;  %v5317_v38 = vrot.slane %v11682_v42, 5  ;;  %v11708_v49 = vmax.f32 %v4496_v34, 0.0 }
 0x550   : > { %6004 = vst.msk [vmem:[#allocation5 + $0x31] sm:$0xff] %vm584_vm15, %v5827_v53  ;;  %v5493_v53 = vperm.slane %v5435_v24, 0  ;;  %v5618_v45 = vsel %vm848_vm2, %v11682_v42, %v5490_v32  ;;  %v5620_v52 = vsel %vm848_vm2, %v5314_v50, %v5492_v33  ;;  %v5494_v46 = vperm.slane %v5436_v54, 0  ;;  %v4758_v25 = vpop.permute.xlu2 %4757 }
 0x551   : > { %6005 = vst.msk [vmem:[#allocation5 + $0x39] sm:$0xff] %vm584_vm15, %v5828_v56  ;;  %v5318_v8 = vrot.slane %v11682_v42, 6  ;;  %v4303_v23 = vadd.f32 %v11343_v21, %v4102_v63  ;;  %v5495_v31 = vperm.slane %v5437_v47, 0  ;;  %v5319_v56 = vrot.slane %v11682_v42, 7  ;;  %v4354_v21 = vpop.permute.xlu1 %4353 }
 0x552   : > { %v5837_v5 = vld.sshfl [vmem:[#allocation1] sm:$0xff pattern:$0x73625140]  ;;  %v4515_v22 = vpop.permute.xlu0 %4514  ;;  %v5621_v13 = vsel %vm848_vm2, %v5315_v60, %v5493_v53  ;;  %v5496_v16 = vperm.slane %v5438_v3, 0  ;;  %v5622_v19 = vsel %vm848_vm2, %v5316_v18, %v5494_v46  ;;  %v4142_v30 = vadd.f32 %v11393_v14, %v4121_v20  ;;  %v4864_v3 = vpop.f32.mrf.mxu2 }
 0x553   : > { %6006 = vst.msk [vmem:[#allocation5 + $0x49] sm:$0xff] %vm584_vm15, %v5837_v5  ;;  %v4536_v4 = vadd.f32 %v4515_v22, %v4407_v27  ;;  %v5497_v59 = vperm.slane %v5439_v6, 0  ;;  %v5623_v43 = vsel %vm848_vm2, %v5317_v38, %v5495_v31  ;;  %v5048_v24 = vrot.slane %v11708_v49, 1  ;;  %v4606_v22 = vpop.f32.mrf.mxu0 }
 0x554   : > { %5839 = vst [vmem:[#allocation1] ss:$4 sm:$0xff] %v5618_v45  ;;  %v5624_v17 = vsel %vm848_vm2, %v5318_v8, %v5496_v16  ;;  %v5049_v63 = vrot.slane %v11708_v49, 2  ;;  %v11723_v50 = vmax.f32 %v4303_v23, 0.0  ;;  %v4375_v54 = vadd.f32 %v4354_v21, %v4142_v30 }
 0x555   : > { %5840 = vst [vmem:[#allocation1 + $0x1] ss:$4 sm:$0xff] %v5619_v41  ;;  %v4779_v20 = vadd.f32 %v4758_v25, %v4536_v4  ;;  %v5625_v34 = vsel %vm848_vm2, %v5319_v56, %v5497_v59  ;;  %v5050_v47 = vrot.slane %v11708_v49, 3  ;;  %v5051_v32 = vrot.slane %v11708_v49, 4 }
 0x556   : > { %v5838_v11 = vld.sshfl [vmem:[#allocation1 + $0x20] sm:$0xff pattern:$0x73625140]  ;;  %5841 = vst [vmem:[#allocation1 + $0x2] ss:$4 sm:$0xff] %v5620_v52  ;;  %v5107_v33 = vperm.slane %v5048_v24, 0  ;;  %v4626_v52 = vadd.f32 %v4606_v22, %v4375_v54  ;;  %v3756_v22 = vadd.f32 %v11393_v14, %v11238_v9 }
 0x557   : > { %6007 = vst.msk [vmem:[#allocation5 + $0x51] sm:$0xff] %vm584_vm15, %v5838_v11  ;;  %v6042_v42 = vld [vmem:[#allocation5 + $0x30] sm:$0xff]  ;;  %v5052_v60 = vrot.slane %v11708_v49, 5  ;;  %v5106_v5 = vperm.slane %v11708_v49, 0  ;;  %v5108_v6 = vperm.slane %v5049_v63, 0  ;;  %v4884_v53 = vadd.f32 %v4864_v3, %v4779_v20 }
 0x558   : > { %5842 = vst [vmem:[#allocation1 + $0x3] ss:$4 sm:$0xff] %v5621_v13  ;;  %8838 = vmatmul.msk.f32.gmra.mxu3 %vm584_vm15, %v6042_v42  ;;  %8944 = vmatmul.msk.f32.gmra.mxu2 %vm584_vm15, %v6042_v42  ;;  %v6319_v48 = vld [vmem:[#allocation5 + $0x31] sm:$0xff]  ;;  %v4928_v41 = vrot.slane %v11723_v50, 1  ;;  %v5053_v38 = vrot.slane %v11708_v49, 6  ;;  %v4929_v45 = vrot.slane %v11723_v50, 2  ;;  %v4739_v42 = vadd.f32 %v11345_v10, %v4626_v52 }
 0x559   : > { %5843 = vst [vmem:[#allocation1 + $0x20] ss:$4 sm:$0xff] %v5622_v19  ;;  %v6597_v27 = vld [vmem:[#allocation5 + $0x32] sm:$0xff]  ;;  %8874 = vmatmul.msk.f32.gmra.mxu0 %vm584_vm15, %v6319_v48  ;;  %v5054_v46 = vrot.slane %v11708_v49, 7  ;;  %v5109_v8 = vperm.slane %v5050_v47, 0  ;;  %v4930_v4 = vrot.slane %v11723_v50, 3  ;;  %v5234_v19 = vsel %vm848_vm2, %v11723_v50, %v5106_v5  ;;  %v4324_v21 = vpop.permute.xlu1 %4323 }
 0x55a   : > { %5844 = vst [vmem:[#allocation1 + $0x21] ss:$4 sm:$0xff] %v5623_v43  ;;  %8910 = vmatmul.msk.f32.gmra.mxu1 %vm584_vm15, %v6597_v27  ;;  %v3889_v18 = vpop.permute.xlu0 %3888  ;;  %v5110_v31 = vperm.slane %v5051_v32, 0  ;;  %v5235_v56 = vsel %vm848_vm2, %v4928_v41, %v5107_v33  ;;  %v6043_v13 = vld [vmem:[#allocation5 + $0x38] sm:$0xff]  ;;  %v5111_v16 = vperm.slane %v5052_v60, 0  ;;  %v5236_v30 = vsel %vm848_vm2, %v4929_v45, %v5108_v6  ;;  %v4388_v32 = vpop.permute.xlu2 %4387  ;;  %v6044_v41 = vld [vmem:[#allocation5 + $0x48] sm:$0xff] }
 0x55b   : > { %5845 = vst [vmem:[#allocation1 + $0x22] ss:$4 sm:$0xff] %v5624_v17  ;;  %v3909_v11 = vadd.f32 %v11393_v14, %v3889_v18  ;;  %v11743_v25 = vmax.f32 %v4884_v53, 0.0  ;;  %v4931_v49 = vrot.slane %v11723_v50, 4  ;;  %v4932_v59 = vrot.slane %v11723_v50, 5  ;;  %v6320_v20 = vld [vmem:[#allocation5 + $0x39] sm:$0xff] }
 0x55c   : > { %5846 = vst [vmem:[#allocation1 + $0x23] ss:$4 sm:$0xff] %v5625_v34  ;;  %v5112_v43 = vperm.slane %v5053_v38, 0  ;;  %v4933_v24 = vrot.slane %v11723_v50, 6  ;;  %v5113_v17 = vperm.slane %v5054_v46, 0  ;;  %v5237_v63 = vsel %vm848_vm2, %v4930_v4, %v5109_v8  ;;  %v6598_v47 = vld [vmem:[#allocation5 + $0x3a] sm:$0xff] }
 0x55d   : > { %v5238_v54 = vsel %vm848_vm2, %v4931_v49, %v5110_v31  ;;  %v4014_v48 = vadd.f32 %v11497_v62, %v3909_v11  ;;  %v4934_v27 = vrot.slane %v11723_v50, 7  ;;  %v5239_v3 = vsel %vm848_vm2, %v4932_v59, %v5111_v16 }
 0x55e   : > { %v5441_v10 = vrot.slane %v11743_v25, 2  ;;  %v5240_v33 = vsel %vm848_vm2, %v4933_v24, %v5112_v43  ;;  %v5440_v60 = vrot.slane %v11743_v25, 1  ;;  %v11762_v5 = vmax.f32 %v4739_v42, 0.0 }
 0x55f   : > { %v5847_v23 = vld.sshfl [vmem:[#allocation1] sm:$0xff pattern:$0x73625140]  ;;  %v5241_v62 = vsel %vm848_vm2, %v4934_v27, %v5113_v17  ;;  %v5443_v6 = vrot.slane %v11743_v25, 4  ;;  %v5498_v53 = vperm.slane %v11743_v25, 0  ;;  %v4344_v18 = vadd.f32 %v4324_v21, %v4014_v48  ;;  %v6045_v48 = vld [vmem:[#allocation5 + $0x50] sm:$0xff] }
 0x560   : > { %6008 = vst.msk [vmem:[#allocation5 + $0x61] sm:$0xff] %vm584_vm15, %v5847_v23  ;;  %8839 = vmatmul.msk.f32.gmra.mxu3 %vm584_vm15, %v6043_v13  ;;  %8945 = vmatmul.msk.f32.gmra.mxu2 %vm584_vm15, %v6043_v13  ;;  %v5444_v38 = vrot.slane %v11743_v25, 5  ;;  %v5500_v45 = vperm.slane %v5441_v10, 0  ;;  %v5445_v52 = vrot.slane %v11743_v25, 6  ;;  %v5499_v46 = vperm.slane %v5440_v60, 0 }
 0x561   : > { %5849 = vst [vmem:[#allocation1] ss:$4 sm:$0xff] %v5234_v19  ;;  %8875 = vmatmul.msk.f32.gmra.mxu0 %vm584_vm15, %v6320_v20  ;;  %v3869_v8 = vadd.f32 %v11321_v39, %v3756_v22  ;;  %v5320_v4 = vrot.slane %v11762_v5, 1  ;;  %v5321_v23 = vrot.slane %v11762_v5, 2  ;;  %v5446_v9 = vrot.slane %v11743_v25, 7  ;;  %v4517_v16 = vpop.permute.xlu1 %4516  ;;  %v6321_v19 = vld [vmem:[#allocation5 + $0x49] sm:$0xff] }
 0x562   : > { %5850 = vst [vmem:[#allocation1 + $0x1] ss:$4 sm:$0xff] %v5235_v56  ;;  %8911 = vmatmul.msk.f32.gmra.mxu1 %vm584_vm15, %v6598_v47  ;;  %v4123_v50 = vpop.permute.xlu0 %4122  ;;  %v5442_v31 = vrot.slane %v11743_v25, 3  ;;  %v5502_v56 = vperm.slane %v5443_v6, 0  ;;  %v5626_v13 = vsel %vm848_vm2, %v11762_v5, %v5498_v53  ;;  %v4497_v11 = vadd.f32 %v11308_v55, %v4344_v18  ;;  %v6600_v22 = vld [vmem:[#allocation5 + $0x52] sm:$0xff] }
 0x563   : > { %v5848_v34 = vld.sshfl [vmem:[#allocation1 + $0x20] sm:$0xff pattern:$0x73625140]  ;;  %5851 = vst [vmem:[#allocation1 + $0x2] ss:$4 sm:$0xff] %v5236_v30  ;;  %v5503_v59 = vperm.slane %v5444_v38, 0  ;;  %v5628_v39 = vsel %vm848_vm2, %v5321_v23, %v5500_v45  ;;  %v5627_v21 = vsel %vm848_vm2, %v5320_v4, %v5499_v46  ;;  %v4103_v55 = vadd.f32 %v11242_v51, %v3869_v8  ;;  %v4867_v8 = vpop.f32.mrf.mxu2 }
 0x564   : > { %6009 = vst.msk [vmem:[#allocation5 + $0x69] sm:$0xff] %vm584_vm15, %v5848_v34  ;;  %v6599_v30 = vld [vmem:[#allocation5 + $0x4a] sm:$0xff]  ;;  %v5323_v43 = vrot.slane %v11762_v5, 4  ;;  %v5504_v25 = vperm.slane %v5445_v52, 0  ;;  %v4408_v24 = vadd.f32 %v11393_v14, %v4388_v32  ;;  %v5324_v42 = vrot.slane %v11762_v5, 5 }
 0x565   : > { %5852 = vst [vmem:[#allocation1 + $0x3] ss:$4 sm:$0xff] %v5237_v63  ;;  %v5505_v17 = vperm.slane %v5446_v9, 0  ;;  %v4356_v63 = vpop.permute.xlu2 %4355  ;;  %v5325_v20 = vrot.slane %v11762_v5, 6  ;;  %v5501_v34 = vperm.slane %v5442_v31, 0  ;;  %v11792_v47 = vmax.f32 %v4497_v11, 0.0 }
 0x566   : > { %5853 = vst [vmem:[#allocation1 + $0x20] ss:$4 sm:$0xff] %v5238_v54  ;;  %v5630_v54 = vsel %vm848_vm2, %v5323_v43, %v5502_v56  ;;  %v4304_v27 = vadd.f32 %v11355_v15, %v4103_v55  ;;  %v5326_v51 = vrot.slane %v11762_v5, 7  ;;  %v5631_v14 = vsel %vm848_vm2, %v5324_v42, %v5503_v59  ;;  %v4609_v56 = vpop.f32.mrf.mxu0 }
 0x567   : > { %5854 = vst [vmem:[#allocation1 + $0x21] ss:$4 sm:$0xff] %v5239_v3  ;;  %v5322_v32 = vrot.slane %v11762_v5, 3  ;;  %v4537_v60 = vadd.f32 %v4517_v16, %v4408_v24  ;;  %v5058_v18 = vrot.slane %v11792_v47, 4  ;;  %v5059_v38 = vrot.slane %v11792_v47, 5  ;;  %v6046_v31 = vld [vmem:[#allocation5 + $0x60] sm:$0xff] }
 0x568   : > { %5855 = vst [vmem:[#allocation1 + $0x22] ss:$4 sm:$0xff] %v5240_v33  ;;  %8840 = vmatmul.msk.f32.gmra.mxu3 %vm584_vm15, %v6044_v41  ;;  %8946 = vmatmul.msk.f32.gmra.mxu2 %vm584_vm15, %v6044_v41  ;;  %v5632_v33 = vsel %vm848_vm2, %v5325_v20, %v5504_v25  ;;  %v5633_v6 = vsel %vm848_vm2, %v5326_v51, %v5505_v17  ;;  %v6322_v41 = vld [vmem:[#allocation5 + $0x51] sm:$0xff]  ;;  %v11811_v45 = vmax.f32 %v4304_v27, 0.0  ;;  %v5061_v4 = vrot.slane %v11792_v47, 7  ;;  %v6323_v17 = vld [vmem:[#allocation5 + $0x61] sm:$0xff] }
 0x569   : > { %5856 = vst [vmem:[#allocation1 + $0x23] ss:$4 sm:$0xff] %v5241_v62  ;;  %8876 = vmatmul.msk.f32.gmra.mxu0 %vm584_vm15, %v6321_v19  ;;  %v11802_v62 = vld [vmem:[#allocation19] ss:$0 sm:$0xff]  ;;  %v5629_v53 = vsel %vm848_vm2, %v5322_v32, %v5501_v34  ;;  %v3891_v46 = vpop.permute.xlu1 %3890  ;;  %v5118_v23 = vperm.slane %v5058_v18, 0  ;;  %v5056_v43 = vrot.slane %v11792_v47, 2 }
 0x56a   : > { %8912 = vmatmul.msk.f32.gmra.mxu1 %vm584_vm15, %v6599_v30  ;;  %v4760_v10 = vpop.permute.xlu0 %4759  ;;  %v4143_v15 = vadd.f32 %v11802_v62, %v4123_v50  ;;  %v5060_v50 = vrot.slane %v11792_v47, 6  ;;  %v3910_v11 = vadd.f32 %v11802_v62, %v3891_v46  ;;  %v4938_v16 = vrot.slane %v11811_v45, 4 }
 0x56b   : > { %v4780_v5 = vadd.f32 %v4760_v10, %v4537_v60  ;;  %v5055_v30 = vrot.slane %v11792_v47, 1  ;;  %v5057_v25 = vrot.slane %v11792_v47, 3  ;;  %v4940_v55 = vrot.slane %v11811_v45, 6 }
 0x56c   : > { %v5857_v49 = vld.sshfl [vmem:[#allocation1] sm:$0xff pattern:$0x73625140]  ;;  %v4376_v52 = vadd.f32 %v4356_v63, %v4143_v15  ;;  %v5246_v24 = vsel %vm848_vm2, %v4938_v16, %v5118_v23  ;;  %v4941_v20 = vrot.slane %v11811_v45, 7  ;;  %v4015_v27 = vadd.f32 %v11539_v44, %v3910_v11 }
 0x56d   : > { %6010 = vst.msk [vmem:[#allocation5 + $0x79] sm:$0xff] %vm584_vm15, %v5857_v49  ;;  %v4885_v9 = vadd.f32 %v4867_v8, %v4780_v5  ;;  %v4326_v19 = vpop.permute.xlu2 %4325  ;;  %v5120_v49 = vperm.slane %v5060_v50, 0  ;;  %v6601_v63 = vld [vmem:[#allocation5 + $0x62] sm:$0xff]  ;;  %v3757_v51 = vadd.f32 %v11802_v62, %v11247_v37  ;;  %v5117_v60 = vperm.slane %v5057_v25, 0 }
 0x56e   : > { %5859 = vst [vmem:[#allocation1] ss:$4 sm:$0xff] %v5626_v13  ;;  %v5119_v13 = vperm.slane %v5059_v38, 0  ;;  %v4627_v59 = vadd.f32 %v4609_v56, %v4376_v52  ;;  %v4937_v5 = vrot.slane %v11811_v45, 3 }
 0x56f   : > { %5861 = vst [vmem:[#allocation1 + $0x2] ss:$4 sm:$0xff] %v5628_v39  ;;  %v4939_v39 = vrot.slane %v11811_v45, 5  ;;  %v11825_v42 = vmax.f32 %v4885_v9, 0.0  ;;  %v3870_v15 = vadd.f32 %v11325_v28, %v3757_v51  ;;  %v6324_v9 = vld [vmem:[#allocation5 + $0x69] sm:$0xff] }
 0x570   : > { %v5858_v3 = vld.sshfl [vmem:[#allocation1 + $0x20] sm:$0xff pattern:$0x73625140]  ;;  %5860 = vst [vmem:[#allocation1 + $0x1] ss:$4 sm:$0xff] %v5627_v21  ;;  %8841 = vmatmul.msk.f32.gmra.mxu3 %vm584_vm15, %v6045_v48  ;;  %8947 = vmatmul.msk.f32.gmra.mxu2 %vm584_vm15, %v6045_v48  ;;  %v5121_v21 = vperm.slane %v5061_v4, 0  ;;  %v4740_v10 = vadd.f32 %v11484_v29, %v4627_v59  ;;  %v4345_v29 = vadd.f32 %v4326_v19, %v4015_v27 }
 0x571   : > { %6011 = vst.msk [vmem:[#allocation5 + $0x81] sm:$0xff] %vm584_vm15, %v5858_v3  ;;  %8877 = vmatmul.msk.f32.gmra.mxu0 %vm584_vm15, %v6322_v41  ;;  %v5247_v48 = vsel %vm848_vm2, %v4939_v39, %v5119_v13  ;;  %v5115_v3 = vperm.slane %v5055_v30, 0  ;;  %v5450_v37 = vrot.slane %v11825_v42, 4  ;;  %v5451_v41 = vrot.slane %v11825_v42, 5  ;;  %v4125_v52 = vpop.permute.xlu1 %4124 }
 0x572   : > { %5863 = vst [vmem:[#allocation1 + $0x20] ss:$4 sm:$0xff] %v5630_v54  ;;  %8913 = vmatmul.msk.f32.gmra.mxu1 %vm584_vm15, %v6600_v22  ;;  %v5114_v54 = vperm.slane %v11792_v47, 0  ;;  %v4390_v32 = vpop.permute.xlu0 %4389  ;;  %v4935_v47 = vrot.slane %v11811_v45, 1  ;;  %v5249_v44 = vsel %vm848_vm2, %v4941_v20, %v5121_v21  ;;  %v6047_v22 = vld [vmem:[#allocation5 + $0x68] sm:$0xff]  ;;  %v11848_v28 = vmax.f32 %v4740_v10, 0.0 }
 0x573   : > { %5864 = vst [vmem:[#allocation1 + $0x21] ss:$4 sm:$0xff] %v5631_v14  ;;  %v5248_v14 = vsel %vm848_vm2, %v4940_v55, %v5120_v49  ;;  %v5452_v50 = vrot.slane %v11825_v42, 6  ;;  %v5453_v8 = vrot.slane %v11825_v42, 7  ;;  %v5510_v23 = vperm.slane %v5450_v37, 0 }
 0x574   : > { %5865 = vst [vmem:[#allocation1 + $0x22] ss:$4 sm:$0xff] %v5632_v33  ;;  %v5116_v33 = vperm.slane %v5056_v43, 0  ;;  %v5242_v18 = vsel %vm848_vm2, %v11811_v45, %v5114_v54  ;;  %v5243_v38 = vsel %vm848_vm2, %v4935_v47, %v5115_v3  ;;  %v4498_v56 = vadd.f32 %v11315_v12, %v4345_v29  ;;  %v6048_v54 = vld [vmem:[#allocation5 + $0x78] sm:$0xff] }
 0x575   : > { %5866 = vst [vmem:[#allocation1 + $0x23] ss:$4 sm:$0xff] %v5633_v6  ;;  %v4519_v4 = vpop.permute.xlu2 %4518  ;;  %v5511_v13 = vperm.slane %v5451_v41, 0  ;;  %v4409_v11 = vadd.f32 %v11802_v62, %v4390_v32  ;;  %v4104_v16 = vadd.f32 %v11251_v2, %v3870_v15  ;;  %v5330_v19 = vrot.slane %v11848_v28, 4 }
 0x576   : > { %5862 = vst [vmem:[#allocation1 + $0x3] ss:$4 sm:$0xff] %v5629_v53  ;;  %v4936_v53 = vrot.slane %v11811_v45, 2  ;;  %v5245_v45 = vsel %vm848_vm2, %v4937_v5, %v5117_v60  ;;  %v5512_v30 = vperm.slane %v5452_v50, 0  ;;  %v5331_v49 = vrot.slane %v11848_v28, 5 }
 0x577   : > { %v5447_v59 = vrot.slane %v11825_v42, 1  ;;  %v5513_v39 = vperm.slane %v5453_v8, 0  ;;  %v4144_v12 = vadd.f32 %v11802_v62, %v4125_v52  ;;  %v5332_v43 = vrot.slane %v11848_v28, 6  ;;  %v4870_v8 = vpop.f32.mrf.mxu2 }
 0x578   : > { %8842 = vmatmul.msk.f32.gmra.mxu3 %vm584_vm15, %v6046_v31  ;;  %8948 = vmatmul.msk.f32.gmra.mxu2 %vm584_vm15, %v6046_v31  ;;  %v5244_v46 = vsel %vm848_vm2, %v4936_v53, %v5116_v33  ;;  %v6602_v31 = vld [vmem:[#allocation5 + $0x6a] sm:$0xff]  ;;  %v5333_v25 = vrot.slane %v11848_v28, 7  ;;  %v5448_v21 = vrot.slane %v11825_v42, 2  ;;  %v5638_v55 = vsel %vm848_vm2, %v5330_v19, %v5510_v23  ;;  %v6325_v33 = vld [vmem:[#allocation5 + $0x79] sm:$0xff] }
 0x579   : > { %8878 = vmatmul.msk.f32.gmra.mxu0 %vm584_vm15, %v6323_v17  ;;  %v11870_v17 = vmax.f32 %v4498_v56, 0.0  ;;  %v5639_v20 = vsel %vm848_vm2, %v5331_v49, %v5511_v13  ;;  %v5506_v27 = vperm.slane %v11825_v42, 0  ;;  %v5640_v51 = vsel %vm848_vm2, %v5332_v43, %v5512_v30  ;;  %v4762_v47 = vpop.permute.xlu1 %4761  ;;  %v6049_v56 = vld [vmem:[#allocation5 + $0x80] sm:$0xff] }
 0x57a   : > { %8914 = vmatmul.msk.f32.gmra.mxu1 %vm584_vm15, %v6601_v63  ;;  %v4358_v2 = vpop.permute.xlu0 %4357  ;;  %v5449_v63 = vrot.slane %v11825_v42, 3  ;;  %v5507_v3 = vperm.slane %v5447_v59, 0  ;;  %v5508_v32 = vperm.slane %v5448_v21, 0  ;;  %v5327_v60 = vrot.slane %v11848_v28, 1  ;;  %v6604_v43 = vld [vmem:[#allocation5 + $0x82] sm:$0xff] }
 0x57b   : > { %v4377_v10 = vadd.f32 %v4358_v2, %v4144_v12  ;;  %v5065_v42 = vrot.slane %v11870_v17, 4  ;;  %v5066_v29 = vrot.slane %v11870_v17, 5  ;;  %v5634_v41 = vsel %vm848_vm2, %v11848_v28, %v5506_v27  ;;  %v6326_v12 = vld [vmem:[#allocation5 + $0x81] sm:$0xff] }
 0x57c   : > { %v5868_v34 = vld.sshfl [vmem:[#allocation1 + $0x20] sm:$0xff pattern:$0x73625140]  ;;  %v5329_v5 = vrot.slane %v11848_v28, 3  ;;  %v5635_v50 = vsel %vm848_vm2, %v5327_v60, %v5507_v3  ;;  %v5122_v3 = vperm.slane %v11870_v17, 0 }
 0x57d   : > { %6013 = vst.msk [vmem:[#allocation5 + $0x99] sm:$0xff] %vm584_vm15, %v5868_v34  ;;  %v5867_v6 = vld.sshfl [vmem:[#allocation1] sm:$0xff pattern:$0x73625140]  ;;  %v4538_v34 = vadd.f32 %v4519_v4, %v4409_v11  ;;  %v3893_v53 = vpop.permute.xlu2 %3892  ;;  %v5068_v4 = vrot.slane %v11870_v17, 7  ;;  %v5127_v13 = vperm.slane %v5066_v29, 0 }
 0x57e   : > { %5873 = vst [vmem:[#allocation1 + $0x20] ss:$4 sm:$0xff] %v5246_v24  ;;  %v3911_v23 = vadd.f32 %v11802_v62, %v3893_v53 }
 0x57f   : > { %5874 = vst [vmem:[#allocation1 + $0x21] ss:$4 sm:$0xff] %v5247_v48  ;;  %v4305_v48 = vadd.f32 %v11434_v35, %v4104_v16  ;;  %v6603_v35 = vld [vmem:[#allocation5 + $0x7a] sm:$0xff]  ;;  %v4781_v15 = vadd.f32 %v4762_v47, %v4538_v34  ;;  %v5129_v59 = vperm.slane %v5068_v4, 0  ;;  %v5064_v34 = vrot.slane %v11870_v17, 3 }
 0x580   : > { %5875 = vst [vmem:[#allocation1 + $0x22] ss:$4 sm:$0xff] %v5248_v14  ;;  %8843 = vmatmul.msk.f32.gmra.mxu3 %vm584_vm15, %v6047_v22  ;;  %8949 = vmatmul.msk.f32.gmra.mxu2 %vm584_vm15, %v6047_v22  ;;  %v5641_v14 = vsel %vm848_vm2, %v5333_v25, %v5513_v39  ;;  %v8976_v22 = vld [vmem:[%s12988_s9 + $0x90] sm:$0xff]  ;;  %v5062_v25 = vrot.slane %v11870_v17, 1 }
 0x581   : > { %5876 = vst [vmem:[#allocation1 + $0x23] ss:$4 sm:$0xff] %v5249_v44  ;;  %8879 = vmatmul.msk.f32.gmra.mxu0 %vm584_vm15, %v6324_v9  ;;  %v5509_v44 = vperm.slane %v5449_v63, 0  ;;  %v11885_v37 = vmax.f32 %v4305_v48, 0.0  ;;  %7295 = vmatpush.msra.mxu3 %v8976_v22  ;;  %v5126_v9 = vperm.slane %v5065_v42, 0  ;;  %v5063_v63 = vrot.slane %v11870_v17, 2  ;;  %v4392_v22 = vpop.permute.xlu1 %4391 }
 0x582   : > { %6012 = vst.msk [vmem:[#allocation5 + $0x91] sm:$0xff] %vm584_vm15, %v5867_v6  ;;  %8915 = vmatmul.msk.f32.gmra.mxu1 %vm584_vm15, %v6602_v31  ;;  %v4612_v6 = vpop.f32.mrf.mxu0  ;;  %v4328_v39 = vpop.permute.xlu0 %4327 }
 0x583   : > { %5869 = vst [vmem:[#allocation1] ss:$4 sm:$0xff] %v5242_v18  ;;  %v5328_v18 = vrot.slane %v11848_v28, 2  ;;  %v4628_v52 = vadd.f32 %v4612_v6, %v4377_v10  ;;  %v5637_v31 = vsel %vm848_vm2, %v5329_v5, %v5509_v44  ;;  %v4886_v28 = vadd.f32 %v4870_v8, %v4781_v15 }
 0x584   : > { %5870 = vst [vmem:[#allocation1 + $0x1] ss:$4 sm:$0xff] %v5243_v38  ;;  %v5067_v38 = vrot.slane %v11870_v17, 6  ;;  %v4945_v11 = vrot.slane %v11885_v37, 4  ;;  %v4946_v16 = vrot.slane %v11885_v37, 5  ;;  %v4947_v49 = vrot.slane %v11885_v37, 6 }
 0x585   : > { %5871 = vst [vmem:[#allocation1 + $0x2] ss:$4 sm:$0xff] %v5244_v46  ;;  %v4741_v30 = vadd.f32 %v11522_v57, %v4628_v52  ;;  %v11910_v2 = vmax.f32 %v4886_v28, 0.0  ;;  %v4948_v57 = vrot.slane %v11885_v37, 7  ;;  %v5123_v10 = vperm.slane %v5062_v25, 0  ;;  %v4127_v53 = vpop.permute.xlu2 %4126 }
 0x586   : > { %5872 = vst [vmem:[#allocation1 + $0x3] ss:$4 sm:$0xff] %v5245_v45  ;;  %v5636_v45 = vsel %vm848_vm2, %v5328_v18, %v5508_v32  ;;  %v5128_v19 = vperm.slane %v5067_v38, 0  ;;  %v5254_v21 = vsel %vm848_vm2, %v4945_v11, %v5126_v9  ;;  %v5124_v60 = vperm.slane %v5063_v63, 0 }
 0x587   : > { %v11920_v48 = vmax.f32 %v4741_v30, 0.0  ;;  %v5457_v32 = vrot.slane %v11910_v2, 4  ;;  %v5125_v17 = vperm.slane %v5064_v34, 0  ;;  %v5459_v42 = vrot.slane %v11910_v2, 6 }
 0x588   : > { %v5878_v24 = vld.sshfl [vmem:[#allocation1 + $0x20] sm:$0xff pattern:$0x73625140]  ;;  %8844 = vmatmul.msk.f32.gmra.mxu3 %vm584_vm15, %v6048_v54  ;;  %8950 = vmatmul.msk.f32.gmra.mxu2 %vm584_vm15, %v6048_v54  ;;  %v5256_v54 = vsel %vm848_vm2, %v4947_v49, %v5128_v19  ;;  %v5250_v18 = vsel %vm848_vm2, %v11885_v37, %v5122_v3  ;;  %v5460_v29 = vrot.slane %v11910_v2, 7  ;;  %v5454_v19 = vrot.slane %v11910_v2, 1 }
 0x589   : > { %6015 = vst.msk [vmem:[#allocation5 + $0xb1] sm:$0xff] %vm584_vm15, %v5878_v24  ;;  %8880 = vmatmul.msk.f32.gmra.mxu0 %vm584_vm15, %v6325_v33  ;;  %v4016_v24 = vadd.f32 %v11567_v26, %v3911_v23  ;;  %v3758_v26 = vadd.f32 %v11802_v62, %v11256_v7  ;;  %v6050_v47 = vld [vmem:[#allocation5 + $0x90] sm:$0xff]  ;;  %v5458_v7 = vrot.slane %v11910_v2, 5  ;;  %v5337_v44 = vrot.slane %v11920_v48, 4 }
 0x58a   : > { %5883 = vst [vmem:[#allocation1 + $0x20] ss:$4 sm:$0xff] %v5638_v55  ;;  %8916 = vmatmul.msk.f32.gmra.mxu1 %vm584_vm15, %v6603_v35  ;;  %v4942_v35 = vrot.slane %v11885_v37, 1  ;;  %v6327_v5 = vld [vmem:[#allocation5 + $0x91] sm:$0xff]  ;;  %v5518_v52 = vperm.slane %v5457_v32, 0  ;;  %v5340_v23 = vrot.slane %v11920_v48, 7  ;;  %v4410_v49 = vadd.f32 %v11802_v62, %v4392_v22  ;;  %v4873_v22 = vpop.f32.mrf.mxu2 }
 0x58b   : > { %5884 = vst [vmem:[#allocation1 + $0x21] ss:$4 sm:$0xff] %v5639_v20  ;;  %v5255_v20 = vsel %vm848_vm2, %v4946_v16, %v5127_v13  ;;  %v4346_v27 = vadd.f32 %v4328_v39, %v4016_v24  ;;  %v3871_v33 = vadd.f32 %v11329_v61, %v3758_v26  ;;  %v4943_v61 = vrot.slane %v11885_v37, 2  ;;  %v6605_v38 = vld [vmem:[#allocation5 + $0x92] sm:$0xff]  ;;  %v4521_v16 = vpop.permute.xlu0 %4520  ;;  %v6606_v26 = vld [vmem:[#allocation5 + $0x9a] sm:$0xff] }
 0x58c   : > { %5885 = vst [vmem:[#allocation1 + $0x22] ss:$4 sm:$0xff] %v5640_v51  ;;  %v11924_v51 = vpop.f32.mrf.mxu0  ;;  %v5520_v9 = vperm.slane %v5459_v42, 0  ;;  %v5521_v11 = vperm.slane %v5460_v29, 0  ;;  %v5334_v25 = vrot.slane %v11920_v48, 1  ;;  %v5515_v34 = vperm.slane %v5454_v19, 0 }
 0x58d   : > { %5886 = vst [vmem:[#allocation1 + $0x23] ss:$4 sm:$0xff] %v5641_v14  ;;  %v5877_v46 = vld.sshfl [vmem:[#allocation1] sm:$0xff pattern:$0x73625140]  ;;  %v5257_v14 = vsel %vm848_vm2, %v4948_v57, %v5129_v59  ;;  %v4499_v15 = vadd.f32 %v11319_v36, %v4346_v27  ;;  %v5251_v36 = vsel %vm848_vm2, %v4942_v35, %v5123_v10  ;;  %v4105_v8 = vadd.f32 %v11260_v40, %v3871_v33  ;;  %v6051_v59 = vld [vmem:[#allocation5 + $0x98] sm:$0xff] }
 0x58e   : > { %6014 = vst.msk [vmem:[#allocation5 + $0xa9] sm:$0xff] %vm584_vm15, %v5877_v46  ;;  %v5339_v46 = vrot.slane %v11920_v48, 6  ;;  %v5252_v4 = vsel %vm848_vm2, %v4943_v61, %v5124_v60  ;;  %v5335_v57 = vrot.slane %v11920_v48, 2  ;;  %v4145_v3 = vadd.f32 %v11802_v62, %v4127_v53 }
 0x58f   : > { %5879 = vst [vmem:[#allocation1] ss:$4 sm:$0xff] %v5634_v41  ;;  %v5338_v41 = vrot.slane %v11920_v48, 5  ;;  %v11954_v28 = vmax.f32 %v4499_v15, 0.0  ;;  %v5514_v10 = vperm.slane %v11910_v2, 0  ;;  %v5643_v60 = vsel %vm848_vm2, %v5334_v25, %v5515_v34  ;;  %v12020_v25 = vpop.f32.mrf.mxu1 }
 0x590   : > { %8845 = vmatmul.msk.f32.gmra.mxu3 %vm584_vm15, %v6049_v56  ;;  %8951 = vmatmul.msk.f32.gmra.mxu2 %vm584_vm15, %v6049_v56  ;;  %5880 = vst [vmem:[#allocation1 + $0x1] ss:$4 sm:$0xff] %v5635_v50  ;;  %v4944_v50 = vrot.slane %v11885_v37, 3  ;;  %v4306_v56 = vadd.f32 %v11545_v0, %v4105_v8  ;;  %v5648_v30 = vsel %vm848_vm2, %v5339_v46, %v5520_v9 }
 0x591   : > { %5881 = vst [vmem:[#allocation1 + $0x2] ss:$4 sm:$0xff] %v5636_v45  ;;  %8881 = vmatmul.msk.f32.gmra.mxu0 %vm584_vm15, %v6326_v12  ;;  %v5519_v45 = vperm.slane %v5458_v7, 0  ;;  %v5455_v12 = vrot.slane %v11910_v2, 2  ;;  %v5649_v0 = vsel %vm848_vm2, %v5340_v23, %v5521_v11  ;;  %v5073_v63 = vrot.slane %v11954_v28, 5 }
 0x592   : > { %5882 = vst [vmem:[#allocation1 + $0x3] ss:$4 sm:$0xff] %v5637_v31  ;;  %8917 = vmatmul.msk.f32.gmra.mxu1 %vm584_vm15, %v6604_v43  ;;  %v5253_v37 = vsel %vm848_vm2, %v4944_v50, %v5125_v17  ;;  %v5646_v31 = vsel %vm848_vm2, %v5337_v44, %v5518_v52  ;;  %v5456_v43 = vrot.slane %v11910_v2, 3  ;;  %v11971_v24 = vmax.f32 %v4306_v56, 0.0 }
 0x593   : > { %v5647_v40 = vsel %vm848_vm2, %v5338_v41, %v5519_v45  ;;  %v5074_v27 = vrot.slane %v11954_v28, 6  ;;  %v5516_v32 = vperm.slane %v5455_v12, 0  ;;  %v5075_v33 = vrot.slane %v11954_v28, 7  ;;  %v13030_v12 = vld [vmem:[#allocation37_spill] sm:$0xff] }
 0x594   : > { %v5888_v55 = vld.sshfl [vmem:[#allocation1 + $0x20] sm:$0xff pattern:$0x73625140]  ;;  %v11962_v39 = vpop.f32.mrf.mxu0  ;;  %v5517_v35 = vperm.slane %v5456_v43, 0  ;;  %v5642_v44 = vsel %vm848_vm2, %v11920_v48, %v5514_v10  ;;  %v5135_v2 = vperm.slane %v5073_v63, 0  ;;  %v4953_v41 = vrot.slane %v11971_v24, 5 }
 0x595   : > { %5893 = vst [vmem:[#allocation1 + $0x20] ss:$4 sm:$0xff] %v5254_v21  ;;  %v5072_v21 = vrot.slane %v11954_v28, 4  ;;  %v5644_v15 = vsel %vm848_vm2, %v5335_v57, %v5516_v32  ;;  %v6052_v29 = vld [vmem:[#allocation5 + $0xa8] sm:$0xff]  ;;  %v4955_v52 = vrot.slane %v11971_v24, 7  ;;  %v5071_v19 = vrot.slane %v11954_v28, 3 }
 0x596   : > { %5894 = vst [vmem:[#allocation1 + $0x21] ss:$4 sm:$0xff] %v5255_v20  ;;  %v6328_v20 = vld [vmem:[#allocation5 + $0x99] sm:$0xff]  ;;  %v5263_v8 = vsel %vm848_vm2, %v4953_v41, %v5135_v2  ;;  %v6607_v9 = vld [vmem:[#allocation5 + $0xaa] sm:$0xff]  ;;  %v4949_v57 = vrot.slane %v11971_v24, 1 }
 0x597   : > { %5895 = vst [vmem:[#allocation1 + $0x22] ss:$4 sm:$0xff] %v5256_v54  ;;  %v5336_v54 = vrot.slane %v11920_v48, 3  ;;  %v5134_v7 = vperm.slane %v5072_v21, 0  ;;  %v4954_v48 = vrot.slane %v11971_v24, 6  ;;  %v5130_v21 = vperm.slane %v11954_v28, 0 }
 0x598   : > { %5896 = vst [vmem:[#allocation1 + $0x23] ss:$4 sm:$0xff] %v5257_v14  ;;  %8846 = vmatmul.msk.f32.gmra.mxu3 %vm584_vm15, %v6050_v47  ;;  %8952 = vmatmul.msk.f32.gmra.mxu2 %vm584_vm15, %v6050_v47  ;;  %v4764_v14 = vpop.permute.xlu2 %4763  ;;  %v4360_v47 = vpop.permute.xlu1 %4359 }
 0x599   : > { %6017 = vst.msk [vmem:[#allocation5 + $0xc9] sm:$0xff] %vm584_vm15, %v5888_v55  ;;  %v5887_v6 = vld.sshfl [vmem:[#allocation1] sm:$0xff pattern:$0x73625140]  ;;  %8882 = vmatmul.msk.f32.gmra.mxu0 %vm584_vm15, %v6327_v5  ;;  %v4539_v55 = vadd.f32 %v4521_v16, %v4410_v49  ;;  %v5645_v61 = vsel %vm848_vm2, %v5336_v54, %v5517_v35  ;;  %v4378_v53 = vadd.f32 %v4360_v47, %v4145_v3  ;;  %v4950_v3 = vrot.slane %v11971_v24, 2 }
 0x59a   : > { %6016 = vst.msk [vmem:[#allocation5 + $0xc1] sm:$0xff] %vm584_vm15, %v5887_v6  ;;  %8918 = vmatmul.msk.f32.gmra.mxu1 %vm584_vm15, %v6605_v38  ;;  %v4952_v6 = vrot.slane %v11971_v24, 4  ;;  %v5137_v38 = vperm.slane %v5075_v33, 0 }
 0x59b   : > { %5889 = vst [vmem:[#allocation1] ss:$4 sm:$0xff] %v5250_v18  ;;  %v4782_v17 = vadd.f32 %v4764_v14, %v4539_v55  ;;  %v5136_v18 = vperm.slane %v5074_v27, 0  ;;  %v4629_v45 = vadd.f32 %v11924_v51, %v4378_v53  ;;  %v6330_v27 = vld [vmem:[#allocation5 + $0xb1] sm:$0xff]  ;;  %v12029_v14 = vpop.f32.mrf.mxu3 }
 0x59c   : > { %5890 = vst [vmem:[#allocation1 + $0x1] ss:$4 sm:$0xff] %v5251_v36  ;;  %v11990_v5 = vpop.f32.mrf.mxu0  ;;  %v5262_v50 = vsel %vm848_vm2, %v4952_v6, %v5134_v7  ;;  %v5265_v56 = vsel %vm848_vm2, %v4955_v52, %v5137_v38  ;;  %v13033_v52 = vld [vmem:[#allocation32_spill] sm:$0xff] }
 0x59d   : > { %5891 = vst [vmem:[#allocation1 + $0x2] ss:$4 sm:$0xff] %v5252_v4  ;;  %v4887_v36 = vadd.f32 %v4873_v22, %v4782_v17  ;;  %v3895_v4 = vpop.permute.xlu0 %3894  ;;  %v5264_v23 = vsel %vm848_vm2, %v4954_v48, %v5136_v18  ;;  %v4742_v16 = vadd.f32 %v11551_v1, %v4629_v45  ;;  %v12038_v17 = vpop.f32.mrf.mxu2 }
 0x59e   : > { %5892 = vst [vmem:[#allocation1 + $0x3] ss:$4 sm:$0xff] %v5253_v37  ;;  %v6329_v37 = vld [vmem:[#allocation5 + $0xa9] sm:$0xff]  ;;  %v3912_v51 = vadd.f32 %v11802_v62, %v3895_v4 }
 0x59f   : > { %v5898_v13 = vld.sshfl [vmem:[#allocation1 + $0x20] sm:$0xff pattern:$0x73625140]  ;;  %v12008_v11 = vmax.f32 %v4887_v36, 0.0  ;;  %v12025_v63 = vmax.f32 %v4742_v16, 0.0 }
 0x5a0   : > { %6019 = vst.msk [vmem:[#allocation5 + $0xe1] sm:$0xff] %vm584_vm15, %v5898_v13  ;;  %8847 = vmatmul.msk.f32.gmra.mxu3 %vm584_vm15, %v6051_v59  ;;  %8953 = vmatmul.msk.f32.gmra.mxu2 %vm584_vm15, %v6051_v59  ;;  %v5069_v13 = vrot.slane %v11954_v28, 1  ;;  %v4330_v54 = vpop.permute.xlu1 %4329 }
 0x5a1   : > { %5903 = vst [vmem:[#allocation1 + $0x20] ss:$4 sm:$0xff] %v5646_v31  ;;  %8883 = vmatmul.msk.f32.gmra.mxu0 %vm584_vm15, %v6328_v20  ;;  %v8975_v31 = vld [vmem:[%s12988_s9 + $0x88] sm:$0xff]  ;;  %v5464_v59 = vrot.slane %v12008_v11, 4  ;;  %v5465_v55 = vrot.slane %v12008_v11, 5  ;;  %v5133_v20 = vperm.slane %v5071_v19, 0 }
 0x5a2   : > { %5904 = vst [vmem:[#allocation1 + $0x21] ss:$4 sm:$0xff] %v5647_v40  ;;  %8919 = vmatmul.msk.f32.gmra.mxu1 %vm584_vm15, %v6606_v26  ;;  %7296 = vmatpush.msra.mxu3 %v8975_v31  ;;  %v5070_v40 = vrot.slane %v11954_v28, 2  ;;  %v5131_v49 = vperm.slane %v5069_v13, 0  ;;  %v5466_v34 = vrot.slane %v12008_v11, 6  ;;  %v6608_v26 = vld [vmem:[#allocation5 + $0xb2] sm:$0xff] }
 0x5a3   : > { %5905 = vst [vmem:[#allocation1 + $0x22] ss:$4 sm:$0xff] %v5648_v30  ;;  %v6053_v30 = vld [vmem:[#allocation5 + $0xb0] sm:$0xff]  ;;  %v5467_v10 = vrot.slane %v12008_v11, 7  ;;  %v4951_v28 = vrot.slane %v11971_v24, 3  ;;  %v5526_v47 = vperm.slane %v5464_v59, 0 }
 0x5a4   : > { %5906 = vst [vmem:[#allocation1 + $0x23] ss:$4 sm:$0xff] %v5649_v0  ;;  %v4017_v0 = vadd.f32 %v13030_v12, %v3912_v51  ;;  %v12018_v43 = vpop.f32.mrf.mxu0  ;;  %v5132_v1 = vperm.slane %v5070_v40, 0  ;;  %v5259_v32 = vsel %vm848_vm2, %v4949_v57, %v5131_v49  ;;  %v5344_v2 = vrot.slane %v12025_v63, 4  ;;  %v6054_v18 = vld [vmem:[#allocation5 + $0xc0] sm:$0xff]  ;;  %v12062_v51 = vpop.f32.mrf.mxu1  ;;  %v13034_v19 = vld [vmem:[#allocation29_spill] sm:$0xff] }
 0x5a5   : > { %v5897_v42 = vld.sshfl [vmem:[#allocation1] sm:$0xff pattern:$0x73625140]  ;;  %v5345_v6 = vrot.slane %v12025_v63, 5  ;;  %v5528_v53 = vperm.slane %v5466_v34, 0  ;;  %v5529_v22 = vperm.slane %v5467_v10, 0  ;;  %v4129_v38 = vpop.permute.xlu0 %4128 }
 0x5a6   : > { %6018 = vst.msk [vmem:[#allocation5 + $0xd9] sm:$0xff] %vm584_vm15, %v5897_v42  ;;  %v4347_v33 = vadd.f32 %v4330_v54, %v4017_v0  ;;  %v5258_v42 = vsel %vm848_vm2, %v11971_v24, %v5130_v21  ;;  %v5346_v48 = vrot.slane %v12025_v63, 6  ;;  %v5654_v36 = vsel %vm848_vm2, %v5344_v2, %v5526_v47  ;;  %v6331_v31 = vld [vmem:[#allocation5 + $0xc1] sm:$0xff]  ;;  %v12071_v0 = vpop.f32.mrf.mxu2  ;;  %v12073_v21 = vpop.f32.mrf.mxu3 }
 0x5a7   : > { %5899 = vst [vmem:[#allocation1] ss:$4 sm:$0xff] %v5642_v44  ;;  %v5260_v44 = vsel %vm848_vm2, %v4950_v3, %v5132_v1  ;;  %v5462_v4 = vrot.slane %v12008_v11, 2  ;;  %v5522_v40 = vperm.slane %v12008_v11, 0  ;;  %v5341_v57 = vrot.slane %v12025_v63, 1  ;;  %v6055_v34 = vld [vmem:[#allocation5 + $0xc8] sm:$0xff] }
 0x5a8   : > { %8848 = vmatmul.msk.f32.gmra.mxu3 %vm584_vm15, %v6052_v29  ;;  %8954 = vmatmul.msk.f32.gmra.mxu2 %vm584_vm15, %v6052_v29  ;;  %5900 = vst [vmem:[#allocation1 + $0x1] ss:$4 sm:$0xff] %v5643_v60  ;;  %v13031_v60 = vld [vmem:[#allocation28_spill] sm:$0xff]  ;;  %v13032_v29 = vld [vmem:[#allocation34_spill] sm:$0xff]  ;;  %v4523_v12 = vpop.permute.xlu1 %4522  ;;  %v5342_v54 = vrot.slane %v12025_v63, 2  ;;  %v5343_v3 = vrot.slane %v12025_v63, 3 }
 0x5a9   : > { %5901 = vst [vmem:[#allocation1 + $0x2] ss:$4 sm:$0xff] %v5644_v15  ;;  %8884 = vmatmul.msk.f32.gmra.mxu0 %vm584_vm15, %v6329_v37  ;;  %v3759_v7 = vadd.f32 %v11802_v62, %v13031_v60  ;;  %v5527_v15 = vperm.slane %v5465_v55, 0  ;;  %v5463_v37 = vrot.slane %v12008_v11, 3  ;;  %v5524_v1 = vperm.slane %v5462_v4, 0 }
 0x5aa   : > { %5902 = vst [vmem:[#allocation1 + $0x3] ss:$4 sm:$0xff] %v5645_v61  ;;  %8920 = vmatmul.msk.f32.gmra.mxu1 %vm584_vm15, %v6607_v9  ;;  %v5261_v61 = vsel %vm848_vm2, %v4951_v28, %v5133_v20  ;;  %v5656_v9 = vsel %vm848_vm2, %v5346_v48, %v5528_v53 }
 0x5ab   : > { %v5908_v46 = vld.sshfl [vmem:[#allocation1 + $0x20] sm:$0xff pattern:$0x73625140]  ;;  %v3872_v41 = vadd.f32 %v13032_v29, %v3759_v7  ;;  %v5655_v45 = vsel %vm848_vm2, %v5345_v6, %v5527_v15  ;;  %v5525_v20 = vperm.slane %v5463_v37, 0  ;;  %v5652_v47 = vsel %vm848_vm2, %v5342_v54, %v5524_v1 }
 0x5ac   : > { %6021 = vst.msk [vmem:[#allocation5 + $0xf9] sm:$0xff] %vm584_vm15, %v5908_v46  ;;  %v4500_v46 = vadd.f32 %v13033_v52, %v4347_v33  ;;  %v12060_v13 = vpop.f32.mrf.mxu0  ;;  %v6610_v15 = vld [vmem:[#allocation5 + $0xca] sm:$0xff]  ;;  %v12098_v29 = vpop.f32.mrf.mxu1 }
 0x5ad   : > { %5913 = vst [vmem:[#allocation1 + $0x20] ss:$4 sm:$0xff] %v5262_v50  ;;  %v5461_v50 = vrot.slane %v12008_v11, 1  ;;  %v13035_v11 = vld [vmem:[#allocation36_spill] sm:$0xff]  ;;  %v5653_v7 = vsel %vm848_vm2, %v5343_v3, %v5525_v20  ;;  %v6333_v1 = vld [vmem:[#allocation5 + $0xd9] sm:$0xff] }
 0x5ae   : > { %5914 = vst [vmem:[#allocation1 + $0x21] ss:$4 sm:$0xff] %v5263_v8  ;;  %v5347_v8 = vrot.slane %v12025_v63, 7  ;;  %v12069_v59 = vmax.f32 %v4500_v46, 0.0  ;;  %v12104_v46 = vpop.f32.mrf.mxu3  ;;  %v13036_v3 = vld [vmem:[#allocation38_spill] sm:$0xff] }
 0x5af   : > { %5915 = vst [vmem:[#allocation1 + $0x22] ss:$4 sm:$0xff] %v5264_v23  ;;  %v4394_v23 = vpop.permute.xlu2 %4393  ;;  %v5523_v49 = vperm.slane %v5461_v50, 0 }
 0x5b0   : > { %5916 = vst [vmem:[#allocation1 + $0x23] ss:$4 sm:$0xff] %v5265_v56  ;;  %8849 = vmatmul.msk.f32.gmra.mxu3 %vm584_vm15, %v6053_v30  ;;  %8955 = vmatmul.msk.f32.gmra.mxu2 %vm584_vm15, %v6053_v30  ;;  %v6609_v56 = vld [vmem:[#allocation5 + $0xc2] sm:$0xff]  ;;  %v5657_v16 = vsel %vm848_vm2, %v5347_v8, %v5529_v22  ;;  %v4106_v30 = vadd.f32 %v13034_v19, %v3872_v41  ;;  %v5079_v28 = vrot.slane %v12069_v59, 4  ;;  %v5080_v33 = vrot.slane %v12069_v59, 5  ;;  %v3897_v50 = vpop.permute.xlu1 %3896  ;;  %v12106_v8 = vpop.f32.mrf.mxu2 }
 0x5b1   : > { %8885 = vmatmul.msk.f32.gmra.mxu0 %vm584_vm15, %v6330_v27  ;;  %v5907_v35 = vld.sshfl [vmem:[#allocation1] sm:$0xff pattern:$0x73625140]  ;;  %v5650_v27 = vsel %vm848_vm2, %v12025_v63, %v5522_v40  ;;  %v5651_v10 = vsel %vm848_vm2, %v5341_v57, %v5523_v49  ;;  %v5076_v6 = vrot.slane %v12069_v59, 1  ;;  %v5077_v41 = vrot.slane %v12069_v59, 2 }
 0x5b2   : > { %8921 = vmatmul.msk.f32.gmra.mxu1 %vm584_vm15, %v6608_v26  ;;  %6020 = vst.msk [vmem:[#allocation5 + $0xf1] sm:$0xff] %vm584_vm15, %v5907_v35  ;;  %v4307_v55 = vadd.f32 %v13035_v11, %v4106_v30  ;;  %v4411_v26 = vadd.f32 %v11802_v62, %v4394_v23  ;;  %v4766_v35 = vpop.permute.xlu0 %4765  ;;  %v6332_v63 = vld [vmem:[#allocation5 + $0xc9] sm:$0xff]  ;;  %v5143_v22 = vperm.slane %v5080_v33, 0  ;;  %v5081_v4 = vrot.slane %v12069_v59, 6  ;;  %v6611_v11 = vld [vmem:[#allocation5 + $0xda] sm:$0xff] }
 0x5b3   : > { %5909 = vst [vmem:[#allocation1] ss:$4 sm:$0xff] %v5258_v42  ;;  %v5138_v23 = vperm.slane %v12069_v59, 0  ;;  %v5139_v37 = vperm.slane %v5076_v6, 0  ;;  %v13037_v33 = vld [vmem:[#allocation39_spill] sm:$0xff] }
 0x5b4   : > { %5910 = vst [vmem:[#allocation1 + $0x1] ss:$4 sm:$0xff] %v5259_v32  ;;  %v12089_v60 = vmax.f32 %v4307_v55, 0.0  ;;  %v4540_v42 = vadd.f32 %v4523_v12, %v4411_v26 }
 0x5b5   : > { %5911 = vst [vmem:[#allocation1 + $0x2] ss:$4 sm:$0xff] %v5260_v44  ;;  %v4146_v44 = vadd.f32 %v11802_v62, %v4129_v38 }
 0x5b6   : > { %5912 = vst [vmem:[#allocation1 + $0x3] ss:$4 sm:$0xff] %v5261_v61  ;;  %v5142_v61 = vperm.slane %v5079_v28, 0  ;;  %v4783_v53 = vadd.f32 %v4766_v35, %v4540_v42  ;;  %v4959_v38 = vrot.slane %v12089_v60, 4  ;;  %v4960_v52 = vrot.slane %v12089_v60, 5  ;;  %v6057_v42 = vld [vmem:[#allocation5 + $0xe0] sm:$0xff] }
 0x5b7   : > { %v5918_v24 = vld.sshfl [vmem:[#allocation1 + $0x20] sm:$0xff pattern:$0x73625140]  ;;  %v4362_v2 = vpop.permute.xlu2 %4361  ;;  %v4956_v30 = vrot.slane %v12089_v60, 1  ;;  %v4957_v49 = vrot.slane %v12089_v60, 2  ;;  %v4958_v55 = vrot.slane %v12089_v60, 3  ;;  %v5266_v20 = vsel %vm848_vm2, %v12089_v60, %v5138_v23 }
 0x5b8   : > { %8850 = vmatmul.msk.f32.gmra.mxu3 %vm584_vm15, %v6054_v18  ;;  %8956 = vmatmul.msk.f32.gmra.mxu2 %vm584_vm15, %v6054_v18  ;;  %6023 = vst.msk [vmem:[#allocation5 + $0x111] sm:$0xff] %vm584_vm15, %v5918_v24  ;;  %v12096_v18 = vpop.f32.mrf.mxu0  ;;  %v5078_v24 = vrot.slane %v12069_v59, 3  ;;  %v4379_v48 = vadd.f32 %v4362_v2, %v4146_v44  ;;  %v5271_v40 = vsel %vm848_vm2, %v4960_v52, %v5143_v22  ;;  %v4962_v28 = vrot.slane %v12089_v60, 7  ;;  %v13038_v44 = vld [vmem:[#allocation30_spill] sm:$0xff]  ;;  %v12140_v2 = vpop.f32.mrf.mxu1  ;;  %v6612_v52 = vld [vmem:[#allocation5 + $0xe2] sm:$0xff] }
 0x5b9   : > { %8886 = vmatmul.msk.f32.gmra.mxu0 %vm584_vm15, %v6331_v31  ;;  %5923 = vst [vmem:[#allocation1 + $0x20] ss:$4 sm:$0xff] %v5654_v36  ;;  %v6056_v36 = vld [vmem:[#allocation5 + $0xd8] sm:$0xff]  ;;  %v4888_v31 = vadd.f32 %v12038_v17, %v4783_v53  ;;  %v5144_v17 = vperm.slane %v5081_v4, 0  ;;  %v12148_v22 = vpop.f32.mrf.mxu3 }
 0x5ba   : > { %8922 = vmatmul.msk.f32.gmra.mxu1 %vm584_vm15, %v6609_v56  ;;  %5924 = vst [vmem:[#allocation1 + $0x21] ss:$4 sm:$0xff] %v5655_v45  ;;  %v5082_v45 = vrot.slane %v12069_v59, 7  ;;  %v5140_v56 = vperm.slane %v5077_v41, 0  ;;  %v5141_v59 = vperm.slane %v5078_v24, 0  ;;  %v4630_v12 = vadd.f32 %v11962_v39, %v4379_v48  ;;  %v13039_v53 = vld [vmem:[#allocation35_spill] sm:$0xff] }
 0x5bb   : > { %5925 = vst [vmem:[#allocation1 + $0x22] ss:$4 sm:$0xff] %v5656_v9  ;;  %v5270_v9 = vsel %vm848_vm2, %v4959_v38, %v5142_v61  ;;  %v12127_v54 = vmax.f32 %v4888_v31, 0.0 }
 0x5bc   : > { %5926 = vst [vmem:[#allocation1 + $0x23] ss:$4 sm:$0xff] %v5657_v16  ;;  %v3913_v16 = vadd.f32 %v11802_v62, %v3897_v50  ;;  %v5145_v57 = vperm.slane %v5082_v45, 0  ;;  %v5268_v26 = vsel %vm848_vm2, %v4957_v49, %v5140_v56  ;;  %v4743_v35 = vadd.f32 %v13037_v33, %v4630_v12  ;;  %v4131_v45 = vpop.permute.xlu1 %4130  ;;  %v13041_v56 = vld [vmem:[#allocation33_spill] sm:$0xff]  ;;  %v9644_v12 = vld [vmem:[#allocation19] ss:$0 sm:$0xff] }
 0x5bd   : > { %v5917_v32 = vld.sshfl [vmem:[#allocation1] sm:$0xff pattern:$0x73625140]  ;;  %v5468_v61 = vrot.slane %v12127_v54, 1  ;;  %v5469_v24 = vrot.slane %v12127_v54, 2  ;;  %v5470_v50 = vrot.slane %v12127_v54, 3 }
 0x5be   : > { %6022 = vst.msk [vmem:[#allocation5 + $0x109] sm:$0xff] %vm584_vm15, %v5917_v32  ;;  %v12153_v48 = vmax.f32 %v4743_v35, 0.0  ;;  %v5530_v4 = vperm.slane %v12127_v54, 0  ;;  %v5471_v23 = vrot.slane %v12127_v54, 4  ;;  %v5473_v49 = vrot.slane %v12127_v54, 6 }
 0x5bf   : > { %5919 = vst [vmem:[#allocation1] ss:$4 sm:$0xff] %v5650_v27  ;;  %v4961_v27 = vrot.slane %v12089_v60, 6  ;;  %v4332_v32 = vpop.permute.xlu2 %4331  ;;  %v5273_v60 = vsel %vm848_vm2, %v4962_v28, %v5145_v57  ;;  %v5474_v57 = vrot.slane %v12127_v54, 7 }
 0x5c0   : > { %8851 = vmatmul.msk.f32.gmra.mxu3 %vm584_vm15, %v6055_v34  ;;  %8957 = vmatmul.msk.f32.gmra.mxu2 %vm584_vm15, %v6055_v34  ;;  %5920 = vst [vmem:[#allocation1 + $0x1] ss:$4 sm:$0xff] %v5651_v10  ;;  %v5267_v34 = vsel %vm848_vm2, %v4956_v30, %v5139_v37  ;;  %v4018_v10 = vadd.f32 %v13036_v3, %v3913_v16  ;;  %v5531_v37 = vperm.slane %v5468_v61, 0  ;;  %v5472_v16 = vrot.slane %v12127_v54, 5 }
 0x5c1   : > { %8887 = vmatmul.msk.f32.gmra.mxu0 %vm584_vm15, %v6332_v63  ;;  %5921 = vst [vmem:[#allocation1 + $0x2] ss:$4 sm:$0xff] %v5652_v47  ;;  %v5269_v47 = vsel %vm848_vm2, %v4958_v55, %v5141_v59  ;;  %v3760_v63 = vadd.f32 %v11802_v62, %v13038_v44  ;;  %v5272_v6 = vsel %vm848_vm2, %v4961_v27, %v5144_v17  ;;  %v12150_v62 = vpop.f32.mrf.mxu2  ;;  %v5348_v30 = vrot.slane %v12153_v48, 1  ;;  %v12165_v55 = vld [vmem:[#allocation20] ss:$0 sm:$0xff] }
 0x5c2   : > { %8923 = vmatmul.msk.f32.gmra.mxu1 %vm584_vm15, %v6610_v15  ;;  %5922 = vst [vmem:[#allocation1 + $0x3] ss:$4 sm:$0xff] %v5653_v7  ;;  %v4396_v7 = vpop.permute.xlu0 %4395  ;;  %v12138_v15 = vpop.f32.mrf.mxu0  ;;  %v4348_v38 = vadd.f32 %v4332_v32, %v4018_v10  ;;  %v5533_v59 = vperm.slane %v5470_v50, 0  ;;  %v5349_v17 = vrot.slane %v12153_v48, 2  ;;  %v5350_v3 = vrot.slane %v12153_v48, 3 }
 0x5c3   : > { %v5928_v19 = vld.sshfl [vmem:[#allocation1 + $0x20] sm:$0xff pattern:$0x73625140]  ;;  %v3873_v41 = vadd.f32 %v13039_v53, %v3760_v63  ;;  %v5351_v10 = vrot.slane %v12153_v48, 4  ;;  %v5534_v28 = vperm.slane %v5471_v23, 0  ;;  %v5659_v32 = vsel %vm848_vm2, %v5348_v30, %v5531_v37  ;;  %v6335_v53 = vld [vmem:[#allocation5 + $0xf1] sm:$0xff] }
 0x5c4   : > { %6025 = vst.msk [vmem:[#allocation5 + $0x129] sm:$0xff] %vm584_vm15, %v5928_v19  ;;  %v5532_v19 = vperm.slane %v5469_v24, 0  ;;  %v5352_v33 = vrot.slane %v12153_v48, 5  ;;  %v5537_v50 = vperm.slane %v5474_v57, 0 }
 0x5c5   : > { %5933 = vst [vmem:[#allocation1 + $0x20] ss:$4 sm:$0xff] %v5270_v9  ;;  %v13040_v9 = vld [vmem:[#allocation31_spill] sm:$0xff] }
 0x5c6   : > { %5934 = vst [vmem:[#allocation1 + $0x21] ss:$4 sm:$0xff] %v5271_v40  ;;  %v4107_v31 = vadd.f32 %v13040_v9, %v3873_v41  ;;  %v4501_v40 = vadd.f32 %v13041_v56, %v4348_v38  ;;  %v6613_v41 = vld [vmem:[#allocation5 + $0xf2] sm:$0xff]  ;;  %v5354_v9 = vrot.slane %v12153_v48, 7 }
 0x5c7   : > { %5935 = vst [vmem:[#allocation1 + $0x22] ss:$4 sm:$0xff] %v5272_v6  ;;  %v5536_v6 = vperm.slane %v5473_v49, 0 }
 0x5c8   : > { %8852 = vmatmul.msk.f32.gmra.mxu3 %vm584_vm15, %v6056_v36  ;;  %8958 = vmatmul.msk.f32.gmra.mxu2 %vm584_vm15, %v6056_v36  ;;  %v6334_v36 = vld [vmem:[#allocation5 + $0xe1] sm:$0xff]  ;;  %5936 = vst [vmem:[#allocation1 + $0x23] ss:$4 sm:$0xff] %v5273_v60  ;;  %v12177_v35 = vmax.f32 %v4501_v40, 0.0  ;;  %v5661_v60 = vsel %vm848_vm2, %v5350_v3, %v5533_v59  ;;  %v4308_v24 = vadd.f32 %v11600_v58, %v4107_v31 }
 0x5c9   : > { %8888 = vmatmul.msk.f32.gmra.mxu0 %vm584_vm15, %v6333_v1  ;;  %v5927_v39 = vld.sshfl [vmem:[#allocation1] sm:$0xff pattern:$0x73625140]  ;;  %v4412_v1 = vadd.f32 %v9644_v12, %v4396_v7  ;;  %v5535_v7 = vperm.slane %v5472_v16, 0  ;;  %v6059_v16 = vld [vmem:[#allocation5 + $0xf8] sm:$0xff]  ;;  %v5665_v59 = vsel %vm848_vm2, %v5354_v9, %v5537_v50 }
 0x5ca   : > { %8924 = vmatmul.msk.f32.gmra.mxu1 %vm584_vm15, %v6611_v11  ;;  %6024 = vst.msk [vmem:[#allocation5 + $0x121] sm:$0xff] %vm584_vm15, %v5927_v39  ;;  %v6058_v11 = vld [vmem:[#allocation5 + $0xf0] sm:$0xff]  ;;  %v5083_v58 = vrot.slane %v12177_v35, 1  ;;  %v12197_v30 = vmax.f32 %v4308_v24, 0.0  ;;  %v5084_v49 = vrot.slane %v12177_v35, 2  ;;  %v6614_v3 = vld [vmem:[#allocation5 + $0xfa] sm:$0xff] }
 0x5cb   : > { %5929 = vst [vmem:[#allocation1] ss:$4 sm:$0xff] %v5266_v20  ;;  %v5658_v20 = vsel %vm848_vm2, %v12153_v48, %v5530_v4  ;;  %v5353_v4 = vrot.slane %v12153_v48, 6  ;;  %v5663_v56 = vsel %vm848_vm2, %v5352_v33, %v5535_v7  ;;  %v13042_v33 = vld [vmem:[#allocation40_spill] sm:$0xff] }
 0x5cc   : > { %5930 = vst [vmem:[#allocation1 + $0x1] ss:$4 sm:$0xff] %v5267_v34  ;;  %v4147_v34 = vadd.f32 %v9644_v12, %v4131_v45  ;;  %v5662_v45 = vsel %vm848_vm2, %v5351_v10, %v5534_v28  ;;  %v4963_v28 = vrot.slane %v12197_v30, 1  ;;  %v6060_v24 = vld [vmem:[#allocation5 + $0x108] sm:$0xff]  ;;  %v4968_v9 = vrot.slane %v12197_v30, 6 }
 0x5cd   : > { %5931 = vst [vmem:[#allocation1 + $0x2] ss:$4 sm:$0xff] %v5268_v26  ;;  %v4525_v26 = vpop.permute.xlu2 %4524  ;;  %v5664_v31 = vsel %vm848_vm2, %v5353_v4, %v5536_v6  ;;  %v4965_v6 = vrot.slane %v12197_v30, 3 }
 0x5ce   : > { %5932 = vst [vmem:[#allocation1 + $0x3] ss:$4 sm:$0xff] %v5269_v47  ;;  %v4364_v47 = vpop.permute.xlu0 %4363  ;;  %v4541_v61 = vadd.f32 %v4525_v26, %v4412_v1  ;;  %v5085_v1 = vrot.slane %v12177_v35, 3  ;;  %v6336_v26 = vld [vmem:[#allocation5 + $0xf9] sm:$0xff] }
 0x5cf   : > { %v4380_v23 = vadd.f32 %v4364_v47, %v4147_v34  ;;  %v5086_v34 = vrot.slane %v12177_v35, 4  ;;  %v5088_v47 = vrot.slane %v12177_v35, 6 }
 0x5d0   : > { %8853 = vmatmul.msk.f32.gmra.mxu3 %vm584_vm15, %v6057_v42  ;;  %8959 = vmatmul.msk.f32.gmra.mxu2 %vm584_vm15, %v6057_v42  ;;  %v5660_v42 = vsel %vm848_vm2, %v5349_v17, %v5532_v19  ;;  %v5146_v17 = vperm.slane %v12177_v35, 0 }
 0x5d1   : > { %8889 = vmatmul.msk.f32.gmra.mxu0 %vm584_vm15, %v6334_v36  ;;  %v4768_v36 = vpop.permute.xlu1 %4767 }
 0x5d2   : > { %8925 = vmatmul.msk.f32.gmra.mxu1 %vm584_vm15, %v6612_v52  ;;  %v5938_v52 = vld.sshfl [vmem:[#allocation1 + $0x20] sm:$0xff pattern:$0x73625140]  ;;  %v4784_v40 = vadd.f32 %v4768_v36, %v4541_v61  ;;  %v5274_v61 = vsel %vm848_vm2, %v12197_v30, %v5146_v17  ;;  %v4966_v36 = vrot.slane %v12197_v30, 4 }
 0x5d3   : > { %6027 = vst.msk [vmem:[#allocation5 + $0x141] sm:$0xff] %vm584_vm15, %v5938_v52  ;;  %v4967_v52 = vrot.slane %v12197_v30, 5 }
 0x5d4   : > { %5943 = vst [vmem:[#allocation1 + $0x20] ss:$4 sm:$0xff] %v5662_v45 }
 0x5d5   : > { %v5937_v54 = vld.sshfl [vmem:[#allocation1] sm:$0xff pattern:$0x73625140]  ;;  %5944 = vst [vmem:[#allocation1 + $0x21] ss:$4 sm:$0xff] %v5663_v56  ;;  %v5152_v56 = vperm.slane %v5088_v47, 0 }
 0x5d6   : > { %v6477_v39 = vpop.f32.mrf.mxu0  ;;  %6026 = vst.msk [vmem:[#allocation5 + $0x139] sm:$0xff] %vm584_vm15, %v5937_v54  ;;  %v5149_v54 = vperm.slane %v5085_v1, 0  ;;  %v6337_v1 = vld [vmem:[#allocation5 + $0x109] sm:$0xff] }
 0x5d7   : > { %v6755_v27 = vpop.f32.mrf.mxu1  ;;  %5939 = vst [vmem:[#allocation1] ss:$4 sm:$0xff] %v5658_v20 }
 0x5d8   : > { %8854 = vmatmul.msk.f32.gmra.mxu3 %vm584_vm15, %v6058_v11  ;;  %8960 = vmatmul.msk.f32.gmra.mxu2 %vm584_vm15, %v6058_v11  ;;  %5940 = vst [vmem:[#allocation1 + $0x1] ss:$4 sm:$0xff] %v5659_v32  ;;  %v4631_v11 = vadd.f32 %v11990_v5, %v4380_v23  ;;  %v5087_v5 = vrot.slane %v12177_v35, 5  ;;  %v5148_v32 = vperm.slane %v5084_v49, 0 }
 0x5d9   : > { %8890 = vmatmul.msk.f32.gmra.mxu0 %vm584_vm15, %v6335_v53  ;;  %5941 = vst [vmem:[#allocation1 + $0x2] ss:$4 sm:$0xff] %v5660_v42  ;;  %v5150_v53 = vperm.slane %v5086_v34, 0  ;;  %v4969_v34 = vrot.slane %v12197_v30, 7 }
 0x5da   : > { %8926 = vmatmul.msk.f32.gmra.mxu1 %vm584_vm15, %v6613_v41  ;;  %5942 = vst [vmem:[#allocation1 + $0x3] ss:$4 sm:$0xff] %v5661_v60  ;;  %v4744_v7 = vadd.f32 %v13042_v33, %v4631_v11  ;;  %v5089_v60 = vrot.slane %v12177_v35, 7  ;;  %v5151_v4 = vperm.slane %v5087_v5, 0  ;;  %v6615_v11 = vld [vmem:[#allocation5 + $0x10a] sm:$0xff] }
 0x5db   : > { %v6199_v44 = vpop.f32.mrf.mxu3  ;;  %v12180_v63 = vpop.f32.mrf.mxu2  ;;  %5945 = vst [vmem:[#allocation1 + $0x22] ss:$4 sm:$0xff] %v5664_v31 }
 0x5dc   : > { %v6287_v38 = vadd.f32 %v12165_v55, %v6199_v44  ;;  %5946 = vst [vmem:[#allocation1 + $0x23] ss:$4 sm:$0xff] %v5665_v59  ;;  %v4964_v44 = vrot.slane %v12197_v30, 2  ;;  %v12238_v31 = vmax.f32 %v4744_v7, 0.0 }
 0x5de   : > { %v6565_v37 = vadd.f32 %v6477_v39, %v6287_v38  ;;  %v6480_v48 = vpop.f32.mrf.mxu0  ;;  %v5147_v39 = vperm.slane %v5083_v58, 0  ;;  %v5276_v35 = vsel %vm848_vm2, %v4964_v44, %v5148_v32  ;;  %v5277_v58 = vsel %vm848_vm2, %v4965_v6, %v5149_v54  ;;  %v6061_v54 = vld [vmem:[#allocation5 + $0x110] sm:$0xff] }
 0x5df   : > { %v6758_v12 = vpop.f32.mrf.mxu1  ;;  %v5356_v5 = vrot.slane %v12238_v31, 2  ;;  %v5357_v47 = vrot.slane %v12238_v31, 3 }
 0x5e0   : > { %v12194_v19 = vadd.f32 %v6755_v27, %v6565_v37  ;;  %8855 = vmatmul.msk.f32.gmra.mxu3 %vm584_vm15, %v6059_v16  ;;  %8961 = vmatmul.msk.f32.gmra.mxu2 %vm584_vm15, %v6059_v16  ;;  %v4889_v27 = vadd.f32 %v12071_v0, %v4784_v40  ;;  %v5275_v41 = vsel %vm848_vm2, %v4963_v28, %v5147_v39  ;;  %v8974_v37 = vld [vmem:[%s12988_s9 + $0x80] sm:$0xff]  ;;  %v5153_v40 = vperm.slane %v5089_v60, 0 }
 0x5e1   : > { %8891 = vmatmul.msk.f32.gmra.mxu0 %vm584_vm15, %v6336_v26  ;;  %v5947_v42 = vld.sshfl [vmem:[#allocation1] sm:$0xff pattern:$0x73625140]  ;;  %7297 = vmatpush.msra.mxu3 %v8974_v37  ;;  %v5279_v39 = vsel %vm848_vm2, %v4967_v52, %v5151_v4  ;;  %v5280_v26 = vsel %vm848_vm2, %v4968_v9, %v5152_v56  ;;  %v5359_v4 = vrot.slane %v12238_v31, 5  ;;  %v6338_v56 = vld [vmem:[#allocation5 + $0x111] sm:$0xff] }
 0x5e2   : > { %8927 = vmatmul.msk.f32.gmra.mxu1 %vm584_vm15, %v6614_v3  ;;  %6028 = vst.msk [vmem:[#allocation5 + $0x151] sm:$0xff] %vm584_vm15, %v5947_v42  ;;  %v12224_v38 = vmax.f32 %v4889_v27, 0.0  ;;  %v5281_v28 = vsel %vm848_vm2, %v4969_v34, %v5153_v40 }
 0x5e3   : > { %v6202_v57 = vpop.f32.mrf.mxu3  ;;  %v12206_v20 = vpop.f32.mrf.mxu2  ;;  %5949 = vst [vmem:[#allocation1] ss:$4 sm:$0xff] %v5274_v61  ;;  %v5948_v59 = vld.sshfl [vmem:[#allocation1 + $0x20] sm:$0xff pattern:$0x73625140] }
 0x5e4   : > { %v6288_v10 = vadd.f32 %v12165_v55, %v6202_v57  ;;  %5950 = vst [vmem:[#allocation1 + $0x1] ss:$4 sm:$0xff] %v5275_v41  ;;  %v5476_v27 = vrot.slane %v12224_v38, 2  ;;  %v5477_v3 = vrot.slane %v12224_v38, 3  ;;  %v5478_v30 = vrot.slane %v12224_v38, 4 }
 0x5e5   : > { %5951 = vst [vmem:[#allocation1 + $0x2] ss:$4 sm:$0xff] %v5276_v35  ;;  %v5479_v7 = vrot.slane %v12224_v38, 5  ;;  %v5538_v42 = vperm.slane %v12224_v38, 0  ;;  %v5481_v61 = vrot.slane %v12224_v38, 7  ;;  %v5358_v41 = vrot.slane %v12238_v31, 4 }
 0x5e6   : > { %v6566_v0 = vadd.f32 %v6480_v48, %v6288_v10  ;;  %v6483_v45 = vpop.f32.mrf.mxu0  ;;  %5952 = vst [vmem:[#allocation1 + $0x3] ss:$4 sm:$0xff] %v5277_v58  ;;  %v5278_v48 = vsel %vm848_vm2, %v4966_v36, %v5150_v53  ;;  %v5540_v44 = vperm.slane %v5476_v27, 0  ;;  %v5541_v53 = vperm.slane %v5477_v3, 0  ;;  %v6616_v58 = vld [vmem:[#allocation5 + $0x112] sm:$0xff] }
 0x5e7   : > { %v6761_v23 = vpop.f32.mrf.mxu1  ;;  %6029 = vst.msk [vmem:[#allocation5 + $0x159] sm:$0xff] %vm584_vm15, %v5948_v59  ;;  %v5542_v52 = vperm.slane %v5478_v30, 0  ;;  %v5666_v35 = vsel %vm848_vm2, %v12238_v31, %v5538_v42  ;;  %v5361_v59 = vrot.slane %v12238_v31, 7  ;;  %v6617_v30 = vld [vmem:[#allocation5 + $0x122] sm:$0xff] }
 0x5e8   : > { %v12226_v50 = vadd.f32 %v6758_v12, %v6566_v0  ;;  %8856 = vmatmul.msk.f32.gmra.mxu3 %vm584_vm15, %v6060_v24  ;;  %8962 = vmatmul.msk.f32.gmra.mxu2 %vm584_vm15, %v6060_v24  ;;  %v5475_v12 = vrot.slane %v12224_v38, 1  ;;  %5953 = vst [vmem:[#allocation1 + $0x20] ss:$4 sm:$0xff] %v5278_v48  ;;  %v5480_v0 = vrot.slane %v12224_v38, 6  ;;  %v5360_v38 = vrot.slane %v12238_v31, 6 }
 0x5e9   : > { %8892 = vmatmul.msk.f32.gmra.mxu0 %vm584_vm15, %v6337_v1  ;;  %5954 = vst [vmem:[#allocation1 + $0x21] ss:$4 sm:$0xff] %v5279_v39  ;;  %v5669_v9 = vsel %vm848_vm2, %v5357_v47, %v5541_v53  ;;  %v6062_v39 = vld [vmem:[#allocation5 + $0x120] sm:$0xff] }
 0x5ea   : > { %8928 = vmatmul.msk.f32.gmra.mxu1 %vm584_vm15, %v6615_v11  ;;  %5955 = vst [vmem:[#allocation1 + $0x22] ss:$4 sm:$0xff] %v5280_v26  ;;  %v5539_v32 = vperm.slane %v5475_v12, 0  ;;  %v5544_v48 = vperm.slane %v5480_v0, 0  ;;  %v5670_v12 = vsel %vm848_vm2, %v5358_v41, %v5542_v52  ;;  %v5545_v11 = vperm.slane %v5481_v61, 0  ;;  %v6064_v52 = vld [vmem:[#allocation5 + $0x138] sm:$0xff] }
 0x5eb   : > { %v6205_v16 = vpop.f32.mrf.mxu3  ;;  %v7033_v49 = vpop.f32.mrf.mxu2  ;;  %5956 = vst [vmem:[#allocation1 + $0x23] ss:$4 sm:$0xff] %v5281_v28  ;;  %v6339_v28 = vld [vmem:[#allocation5 + $0x121] sm:$0xff] }
 0x5ec   : > { %v6289_v17 = vadd.f32 %v12165_v55, %v6205_v16  ;;  %v12244_v57 = vadd.f32 %v7033_v49, %v12194_v19  ;;  %v5355_v19 = vrot.slane %v12238_v31, 1  ;;  %v5543_v49 = vperm.slane %v5479_v7, 0  ;;  %v6063_v7 = vld [vmem:[#allocation5 + $0x128] sm:$0xff] }
 0x5ed   : > { %v5957_v36 = vld.sshfl [vmem:[#allocation1] sm:$0xff pattern:$0x73625140]  ;;  %v5672_v34 = vsel %vm848_vm2, %v5360_v38, %v5544_v48  ;;  %v5673_v31 = vsel %vm848_vm2, %v5361_v59, %v5545_v11 }
 0x5ee   : > { %v6567_v10 = vadd.f32 %v6483_v45, %v6289_v17  ;;  %v6486_v6 = vpop.f32.mrf.mxu0  ;;  %v5667_v24 = vsel %vm848_vm2, %v5355_v19, %v5539_v32  ;;  %v5668_v45 = vsel %vm848_vm2, %v5356_v5, %v5540_v44  ;;  %6030 = vst.msk [vmem:[#allocation5 + $0x169] sm:$0xff] %vm584_vm15, %v5957_v36  ;;  %v5671_v17 = vsel %vm848_vm2, %v5359_v4, %v5543_v49  ;;  %v12309_v49 = vld [vmem:[#allocation5 + $0x140] sm:$0xff] }
 0x5ef   : > { %v6764_v60 = vpop.f32.mrf.mxu1  ;;  %5959 = vst [vmem:[#allocation1] ss:$4 sm:$0xff] %v5666_v35  ;;  %v6620_v11 = vld [vmem:[#allocation5 + $0x142] sm:$0xff]  ;;  %vm8540_vm2 = vcmask 23552  }
 0x5f0   : > { %v6845_v33 = vadd.f32 %v6761_v23, %v6567_v10  ;;  %8857 = vmatmul.msk.f32.gmra.mxu3 %vm584_vm15, %v6061_v54  ;;  %8963 = vmatmul.msk.f32.gmra.mxu2 %vm584_vm15, %v6061_v54  ;;  %5960 = vst [vmem:[#allocation1 + $0x1] ss:$4 sm:$0xff] %v5667_v24 }
 0x5f1   : > { %8893 = vmatmul.msk.f32.gmra.mxu0 %vm584_vm15, %v6338_v56  ;;  %5961 = vst [vmem:[#allocation1 + $0x2] ss:$4 sm:$0xff] %v5668_v45 }
 0x5f2   : > { %8929 = vmatmul.msk.f32.gmra.mxu1 %vm584_vm15, %v6616_v58  ;;  %5962 = vst [vmem:[#allocation1 + $0x3] ss:$4 sm:$0xff] %v5669_v9 }
 0x5f3   : > { %v6208_v23 = vpop.f32.mrf.mxu3  ;;  %v7036_v37 = vpop.f32.mrf.mxu2 }
 0x5f4   : > { %v6290_v40 = vadd.f32 %v12165_v55, %v6208_v23  ;;  %v12276_v16 = vadd.f32 %v7036_v37, %v12226_v50  ;;  %v5958_v50 = vld.sshfl [vmem:[#allocation1 + $0x20] sm:$0xff pattern:$0x73625140]  ;;  %v6341_v23 = vld [vmem:[#allocation5 + $0x139] sm:$0xff] }
 0x5f5   : > { %6031 = vst.msk [vmem:[#allocation5 + $0x171] sm:$0xff] %vm584_vm15, %v5958_v50  ;;  %v6619_v37 = vld [vmem:[#allocation5 + $0x13a] sm:$0xff] }
 0x5f6   : > { %v6568_v1 = vadd.f32 %v6486_v6, %v6290_v40  ;;  %v6489_v26 = vpop.f32.mrf.mxu0  ;;  %5963 = vst [vmem:[#allocation1 + $0x20] ss:$4 sm:$0xff] %v5670_v12 }
 0x5f7   : > { %v6767_v3 = vpop.f32.mrf.mxu1  ;;  %5964 = vst [vmem:[#allocation1 + $0x21] ss:$4 sm:$0xff] %v5671_v17 }
 0x5f8   : > { %v6846_v27 = vadd.f32 %v6764_v60, %v6568_v1  ;;  %8858 = vmatmul.msk.f32.gmra.mxu3 %vm584_vm15, %v6062_v39  ;;  %8964 = vmatmul.msk.f32.gmra.mxu2 %vm584_vm15, %v6062_v39  ;;  %5965 = vst [vmem:[#allocation1 + $0x22] ss:$4 sm:$0xff] %v5672_v34  ;;  %v6618_v60 = vld [vmem:[#allocation5 + $0x12a] sm:$0xff]  ;;  %v6342_v1 = vld [vmem:[#allocation5 + $0x141] sm:$0xff] }
 0x5f9   : > { %5966 = vst [vmem:[#allocation1 + $0x23] ss:$4 sm:$0xff] %v5673_v31  ;;  %8894 = vmatmul.msk.f32.gmra.mxu0 %vm584_vm15, %v6339_v28  ;;  %v5967_v54 = vld.sshfl [vmem:[#allocation1] sm:$0xff pattern:$0x73625140]  ;;  %v9049_v31 = vld [vmem:[%s12988_s9 + $0xd8] sm:$0xff] }
 0x5fa   : > { %8930 = vmatmul.msk.f32.gmra.mxu1 %vm584_vm15, %v6617_v30  ;;  %6032 = vst.msk [vmem:[#allocation5 + $0x181] sm:$0xff] %vm584_vm15, %v5967_v54  ;;  %v9047_v54 = vld [vmem:[%s12988_s9 + $0xc8] sm:$0xff] }
 0x5fb   : > { %v6211_v19 = vpop.f32.mrf.mxu3  ;;  %v7039_v10 = vpop.f32.mrf.mxu2  ;;  %7851 = vmatpush.msrb.mxu1 %v9049_v31 }
 0x5fc   : > { %v6291_v5 = vadd.f32 %v12165_v55, %v6211_v19  ;;  %v12289_v32 = vadd.f32 %v7039_v10, %v6845_v33  ;;  %v6340_v33 = vld [vmem:[#allocation5 + $0x129] sm:$0xff]  ;;  %v9048_v19 = vld [vmem:[%s12988_s9 + $0xd0] sm:$0xff] }
 0x5fd   : > { %v12332_v10 = vld [vmem:[#allocation5 + $0x150] sm:$0xff]  ;;  %7852 = vmatpush.msrb.mxu1 %v9048_v19 }
 0x5fe   : > { %v6569_v47 = vadd.f32 %v6489_v26, %v6291_v5  ;;  %v6492_v42 = vpop.f32.mrf.mxu0  ;;  %v6623_v31 = vld [vmem:[#allocation5 + $0x16a] sm:$0xff] }
 0x5ff   : > { %v6770_v44 = vpop.f32.mrf.mxu1  ;;  %7853 = vmatpush.msrb.mxu1 %v9047_v54 }
 0x600   : > { %v6847_v0 = vadd.f32 %v6767_v3, %v6569_v47  ;;  %8859 = vmatmul.msk.f32.gmra.mxu3 %vm584_vm15, %v6063_v7  ;;  %8965 = vmatmul.msk.f32.gmra.mxu2 %vm584_vm15, %v6063_v7  ;;  %v5968_v6 = vld.sshfl [vmem:[#allocation1 + $0x20] sm:$0xff pattern:$0x73625140]  ;;  %v9012_v3 = vld [vmem:[%s12988_s9 + $0xb0] sm:$0xff]  ;;  %v9011_v47 = vld [vmem:[%s12988_s9 + $0xa8] sm:$0xff] }
 0x601   : > { %6033 = vst.msk [vmem:[#allocation5 + $0x189] sm:$0xff] %vm584_vm15, %v5968_v6  ;;  %8895 = vmatmul.msk.f32.gmra.mxu0 %vm584_vm15, %v6340_v33  ;;  %v9010_v7 = vld [vmem:[%s12988_s9 + $0xa0] sm:$0xff] }
 0x602   : > { %8931 = vmatmul.msk.f32.gmra.mxu1 %vm584_vm15, %v6618_v60 }
 0x603   : > { %v6214_v61 = vpop.f32.mrf.mxu3  ;;  %v7042_v53 = vpop.f32.mrf.mxu2 }
 0x604   : > { %v6292_v41 = vadd.f32 %v12165_v55, %v6214_v61  ;;  %v12300_v24 = vadd.f32 %v7042_v53, %v6846_v27  ;;  %v9013_v27 = vld [vmem:[%s12988_s9 + $0xb8] sm:$0xff] }
 0x605   : > { %7572 = vmatpush.msrb.mxu0 %v9013_v27  ;;  %v6345_v27 = vld [vmem:[#allocation5 + $0x169] sm:$0xff] }
 0x606   : > { %v6570_v36 = vadd.f32 %v6492_v42, %v6292_v41  ;;  %v6495_v4 = vpop.f32.mrf.mxu0  ;;  %v6343_v42 = vld [vmem:[#allocation5 + $0x151] sm:$0xff] }
 0x607   : > { %v6773_v35 = vpop.f32.mrf.mxu1  ;;  %7573 = vmatpush.msrb.mxu0 %v9012_v3  ;;  %v12355_v41 = vld [vmem:[#allocation5 + $0x158] sm:$0xff] }
 0x608   : > { %8860 = vmatmul.msk.f32.gmra.mxu3 %vm584_vm15, %v6064_v52  ;;  %8966 = vmatmul.msk.f32.gmra.mxu2 %vm584_vm15, %v6064_v52  ;;  %v6848_v45 = vadd.f32 %v6770_v44, %v6570_v36  ;;  %v6621_v44 = vld [vmem:[#allocation5 + $0x152] sm:$0xff] }
 0x609   : > { %8896 = vmatmul.msk.f32.gmra.mxu0 %vm584_vm15, %v6341_v23 }
 0x60a   : > { %8932 = vmatmul.msk.f32.gmra.mxu1 %vm584_vm15, %v6619_v37  ;;  %7574 = vmatpush.msrb.mxu0 %v9011_v47 }
 0x60b   : > { %v6217_v38 = vpop.f32.mrf.mxu3  ;;  %v7045_v9 = vpop.f32.mrf.mxu2 }
 0x60c   : > { %v6293_v56 = vadd.f32 %v12165_v55, %v6217_v38  ;;  %v12307_v58 = vadd.f32 %v7045_v9, %v6847_v0  ;;  %v9046_v0 = vld [vmem:[%s12988_s9 + $0xc0] sm:$0xff]  ;;  %7575 = vmatpush.msrb.mxu0 %v9010_v7 }
 0x60d   : > { %7854 = vmatpush.msrb.mxu1 %v9046_v0  ;;  %v6346_v0 = vld [vmem:[#allocation5 + $0x171] sm:$0xff] }
 0x60e   : > { %v6571_v40 = vadd.f32 %v6495_v4, %v6293_v56  ;;  %v6498_v59 = vpop.f32.mrf.mxu0  ;;  %v9085_v56 = vld [vmem:[%s12988_s9 + $0xf8] sm:$0xff] }
 0x60f   : > { %v6776_v48 = vpop.f32.mrf.mxu1  ;;  %8129 = vmatpush.msrb.mxu2 %v9085_v56 }
 0x610   : > { %8861 = vmatmul.msk.f32.gmra.mxu3 %vm584_vm15, %v12309_v49  ;;  %8967 = vmatmul.msk.f32.gmra.mxu2 %vm584_vm15, %v12309_v49  ;;  %v6849_v12 = vadd.f32 %v6773_v35, %v6571_v40  ;;  %v6344_v35 = vld [vmem:[#allocation5 + $0x159] sm:$0xff] }
 0x611   : > { %8897 = vmatmul.msk.f32.gmra.mxu0 %vm584_vm15, %v6342_v1 }
 0x612   : > { %8933 = vmatmul.msk.f32.gmra.mxu1 %vm584_vm15, %v6620_v11 }
 0x613   : > { %v6220_v17 = vpop.f32.mrf.mxu3  ;;  %v7048_v50 = vpop.f32.mrf.mxu2 }
 0x614   : > { %v6294_v34 = vadd.f32 %v12165_v55, %v6220_v17  ;;  %v12318_v39 = vadd.f32 %v7048_v50, %v6848_v45  ;;  %v6622_v45 = vld [vmem:[#allocation5 + $0x15a] sm:$0xff]  ;;  %v9083_v17 = vld [vmem:[%s12988_s9 + $0xe8] sm:$0xff] }
 0x615   : > { %v9121_v50 = vld [vmem:[%s12988_s9 + $0x118] sm:$0xff] }
 0x616   : > { %v6572_v26 = vadd.f32 %v6498_v59, %v6294_v34  ;;  %v6501_v28 = vpop.f32.mrf.mxu0  ;;  %v9084_v59 = vld [vmem:[%s12988_s9 + $0xf0] sm:$0xff]  ;;  %8407 = vmatpush.msrb.mxu3 %v9121_v50  ;;  %v9082_v34 = vld [vmem:[%s12988_s9 + $0xe0] sm:$0xff] }
 0x617   : > { %v6779_v30 = vpop.f32.mrf.mxu1  ;;  %8130 = vmatpush.msrb.mxu2 %v9084_v59 }
 0x618   : > { %8862 = vmatmul.msk.f32.gmra.mxu3 %vm584_vm15, %v12332_v10  ;;  %8968 = vmatmul.msk.f32.gmra.mxu2 %vm584_vm15, %v12332_v10  ;;  %v6850_v5 = vadd.f32 %v6776_v48, %v6572_v26  ;;  %v12372_v48 = vld [vmem:[#allocation5 + $0x168] sm:$0xff] }
 0x619   : > { %8898 = vmatmul.msk.f32.gmra.mxu0 %vm584_vm15, %v6343_v42  ;;  %8131 = vmatpush.msrb.mxu2 %v9083_v17  ;;  %v6624_v42 = vld [vmem:[#allocation5 + $0x172] sm:$0xff] }
 0x61a   : > { %8934 = vmatmul.msk.f32.gmra.mxu1 %vm584_vm15, %v6621_v44 }
 0x61b   : > { %v6223_v6 = vpop.f32.mrf.mxu3  ;;  %v7051_v33 = vpop.f32.mrf.mxu2  ;;  %8132 = vmatpush.msrb.mxu2 %v9082_v34 }
 0x61c   : > { %v6295_v60 = vadd.f32 %v12165_v55, %v6223_v6  ;;  %v12353_v61 = vadd.f32 %v7051_v33, %v6849_v12 }
 0x61e   : > { %v6573_v53 = vadd.f32 %v6501_v28, %v6295_v60  ;;  %v6504_v52 = vpop.f32.mrf.mxu0 }
 0x61f   : > { %v6782_v4 = vpop.f32.mrf.mxu1 }
 0x620   : > { %8863 = vmatmul.msk.f32.gmra.mxu3 %vm584_vm15, %v12355_v41  ;;  %8969 = vmatmul.msk.f32.gmra.mxu2 %vm584_vm15, %v12355_v41  ;;  %v6851_v36 = vadd.f32 %v6779_v30, %v6573_v53 }
 0x621   : > { %8899 = vmatmul.msk.f32.gmra.mxu0 %vm584_vm15, %v6344_v35 }
 0x622   : > { %8935 = vmatmul.msk.f32.gmra.mxu1 %vm584_vm15, %v6622_v45 }
 0x623   : > { %v6226_v23 = vpop.f32.mrf.mxu3  ;;  %v7054_v37 = vpop.f32.mrf.mxu2 }
 0x624   : > { %v6296_v38 = vadd.f32 %v12165_v55, %v6226_v23  ;;  %v12364_v9 = vadd.f32 %v7054_v37, %v6850_v5  ;;  %v12392_v5 = vld [vmem:[#allocation5 + $0x170] sm:$0xff]  ;;  %v7427_v23 = vld [vmem:[#allocation5 + $0x1a] sm:$0xff] }
 0x625   : > { %v7706_v37 = vld [vmem:[#allocation5 + $0x30] sm:$0xff] }
 0x626   : > { %v6574_v40 = vadd.f32 %v6504_v52, %v6296_v38  ;;  %v6507_v1 = vpop.f32.mrf.mxu0  ;;  %v7149_v52 = vld [vmem:[#allocation5 + $0x19] sm:$0xff] }
 0x627   : > { %v6785_v11 = vpop.f32.mrf.mxu1 }
 0x628   : > { %8864 = vmatmul.msk.f32.gmra.mxu3 %vm584_vm15, %v12372_v48  ;;  %8970 = vmatmul.msk.f32.gmra.mxu2 %vm584_vm15, %v12372_v48  ;;  %v6852_v12 = vadd.f32 %v6782_v4, %v6574_v40 }
 0x629   : > { %8900 = vmatmul.msk.f32.gmra.mxu0 %vm584_vm15, %v6345_v27  ;;  %v7428_v27 = vld [vmem:[#allocation5 + $0x22] sm:$0xff] }
 0x62a   : > { %8936 = vmatmul.msk.f32.gmra.mxu1 %vm584_vm15, %v6623_v31  ;;  %v7707_v31 = vld [vmem:[#allocation5 + $0x38] sm:$0xff] }
 0x62b   : > { %v6229_v26 = vpop.f32.mrf.mxu3  ;;  %v7057_v3 = vpop.f32.mrf.mxu2 }
 0x62c   : > { %v6297_v19 = vadd.f32 %v12165_v55, %v6229_v26  ;;  %v12390_v28 = vadd.f32 %v7057_v3, %v6851_v36  ;;  %v12403_v36 = vld [vmem:[#allocation5 + $0x180] sm:$0xff] }
 0x62e   : > { %v6575_v30 = vadd.f32 %v6507_v1, %v6297_v19  ;;  %v6510_v54 = vpop.f32.mrf.mxu0  ;;  %v12413_v1 = vld [vmem:[#allocation5 + $0x188] sm:$0xff] }
 0x62f   : > { %v6788_v7 = vpop.f32.mrf.mxu1 }
 0x630   : > { %8865 = vmatmul.msk.f32.gmra.mxu3 %vm584_vm15, %v12392_v5  ;;  %8971 = vmatmul.msk.f32.gmra.mxu2 %vm584_vm15, %v12392_v5  ;;  %v6853_v47 = vadd.f32 %v6785_v11, %v6575_v30  ;;  %v7150_v11 = vld [vmem:[#allocation5 + $0x21] sm:$0xff] }
 0x631   : > { %8901 = vmatmul.msk.f32.gmra.mxu0 %vm584_vm15, %v6346_v0 }
 0x632   : > { %8937 = vmatmul.msk.f32.gmra.mxu1 %vm584_vm15, %v6624_v42 }
 0x633   : > { %v6232_v44 = vpop.f32.mrf.mxu3  ;;  %v7060_v6 = vpop.f32.mrf.mxu2 }
 0x634   : > { %v6298_v33 = vadd.f32 %v12165_v55, %v6232_v44  ;;  %v12401_v60 = vadd.f32 %v7060_v6, %v6852_v12  ;;  %v12425_v44 = vld [vmem:[#allocation5 + $0x32] sm:$0xff]  ;;  %v7708_v6 = vld [vmem:[#allocation5 + $0x48] sm:$0xff] }
 0x636   : > { %v6576_v53 = vadd.f32 %v6510_v54, %v6298_v33  ;;  %v6513_v35 = vpop.f32.mrf.mxu0  ;;  %v7151_v54 = vld [vmem:[#allocation5 + $0x31] sm:$0xff] }
 0x637   : > { %v6791_v45 = vpop.f32.mrf.mxu1 }
 0x638   : > { %8972 = vmatmul.msk.f32.gmra.mxu2 %vm584_vm15, %v12403_v36  ;;  %8978 = vmatmul.msk.f32.vlgmr.msra.gmra.mxu3 %vm584_vm15, %v7149_v52  ;;  %v6854_v4 = vadd.f32 %v6788_v7, %v6576_v53 }
 0x639   : > { %9014 = vmatmul.msk.f32.vlgmr.msrb.gmra.mxu0 %vm584_vm15, %v7427_v23 }
 0x63a   : > { %9050 = vmatmul.msk.f32.vlgmr.msrb.gmra.mxu1 %vm584_vm15, %v7706_v37 }
 0x63b   : > { %v6235_v38 = vpop.f32.mrf.mxu3  ;;  %v7063_v56 = vpop.f32.mrf.mxu2 }
 0x63c   : > { %v6299_v40 = vadd.f32 %v12165_v55, %v6235_v38  ;;  %v12411_v59 = vadd.f32 %v7063_v56, %v6853_v47  ;;  %v12435_v56 = vld [vmem:[#allocation5 + $0x3a] sm:$0xff] }
 0x63e   : > { %v6577_v12 = vadd.f32 %v6513_v35, %v6299_v40  ;;  %v6516_v50 = vpop.f32.mrf.mxu0  ;;  %v7709_v40 = vld [vmem:[#allocation5 + $0x50] sm:$0xff] }
 0x63f   : > { %v6794_v34 = vpop.f32.mrf.mxu1 }
 0x640   : > { %8973 = vmatmul.msk.f32.gmra.mxu2 %vm584_vm15, %v12413_v1  ;;  %8979 = vmatmul.msk.f32.gmra.mxu3 %vm584_vm15, %v7150_v11  ;;  %v6855_v17 = vadd.f32 %v6791_v45, %v6577_v12  ;;  %v7152_v45 = vld [vmem:[#allocation5 + $0x39] sm:$0xff] }
 0x641   : > { %9015 = vmatmul.msk.f32.gmra.mxu0 %vm584_vm15, %v7428_v27  ;;  %v7153_v27 = vld [vmem:[#allocation5 + $0x49] sm:$0xff] }
 0x642   : > { %9051 = vmatmul.msk.f32.gmra.mxu1 %vm584_vm15, %v7707_v31 }
 0x643   : > { %v6238_v26 = vpop.f32.mrf.mxu3  ;;  %v7066_v3 = vpop.f32.mrf.mxu2 }
 0x644   : > { %v6300_v19 = vadd.f32 %v12165_v55, %v6238_v26  ;;  %v12421_v30 = vadd.f32 %v7066_v3, %v6854_v4 }
 0x646   : > { %v6578_v47 = vadd.f32 %v6516_v50, %v6300_v19  ;;  %v6519_v0 = vpop.f32.mrf.mxu0  ;;  %v12445_v19 = vld [vmem:[#allocation5 + $0x4a] sm:$0xff] }
 0x647   : > { %v6797_v42 = vpop.f32.mrf.mxu1 }
 0x648   : > { %8980 = vmatmul.msk.f32.gmra.mxu3 %vm584_vm15, %v7151_v54  ;;  %9086 = vmatmul.msk.f32.vlgmr.msrb.gmra.mxu2 %vm584_vm15, %v7151_v54  ;;  %v6856_v7 = vadd.f32 %v6794_v34, %v6578_v47  ;;  %v7710_v47 = vld [vmem:[#allocation5 + $0x60] sm:$0xff] }
 0x649   : > { %9016 = vmatmul.msk.f32.gmra.mxu0 %vm584_vm15, %v12425_v44 }
 0x64a   : > { %9052 = vmatmul.msk.f32.gmra.mxu1 %vm584_vm15, %v7708_v6 }
 0x64b   : > { %v6241_v33 = vpop.f32.mrf.mxu3  ;;  %v7069_v53 = vpop.f32.mrf.mxu2 }
 0x64c   : > { %v6301_v52 = vadd.f32 %v12165_v55, %v6241_v33  ;;  %v12431_v4 = vadd.f32 %v7069_v53, %v6855_v17  ;;  %v7154_v33 = vld [vmem:[#allocation5 + $0x51] sm:$0xff] }
 0x64e   : > { %v6579_v35 = vadd.f32 %v6519_v0, %v6301_v52  ;;  %v6522_v37 = vpop.f32.mrf.mxu0 }
 0x64f   : > { %v6800_v38 = vpop.f32.mrf.mxu1 }
 0x650   : > { %8981 = vmatmul.msk.f32.gmra.mxu3 %vm584_vm15, %v7152_v45  ;;  %9087 = vmatmul.msk.f32.gmra.mxu2 %vm584_vm15, %v7152_v45  ;;  %v6857_v23 = vadd.f32 %v6797_v42, %v6579_v35  ;;  %v12455_v45 = vld [vmem:[#allocation5 + $0x52] sm:$0xff] }
 0x651   : > { %9017 = vmatmul.msk.f32.gmra.mxu0 %vm584_vm15, %v12435_v56 }
 0x652   : > { %9053 = vmatmul.msk.f32.gmra.mxu1 %vm584_vm15, %v7709_v40 }
 0x653   : > { %v6244_v12 = vpop.f32.mrf.mxu3  ;;  %v7072_v11 = vpop.f32.mrf.mxu2 }
 0x654   : > { %v6302_v17 = vadd.f32 %v12165_v55, %v6244_v12  ;;  %v12441_v50 = vadd.f32 %v7072_v11, %v6856_v7 }
 0x656   : > { %v6580_v34 = vadd.f32 %v6522_v37, %v6302_v17  ;;  %v6525_v26 = vpop.f32.mrf.mxu0  ;;  %v7711_v37 = vld [vmem:[#allocation5 + $0x68] sm:$0xff] }
 0x657   : > { %v6803_v3 = vpop.f32.mrf.mxu1  ;;  %v7155_v17 = vld [vmem:[#allocation5 + $0x61] sm:$0xff] }
 0x658   : > { %8982 = vmatmul.msk.f32.gmra.mxu3 %vm584_vm15, %v7153_v27  ;;  %9088 = vmatmul.msk.f32.gmra.mxu2 %vm584_vm15, %v7153_v27  ;;  %v6858_v31 = vadd.f32 %v6800_v38, %v6580_v34 }
 0x659   : > { %9018 = vmatmul.msk.f32.gmra.mxu0 %vm584_vm15, %v12445_v19 }
 0x65a   : > { %9054 = vmatmul.msk.f32.gmra.mxu1 %vm584_vm15, %v7710_v47  ;;  %v12468_v47 = vld [vmem:[#allocation5 + $0x62] sm:$0xff] }
 0x65b   : > { %v6247_v54 = vpop.f32.mrf.mxu3  ;;  %v7075_v0 = vpop.f32.mrf.mxu2 }
 0x65c   : > { %v6303_v7 = vadd.f32 %v12165_v55, %v6247_v54  ;;  %v12451_v42 = vadd.f32 %v7075_v0, %v6857_v23  ;;  %v7712_v54 = vld [vmem:[#allocation5 + $0x78] sm:$0xff] }
 0x65e   : > { %v6581_v6 = vadd.f32 %v6525_v26, %v6303_v7  ;;  %v6528_v52 = vpop.f32.mrf.mxu0 }
 0x65f   : > { %v6806_v35 = vpop.f32.mrf.mxu1 }
 0x660   : > { %8983 = vmatmul.msk.f32.gmra.mxu3 %vm584_vm15, %v7154_v33  ;;  %9089 = vmatmul.msk.f32.gmra.mxu2 %vm584_vm15, %v7154_v33  ;;  %v6859_v53 = vadd.f32 %v6803_v3, %v6581_v6  ;;  %v9120_v3 = vld [vmem:[%s12988_s9 + $0x110] sm:$0xff] }
 0x661   : > { %9019 = vmatmul.msk.f32.gmra.mxu0 %vm584_vm15, %v12455_v45  ;;  %8408 = vmatpush.msrb.mxu3 %v9120_v3 }
 0x662   : > { %9055 = vmatmul.msk.f32.gmra.mxu1 %vm584_vm15, %v7711_v37 }
 0x663   : > { %v6250_v38 = vpop.f32.mrf.mxu3  ;;  %v7078_v40 = vpop.f32.mrf.mxu2 }
 0x664   : > { %v6304_v23 = vadd.f32 %v12165_v55, %v6250_v38  ;;  %v12461_v12 = vadd.f32 %v7078_v40, %v6858_v31  ;;  %v12478_v40 = vld [vmem:[#allocation5 + $0x6a] sm:$0xff] }
 0x665   : > { %13043 = vst [vmem:[#allocation37_spill] sm:$0xff] %v12478_v40 }
 0x666   : > { %v6582_v11 = vadd.f32 %v6528_v52, %v6304_v23  ;;  %v6531_v27 = vpop.f32.mrf.mxu0  ;;  %v7156_v52 = vld [vmem:[#allocation5 + $0x69] sm:$0xff]  ;;  %v7713_v23 = vld [vmem:[#allocation5 + $0x80] sm:$0xff] }
 0x667   : > { %v6809_v26 = vpop.f32.mrf.mxu1 }
 0x668   : > { %8984 = vmatmul.msk.f32.gmra.mxu3 %vm584_vm15, %v7155_v17  ;;  %9090 = vmatmul.msk.f32.gmra.mxu2 %vm584_vm15, %v7155_v17  ;;  %v6860_v34 = vadd.f32 %v6806_v35, %v6582_v11 }
 0x669   : > { %9020 = vmatmul.msk.f32.gmra.mxu0 %vm584_vm15, %v12468_v47 }
 0x66a   : > { %9056 = vmatmul.msk.f32.gmra.mxu1 %vm584_vm15, %v7712_v54  ;;  %v7157_v54 = vld [vmem:[#allocation5 + $0x79] sm:$0xff] }
 0x66b   : > { %v6253_v0 = vpop.f32.mrf.mxu3  ;;  %v7081_v31 = vpop.f32.mrf.mxu2 }
 0x66c   : > { %v6305_v7 = vadd.f32 %v12165_v55, %v6253_v0  ;;  %v12474_v6 = vadd.f32 %v7081_v31, %v6859_v53 }
 0x66e   : > { %v6583_v33 = vadd.f32 %v6531_v27, %v6305_v7  ;;  %v6534_v37 = vpop.f32.mrf.mxu0  ;;  %v12488_v7 = vld [vmem:[#allocation5 + $0x7a] sm:$0xff] }
 0x66f   : > { %v6812_v38 = vpop.f32.mrf.mxu1  ;;  %13045 = vst [vmem:[#allocation34_spill] sm:$0xff] %v12488_v7 }
 0x670   : > { %8985 = vmatmul.msk.f32.gmra.mxu3 %vm584_vm15, %v7156_v52  ;;  %9091 = vmatmul.msk.f32.gmra.mxu2 %vm584_vm15, %v7156_v52  ;;  %v6861_v35 = vadd.f32 %v6809_v26, %v6583_v33  ;;  %v7714_v33 = vld [vmem:[#allocation5 + $0x90] sm:$0xff] }
 0x671   : > { %9021 = vmatmul.msk.f32.gmra.mxu0 %vm584_vm15, %v12478_v40 }
 0x672   : > { %9057 = vmatmul.msk.f32.gmra.mxu1 %vm584_vm15, %v7713_v23 }
 0x673   : > { %v6256_v11 = vpop.f32.mrf.mxu3  ;;  %v7084_v17 = vpop.f32.mrf.mxu2 }
 0x674   : > { %v6306_v53 = vadd.f32 %v12165_v55, %v6256_v11  ;;  %v12484_v27 = vadd.f32 %v7084_v17, %v6860_v34  ;;  %v7158_v11 = vld [vmem:[#allocation5 + $0x81] sm:$0xff] }
 0x676   : > { %13044 = vst [vmem:[#allocation28_spill] sm:$0xff] %v12484_v27  ;;  %v6584_v3 = vadd.f32 %v6534_v37, %v6306_v53  ;;  %v6537_v0 = vpop.f32.mrf.mxu0 }
 0x677   : > { %v6815_v31 = vpop.f32.mrf.mxu1 }
 0x678   : > { %8986 = vmatmul.msk.f32.gmra.mxu3 %vm584_vm15, %v7157_v54  ;;  %9092 = vmatmul.msk.f32.gmra.mxu2 %vm584_vm15, %v7157_v54  ;;  %v6862_v26 = vadd.f32 %v6812_v38, %v6584_v3  ;;  %v12498_v3 = vld [vmem:[#allocation5 + $0x82] sm:$0xff]  ;;  %v7715_v54 = vld [vmem:[#allocation5 + $0x98] sm:$0xff] }
 0x679   : > { %9022 = vmatmul.msk.f32.gmra.mxu0 %vm584_vm15, %v12488_v7  ;;  %13047 = vst [vmem:[#allocation29_spill] sm:$0xff] %v12498_v3 }
 0x67a   : > { %9058 = vmatmul.msk.f32.gmra.mxu1 %vm584_vm15, %v7714_v33  ;;  %v7159_v33 = vld [vmem:[#allocation5 + $0x91] sm:$0xff] }
 0x67b   : > { %v6259_v52 = vpop.f32.mrf.mxu3  ;;  %v7087_v40 = vpop.f32.mrf.mxu2 }
 0x67c   : > { %v6307_v34 = vadd.f32 %v12165_v55, %v6259_v52  ;;  %v12494_v37 = vadd.f32 %v7087_v40, %v6861_v35 }
 0x67e   : > { %13046 = vst [vmem:[#allocation32_spill] sm:$0xff] %v12494_v37  ;;  %v6585_v23 = vadd.f32 %v6537_v0, %v6307_v34  ;;  %v6540_v17 = vpop.f32.mrf.mxu0 }
 0x67f   : > { %v6818_v53 = vpop.f32.mrf.mxu1 }
 0x680   : > { %8987 = vmatmul.msk.f32.gmra.mxu3 %vm584_vm15, %v7158_v11  ;;  %9093 = vmatmul.msk.f32.gmra.mxu2 %vm584_vm15, %v7158_v11  ;;  %v6863_v38 = vadd.f32 %v6815_v31, %v6585_v23  ;;  %v12508_v23 = vld [vmem:[#allocation5 + $0x92] sm:$0xff]  ;;  %v7716_v11 = vld [vmem:[#allocation5 + $0xa8] sm:$0xff] }
 0x681   : > { %9023 = vmatmul.msk.f32.gmra.mxu0 %vm584_vm15, %v12498_v3  ;;  %13049 = vst [vmem:[#allocation38_spill] sm:$0xff] %v12508_v23 }
 0x682   : > { %9059 = vmatmul.msk.f32.gmra.mxu1 %vm584_vm15, %v7715_v54 }
 0x683   : > { %v6262_v27 = vpop.f32.mrf.mxu3  ;;  %v7090_v7 = vpop.f32.mrf.mxu2 }
 0x684   : > { %v6308_v35 = vadd.f32 %v12165_v55, %v6262_v27  ;;  %v12504_v40 = vadd.f32 %v7090_v7, %v6862_v26 }
 0x686   : > { %13048 = vst [vmem:[#allocation36_spill] sm:$0xff] %v12504_v40  ;;  %v6586_v0 = vadd.f32 %v6540_v17, %v6308_v35  ;;  %v6543_v52 = vpop.f32.mrf.mxu0  ;;  %v7160_v17 = vld [vmem:[#allocation5 + $0x99] sm:$0xff] }
 0x687   : > { %v6821_v34 = vpop.f32.mrf.mxu1 }
 0x688   : > { %8988 = vmatmul.msk.f32.gmra.mxu3 %vm584_vm15, %v7159_v33  ;;  %9094 = vmatmul.msk.f32.gmra.mxu2 %vm584_vm15, %v7159_v33  ;;  %v6864_v31 = vadd.f32 %v6818_v53, %v6586_v0  ;;  %v12518_v0 = vld [vmem:[#allocation5 + $0x9a] sm:$0xff]  ;;  %v7717_v33 = vld [vmem:[#allocation5 + $0xb0] sm:$0xff] }
 0x689   : > { %9024 = vmatmul.msk.f32.gmra.mxu0 %vm584_vm15, %v12508_v23  ;;  %13051 = vst [vmem:[#allocation30_spill] sm:$0xff] %v12518_v0 }
 0x68a   : > { %9060 = vmatmul.msk.f32.gmra.mxu1 %vm584_vm15, %v7716_v11 }
 0x68b   : > { %v6265_v37 = vpop.f32.mrf.mxu3  ;;  %v7093_v3 = vpop.f32.mrf.mxu2 }
 0x68c   : > { %v6309_v27 = vadd.f32 %v12165_v55, %v6265_v37  ;;  %v12514_v26 = vadd.f32 %v7093_v3, %v6863_v38  ;;  %v12523_v55 = vld [vmem:[#allocation20] ss:$0 sm:$0xff] }
 0x68e   : > { %13050 = vst [vmem:[#allocation39_spill] sm:$0xff] %v12514_v26  ;;  %v6587_v7 = vadd.f32 %v6543_v52, %v6309_v27  ;;  %v6546_v54 = vpop.f32.mrf.mxu0  ;;  %v7161_v52 = vld [vmem:[#allocation5 + $0xa9] sm:$0xff] }
 0x68f   : > { %v6824_v35 = vpop.f32.mrf.mxu1 }
 0x690   : > { %8989 = vmatmul.msk.f32.gmra.mxu3 %vm584_vm15, %v7160_v17  ;;  %9095 = vmatmul.msk.f32.gmra.mxu2 %vm584_vm15, %v7160_v17  ;;  %v6865_v53 = vadd.f32 %v6821_v34, %v6587_v7  ;;  %v12530_v7 = vld [vmem:[#allocation5 + $0xaa] sm:$0xff]  ;;  %v7718_v17 = vld [vmem:[#allocation5 + $0xc0] sm:$0xff] }
 0x691   : > { %9025 = vmatmul.msk.f32.gmra.mxu0 %vm584_vm15, %v12518_v0  ;;  %13053 = vst [vmem:[#allocation31_spill] sm:$0xff] %v12530_v7 }
 0x692   : > { %9061 = vmatmul.msk.f32.gmra.mxu1 %vm584_vm15, %v7717_v33 }
 0x693   : > { %v6268_v40 = vpop.f32.mrf.mxu3  ;;  %v7096_v23 = vpop.f32.mrf.mxu2 }
 0x694   : > { %v6310_v37 = vadd.f32 %v12523_v55, %v6268_v40  ;;  %v12526_v38 = vadd.f32 %v7096_v23, %v6864_v31 }
 0x696   : > { %13052 = vst [vmem:[#allocation35_spill] sm:$0xff] %v12526_v38  ;;  %v6588_v3 = vadd.f32 %v6546_v54, %v6310_v37  ;;  %v6549_v11 = vpop.f32.mrf.mxu0  ;;  %v7162_v54 = vld [vmem:[#allocation5 + $0xb1] sm:$0xff]  ;;  %v7719_v38 = vld [vmem:[#allocation5 + $0xc8] sm:$0xff] }
 0x697   : > { %v6827_v27 = vpop.f32.mrf.mxu1 }
 0x698   : > { %8990 = vmatmul.msk.f32.gmra.mxu3 %vm584_vm15, %v7161_v52  ;;  %9096 = vmatmul.msk.f32.gmra.mxu2 %vm584_vm15, %v7161_v52  ;;  %v6866_v34 = vadd.f32 %v6824_v35, %v6588_v3  ;;  %v12540_v52 = vld [vmem:[#allocation5 + $0xb2] sm:$0xff] }
 0x699   : > { %9026 = vmatmul.msk.f32.gmra.mxu0 %vm584_vm15, %v12530_v7  ;;  %13054 = vst [vmem:[#allocation33_spill] sm:$0xff] %v12540_v52 }
 0x69a   : > { %9062 = vmatmul.msk.f32.gmra.mxu1 %vm584_vm15, %v7718_v17  ;;  %v7163_v17 = vld [vmem:[#allocation5 + $0xc1] sm:$0xff] }
 0x69b   : > { %v6271_v0 = vpop.f32.mrf.mxu3  ;;  %v7099_v33 = vpop.f32.mrf.mxu2 }
 0x69c   : > { %v6311_v40 = vadd.f32 %v12523_v55, %v6271_v0  ;;  %v12536_v31 = vadd.f32 %v7099_v33, %v6865_v53 }
 0x69e   : > { %v6589_v23 = vadd.f32 %v6549_v11, %v6311_v40  ;;  %v6552_v37 = vpop.f32.mrf.mxu0 }
 0x69f   : > { %v6830_v3 = vpop.f32.mrf.mxu1 }
 0x6a0   : > { %8991 = vmatmul.msk.f32.gmra.mxu3 %vm584_vm15, %v7162_v54  ;;  %9097 = vmatmul.msk.f32.gmra.mxu2 %vm584_vm15, %v7162_v54  ;;  %v6867_v35 = vadd.f32 %v6827_v27, %v6589_v23  ;;  %v9119_v23 = vld [vmem:[%s12988_s9 + $0x108] sm:$0xff]  ;;  %v12553_v54 = vld [vmem:[#allocation5 + $0xc2] sm:$0xff] }
 0x6a1   : > { %9027 = vmatmul.msk.f32.gmra.mxu0 %vm584_vm15, %v12540_v52  ;;  %8409 = vmatpush.msrb.mxu3 %v9119_v23  ;;  %13056 = vst [vmem:[#allocation41_spill] sm:$0xff] %v12553_v54  ;;  %v12566_v52 = vld [vmem:[#allocation5 + $0xca] sm:$0xff] }
 0x6a2   : > { %9063 = vmatmul.msk.f32.gmra.mxu1 %vm584_vm15, %v7719_v38  ;;  %v7720_v38 = vld [vmem:[#allocation5 + $0xd8] sm:$0xff] }
 0x6a3   : > { %v6274_v26 = vpop.f32.mrf.mxu3  ;;  %v7102_v7 = vpop.f32.mrf.mxu2 }
 0x6a4   : > { %v6312_v53 = vadd.f32 %v12523_v55, %v6274_v26  ;;  %v12546_v0 = vadd.f32 %v7102_v7, %v6866_v34 }
 0x6a6   : > { %13055 = vst [vmem:[#allocation40_spill] sm:$0xff] %v12546_v0  ;;  %v6590_v11 = vadd.f32 %v6552_v37, %v6312_v53  ;;  %v6555_v33 = vpop.f32.mrf.mxu0 }
 0x6a7   : > { %v6833_v40 = vpop.f32.mrf.mxu1 }
 0x6a8   : > { %8992 = vmatmul.msk.f32.gmra.mxu3 %vm584_vm15, %v7163_v17  ;;  %9098 = vmatmul.msk.f32.gmra.mxu2 %vm584_vm15, %v7163_v17  ;;  %v6868_v27 = vadd.f32 %v6830_v3, %v6590_v11  ;;  %v6283_v3 = vadd.f32 %v12523_v55, %v12029_v14  ;;  %v7164_v11 = vld [vmem:[#allocation5 + $0xc9] sm:$0xff] }
 0x6a9   : > { %9028 = vmatmul.msk.f32.gmra.mxu0 %vm584_vm15, %v12553_v54 }
 0x6aa   : > { %9064 = vmatmul.msk.f32.gmra.mxu1 %vm584_vm15, %v7720_v38  ;;  %v6561_v54 = vadd.f32 %v12018_v43, %v6283_v3  ;;  %v7721_v38 = vld [vmem:[#allocation5 + $0xe0] sm:$0xff] }
 0x6ab   : > { %v6277_v26 = vpop.f32.mrf.mxu3  ;;  %v7105_v34 = vpop.f32.mrf.mxu2 }
 0x6ac   : > { %v6313_v7 = vadd.f32 %v12523_v55, %v6277_v26  ;;  %v12559_v37 = vadd.f32 %v7105_v34, %v6867_v35  ;;  %v6839_v34 = vadd.f32 %v12020_v25, %v6561_v54 }
 0x6ae   : > { %v6591_v53 = vadd.f32 %v6555_v33, %v6313_v7  ;;  %v6558_v23 = vpop.f32.mrf.mxu0  ;;  %v7165_v7 = vld [vmem:[#allocation5 + $0xd9] sm:$0xff] }
 0x6af   : > { %v6836_v0 = vpop.f32.mrf.mxu1 }
 0x6b0   : > { %8993 = vmatmul.msk.f32.gmra.mxu3 %vm584_vm15, %v7164_v11  ;;  %9099 = vmatmul.msk.f32.gmra.mxu2 %vm584_vm15, %v7164_v11  ;;  %v6869_v17 = vadd.f32 %v6833_v40, %v6591_v53  ;;  %v6284_v40 = vadd.f32 %v12523_v55, %v12073_v21 }
 0x6b1   : > { %9029 = vmatmul.msk.f32.gmra.mxu0 %vm584_vm15, %v12566_v52 }
 0x6b2   : > { %9065 = vmatmul.msk.f32.gmra.mxu1 %vm584_vm15, %v7721_v38  ;;  %v6562_v38 = vadd.f32 %v12060_v13, %v6284_v40  ;;  %v6285_v13 = vadd.f32 %v12523_v55, %v12104_v46 }
 0x6b3   : > { %v6280_v26 = vpop.f32.mrf.mxu3  ;;  %v7108_v35 = vpop.f32.mrf.mxu2 }
 0x6b4   : > { %v6314_v14 = vadd.f32 %v12523_v55, %v6280_v26  ;;  %v12572_v33 = vadd.f32 %v7108_v35, %v6868_v27  ;;  %v7117_v26 = vadd.f32 %v12106_v8, %v6839_v34  ;;  %v12581_v27 = vld [vmem:[#allocation5 + $0xda] sm:$0xff]  ;;  %v7722_v35 = vld [vmem:[#allocation5 + $0xf0] sm:$0xff] }
 0x6b6   : > { %13057 = vst [vmem:[#allocation42_spill] sm:$0xff] %v12572_v33  ;;  %v6592_v43 = vadd.f32 %v6558_v23, %v6314_v14  ;;  %v7577_v53 = vpop.f32.mrf.mxu0  ;;  %v7166_v14 = vld [vmem:[#allocation5 + $0xe1] sm:$0xff] }
 0x6b7   : > { %v7856_v11 = vpop.f32.mrf.mxu1 }
 0x6b8   : > { %8994 = vmatmul.msk.f32.gmra.mxu3 %vm584_vm15, %v7165_v7  ;;  %9100 = vmatmul.msk.f32.gmra.mxu2 %vm584_vm15, %v7165_v7  ;;  %v6870_v3 = vadd.f32 %v6836_v0, %v6592_v43  ;;  %v6840_v0 = vadd.f32 %v12062_v51, %v6562_v38  ;;  %v12594_v7 = vld [vmem:[#allocation5 + $0xe2] sm:$0xff]  ;;  %v6563_v51 = vadd.f32 %v12096_v18, %v6285_v13  ;;  %v7167_v38 = vld [vmem:[#allocation5 + $0xf1] sm:$0xff] }
 0x6b9   : > { %9030 = vmatmul.msk.f32.gmra.mxu0 %vm584_vm15, %v12581_v27 }
 0x6ba   : > { %9066 = vmatmul.msk.f32.gmra.mxu1 %vm584_vm15, %v7722_v35  ;;  %v7118_v43 = vadd.f32 %v12150_v62, %v6840_v0  ;;  %v6286_v62 = vadd.f32 %v12523_v55, %v12148_v22  ;;  %v6841_v35 = vadd.f32 %v12098_v29, %v6563_v51  ;;  %v7725_v51 = vld [vmem:[#allocation5 + $0x110] sm:$0xff] }
 0x6bb   : > { %v7111_v33 = vpop.f32.mrf.mxu2  ;;  %v7299_v21 = vpop.f32.mrf.mxu3 }
 0x6bc   : > { %v12586_v25 = vadd.f32 %v7111_v33, %v6869_v17  ;;  %v7395_v54 = vadd.f32 %v7299_v21, %v7117_v26  ;;  %v7723_v17 = vld [vmem:[#allocation5 + $0xf8] sm:$0xff]  ;;  %v7119_v0 = vadd.f32 %v12180_v63, %v6841_v35 }
 0x6be   : > { %v7673_v23 = vadd.f32 %v7577_v53, %v7395_v54  ;;  %v7580_v40 = vpop.f32.mrf.mxu0 }
 0x6bf   : > { %v7859_v34 = vpop.f32.mrf.mxu1 }
 0x6c0   : > { %8995 = vmatmul.msk.f32.gmra.mxu3 %vm584_vm15, %v7166_v14  ;;  %9101 = vmatmul.msk.f32.gmra.mxu2 %vm584_vm15, %v7166_v14  ;;  %v7952_v8 = vadd.f32 %v7856_v11, %v7673_v23  ;;  %v12608_v23 = vld [vmem:[#allocation5 + $0xf2] sm:$0xff] }
 0x6c1   : > { %9031 = vmatmul.msk.f32.gmra.mxu0 %vm584_vm15, %v12594_v7 }
 0x6c2   : > { %9067 = vmatmul.msk.f32.gmra.mxu1 %vm584_vm15, %v7723_v17 }
 0x6c3   : > { %v7114_v33 = vpop.f32.mrf.mxu2  ;;  %v7302_v26 = vpop.f32.mrf.mxu3 }
 0x6c4   : > { %v12600_v46 = vadd.f32 %v7114_v33, %v6870_v3  ;;  %v7396_v53 = vadd.f32 %v7302_v26, %v7118_v43  ;;  %v7724_v3 = vld [vmem:[#allocation5 + $0x108] sm:$0xff]  ;;  %v12620_v26 = vld [vmem:[#allocation5 + $0xfa] sm:$0xff] }
 0x6c6   : > { %v7674_v11 = vadd.f32 %v7580_v40, %v7396_v53  ;;  %v7583_v21 = vpop.f32.mrf.mxu0  ;;  %v6564_v40 = vadd.f32 %v12138_v15, %v6286_v62  ;;  %v7169_v62 = vld [vmem:[#allocation5 + $0x109] sm:$0xff] }
 0x6c7   : > { %v7862_v54 = vpop.f32.mrf.mxu1 }
 0x6c8   : > { %8996 = vmatmul.msk.f32.gmra.mxu3 %vm584_vm15, %v7167_v38  ;;  %9102 = vmatmul.msk.f32.gmra.mxu2 %vm584_vm15, %v7167_v38  ;;  %v7953_v18 = vadd.f32 %v7859_v34, %v7674_v11  ;;  %v7168_v34 = vld [vmem:[#allocation5 + $0xf9] sm:$0xff]  ;;  %v6842_v43 = vadd.f32 %v12140_v2, %v6564_v40 }
 0x6c9   : > { %9032 = vmatmul.msk.f32.gmra.mxu0 %vm584_vm15, %v12608_v23 }
 0x6ca   : > { %9068 = vmatmul.msk.f32.gmra.mxu1 %vm584_vm15, %v7724_v3  ;;  %v7120_v15 = vadd.f32 %v12206_v20, %v6842_v43 }
 0x6cb   : > { %v7305_v14 = vpop.f32.mrf.mxu3  ;;  %v8134_v13 = vpop.f32.mrf.mxu2 }
 0x6cc   : > { %v7397_v29 = vadd.f32 %v7305_v14, %v7119_v0  ;;  %v12614_v22 = vadd.f32 %v8134_v13, %v7952_v8  ;;  %v7726_v0 = vld [vmem:[#allocation5 + $0x120] sm:$0xff] }
 0x6ce   : > { %v7675_v55 = vadd.f32 %v7583_v21, %v7397_v29  ;;  %v7586_v17 = vpop.f32.mrf.mxu0  ;;  %v7170_v29 = vld [vmem:[#allocation5 + $0x111] sm:$0xff] }
 0x6cf   : > { %v7865_v33 = vpop.f32.mrf.mxu1 }
 0x6d0   : > { %8997 = vmatmul.msk.f32.gmra.mxu3 %vm584_vm15, %v7168_v34  ;;  %9103 = vmatmul.msk.f32.gmra.mxu2 %vm584_vm15, %v7168_v34  ;;  %v7954_v63 = vadd.f32 %v7862_v54, %v7675_v55  ;;  %v12629_v54 = vld [vmem:[#allocation5 + $0x10a] sm:$0xff] }
 0x6d1   : > { %9033 = vmatmul.msk.f32.gmra.mxu0 %vm584_vm15, %v12620_v26 }
 0x6d2   : > { %9069 = vmatmul.msk.f32.gmra.mxu1 %vm584_vm15, %v7725_v51 }
 0x6d3   : > { %v7308_v53 = vpop.f32.mrf.mxu3  ;;  %v8137_v11 = vpop.f32.mrf.mxu2 }
 0x6d4   : > { %v7398_v2 = vadd.f32 %v7308_v53, %v7120_v15  ;;  %v12625_v8 = vadd.f32 %v8137_v11, %v7953_v18  ;;  %v7171_v11 = vld [vmem:[#allocation5 + $0x121] sm:$0xff] }
 0x6d6   : > { %v7676_v38 = vadd.f32 %v7586_v17, %v7398_v2  ;;  %v7589_v35 = vpop.f32.mrf.mxu0  ;;  %v12639_v17 = vld [vmem:[#allocation5 + $0x112] sm:$0xff] }
 0x6d7   : > { %v7868_v21 = vpop.f32.mrf.mxu1 }
 0x6d8   : > { %8998 = vmatmul.msk.f32.gmra.mxu3 %vm584_vm15, %v7169_v62  ;;  %9104 = vmatmul.msk.f32.gmra.mxu2 %vm584_vm15, %v7169_v62  ;;  %v7955_v20 = vadd.f32 %v7865_v33, %v7676_v38  ;;  %v7727_v33 = vld [vmem:[#allocation5 + $0x128] sm:$0xff] }
 0x6d9   : > { %9034 = vmatmul.msk.f32.gmra.mxu0 %vm584_vm15, %v12629_v54  ;;  %v9118_v38 = vld [vmem:[%s12988_s9 + $0x100] sm:$0xff] }
 0x6da   : > { %9070 = vmatmul.msk.f32.gmra.mxu1 %vm584_vm15, %v7726_v0  ;;  %8410 = vmatpush.msrb.mxu3 %v9118_v38  ;;  %v12673_v38 = vld [vmem:[#allocation5 + $0x13a] sm:$0xff] }
 0x6db   : > { %v7311_v3 = vpop.f32.mrf.mxu3  ;;  %v8140_v14 = vpop.f32.mrf.mxu2 }
 0x6dc   : > { %v7399_v18 = vadd.f32 %v7311_v3, %v12244_v57  ;;  %v12635_v13 = vadd.f32 %v8140_v14, %v7954_v63 }
 0x6de   : > { %v7677_v40 = vadd.f32 %v7589_v35, %v7399_v18  ;;  %v7592_v34 = vpop.f32.mrf.mxu0  ;;  %v12652_v35 = vld [vmem:[#allocation5 + $0x122] sm:$0xff] }
 0x6df   : > { %v7871_v43 = vpop.f32.mrf.mxu1 }
 0x6e0   : > { %8999 = vmatmul.msk.f32.gmra.mxu3 %vm584_vm15, %v7170_v29  ;;  %9105 = vmatmul.msk.f32.gmra.mxu2 %vm584_vm15, %v7170_v29  ;;  %v7956_v55 = vadd.f32 %v7868_v21, %v7677_v40  ;;  %v7728_v21 = vld [vmem:[#allocation5 + $0x138] sm:$0xff]  ;;  %v7172_v40 = vld [vmem:[#allocation5 + $0x129] sm:$0xff] }
 0x6e1   : > { %9035 = vmatmul.msk.f32.gmra.mxu0 %vm584_vm15, %v12639_v17 }
 0x6e2   : > { %9071 = vmatmul.msk.f32.gmra.mxu1 %vm584_vm15, %v7727_v33 }
 0x6e3   : > { %v7314_v15 = vpop.f32.mrf.mxu3  ;;  %v8143_v51 = vpop.f32.mrf.mxu2 }
 0x6e4   : > { %v7400_v57 = vadd.f32 %v7314_v15, %v12276_v16  ;;  %v12645_v63 = vadd.f32 %v8143_v51, %v7955_v20 }
 0x6e6   : > { %v7678_v53 = vadd.f32 %v7592_v34, %v7400_v57  ;;  %v7595_v62 = vpop.f32.mrf.mxu0  ;;  %v12662_v34 = vld [vmem:[#allocation5 + $0x12a] sm:$0xff] }
 0x6e7   : > { %v7874_v14 = vpop.f32.mrf.mxu1 }
 0x6e8   : > { %9000 = vmatmul.msk.f32.gmra.mxu3 %vm584_vm15, %v7171_v11  ;;  %9106 = vmatmul.msk.f32.gmra.mxu2 %vm584_vm15, %v7171_v11  ;;  %v7957_v2 = vadd.f32 %v7871_v43, %v7678_v53  ;;  %v7173_v53 = vld [vmem:[#allocation5 + $0x139] sm:$0xff] }
 0x6e9   : > { %9036 = vmatmul.msk.f32.gmra.mxu0 %vm584_vm15, %v12652_v35 }
 0x6ea   : > { %9072 = vmatmul.msk.f32.gmra.mxu1 %vm584_vm15, %v7728_v21 }
 0x6eb   : > { %v7317_v0 = vpop.f32.mrf.mxu3  ;;  %v8146_v16 = vpop.f32.mrf.mxu2 }
 0x6ec   : > { %v7401_v20 = vadd.f32 %v7317_v0, %v12289_v32  ;;  %v12658_v3 = vadd.f32 %v8146_v16, %v7956_v55  ;;  %v12686_v0 = vld [vmem:[#allocation5 + $0x142] sm:$0xff] }
 0x6ee   : > { %v7679_v18 = vadd.f32 %v7595_v62, %v7401_v20  ;;  %v7598_v15 = vpop.f32.mrf.mxu0 }
 0x6ef   : > { %v7877_v57 = vpop.f32.mrf.mxu1 }
 0x6f0   : > { %9001 = vmatmul.msk.f32.gmra.mxu3 %vm584_vm15, %v7172_v40  ;;  %9107 = vmatmul.msk.f32.gmra.mxu2 %vm584_vm15, %v7172_v40  ;;  %v7958_v29 = vadd.f32 %v7874_v14, %v7679_v18  ;;  %v7175_v14 = vld [vmem:[#allocation5 + $0x151] sm:$0xff] }
 0x6f1   : > { %9037 = vmatmul.msk.f32.gmra.mxu0 %vm584_vm15, %v12662_v34  ;;  %v12699_v18 = vld [vmem:[#allocation5 + $0x152] sm:$0xff] }
 0x6f2   : > { %9073 = vmatmul.msk.f32.gmra.mxu1 %vm584_vm15, %v12309_v49 }
 0x6f3   : > { %v7320_v43 = vpop.f32.mrf.mxu3  ;;  %v8149_v33 = vpop.f32.mrf.mxu2 }
 0x6f4   : > { %v7402_v32 = vadd.f32 %v7320_v43, %v12300_v24  ;;  %v12669_v55 = vadd.f32 %v8149_v33, %v7957_v2  ;;  %v7174_v2 = vld [vmem:[#allocation5 + $0x141] sm:$0xff] }
 0x6f6   : > { %v7680_v51 = vadd.f32 %v7598_v15, %v7402_v32 }
 0x6f8   : > { %9002 = vmatmul.msk.f32.gmra.mxu3 %vm584_vm15, %v7173_v53  ;;  %9108 = vmatmul.msk.f32.gmra.mxu2 %vm584_vm15, %v7173_v53  ;;  %v7959_v11 = vadd.f32 %v7877_v57, %v7680_v51  ;;  %v12743_v53 = vld [vmem:[#allocation5 + $0x182] sm:$0xff] }
 0x6f9   : > { %9038 = vmatmul.msk.f32.gmra.mxu0 %vm584_vm15, %v12673_v38 }
 0x6fa   : > { %9074 = vmatmul.msk.f32.gmra.mxu1 %vm584_vm15, %v12332_v10 }
 0x6fb   : > { %v7323_v62 = vpop.f32.mrf.mxu3  ;;  %v8152_v21 = vpop.f32.mrf.mxu2 }
 0x6fc   : > { %v12680_v24 = vadd.f32 %v7323_v62, %v12307_v58  ;;  %v12682_v49 = vadd.f32 %v8152_v21, %v7958_v29  ;;  %v12710_v29 = vld [vmem:[#allocation5 + $0x15a] sm:$0xff]  ;;  %v12753_v21 = vld [vmem:[#allocation5 + $0x18a] sm:$0xff] }
 0x700   : > { %9003 = vmatmul.msk.f32.gmra.mxu3 %vm584_vm15, %v7174_v2  ;;  %9109 = vmatmul.msk.f32.gmra.mxu2 %vm584_vm15, %v7174_v2 }
 0x701   : > { %9039 = vmatmul.msk.f32.gmra.mxu0 %vm584_vm15, %v12686_v0 }
 0x702   : > { %9075 = vmatmul.msk.f32.gmra.mxu1 %vm584_vm15, %v12355_v41 }
 0x703   : > { %v7326_v16 = vpop.f32.mrf.mxu3  ;;  %v8155_v20 = vpop.f32.mrf.mxu2 }
 0x704   : > { %v12693_v58 = vadd.f32 %v7326_v16, %v12318_v39  ;;  %v12695_v10 = vadd.f32 %v8155_v20, %v7959_v11  ;;  %v7176_v39 = vld [vmem:[#allocation5 + $0x159] sm:$0xff] }
 0x708   : > { %9004 = vmatmul.msk.f32.gmra.mxu3 %vm584_vm15, %v7175_v14  ;;  %9110 = vmatmul.msk.f32.gmra.mxu2 %vm584_vm15, %v7175_v14 }
 0x709   : > { %9040 = vmatmul.msk.f32.gmra.mxu0 %vm584_vm15, %v12699_v18 }
 0x70a   : > { %9076 = vmatmul.msk.f32.gmra.mxu1 %vm584_vm15, %v12372_v48  ;;  %v7177_v48 = vld [vmem:[#allocation5 + $0x169] sm:$0xff] }
 0x70b   : > { %v7329_v40 = vpop.f32.mrf.mxu3 }
 0x70c   : > { %v12706_v41 = vadd.f32 %v7329_v40, %v12353_v61  ;;  %v12721_v61 = vld [vmem:[#allocation5 + $0x16a] sm:$0xff]  ;;  %v8015_v40 = vld [vmem:[#allocation5 + $0x1a1] sm:$0xff] }
 0x710   : > { %9005 = vmatmul.msk.f32.gmra.mxu3 %vm584_vm15, %v7176_v39  ;;  %9111 = vmatmul.msk.f32.gmra.mxu2 %vm584_vm15, %v7176_v39 }
 0x711   : > { %9041 = vmatmul.msk.f32.gmra.mxu0 %vm584_vm15, %v12710_v29 }
 0x712   : > { %9077 = vmatmul.msk.f32.gmra.mxu1 %vm584_vm15, %v12392_v5  ;;  %v7178_v5 = vld [vmem:[#allocation5 + $0x171] sm:$0xff] }
 0x713   : > { %v7332_v43 = vpop.f32.mrf.mxu3 }
 0x714   : > { %v12717_v33 = vadd.f32 %v7332_v43, %v12364_v9  ;;  %v12732_v9 = vld [vmem:[#allocation5 + $0x172] sm:$0xff] }
 0x718   : > { %9006 = vmatmul.msk.f32.gmra.mxu3 %vm584_vm15, %v7177_v48  ;;  %9112 = vmatmul.msk.f32.gmra.mxu2 %vm584_vm15, %v7177_v48 }
 0x719   : > { %9042 = vmatmul.msk.f32.gmra.mxu0 %vm584_vm15, %v12721_v61 }
 0x71a   : > { %9078 = vmatmul.msk.f32.gmra.mxu1 %vm584_vm15, %v12403_v36  ;;  %v7179_v36 = vld [vmem:[#allocation5 + $0x181] sm:$0xff] }
 0x71b   : > { %v7335_v32 = vpop.f32.mrf.mxu3 }
 0x71c   : > { %v12728_v15 = vadd.f32 %v7335_v32, %v12390_v28  ;;  %v7736_v28 = vld [vmem:[#allocation5 + $0x198] sm:$0xff]  ;;  %v13058_v32 = vld [vmem:[#allocation37_spill] sm:$0xff] }
 0x720   : > { %9007 = vmatmul.msk.f32.gmra.mxu3 %vm584_vm15, %v7178_v5  ;;  %9113 = vmatmul.msk.f32.gmra.mxu2 %vm584_vm15, %v7178_v5 }
 0x721   : > { %9043 = vmatmul.msk.f32.gmra.mxu0 %vm584_vm15, %v12732_v9 }
 0x722   : > { %9079 = vmatmul.msk.f32.gmra.mxu1 %vm584_vm15, %v12413_v1  ;;  %v7180_v1 = vld [vmem:[#allocation5 + $0x189] sm:$0xff] }
 0x723   : > { %v7338_v51 = vpop.f32.mrf.mxu3 }
 0x724   : > { %v12739_v57 = vadd.f32 %v7338_v51, %v12401_v60  ;;  %v7737_v60 = vld [vmem:[#allocation5 + $0x1a0] sm:$0xff]  ;;  %v13060_v51 = vld [vmem:[#allocation34_spill] sm:$0xff] }
 0x728   : > { %9008 = vmatmul.msk.f32.gmra.mxu3 %vm584_vm15, %v7179_v36  ;;  %9114 = vmatmul.msk.f32.gmra.mxu2 %vm584_vm15, %v7179_v36 }
 0x729   : > { %9044 = vmatmul.msk.f32.gmra.mxu0 %vm584_vm15, %v12743_v53 }
 0x72a   : > { %9080 = vmatmul.msk.f32.gmra.mxu1 %vm584_vm15, %v7736_v28  ;;  %v13062_v28 = vld [vmem:[#allocation29_spill] sm:$0xff] }
 0x72b   : > { %v7341_v11 = vpop.f32.mrf.mxu3 }
 0x72c   : > { %v12748_v62 = vadd.f32 %v7341_v11, %v12411_v59  ;;  %v8014_v59 = vld [vmem:[#allocation5 + $0x199] sm:$0xff] }
 0x730   : > { %9009 = vmatmul.msk.f32.gmra.mxu3 %vm584_vm15, %v7180_v1  ;;  %9115 = vmatmul.msk.f32.gmra.mxu2 %vm584_vm15, %v7180_v1  ;;  %v13064_v1 = vld [vmem:[#allocation38_spill] sm:$0xff] }
 0x731   : > { %9045 = vmatmul.msk.f32.gmra.mxu0 %vm584_vm15, %v12753_v21 }
 0x732   : > { %9081 = vmatmul.msk.f32.gmra.mxu1 %vm584_vm15, %v7737_v60 }
 0x733   : > { %v7344_v2 = vpop.f32.mrf.mxu3 }
 0x734   : > { %v12758_v16 = vadd.f32 %v7344_v2, %v12421_v30  ;;  %v13065_v2 = vld [vmem:[#allocation39_spill] sm:$0xff] }
 0x738   : > { %9116 = vmatmul.msk.f32.gmra.mxu2 %vm584_vm15, %v8014_v59  ;;  %9122 = vmatmul.msk.f32.vlgmr.msrb.gmra.mxu3 %vm584_vm15, %v12425_v44 }
 0x73b   : > { %v7347_v20 = vpop.f32.mrf.mxu3 }
 0x73c   : > { %v12765_v14 = vadd.f32 %v7347_v20, %v12431_v4  ;;  %v13066_v20 = vld [vmem:[#allocation30_spill] sm:$0xff] }
 0x740   : > { %9117 = vmatmul.msk.f32.gmra.mxu2 %vm584_vm15, %v8015_v40  ;;  %9123 = vmatmul.msk.f32.gmra.mxu3 %vm584_vm15, %v12435_v56 }
 0x743   : > { %v7350_v30 = vpop.f32.mrf.mxu3 }
 0x744   : > { %v12771_v39 = vadd.f32 %v7350_v30, %v12441_v50  ;;  %v13067_v30 = vld [vmem:[#allocation35_spill] sm:$0xff] }
 0x748   : > { %9124 = vmatmul.msk.f32.gmra.mxu3 %vm584_vm15, %v12445_v19 }
 0x74b   : > { %v7353_v43 = vpop.f32.mrf.mxu3 }
 0x74c   : > { %v12776_v44 = vadd.f32 %v7353_v43, %v12451_v42  ;;  %v13059_v42 = vld [vmem:[#allocation28_spill] sm:$0xff] }
 0x750   : > { %9125 = vmatmul.msk.f32.gmra.mxu3 %vm584_vm15, %v12455_v45 }
 0x753   : > { %v7356_v4 = vpop.f32.mrf.mxu3 }
 0x754   : > { %v12781_v48 = vadd.f32 %v7356_v4, %v12461_v12  ;;  %v13061_v12 = vld [vmem:[#allocation32_spill] sm:$0xff]  ;;  %v13068_v4 = vld [vmem:[#allocation31_spill] sm:$0xff] }
 0x758   : > { %9126 = vmatmul.msk.f32.gmra.mxu3 %vm584_vm15, %v12468_v47 }
 0x75b   : > { %v7359_v56 = vpop.f32.mrf.mxu3 }
 0x75c   : > { %v12786_v50 = vadd.f32 %v7359_v56, %v12474_v6  ;;  %v13063_v6 = vld [vmem:[#allocation36_spill] sm:$0xff] }
 0x760   : > { %9127 = vmatmul.msk.f32.gmra.mxu3 %vm584_vm15, %v13058_v32 }
 0x763   : > { %v7362_v19 = vpop.f32.mrf.mxu3 }
 0x764   : > { %v12791_v5 = vadd.f32 %v7362_v19, %v13059_v42  ;;  %v13069_v19 = vld [vmem:[#allocation33_spill] sm:$0xff] }
 0x768   : > { %9128 = vmatmul.msk.f32.gmra.mxu3 %vm584_vm15, %v13060_v51  ;;  %v13070_v51 = vld [vmem:[#allocation40_spill] sm:$0xff] }
 0x76b   : > { %v7365_v45 = vpop.f32.mrf.mxu3 }
 0x76c   : > { %v12796_v36 = vadd.f32 %v7365_v45, %v13061_v12  ;;  %v13071_v12 = vld [vmem:[#allocation41_spill] sm:$0xff] }
 0x770   : > { %9129 = vmatmul.msk.f32.gmra.mxu3 %vm584_vm15, %v13062_v28 }
 0x773   : > { %v7368_v47 = vpop.f32.mrf.mxu3 }
 0x774   : > { %v12801_v11 = vadd.f32 %v7368_v47, %v13063_v6  ;;  %v13072_v6 = vld [vmem:[#allocation42_spill] sm:$0xff] }
 0x778   : > { %9130 = vmatmul.msk.f32.gmra.mxu3 %vm584_vm15, %v13064_v1 }
 0x77b   : > { %v7371_v60 = vpop.f32.mrf.mxu3 }
 0x77c   : > { %v12806_v59 = vadd.f32 %v7371_v60, %v13065_v2 }
 0x780   : > { %9131 = vmatmul.msk.f32.gmra.mxu3 %vm584_vm15, %v13066_v20 }
 0x783   : > { %v7374_v40 = vpop.f32.mrf.mxu3 }
 0x784   : > { %v12811_v43 = vadd.f32 %v7374_v40, %v13067_v30  ;;  %v8158_v40 = vpop.f32.mrf.mxu2 }
 0x788   : > { %9132 = vmatmul.msk.f32.gmra.mxu3 %vm584_vm15, %v13068_v4 }
 0x78b   : > { %v7377_v56 = vpop.f32.mrf.mxu3 }
 0x78c   : > { %v12816_v32 = vadd.f32 %v7377_v56, %v12536_v31 }
 0x790   : > { %9133 = vmatmul.msk.f32.gmra.mxu3 %vm584_vm15, %v13069_v19 }
 0x793   : > { %v7380_v42 = vpop.f32.mrf.mxu3 }
 0x794   : > { %v12821_v45 = vadd.f32 %v7380_v42, %v13070_v51 }
 0x798   : > { %9134 = vmatmul.msk.f32.gmra.mxu3 %vm584_vm15, %v13071_v12 }
 0x79b   : > { %v7383_v28 = vpop.f32.mrf.mxu3 }
 0x79c   : > { %v12826_v47 = vadd.f32 %v7383_v28, %v12559_v37 }
 0x7a0   : > { %9135 = vmatmul.msk.f32.gmra.mxu3 %vm584_vm15, %v12566_v52 }
 0x7a3   : > { %v7386_v31 = vpop.f32.mrf.mxu3 }
 0x7a4   : > { %v12831_v1 = vadd.f32 %v7386_v31, %v13072_v6 }
 0x7a8   : > { %9136 = vmatmul.msk.f32.gmra.mxu3 %vm584_vm15, %v12581_v27 }
 0x7ab   : > { %v7389_v60 = vpop.f32.mrf.mxu3 }
 0x7ac   : > { %v12836_v2 = vadd.f32 %v7389_v60, %v12586_v25 }
 0x7b0   : > { %9137 = vmatmul.msk.f32.gmra.mxu3 %vm584_vm15, %v12594_v7 }
 0x7b3   : > { %v7392_v37 = vpop.f32.mrf.mxu3 }
 0x7b4   : > { %v12842_v20 = vadd.f32 %v7392_v37, %v12600_v46  ;;  %v7601_v46 = vpop.f32.mrf.mxu0 }
 0x7b8   : > { %9138 = vmatmul.msk.f32.gmra.mxu3 %vm584_vm15, %v12608_v23  ;;  %v7880_v23 = vpop.f32.mrf.mxu1 }
 0x7bb   : > { %v8412_v52 = vpop.f32.mrf.mxu3 }
 0x7bc   : > { %v8508_v27 = vadd.f32 %v8412_v52, %v12614_v22  ;;  %v7604_v4 = vpop.f32.mrf.mxu0  ;;  %v7681_v52 = vadd.f32 %v7601_v46, %v12680_v24 }
 0x7be   : > { %8541 = vst.msk [vmem:[%s12850_s12] sm:$0xff] %vm8540_vm2, %v8508_v27 }
 0x7c0   : > { %9139 = vmatmul.msk.f32.gmra.mxu3 %vm584_vm15, %v12620_v26  ;;  %v7883_v26 = vpop.f32.mrf.mxu1 }
 0x7c3   : > { %v8415_v25 = vpop.f32.mrf.mxu3 }
 0x7c4   : > { %v8509_v7 = vadd.f32 %v8415_v25, %v12625_v8  ;;  %v8161_v8 = vpop.f32.mrf.mxu2  ;;  %v7960_v25 = vadd.f32 %v7880_v23, %v7681_v52 }
 0x7c6   : > { %8542 = vst.msk [vmem:[%s12850_s12 + $0x8] sm:$0xff] %vm8540_vm2, %v8509_v7 }
 0x7c8   : > { %9140 = vmatmul.msk.f32.gmra.mxu3 %vm584_vm15, %v12629_v54  ;;  %v7607_v54 = vpop.f32.mrf.mxu0 }
 0x7cb   : > { %v8418_v30 = vpop.f32.mrf.mxu3 }
 0x7cc   : > { %v8510_v22 = vadd.f32 %v8418_v30, %v12635_v13  ;;  %v7886_v13 = vpop.f32.mrf.mxu1  ;;  %v8164_v12 = vpop.f32.mrf.mxu2 }
 0x7ce   : > { %8543 = vst.msk [vmem:[%s12850_s12 + $0x10] sm:$0xff] %vm8540_vm2, %v8510_v22 }
 0x7d0   : > { %9141 = vmatmul.msk.f32.gmra.mxu3 %vm584_vm15, %v12639_v17  ;;  %v7610_v17 = vpop.f32.mrf.mxu0 }
 0x7d3   : > { %v8421_v56 = vpop.f32.mrf.mxu3 }
 0x7d4   : > { %v8511_v19 = vadd.f32 %v8421_v56, %v12645_v63  ;;  %v7889_v31 = vpop.f32.mrf.mxu1 }
 0x7d6   : > { %8544 = vst.msk [vmem:[%s12850_s12 + $0x18] sm:$0xff] %vm8540_vm2, %v8511_v19 }
 0x7d8   : > { %9142 = vmatmul.msk.f32.gmra.mxu3 %vm584_vm15, %v12652_v35  ;;  %v8167_v35 = vpop.f32.mrf.mxu2  ;;  %v7613_v60 = vpop.f32.mrf.mxu0 }
 0x7db   : > { %v8424_v42 = vpop.f32.mrf.mxu3 }
 0x7dc   : > { %v8512_v51 = vadd.f32 %v8424_v42, %v12658_v3  ;;  %v7892_v37 = vpop.f32.mrf.mxu1 }
 0x7de   : > { %8545 = vst.msk [vmem:[%s12850_s12 + $0x20] sm:$0xff] %vm8540_vm2, %v8512_v51 }
 0x7e0   : > { %9143 = vmatmul.msk.f32.gmra.mxu3 %vm584_vm15, %v12662_v34  ;;  %v8170_v34 = vpop.f32.mrf.mxu2 }
 0x7e3   : > { %v8427_v28 = vpop.f32.mrf.mxu3 }
 0x7e4   : > { %v8513_v63 = vadd.f32 %v8427_v28, %v12669_v55  ;;  %v7895_v7 = vpop.f32.mrf.mxu1 }
 0x7e6   : > { %8546 = vst.msk [vmem:[%s12850_s12 + $0x28] sm:$0xff] %vm8540_vm2, %v8513_v63 }
 0x7e8   : > { %9144 = vmatmul.msk.f32.gmra.mxu3 %vm584_vm15, %v12673_v38  ;;  %v7616_v38 = vpop.f32.mrf.mxu0  ;;  %v8173_v30 = vpop.f32.mrf.mxu2 }
 0x7e9   : > { %v7686_v52 = vadd.f32 %v7616_v38, %v12739_v57 }
 0x7eb   : > { %v8430_v6 = vpop.f32.mrf.mxu3 }
 0x7ec   : > { %v8514_v3 = vadd.f32 %v8430_v6, %v12682_v49  ;;  %v8238_v49 = vadd.f32 %v8158_v40, %v7960_v25  ;;  %v7898_v40 = vpop.f32.mrf.mxu1 }
 0x7ee   : > { %8547 = vst.msk [vmem:[%s12850_s12 + $0x30] sm:$0xff] %vm8540_vm2, %v8514_v3 }
 0x7f0   : > { %9145 = vmatmul.msk.f32.gmra.mxu3 %vm584_vm15, %v12686_v0  ;;  %v7682_v0 = vadd.f32 %v7604_v4, %v12693_v58  ;;  %v8176_v42 = vpop.f32.mrf.mxu2 }
 0x7f2   : > { %v7961_v24 = vadd.f32 %v7883_v26, %v7682_v0 }
 0x7f3   : > { %v8433_v55 = vpop.f32.mrf.mxu3 }
 0x7f4   : > { %v8515_v27 = vadd.f32 %v8433_v55, %v12695_v10  ;;  %v7619_v10 = vpop.f32.mrf.mxu0  ;;  %v8239_v46 = vadd.f32 %v8161_v8, %v7961_v24  ;;  %v7901_v8 = vpop.f32.mrf.mxu1  ;;  %v8293_v24 = vld [vmem:[#allocation5 + $0x1a2] sm:$0xff] }
 0x7f6   : > { %8548 = vst.msk [vmem:[%s12850_s12 + $0x38] sm:$0xff] %vm8540_vm2, %v8515_v27 }
 0x7f8   : > { %9146 = vmatmul.msk.f32.gmra.mxu3 %vm584_vm15, %v12699_v18  ;;  %v7683_v18 = vadd.f32 %v7607_v54, %v12706_v41  ;;  %v8179_v41 = vpop.f32.mrf.mxu2 }
 0x7fa   : > { %v7962_v51 = vadd.f32 %v7886_v13, %v7683_v18 }
 0x7fb   : > { %v8436_v22 = vpop.f32.mrf.mxu3 }
 0x7fc   : > { %v8516_v56 = vadd.f32 %v8436_v22, %v8238_v49  ;;  %v8240_v58 = vadd.f32 %v8164_v12, %v7962_v51  ;;  %v7622_v4 = vpop.f32.mrf.mxu0 }
 0x7fe   : > { %8549 = vst.msk [vmem:[%s12850_s12 + $0x40] sm:$0xff] %vm8540_vm2, %v8516_v56 }
 0x800   : > { %9147 = vmatmul.msk.f32.gmra.mxu3 %vm584_vm15, %v12710_v29  ;;  %v7684_v29 = vadd.f32 %v7610_v17, %v12717_v33  ;;  %v7904_v33 = vpop.f32.mrf.mxu1  ;;  %v8182_v17 = vpop.f32.mrf.mxu2 }
 0x802   : > { %v7963_v54 = vadd.f32 %v7889_v31, %v7684_v29 }
 0x803   : > { %v8439_v23 = vpop.f32.mrf.mxu3 }
 0x804   : > { %v8517_v19 = vadd.f32 %v8439_v23, %v8239_v46  ;;  %v8241_v13 = vadd.f32 %v8167_v35, %v7963_v54  ;;  %v7625_v12 = vpop.f32.mrf.mxu0 }
 0x805   : > { %v7689_v18 = vadd.f32 %v7625_v12, %v12765_v14 }
 0x806   : > { %8550 = vst.msk [vmem:[%s12850_s12 + $0x48] sm:$0xff] %vm8540_vm2, %v8517_v19 }
 0x808   : > { %9148 = vmatmul.msk.f32.gmra.mxu3 %vm584_vm15, %v12721_v61  ;;  %v7685_v61 = vadd.f32 %v7613_v60, %v12728_v15  ;;  %v7965_v15 = vadd.f32 %v7895_v7, %v7686_v52  ;;  %v8185_v27 = vpop.f32.mrf.mxu2 }
 0x80a   : > { %v7964_v3 = vadd.f32 %v7892_v37, %v7685_v61  ;;  %v8243_v60 = vadd.f32 %v8173_v30, %v7965_v15  ;;  %v7907_v37 = vpop.f32.mrf.mxu1 }
 0x80b   : > { %v8442_v26 = vpop.f32.mrf.mxu3 }
 0x80c   : > { %v8518_v28 = vadd.f32 %v8442_v26, %v8240_v58  ;;  %v8242_v31 = vadd.f32 %v8170_v34, %v7964_v3  ;;  %v7628_v35 = vpop.f32.mrf.mxu0  ;;  %v8292_v34 = vld [vmem:[#allocation5 + $0x19a] sm:$0xff] }
 0x80e   : > { %8551 = vst.msk [vmem:[%s12850_s12 + $0x50] sm:$0xff] %vm8540_vm2, %v8518_v28 }
 0x810   : > { %9149 = vmatmul.msk.f32.gmra.mxu3 %vm584_vm15, %v12732_v9  ;;  %v8188_v56 = vpop.f32.mrf.mxu2 }
 0x812   : > { %v7910_v30 = vpop.f32.mrf.mxu1 }
 0x813   : > { %v8445_v63 = vpop.f32.mrf.mxu3 }
 0x814   : > { %v8519_v6 = vadd.f32 %v8445_v63, %v8241_v13  ;;  %v7631_v38 = vpop.f32.mrf.mxu0 }
 0x815   : > { %v7691_v13 = vadd.f32 %v7631_v38, %v12776_v44 }
 0x816   : > { %8552 = vst.msk [vmem:[%s12850_s12 + $0x58] sm:$0xff] %vm8540_vm2, %v8519_v6 }
 0x817   : > { %v7970_v6 = vadd.f32 %v7910_v30, %v7691_v13 }
 0x818   : > { %9150 = vmatmul.msk.f32.gmra.mxu3 %vm584_vm15, %v12743_v53  ;;  %v7687_v53 = vadd.f32 %v7619_v10, %v12748_v62 }
 0x819   : > { %v8248_v12 = vadd.f32 %v8188_v56, %v7970_v6 }
 0x81a   : > { %v7966_v57 = vadd.f32 %v7898_v40, %v7687_v53  ;;  %v7913_v19 = vpop.f32.mrf.mxu1 }
 0x81b   : > { %v8448_v55 = vpop.f32.mrf.mxu3 }
 0x81c   : > { %v8520_v9 = vadd.f32 %v8448_v55, %v8242_v31  ;;  %v8244_v22 = vadd.f32 %v8176_v42, %v7966_v57  ;;  %v7634_v46 = vpop.f32.mrf.mxu0  ;;  %v7968_v42 = vadd.f32 %v7904_v33, %v7689_v18 }
 0x81e   : > { %8553 = vst.msk [vmem:[%s12850_s12 + $0x60] sm:$0xff] %vm8540_vm2, %v8520_v9  ;;  %v8246_v51 = vadd.f32 %v8182_v17, %v7968_v42  ;;  %v7692_v17 = vadd.f32 %v7634_v46, %v12781_v48 }
 0x820   : > { %9151 = vmatmul.msk.f32.gmra.mxu3 %vm584_vm15, %v12753_v21  ;;  %v7688_v21 = vadd.f32 %v7622_v4, %v12758_v16  ;;  %v8191_v16 = vpop.f32.mrf.mxu2  ;;  %v7690_v4 = vadd.f32 %v7628_v35, %v12771_v39  ;;  %v7971_v55 = vadd.f32 %v7913_v19, %v7692_v17 }
 0x822   : > { %v7967_v62 = vadd.f32 %v7901_v8, %v7688_v21  ;;  %v7969_v28 = vadd.f32 %v7907_v37, %v7690_v4  ;;  %v7916_v8 = vpop.f32.mrf.mxu1  ;;  %v8249_v9 = vadd.f32 %v8191_v16, %v7971_v55 }
 0x823   : > { %v8451_v25 = vpop.f32.mrf.mxu3 }
 0x824   : > { %v8521_v49 = vadd.f32 %v8451_v25, %v8243_v60  ;;  %v8245_v10 = vadd.f32 %v8179_v41, %v7967_v62  ;;  %v7637_v29 = vpop.f32.mrf.mxu0  ;;  %v8247_v14 = vadd.f32 %v8185_v27, %v7969_v28 }
 0x825   : > { %v7693_v35 = vadd.f32 %v7637_v29, %v12786_v50 }
 0x826   : > { %8554 = vst.msk [vmem:[%s12850_s12 + $0x68] sm:$0xff] %vm8540_vm2, %v8521_v49 }
 0x827   : > { %v7972_v27 = vadd.f32 %v7916_v8, %v7693_v35 }
 0x828   : > { %9152 = vmatmul.msk.f32.gmra.mxu3 %vm584_vm15, %v8292_v34  ;;  %v8194_v41 = vpop.f32.mrf.mxu2 }
 0x829   : > { %v8250_v25 = vadd.f32 %v8194_v41, %v7972_v27 }
 0x82a   : > { %v7919_v39 = vpop.f32.mrf.mxu1 }
 0x82b   : > { %v8454_v7 = vpop.f32.mrf.mxu3 }
 0x82c   : > { %v8522_v0 = vadd.f32 %v8454_v7, %v8244_v22  ;;  %v7640_v61 = vpop.f32.mrf.mxu0 }
 0x82d   : > { %v7694_v49 = vadd.f32 %v7640_v61, %v12791_v5 }
 0x82e   : > { %8555 = vst.msk [vmem:[%s12850_s12 + $0x70] sm:$0xff] %vm8540_vm2, %v8522_v0 }
 0x82f   : > { %v7973_v22 = vadd.f32 %v7919_v39, %v7694_v49 }
 0x830   : > { %9153 = vmatmul.msk.f32.gmra.mxu3 %vm584_vm15, %v8293_v24  ;;  %v8197_v3 = vpop.f32.mrf.mxu2 }
 0x831   : > { %v8251_v50 = vadd.f32 %v8197_v3, %v7973_v22 }
 0x832   : > { %v7922_v15 = vpop.f32.mrf.mxu1 }
 0x833   : > { %v8457_v23 = vpop.f32.mrf.mxu3 }
 0x834   : > { %v8523_v40 = vadd.f32 %v8457_v23, %v8245_v10  ;;  %v7643_v52 = vpop.f32.mrf.mxu0 }
 0x835   : > { %v7695_v21 = vadd.f32 %v7643_v52, %v12796_v36 }
 0x836   : > { %8556 = vst.msk [vmem:[%s12850_s12 + $0x78] sm:$0xff] %vm8540_vm2, %v8523_v40 }
 0x837   : > { %v7974_v24 = vadd.f32 %v7922_v15, %v7695_v21 }
 0x838   : > { %v8200_v37 = vpop.f32.mrf.mxu2 }
 0x839   : > { %v8252_v5 = vadd.f32 %v8200_v37, %v7974_v24 }
 0x83a   : > { %v7925_v57 = vpop.f32.mrf.mxu1 }
 0x83b   : > { %v8460_v58 = vpop.f32.mrf.mxu3 }
 0x83c   : > { %v8524_v26 = vadd.f32 %v8460_v58, %v8246_v51  ;;  %v7646_v53 = vpop.f32.mrf.mxu0 }
 0x83d   : > { %v7696_v46 = vadd.f32 %v7646_v53, %v12801_v11 }
 0x83e   : > { %8557 = vst.msk [vmem:[%s12850_s12 + $0x80] sm:$0xff] %vm8540_vm2, %v8524_v26 }
 0x83f   : > { %v7975_v40 = vadd.f32 %v7925_v57, %v7696_v46 }
 0x840   : > { %v8203_v38 = vpop.f32.mrf.mxu2 }
 0x841   : > { %v8253_v36 = vadd.f32 %v8203_v38, %v7975_v40 }
 0x842   : > { %v7928_v56 = vpop.f32.mrf.mxu1 }
 0x843   : > { %v8463_v54 = vpop.f32.mrf.mxu3 }
 0x844   : > { %v8525_v63 = vadd.f32 %v8463_v54, %v8247_v14  ;;  %v7649_v0 = vpop.f32.mrf.mxu0 }
 0x845   : > { %v7697_v51 = vadd.f32 %v7649_v0, %v12806_v59 }
 0x846   : > { %8558 = vst.msk [vmem:[%s12850_s12 + $0x88] sm:$0xff] %vm8540_vm2, %v8525_v63 }
 0x847   : > { %v7976_v4 = vadd.f32 %v7928_v56, %v7697_v51 }
 0x848   : > { %v8206_v62 = vpop.f32.mrf.mxu2 }
 0x849   : > { %v8254_v29 = vadd.f32 %v8206_v62, %v7976_v4 }
 0x84a   : > { %v7931_v19 = vpop.f32.mrf.mxu1 }
 0x84b   : > { %v8466_v33 = vpop.f32.mrf.mxu3 }
 0x84c   : > { %v8526_v31 = vadd.f32 %v8466_v33, %v8248_v12  ;;  %v7652_v18 = vpop.f32.mrf.mxu0 }
 0x84d   : > { %v7698_v28 = vadd.f32 %v7652_v18, %v12811_v43 }
 0x84e   : > { %8559 = vst.msk [vmem:[%s12850_s12 + $0x90] sm:$0xff] %vm8540_vm2, %v8526_v31 }
 0x84f   : > { %v7977_v54 = vadd.f32 %v7931_v19, %v7698_v28 }
 0x850   : > { %v8209_v16 = vpop.f32.mrf.mxu2 }
 0x851   : > { %v8255_v13 = vadd.f32 %v8209_v16, %v7977_v54 }
 0x852   : > { %v7934_v8 = vpop.f32.mrf.mxu1 }
 0x853   : > { %v8469_v44 = vpop.f32.mrf.mxu3 }
 0x854   : > { %v8527_v60 = vadd.f32 %v8469_v44, %v8249_v9  ;;  %v7655_v26 = vpop.f32.mrf.mxu0 }
 0x855   : > { %v7699_v61 = vadd.f32 %v7655_v26, %v12816_v32 }
 0x856   : > { %8560 = vst.msk [vmem:[%s12850_s12 + $0x98] sm:$0xff] %vm8540_vm2, %v8527_v60 }
 0x857   : > { %v7978_v3 = vadd.f32 %v7934_v8, %v7699_v61 }
 0x858   : > { %v8212_v14 = vpop.f32.mrf.mxu2 }
 0x859   : > { %v8256_v43 = vadd.f32 %v8212_v14, %v7978_v3 }
 0x85a   : > { %v7937_v12 = vpop.f32.mrf.mxu1 }
 0x85b   : > { %v8472_v48 = vpop.f32.mrf.mxu3 }
 0x85c   : > { %v8528_v34 = vadd.f32 %v8472_v48, %v8250_v25  ;;  %v7658_v63 = vpop.f32.mrf.mxu0 }
 0x85d   : > { %v7700_v17 = vadd.f32 %v7658_v63, %v12821_v45 }
 0x85e   : > { %8561 = vst.msk [vmem:[%s12850_s12 + $0xa0] sm:$0xff] %vm8540_vm2, %v8528_v34 }
 0x85f   : > { %v7979_v9 = vadd.f32 %v7937_v12, %v7700_v17 }
 0x860   : > { %v8215_v39 = vpop.f32.mrf.mxu2 }
 0x861   : > { %v8257_v32 = vadd.f32 %v8215_v39, %v7979_v9 }
 0x862   : > { %v7940_v52 = vpop.f32.mrf.mxu1 }
 0x863   : > { %v8475_v7 = vpop.f32.mrf.mxu3 }
 0x864   : > { %v8529_v30 = vadd.f32 %v8475_v7, %v8251_v50  ;;  %v7661_v55 = vpop.f32.mrf.mxu0 }
 0x865   : > { %v7701_v15 = vadd.f32 %v7661_v55, %v12826_v47 }
 0x866   : > { %8562 = vst.msk [vmem:[%s12850_s12 + $0xa8] sm:$0xff] %vm8540_vm2, %v8529_v30 }
 0x867   : > { %v7980_v27 = vadd.f32 %v7940_v52, %v7701_v15 }
 0x868   : > { %v8218_v44 = vpop.f32.mrf.mxu2 }
 0x869   : > { %v8258_v45 = vadd.f32 %v8218_v44, %v7980_v27 }
 0x86a   : > { %v7943_v25 = vpop.f32.mrf.mxu1 }
 0x86b   : > { %v8478_v10 = vpop.f32.mrf.mxu3 }
 0x86c   : > { %v8530_v23 = vadd.f32 %v8478_v10, %v8252_v5  ;;  %v7664_v37 = vpop.f32.mrf.mxu0 }
 0x86d   : > { %v7702_v49 = vadd.f32 %v7664_v37, %v12831_v1 }
 0x86e   : > { %8563 = vst.msk [vmem:[%s12850_s12 + $0xb0] sm:$0xff] %vm8540_vm2, %v8530_v23 }
 0x86f   : > { %v7981_v57 = vadd.f32 %v7943_v25, %v7702_v49 }
 0x870   : > { %v8221_v53 = vpop.f32.mrf.mxu2 }
 0x871   : > { %v8259_v22 = vadd.f32 %v8221_v53, %v7981_v57 }
 0x872   : > { %v7946_v47 = vpop.f32.mrf.mxu1 }
 0x873   : > { %v8481_v42 = vpop.f32.mrf.mxu3 }
 0x874   : > { %v8531_v58 = vadd.f32 %v8481_v42, %v8253_v36  ;;  %v7667_v38 = vpop.f32.mrf.mxu0 }
 0x875   : > { %v7703_v7 = vadd.f32 %v7667_v38, %v12836_v2 }
 0x876   : > { %8564 = vst.msk [vmem:[%s12850_s12 + $0xb8] sm:$0xff] %vm8540_vm2, %v8531_v58 }
 0x877   : > { %v7982_v0 = vadd.f32 %v7946_v47, %v7703_v7 }
 0x878   : > { %v8224_v30 = vpop.f32.mrf.mxu2 }
 0x879   : > { %v8260_v56 = vadd.f32 %v8224_v30, %v7982_v0 }
 0x87a   : > { %v7949_v10 = vpop.f32.mrf.mxu1 }
 0x87b   : > { %v8484_v11 = vpop.f32.mrf.mxu3 }
 0x87c   : > { %v8532_v41 = vadd.f32 %v8484_v11, %v8254_v29  ;;  %v7670_v24 = vpop.f32.mrf.mxu0 }
 0x87d   : > { %v7704_v62 = vadd.f32 %v7670_v24, %v12842_v20 }
 0x87e   : > { %8565 = vst.msk [vmem:[%s12850_s12 + $0xc0] sm:$0xff] %vm8540_vm2, %v8532_v41 }
 0x87f   : > { %v7983_v23 = vadd.f32 %v7949_v10, %v7704_v62 }
 0x880   : > { %v8227_v46 = vpop.f32.mrf.mxu2 }
 0x881   : > { %v8261_v18 = vadd.f32 %v8227_v46, %v7983_v23 }
 0x883   : > { %v8487_v59 = vpop.f32.mrf.mxu3 }
 0x884   : > { %v8533_v6 = vadd.f32 %v8487_v59, %v8255_v13 }
 0x886   : > { %8566 = vst.msk [vmem:[%s12850_s12 + $0xc8] sm:$0xff] %vm8540_vm2, %v8533_v6 }
 0x88b   : > { %v8490_v33 = vpop.f32.mrf.mxu3 }
 0x88c   : > { %v8534_v31 = vadd.f32 %v8490_v33, %v8256_v43 }
 0x88e   : > { %8567 = vst.msk [vmem:[%s12850_s12 + $0xd0] sm:$0xff] %vm8540_vm2, %v8534_v31 }
 0x893   : > { %v8493_v35 = vpop.f32.mrf.mxu3 }
 0x894   : > { %v8535_v60 = vadd.f32 %v8493_v35, %v8257_v32 }
 0x896   : > { %8568 = vst.msk [vmem:[%s12850_s12 + $0xd8] sm:$0xff] %vm8540_vm2, %v8535_v60 }
 0x89b   : > { %v8496_v48 = vpop.f32.mrf.mxu3 }
 0x89c   : > { %v8536_v34 = vadd.f32 %v8496_v48, %v8258_v45 }
 0x89e   : > { %8569 = vst.msk [vmem:[%s12850_s12 + $0xe0] sm:$0xff] %vm8540_vm2, %v8536_v34 }
 0x8a3   : > { %v8499_v50 = vpop.f32.mrf.mxu3 }
 0x8a4   : > { %v8537_v21 = vadd.f32 %v8499_v50, %v8259_v22 }
 0x8a6   : > { %8570 = vst.msk [vmem:[%s12850_s12 + $0xe8] sm:$0xff] %vm8540_vm2, %v8537_v21 }
 0x8ab   : > { %v8502_v1 = vpop.f32.mrf.mxu3 }
 0x8ac   : > { %v8538_v5 = vadd.f32 %v8502_v1, %v8260_v56 }
 0x8ae   : > { %8571 = vst.msk [vmem:[%s12850_s12 + $0xf0] sm:$0xff] %vm8540_vm2, %v8538_v5 }
 0x8b3   : > { %v8505_v40 = vpop.f32.mrf.mxu3 }
 0x8b4   : > { %v8539_v2 = vadd.f32 %v8505_v40, %v8261_v18 }
 0x8b6   : > { %8572 = vst.msk [vmem:[%s12850_s12 + $0xf8] sm:$0xff] %vm8540_vm2, %v8539_v2 }
 0x8b7 PF: > { %s27_s17 = sadd.s32 1, %s9976_s17  }
 0x8b8   : > { %p24_p7 = scmp.ge.s32.totalorder %s27_s17, 4  }
 0x8ba   :  { %26 = sbr.rel (!%p24_p7) target bundleno = 6 (0x6), region = 220 }
 0x8bf   :  { %8594 = vsyncpa [#allocation7], 1 }
 0x8c0   :  { %8596 = vsyncpa [#allocation7 + $0x1], 1 }
 0x8c1   :  { %8597 = vsyncpa [#allocation9], 1 }
 0x8c2   :  { %8598 = vsyncpa [#allocation12], 1 }
 0x8c3   :  { %8599 = vsyncpa [#allocation15], 1 }
 0x8c4   :  { %8600 = vsyncpa [#allocation18], 1 }
 0x8c5   :  { %8601 = vsyncpa [#allocation21], 1 }

</bundles_post_ra>
